<compile_context>
chip_gen: v6e
topology: v6e:2x2x1
jax: 0.10.0
libtpu: 0.0.40
codegen_flags: <defaults>
</compile_context>

<pallas_src>
import math

import numpy as np
import jax
import jax.numpy as jnp
from jax.experimental import pallas as pl
from jax.experimental.pallas import tpu as pltpu


# ---------------------------------------------------------------------------
# Architecture constants (fixed by the PyTorch module: fc1 = Linear(16*7*7, .))
# ---------------------------------------------------------------------------
H = W = 28
C1, C2 = 6, 16
WP1 = W + 2                       # 30: row stride of conv1's flat padded grid
NPAD1 = WP1 * WP1                 # 900: padded 30x30 input, flattened
N1 = (H - 1) * WP1 + W            # 838: conv1 output extent (flat, stride 30)
P1 = N1 - (WP1 + 1)               # 807: pool1 4-way-max extent (max shift 31)
H2 = W2 = H // 2                  # 14
WP2 = W2 + 2                      # 16: row stride of conv2's flat padded grid
NPAD2 = WP2 * WP2                 # 256
N2 = (H2 - 1) * WP2 + W2          # 222
P2 = N2 - (WP2 + 1)               # 205
HO = WO = H2 // 2                 # 7
OFFS1 = tuple(ki * WP1 + kj for ki in range(3) for kj in range(3))
OFFS2 = tuple(ki * WP2 + kj for ki in range(3) for kj in range(3))


# ---------------------------------------------------------------------------
# Fused forward kernel: one batch block (BB images) per grid step.
# Row layout of every activation is channel-major / image-minor: row = c*BB + b.
# ---------------------------------------------------------------------------
def _cnn_kernel(x_ref, w1_ref, b1_ref, s1_ref, w2_ref, b2_ref, g_ref,
                bfc_ref, o_ref):
    cin, bb, _ = x_ref.shape
    x = x_ref[...]                                            # bf16 [Cin, BB, 900]

    # ---- conv1: one K-stacked, batch-block-diagonal MXU matmul ------------
    # Xs rows ordered (tap, in-channel, image) to match kron(W1, I_BB).
    xs1 = jnp.concatenate(
        [x[i, :, off:off + N1] for off in OFFS1 for i in range(cin)], axis=0)
    a1 = jnp.dot(w1_ref[...], xs1, preferred_element_type=jnp.float32)
    a1 = jnp.maximum(a1 + b1_ref[...], 0.0)                   # f32 [C1*BB, 838]

    # ---- pool1 (2x2/2): 4-way shifted max, then downsample + re-pad -------
    m1 = jnp.maximum(
        jnp.maximum(a1[:, 0:P1], a1[:, 1:P1 + 1]),
        jnp.maximum(a1[:, WP1:WP1 + P1], a1[:, WP1 + 1:WP1 + 1 + P1]))
    # NOTE: a1/m1 hold junk at flat cols 28/29 of each 30-wide row; s1 never
    # selects those positions, and its all-zero columns realize conv2's padding.
    in2 = jnp.dot(m1.astype(jnp.bfloat16), s1_ref[...],
                  preferred_element_type=jnp.float32)
    in2 = in2.astype(jnp.bfloat16)                            # [C1*BB, 256]

    # ---- conv2: same single K-stacked block-diagonal matmul ---------------
    xs2 = jnp.concatenate([in2[:, off:off + N2] for off in OFFS2], axis=0)
    a2 = jnp.dot(w2_ref[...], xs2, preferred_element_type=jnp.float32)
    a2 = jnp.maximum(a2 + b2_ref[...], 0.0)                   # f32 [C2*BB, 222]

    # ---- pool2: 4-way shifted max (downsample folded into the FC weight) --
    m2 = jnp.maximum(
        jnp.maximum(a2[:, 0:P2], a2[:, 1:P2 + 1]),
        jnp.maximum(a2[:, WP2:WP2 + P2], a2[:, WP2 + 1:WP2 + 1 + P2]))
    m2 = m2.astype(jnp.bfloat16)                              # [C2*BB, 205]

    # ---- fc1: single contraction, K = C2*P2 (NCHW flatten baked into g) ---
    m2cat = jnp.concatenate(
        [m2[o * bb:(o + 1) * bb, :] for o in range(C2)], axis=1)  # [BB, C2*205]
    out = jnp.dot(m2cat, g_ref[...], preferred_element_type=jnp.float32)
    o_ref[...] = out + bfc_ref[...]                           # [BB, num_classes]


def cnn_forward(kparams, x_nchw):
    B, cin, h, w = x_nchw.shape
    assert (h, w) == (H, W), "fc1 expects 16*7*7, i.e. 28x28 inputs"
    bb = kparams["b1"].shape[0] // C1               # images per grid step (static)
    num_classes = kparams["bfc"].shape[-1]
    bpad = ((B + bb - 1) // bb) * bb

    xb = x_nchw.astype(jnp.bfloat16)
    if bpad != B:
        xb = jnp.concatenate(
            [xb, jnp.zeros((bpad - B, cin, H, W), jnp.bfloat16)], axis=0)
    # zero-pad spatially (padding=1), channel-major, flatten to [Cin, Bpad, 900]
    xp = jnp.pad(xb, ((0, 0), (0, 0), (1, 1), (1, 1)))
    xp = jnp.transpose(xp, (1, 0, 2, 3)).reshape(cin, bpad, NPAD1)

    out = pl.pallas_call(
        _cnn_kernel,
        out_shape=jax.ShapeDtypeStruct((bpad, num_classes), jnp.float32),
        grid=(bpad // bb,),
        in_specs=[
            pl.BlockSpec((cin, bb, NPAD1), lambda g: (0, g, 0)),
            pl.BlockSpec(kparams["w1"].shape, lambda g: (0, 0)),
            pl.BlockSpec(kparams["b1"].shape, lambda g: (0, 0)),
            pl.BlockSpec(kparams["s1"].shape, lambda g: (0, 0)),
            pl.BlockSpec(kparams["w2"].shape, lambda g: (0, 0)),
            pl.BlockSpec(kparams["b2"].shape, lambda g: (0, 0)),
            pl.BlockSpec(kparams["g"].shape, lambda g: (0, 0)),
            pl.BlockSpec(kparams["bfc"].shape, lambda g: (0, 0)),
        ],
        out_specs=pl.BlockSpec((bb, num_classes), lambda g: (g, 0)),
        compiler_params=pltpu.CompilerParams(
            dimension_semantics=("parallel",)),
    )(xp, kparams["w1"], kparams["b1"], kparams["s1"], kparams["w2"],
      kparams["b2"], kparams["g"], kparams["bfc"])
    return out[:B]


# ---------------------------------------------------------------------------
# Parameter init (mirrors the module's initialize_weights: kaiming_uniform_
# with default a=0 -> bound=sqrt(6/fan_in), biases = 0).
# ---------------------------------------------------------------------------
def kaiming_uniform(key, shape, fan_in):
    bound = math.sqrt(6.0 / fan_in)
    return jax.random.uniform(key, shape, jnp.float32, -bound, bound)


def init_params(key, in_channels, num_classes):
    k1, k2, k3 = jax.random.split(key, 3)
    return {
        "conv1_w": kaiming_uniform(k1, (C1, in_channels, 3, 3), in_channels * 9),
        "conv1_b": jnp.zeros((C1,), jnp.float32),
        "conv2_w": kaiming_uniform(k2, (C2, C1, 3, 3), C1 * 9),
        "conv2_b": jnp.zeros((C2,), jnp.float32),
        "fc1_w": kaiming_uniform(k3, (num_classes, C2 * HO * WO), C2 * HO * WO),
        "fc1_b": jnp.zeros((num_classes,), jnp.float32),
    }


def prepare_kernel_params(params, bb=16):
    """One-time host-side re-layout of torch-style params for the fused kernel."""
    assert bb % 16 == 0, "bb should be a multiple of 16 for clean bf16 tiling"
    cin = params["conv1_w"].shape[1]
    num_classes = params["fc1_b"].shape[0]
    eye = np.eye(bb, dtype=np.float32)

    # conv weights [O, I, 3, 3] -> [O, 9*I] (tap-major, in-channel-minor), then
    # kron with I_BB to form the batch-block-diagonal MXU weight.
    w1s = np.transpose(np.asarray(params["conv1_w"], np.float32),
                       (0, 2, 3, 1)).reshape(C1, 9 * cin)
    w2s = np.transpose(np.asarray(params["conv2_w"], np.float32),
                       (0, 2, 3, 1)).reshape(C2, 9 * C1)
    w1big = np.kron(w1s, eye)                       # [C1*bb, 9*cin*bb]
    w2big = np.kron(w2s, eye)                       # [C2*bb, 9*C1*bb]
    b1col = np.repeat(np.asarray(params["conv1_b"], np.float32), bb)[:, None]
    b2col = np.repeat(np.asarray(params["conv2_b"], np.float32), bb)[:, None]

    # pool1 stride-2 downsample + zero re-pad (conv2's padding=1) as a 0/1
    # selection matrix over the flat conv1 grid:
    #   flat p = 2*ho*30 + 2*wo  ->  conv2 padded flat pos (ho+1)*16 + (wo+1)
    s1 = np.zeros((P1, NPAD2), np.float32)
    for ho in range(H2):
        for wo in range(W2):
            s1[2 * ho * WP1 + 2 * wo, (ho + 1) * WP2 + (wo + 1)] = 1.0

    # FC weight with pool2's downsample + torch NCHW flatten folded in:
    #   g[o*P2 + (2*r*16 + 2*c), n] = fc1_w[n, o*49 + r*7 + c]
    wf = np.asarray(params["fc1_w"], np.float32).reshape(num_classes, C2, HO, WO)
    g = np.zeros((C2, P2, num_classes), np.float32)
    for r in range(HO):
        for c in range(WO):
            g[:, 2 * r * WP2 + 2 * c, :] = wf[:, :, r, c].T
    g = g.reshape(C2 * P2, num_classes)

    return {
        "w1": jnp.asarray(w1big, jnp.bfloat16),
        "b1": jnp.asarray(b1col, jnp.float32),
        "s1": jnp.asarray(s1, jnp.bfloat16),
        "w2": jnp.asarray(w2big, jnp.bfloat16),
        "b2": jnp.asarray(b2col, jnp.float32),
        "g": jnp.asarray(g, jnp.bfloat16),
        "bfc": jnp.asarray(np.asarray(params["fc1_b"], np.float32)[None, :],
                           jnp.float32),
    }


# ---------------------------------------------------------------------------
# Pure-JAX f32 reference (same math, for a self-check; kernel is bf16 on MXU)
# ---------------------------------------------------------------------------
def cnn_reference(params, x):
    dn = ("NCHW", "OIHW", "NCHW")
    y = jax.lax.conv_general_dilated(x, params["conv1_w"], (1, 1),
                                     ((1, 1), (1, 1)), dimension_numbers=dn)
    y = jax.nn.relu(y + params["conv1_b"][None, :, None, None])
    y = jax.lax.reduce_window(y, -jnp.inf, jax.lax.max,
                              (1, 1, 2, 2), (1, 1, 2, 2), "VALID")
    y = jax.lax.conv_general_dilated(y, params["conv2_w"], (1, 1),
                                     ((1, 1), (1, 1)), dimension_numbers=dn)
    y = jax.nn.relu(y + params["conv2_b"][None, :, None, None])
    y = jax.lax.reduce_window(y, -jnp.inf, jax.lax.max,
                              (1, 1, 2, 2), (1, 1, 2, 2), "VALID")
    y = y.reshape(y.shape[0], -1)
    return y @ params["fc1_w"].T + params["fc1_b"]


if __name__ == "__main__":
    in_channels, num_classes, batch, bb = 3, 10, 32, 16

    key = jax.random.PRNGKey(0)
    k_params, k_x = jax.random.split(key)
    params = init_params(k_params, in_channels, num_classes)
    kparams = prepare_kernel_params(params, bb=bb)

    x = jax.random.normal(k_x, (batch, in_channels, H, W), jnp.float32)

    out = jax.jit(cnn_forward)(kparams, x)
    out = jax.block_until_ready(out)
    assert out.shape == (batch, num_classes), out.shape

    ref = cnn_reference(params, x)
    err = float(jnp.max(jnp.abs(out - ref)))
    # bf16 MXU operands -> loosened tolerance vs the f32 reference
    assert jnp.allclose(out, ref, atol=2e-1, rtol=2e-2), err

    print("KERNEL_OK")
</pallas_src>

<mosaic_0001>
module attributes {stable_mosaic.version = 11 : i64} {
  func.func @_cnn_kernel(%arg0: i32, %arg1: memref<3x16x900xbf16, #tpu.memory_space<vmem>>, %arg2: memref<96x432xbf16, #tpu.memory_space<vmem>>, %arg3: memref<96x1xf32, #tpu.memory_space<vmem>>, %arg4: memref<807x256xbf16, #tpu.memory_space<vmem>>, %arg5: memref<256x864xbf16, #tpu.memory_space<vmem>>, %arg6: memref<256x1xf32, #tpu.memory_space<vmem>>, %arg7: memref<3280x10xbf16, #tpu.memory_space<vmem>>, %arg8: memref<1x10xf32, #tpu.memory_space<vmem>>, %arg9: memref<16x10xf32, #tpu.memory_space<vmem>>) attributes {dimension_semantics = [#tpu.dimension_semantics<parallel>], iteration_bounds = array<i64: 2>, scalar_prefetch = 0 : i64, scratch_operands = 0 : i64, tpu.core_type = #tpu.core_type<tc>, window_params = [{transform_indices = @transform_0, window_bounds = array<i64: 3, 16, 900>}, {pipeline_mode = #tpu.pipeline_mode<synchronous>, transform_indices = @transform_1, window_bounds = array<i64: 96, 432>}, {pipeline_mode = #tpu.pipeline_mode<synchronous>, transform_indices = @transform_2, window_bounds = array<i64: 96, 1>}, {pipeline_mode = #tpu.pipeline_mode<synchronous>, transform_indices = @transform_3, window_bounds = array<i64: 807, 256>}, {pipeline_mode = #tpu.pipeline_mode<synchronous>, transform_indices = @transform_4, window_bounds = array<i64: 256, 864>}, {pipeline_mode = #tpu.pipeline_mode<synchronous>, transform_indices = @transform_5, window_bounds = array<i64: 256, 1>}, {pipeline_mode = #tpu.pipeline_mode<synchronous>, transform_indices = @transform_6, window_bounds = array<i64: 3280, 10>}, {pipeline_mode = #tpu.pipeline_mode<synchronous>, transform_indices = @transform_7, window_bounds = array<i64: 1, 10>}, {transform_indices = @transform_8, window_bounds = array<i64: 16, 10>}]} {
    %c0 = arith.constant 0 : index
    %c0_0 = arith.constant 0 : index
    %c0_1 = arith.constant 0 : index
    %0 = vector.load %arg1[%c0, %c0_0, %c0_1] : memref<3x16x900xbf16, #tpu.memory_space<vmem>>, vector<3x16x900xbf16>
    %1 = vector.extract_strided_slice %0 {offsets = [0, 0, 0], sizes = [1, 16, 838], strides = [1, 1, 1]} : vector<3x16x900xbf16> to vector<1x16x838xbf16>
    %2 = vector.shape_cast %1 : vector<1x16x838xbf16> to vector<16x838xbf16>
    %3 = vector.extract_strided_slice %0 {offsets = [1, 0, 0], sizes = [1, 16, 838], strides = [1, 1, 1]} : vector<3x16x900xbf16> to vector<1x16x838xbf16>
    %4 = vector.shape_cast %3 : vector<1x16x838xbf16> to vector<16x838xbf16>
    %5 = vector.extract_strided_slice %0 {offsets = [2, 0, 0], sizes = [1, 16, 838], strides = [1, 1, 1]} : vector<3x16x900xbf16> to vector<1x16x838xbf16>
    %6 = vector.shape_cast %5 : vector<1x16x838xbf16> to vector<16x838xbf16>
    %7 = vector.extract_strided_slice %0 {offsets = [0, 0, 1], sizes = [1, 16, 838], strides = [1, 1, 1]} : vector<3x16x900xbf16> to vector<1x16x838xbf16>
    %8 = vector.shape_cast %7 : vector<1x16x838xbf16> to vector<16x838xbf16>
    %9 = vector.extract_strided_slice %0 {offsets = [1, 0, 1], sizes = [1, 16, 838], strides = [1, 1, 1]} : vector<3x16x900xbf16> to vector<1x16x838xbf16>
    %10 = vector.shape_cast %9 : vector<1x16x838xbf16> to vector<16x838xbf16>
    %11 = vector.extract_strided_slice %0 {offsets = [2, 0, 1], sizes = [1, 16, 838], strides = [1, 1, 1]} : vector<3x16x900xbf16> to vector<1x16x838xbf16>
    %12 = vector.shape_cast %11 : vector<1x16x838xbf16> to vector<16x838xbf16>
    %13 = vector.extract_strided_slice %0 {offsets = [0, 0, 2], sizes = [1, 16, 838], strides = [1, 1, 1]} : vector<3x16x900xbf16> to vector<1x16x838xbf16>
    %14 = vector.shape_cast %13 : vector<1x16x838xbf16> to vector<16x838xbf16>
    %15 = vector.extract_strided_slice %0 {offsets = [1, 0, 2], sizes = [1, 16, 838], strides = [1, 1, 1]} : vector<3x16x900xbf16> to vector<1x16x838xbf16>
    %16 = vector.shape_cast %15 : vector<1x16x838xbf16> to vector<16x838xbf16>
    %17 = vector.extract_strided_slice %0 {offsets = [2, 0, 2], sizes = [1, 16, 838], strides = [1, 1, 1]} : vector<3x16x900xbf16> to vector<1x16x838xbf16>
    %18 = vector.shape_cast %17 : vector<1x16x838xbf16> to vector<16x838xbf16>
    %19 = vector.extract_strided_slice %0 {offsets = [0, 0, 30], sizes = [1, 16, 838], strides = [1, 1, 1]} : vector<3x16x900xbf16> to vector<1x16x838xbf16>
    %20 = vector.shape_cast %19 : vector<1x16x838xbf16> to vector<16x838xbf16>
    %21 = vector.extract_strided_slice %0 {offsets = [1, 0, 30], sizes = [1, 16, 838], strides = [1, 1, 1]} : vector<3x16x900xbf16> to vector<1x16x838xbf16>
    %22 = vector.shape_cast %21 : vector<1x16x838xbf16> to vector<16x838xbf16>
    %23 = vector.extract_strided_slice %0 {offsets = [2, 0, 30], sizes = [1, 16, 838], strides = [1, 1, 1]} : vector<3x16x900xbf16> to vector<1x16x838xbf16>
    %24 = vector.shape_cast %23 : vector<1x16x838xbf16> to vector<16x838xbf16>
    %25 = vector.extract_strided_slice %0 {offsets = [0, 0, 31], sizes = [1, 16, 838], strides = [1, 1, 1]} : vector<3x16x900xbf16> to vector<1x16x838xbf16>
    %26 = vector.shape_cast %25 : vector<1x16x838xbf16> to vector<16x838xbf16>
    %27 = vector.extract_strided_slice %0 {offsets = [1, 0, 31], sizes = [1, 16, 838], strides = [1, 1, 1]} : vector<3x16x900xbf16> to vector<1x16x838xbf16>
    %28 = vector.shape_cast %27 : vector<1x16x838xbf16> to vector<16x838xbf16>
    %29 = vector.extract_strided_slice %0 {offsets = [2, 0, 31], sizes = [1, 16, 838], strides = [1, 1, 1]} : vector<3x16x900xbf16> to vector<1x16x838xbf16>
    %30 = vector.shape_cast %29 : vector<1x16x838xbf16> to vector<16x838xbf16>
    %31 = vector.extract_strided_slice %0 {offsets = [0, 0, 32], sizes = [1, 16, 838], strides = [1, 1, 1]} : vector<3x16x900xbf16> to vector<1x16x838xbf16>
    %32 = vector.shape_cast %31 : vector<1x16x838xbf16> to vector<16x838xbf16>
    %33 = vector.extract_strided_slice %0 {offsets = [1, 0, 32], sizes = [1, 16, 838], strides = [1, 1, 1]} : vector<3x16x900xbf16> to vector<1x16x838xbf16>
    %34 = vector.shape_cast %33 : vector<1x16x838xbf16> to vector<16x838xbf16>
    %35 = vector.extract_strided_slice %0 {offsets = [2, 0, 32], sizes = [1, 16, 838], strides = [1, 1, 1]} : vector<3x16x900xbf16> to vector<1x16x838xbf16>
    %36 = vector.shape_cast %35 : vector<1x16x838xbf16> to vector<16x838xbf16>
    %37 = vector.extract_strided_slice %0 {offsets = [0, 0, 60], sizes = [1, 16, 838], strides = [1, 1, 1]} : vector<3x16x900xbf16> to vector<1x16x838xbf16>
    %38 = vector.shape_cast %37 : vector<1x16x838xbf16> to vector<16x838xbf16>
    %39 = vector.extract_strided_slice %0 {offsets = [1, 0, 60], sizes = [1, 16, 838], strides = [1, 1, 1]} : vector<3x16x900xbf16> to vector<1x16x838xbf16>
    %40 = vector.shape_cast %39 : vector<1x16x838xbf16> to vector<16x838xbf16>
    %41 = vector.extract_strided_slice %0 {offsets = [2, 0, 60], sizes = [1, 16, 838], strides = [1, 1, 1]} : vector<3x16x900xbf16> to vector<1x16x838xbf16>
    %42 = vector.shape_cast %41 : vector<1x16x838xbf16> to vector<16x838xbf16>
    %43 = vector.extract_strided_slice %0 {offsets = [0, 0, 61], sizes = [1, 16, 838], strides = [1, 1, 1]} : vector<3x16x900xbf16> to vector<1x16x838xbf16>
    %44 = vector.shape_cast %43 : vector<1x16x838xbf16> to vector<16x838xbf16>
    %45 = vector.extract_strided_slice %0 {offsets = [1, 0, 61], sizes = [1, 16, 838], strides = [1, 1, 1]} : vector<3x16x900xbf16> to vector<1x16x838xbf16>
    %46 = vector.shape_cast %45 : vector<1x16x838xbf16> to vector<16x838xbf16>
    %47 = vector.extract_strided_slice %0 {offsets = [2, 0, 61], sizes = [1, 16, 838], strides = [1, 1, 1]} : vector<3x16x900xbf16> to vector<1x16x838xbf16>
    %48 = vector.shape_cast %47 : vector<1x16x838xbf16> to vector<16x838xbf16>
    %49 = vector.extract_strided_slice %0 {offsets = [0, 0, 62], sizes = [1, 16, 838], strides = [1, 1, 1]} : vector<3x16x900xbf16> to vector<1x16x838xbf16>
    %50 = vector.shape_cast %49 : vector<1x16x838xbf16> to vector<16x838xbf16>
    %51 = vector.extract_strided_slice %0 {offsets = [1, 0, 62], sizes = [1, 16, 838], strides = [1, 1, 1]} : vector<3x16x900xbf16> to vector<1x16x838xbf16>
    %52 = vector.shape_cast %51 : vector<1x16x838xbf16> to vector<16x838xbf16>
    %53 = vector.extract_strided_slice %0 {offsets = [2, 0, 62], sizes = [1, 16, 838], strides = [1, 1, 1]} : vector<3x16x900xbf16> to vector<1x16x838xbf16>
    %54 = vector.shape_cast %53 : vector<1x16x838xbf16> to vector<16x838xbf16>
    %55 = tpu.concatenate %2, %4, %6, %8, %10, %12, %14, %16, %18, %20, %22, %24, %26, %28, %30, %32 in 0 : vector<16x838xbf16>, vector<16x838xbf16>, vector<16x838xbf16>, vector<16x838xbf16>, vector<16x838xbf16>, vector<16x838xbf16>, vector<16x838xbf16>, vector<16x838xbf16>, vector<16x838xbf16>, vector<16x838xbf16>, vector<16x838xbf16>, vector<16x838xbf16>, vector<16x838xbf16>, vector<16x838xbf16>, vector<16x838xbf16>, vector<16x838xbf16> -> vector<256x838xbf16>
    %56 = tpu.concatenate %34, %36, %38, %40, %42, %44, %46, %48, %50, %52, %54 in 0 : vector<16x838xbf16>, vector<16x838xbf16>, vector<16x838xbf16>, vector<16x838xbf16>, vector<16x838xbf16>, vector<16x838xbf16>, vector<16x838xbf16>, vector<16x838xbf16>, vector<16x838xbf16>, vector<16x838xbf16>, vector<16x838xbf16> -> vector<176x838xbf16>
    %57 = tpu.concatenate %55, %56 in 0 : vector<256x838xbf16>, vector<176x838xbf16> -> vector<432x838xbf16>
    %c0_2 = arith.constant 0 : index
    %c0_3 = arith.constant 0 : index
    %58 = vector.load %arg2[%c0_2, %c0_3] : memref<96x432xbf16, #tpu.memory_space<vmem>>, vector<96x432xbf16>
    %cst = arith.constant dense<0.000000e+00> : vector<96x838xf32>
    %59 = tpu.matmul %58, %57, %cst {dimension_numbers = #tpu.dot_dimension_numbers<[1], [0], [0], [1], [0, 0, 1, 1], [], []>} : vector<96x432xbf16>, vector<432x838xbf16>, vector<96x838xf32> -> vector<96x838xf32>
    %c0_4 = arith.constant 0 : index
    %c0_5 = arith.constant 0 : index
    %60 = vector.load %arg3[%c0_4, %c0_5] : memref<96x1xf32, #tpu.memory_space<vmem>>, vector<96x1xf32>
    %61 = vector.broadcast %60 : vector<96x1xf32> to vector<96x838xf32>
    %62 = arith.addf %59, %61 : vector<96x838xf32>
    %cst_6 = arith.constant 0.000000e+00 : f32
    %63 = vector.broadcast %cst_6 : f32 to vector<96x838xf32>
    %64 = arith.maximumf %62, %63 : vector<96x838xf32>
    %65 = vector.extract_strided_slice %64 {offsets = [0, 0], sizes = [96, 807], strides = [1, 1]} : vector<96x838xf32> to vector<96x807xf32>
    %66 = vector.extract_strided_slice %64 {offsets = [0, 1], sizes = [96, 807], strides = [1, 1]} : vector<96x838xf32> to vector<96x807xf32>
    %67 = arith.maximumf %65, %66 : vector<96x807xf32>
    %68 = vector.extract_strided_slice %64 {offsets = [0, 30], sizes = [96, 807], strides = [1, 1]} : vector<96x838xf32> to vector<96x807xf32>
    %69 = vector.extract_strided_slice %64 {offsets = [0, 31], sizes = [96, 807], strides = [1, 1]} : vector<96x838xf32> to vector<96x807xf32>
    %70 = arith.maximumf %68, %69 : vector<96x807xf32>
    %71 = arith.maximumf %67, %70 : vector<96x807xf32>
    %72 = arith.truncf %71 : vector<96x807xf32> to vector<96x807xbf16>
    %c0_7 = arith.constant 0 : index
    %c0_8 = arith.constant 0 : index
    %73 = vector.load %arg4[%c0_7, %c0_8] : memref<807x256xbf16, #tpu.memory_space<vmem>>, vector<807x256xbf16>
    %cst_9 = arith.constant dense<0.000000e+00> : vector<96x256xf32>
    %74 = tpu.matmul %72, %73, %cst_9 {dimension_numbers = #tpu.dot_dimension_numbers<[1], [0], [0], [1], [0, 0, 1, 1], [], []>} : vector<96x807xbf16>, vector<807x256xbf16>, vector<96x256xf32> -> vector<96x256xf32>
    %75 = arith.truncf %74 : vector<96x256xf32> to vector<96x256xbf16>
    %76 = vector.extract_strided_slice %75 {offsets = [0, 0], sizes = [96, 222], strides = [1, 1]} : vector<96x256xbf16> to vector<96x222xbf16>
    %77 = vector.extract_strided_slice %75 {offsets = [0, 1], sizes = [96, 222], strides = [1, 1]} : vector<96x256xbf16> to vector<96x222xbf16>
    %78 = vector.extract_strided_slice %75 {offsets = [0, 2], sizes = [96, 222], strides = [1, 1]} : vector<96x256xbf16> to vector<96x222xbf16>
    %79 = vector.extract_strided_slice %75 {offsets = [0, 16], sizes = [96, 222], strides = [1, 1]} : vector<96x256xbf16> to vector<96x222xbf16>
    %80 = vector.extract_strided_slice %75 {offsets = [0, 17], sizes = [96, 222], strides = [1, 1]} : vector<96x256xbf16> to vector<96x222xbf16>
    %81 = vector.extract_strided_slice %75 {offsets = [0, 18], sizes = [96, 222], strides = [1, 1]} : vector<96x256xbf16> to vector<96x222xbf16>
    %82 = vector.extract_strided_slice %75 {offsets = [0, 32], sizes = [96, 222], strides = [1, 1]} : vector<96x256xbf16> to vector<96x222xbf16>
    %83 = vector.extract_strided_slice %75 {offsets = [0, 33], sizes = [96, 222], strides = [1, 1]} : vector<96x256xbf16> to vector<96x222xbf16>
    %84 = vector.extract_strided_slice %75 {offsets = [0, 34], sizes = [96, 222], strides = [1, 1]} : vector<96x256xbf16> to vector<96x222xbf16>
    %85 = tpu.concatenate %76, %77, %78, %79, %80, %81, %82, %83, %84 in 0 : vector<96x222xbf16>, vector<96x222xbf16>, vector<96x222xbf16>, vector<96x222xbf16>, vector<96x222xbf16>, vector<96x222xbf16>, vector<96x222xbf16>, vector<96x222xbf16>, vector<96x222xbf16> -> vector<864x222xbf16>
    %c0_10 = arith.constant 0 : index
    %c0_11 = arith.constant 0 : index
    %86 = vector.load %arg5[%c0_10, %c0_11] : memref<256x864xbf16, #tpu.memory_space<vmem>>, vector<256x864xbf16>
    %cst_12 = arith.constant dense<0.000000e+00> : vector<256x222xf32>
    %87 = tpu.matmul %86, %85, %cst_12 {dimension_numbers = #tpu.dot_dimension_numbers<[1], [0], [0], [1], [0, 0, 1, 1], [], []>} : vector<256x864xbf16>, vector<864x222xbf16>, vector<256x222xf32> -> vector<256x222xf32>
    %c0_13 = arith.constant 0 : index
    %c0_14 = arith.constant 0 : index
    %88 = vector.load %arg6[%c0_13, %c0_14] : memref<256x1xf32, #tpu.memory_space<vmem>>, vector<256x1xf32>
    %89 = vector.broadcast %88 : vector<256x1xf32> to vector<256x222xf32>
    %90 = arith.addf %87, %89 : vector<256x222xf32>
    %cst_15 = arith.constant 0.000000e+00 : f32
    %91 = vector.broadcast %cst_15 : f32 to vector<256x222xf32>
    %92 = arith.maximumf %90, %91 : vector<256x222xf32>
    %93 = vector.extract_strided_slice %92 {offsets = [0, 0], sizes = [256, 205], strides = [1, 1]} : vector<256x222xf32> to vector<256x205xf32>
    %94 = vector.extract_strided_slice %92 {offsets = [0, 1], sizes = [256, 205], strides = [1, 1]} : vector<256x222xf32> to vector<256x205xf32>
    %95 = arith.maximumf %93, %94 : vector<256x205xf32>
    %96 = vector.extract_strided_slice %92 {offsets = [0, 16], sizes = [256, 205], strides = [1, 1]} : vector<256x222xf32> to vector<256x205xf32>
    %97 = vector.extract_strided_slice %92 {offsets = [0, 17], sizes = [256, 205], strides = [1, 1]} : vector<256x222xf32> to vector<256x205xf32>
    %98 = arith.maximumf %96, %97 : vector<256x205xf32>
    %99 = arith.maximumf %95, %98 : vector<256x205xf32>
    %100 = arith.truncf %99 : vector<256x205xf32> to vector<256x205xbf16>
    %101 = vector.extract_strided_slice %100 {offsets = [0, 0], sizes = [16, 205], strides = [1, 1]} : vector<256x205xbf16> to vector<16x205xbf16>
    %102 = vector.extract_strided_slice %100 {offsets = [16, 0], sizes = [16, 205], strides = [1, 1]} : vector<256x205xbf16> to vector<16x205xbf16>
    %103 = vector.extract_strided_slice %100 {offsets = [32, 0], sizes = [16, 205], strides = [1, 1]} : vector<256x205xbf16> to vector<16x205xbf16>
    %104 = vector.extract_strided_slice %100 {offsets = [48, 0], sizes = [16, 205], strides = [1, 1]} : vector<256x205xbf16> to vector<16x205xbf16>
    %105 = vector.extract_strided_slice %100 {offsets = [64, 0], sizes = [16, 205], strides = [1, 1]} : vector<256x205xbf16> to vector<16x205xbf16>
    %106 = vector.extract_strided_slice %100 {offsets = [80, 0], sizes = [16, 205], strides = [1, 1]} : vector<256x205xbf16> to vector<16x205xbf16>
    %107 = vector.extract_strided_slice %100 {offsets = [96, 0], sizes = [16, 205], strides = [1, 1]} : vector<256x205xbf16> to vector<16x205xbf16>
    %108 = vector.extract_strided_slice %100 {offsets = [112, 0], sizes = [16, 205], strides = [1, 1]} : vector<256x205xbf16> to vector<16x205xbf16>
    %109 = vector.extract_strided_slice %100 {offsets = [128, 0], sizes = [16, 205], strides = [1, 1]} : vector<256x205xbf16> to vector<16x205xbf16>
    %110 = vector.extract_strided_slice %100 {offsets = [144, 0], sizes = [16, 205], strides = [1, 1]} : vector<256x205xbf16> to vector<16x205xbf16>
    %111 = vector.extract_strided_slice %100 {offsets = [160, 0], sizes = [16, 205], strides = [1, 1]} : vector<256x205xbf16> to vector<16x205xbf16>
    %112 = vector.extract_strided_slice %100 {offsets = [176, 0], sizes = [16, 205], strides = [1, 1]} : vector<256x205xbf16> to vector<16x205xbf16>
    %113 = vector.extract_strided_slice %100 {offsets = [192, 0], sizes = [16, 205], strides = [1, 1]} : vector<256x205xbf16> to vector<16x205xbf16>
    %114 = vector.extract_strided_slice %100 {offsets = [208, 0], sizes = [16, 205], strides = [1, 1]} : vector<256x205xbf16> to vector<16x205xbf16>
    %115 = vector.extract_strided_slice %100 {offsets = [224, 0], sizes = [16, 205], strides = [1, 1]} : vector<256x205xbf16> to vector<16x205xbf16>
    %116 = vector.extract_strided_slice %100 {offsets = [240, 0], sizes = [16, 205], strides = [1, 1]} : vector<256x205xbf16> to vector<16x205xbf16>
    %117 = tpu.concatenate %101, %102, %103, %104, %105, %106, %107, %108, %109, %110, %111, %112, %113, %114, %115, %116 in 1 : vector<16x205xbf16>, vector<16x205xbf16>, vector<16x205xbf16>, vector<16x205xbf16>, vector<16x205xbf16>, vector<16x205xbf16>, vector<16x205xbf16>, vector<16x205xbf16>, vector<16x205xbf16>, vector<16x205xbf16>, vector<16x205xbf16>, vector<16x205xbf16>, vector<16x205xbf16>, vector<16x205xbf16>, vector<16x205xbf16>, vector<16x205xbf16> -> vector<16x3280xbf16>
    %c0_16 = arith.constant 0 : index
    %c0_17 = arith.constant 0 : index
    %118 = vector.load %arg7[%c0_16, %c0_17] : memref<3280x10xbf16, #tpu.memory_space<vmem>>, vector<3280x10xbf16>
    %cst_18 = arith.constant dense<0.000000e+00> : vector<16x10xf32>
    %119 = tpu.matmul %117, %118, %cst_18 {dimension_numbers = #tpu.dot_dimension_numbers<[1], [0], [0], [1], [0, 0, 1, 1], [], []>} : vector<16x3280xbf16>, vector<3280x10xbf16>, vector<16x10xf32> -> vector<16x10xf32>
    %c0_19 = arith.constant 0 : index
    %c0_20 = arith.constant 0 : index
    %120 = vector.load %arg8[%c0_19, %c0_20] : memref<1x10xf32, #tpu.memory_space<vmem>>, vector<1x10xf32>
    %121 = vector.broadcast %120 : vector<1x10xf32> to vector<16x10xf32>
    %122 = arith.addf %119, %121 : vector<16x10xf32>
    %c0_21 = arith.constant 0 : index
    %c0_22 = arith.constant 0 : index
    %123 = vector.load %arg9[%c0_21, %c0_22] : memref<16x10xf32, #tpu.memory_space<vmem>>, vector<16x10xf32>
    tpu.vector_store %arg9[%c0_21, %c0_22], %122 {strides = array<i32>} : memref<16x10xf32, #tpu.memory_space<vmem>>, vector<16x10xf32>,
    return
  }
  func.func @transform_0(%arg0: i32) -> (i32, i32, i32) {
    %c0_i32 = arith.constant 0 : i32
    %c0_i32_0 = arith.constant 0 : i32
    %c0_i32_1 = arith.constant 0 : i32
    return %c0_i32, %arg0, %c0_i32_0 : i32, i32, i32
  }
  func.func @transform_1(%arg0: i32) -> (i32, i32) {
    %c0_i32 = arith.constant 0 : i32
    %c0_i32_0 = arith.constant 0 : i32
    %c0_i32_1 = arith.constant 0 : i32
    return %c0_i32, %c0_i32_0 : i32, i32
  }
  func.func @transform_2(%arg0: i32) -> (i32, i32) {
    %c0_i32 = arith.constant 0 : i32
    %c0_i32_0 = arith.constant 0 : i32
    %c0_i32_1 = arith.constant 0 : i32
    return %c0_i32, %c0_i32_0 : i32, i32
  }
  func.func @transform_3(%arg0: i32) -> (i32, i32) {
    %c0_i32 = arith.constant 0 : i32
    %c0_i32_0 = arith.constant 0 : i32
    %c0_i32_1 = arith.constant 0 : i32
    return %c0_i32, %c0_i32_0 : i32, i32
  }
  func.func @transform_4(%arg0: i32) -> (i32, i32) {
    %c0_i32 = arith.constant 0 : i32
    %c0_i32_0 = arith.constant 0 : i32
    %c0_i32_1 = arith.constant 0 : i32
    return %c0_i32, %c0_i32_0 : i32, i32
  }
  func.func @transform_5(%arg0: i32) -> (i32, i32) {
    %c0_i32 = arith.constant 0 : i32
    %c0_i32_0 = arith.constant 0 : i32
    %c0_i32_1 = arith.constant 0 : i32
    return %c0_i32, %c0_i32_0 : i32, i32
  }
  func.func @transform_6(%arg0: i32) -> (i32, i32) {
    %c0_i32 = arith.constant 0 : i32
    %c0_i32_0 = arith.constant 0 : i32
    %c0_i32_1 = arith.constant 0 : i32
    return %c0_i32, %c0_i32_0 : i32, i32
  }
  func.func @transform_7(%arg0: i32) -> (i32, i32) {
    %c0_i32 = arith.constant 0 : i32
    %c0_i32_0 = arith.constant 0 : i32
    %c0_i32_1 = arith.constant 0 : i32
    return %c0_i32, %c0_i32_0 : i32, i32
  }
  func.func @transform_8(%arg0: i32) -> (i32, i32) {
    %c0_i32 = arith.constant 0 : i32
    %c0_i32_0 = arith.constant 0 : i32
    return %arg0, %c0_i32 : i32, i32
  }
}

</mosaic_0001>

<bundles_post_ra>
// kernel: cnn_forward.1
= control target key start
LH: loop header
LB: loop body
LE: loop exit
PB: predicated region body
PF: predicated region fallthrough
CT: control target
= control target key end

     0   :  { %s12047_s27 = smov 0   ;;  %s12049_s28 = smov 0   ;;  %s18935_s0 = inlined_call_operand.vmem [shape: bf16[3,32,900], index: 0, kind: input, shape index: {}]   ;;  %s18936_s1 = inlined_call_operand.vmem [shape: bf16[96,432], index: 1, kind: input, shape index: {}]   ;;  %s18937_s2 = inlined_call_operand.vmem [shape: f32[96,1], index: 2, kind: input, shape index: {}]   ;;  %s18938_s3 = inlined_call_operand.vmem [shape: bf16[807,256], index: 3, kind: input, shape index: {}]   ;;  %s18939_s4 = inlined_call_operand.vmem [shape: bf16[256,864], index: 4, kind: input, shape index: {}]   ;;  %s18940_s5 = inlined_call_operand.vmem [shape: f32[256,1], index: 5, kind: input, shape index: {}]   ;;  %s18941_s6 = inlined_call_operand.vmem [shape: bf16[3280,10], index: 6, kind: input, shape index: {}]   ;;  %s18942_s7 = inlined_call_operand.vmem [shape: f32[1,10], index: 7, kind: input, shape index: {}]   ;;  %s18943_s8 = inlined_call_operand.vmem [shape: f32[32,10], index: 8, kind: output, shape index: {}]  }
   0x1   :  { %s12051_s29 = smov 0  }
   0x2 LB: > { %s9707_s30 = sadd.s32 4294967295, %s11971_s29   ;;  %s12064_s9 = sadd.s32 1, %s11971_s29   ;;  %s11971_s29 = sphi %s12051_s29, %s19986_s29   ;;  %s11967_s28 = sphi %s12049_s28, %s19985_s28   ;;  %s11963_s27 = sphi %s12047_s27, %s19984_s27  }
   0x3   : > { %s22_s10 = ssub.s32 %s11971_s29, %s12064_s9  ;;  %s25_s11 = sadd.s32 1, %s11967_s28 }
   0x4   : > { %p23_p0 = scmp.eq.s32.totalorder %s22_s10, 0  ;;  %p32_p1 = scmp.ne.s32.totalorder %s11967_s28, %s11963_s27 }
   0x5   : > { %p33_p2 = scmp.eq.s32.totalorder %s11971_s29, 0  ;;  %p9710_p4 = scmp.ge.s32.totalorder %s11971_s29, 2 }
   0x6   : > { %s12073_s12 = scalar_select %p23_p0, %s11967_s28, %s25_s11  }
   0x7   : > { %p34_p3 = por %p33_p2, %p32_p1  ;;  %252 = sbr.rel (%p9710_p4) target bundleno = 29 (0x1d), region = 44 }
   0xc   : > { %255 = sbr.rel (!%p34_p3) target bundleno = 29 (0x1d), region = 48  ;;  %s257_s13 = sand.u32 (%p34_p3), 1, %s11967_s28  }
   0xd   : > { %s10235_s14 = sshll.u32 (%p34_p3), %s11971_s29, 6  ;;  %s10584_s15 = smul.u32 (%p34_p3), 192, %s257_s13 }
   0xe   : > { %s12081_s18 = scalar_lea.vmem (%p34_p3), %s18935_s0, %s10235_s14 }
   0xf   : > { %v276_v0 = vld [vmem:[%s12081_s18] sm:$0xff] (%p34_p3)  ;;  %v278_v1 = vld [vmem:[%s12081_s18 + $0x8] sm:$0xff] (%p34_p3)  ;;  %v280_v2 = vld [vmem:[%s12081_s18 + $0x10] sm:$0xff] (%p34_p3)  ;;  %s12089_s19 = scalar_lea.vmem (%p34_p3), [#allocation2], %s10584_s15 }
  0x10   : > { %v282_v3 = vld [vmem:[%s12081_s18 + $0x18] sm:$0xff] (%p34_p3)  ;;  %v284_v4 = vld [vmem:[%s12081_s18 + $0x20] sm:$0xff] (%p34_p3)  ;;  %v286_v5 = vld [vmem:[%s12081_s18 + $0x28] sm:$0xff] (%p34_p3)  ;;  %277 = vst [vmem:[%s12089_s19] sm:$0xff] (%p34_p3), %v276_v0 }
  0x11   : > { %279 = vst [vmem:[%s12089_s19 + $0x8] sm:$0xff] %v278_v1  ;;  %281 = vst [vmem:[%s12089_s19 + $0x10] sm:$0xff] %v280_v2  ;;  %v288_v6 = vld [vmem:[%s12081_s18 + $0x30] sm:$0xff]  ;;  %v290_v7 = vld [vmem:[%s12081_s18 + $0x38] sm:$0xff] }
  0x12   : > { %283 = vst [vmem:[%s12089_s19 + $0x18] sm:$0xff] %v282_v3  ;;  %285 = vst [vmem:[%s12089_s19 + $0x20] sm:$0xff] %v284_v4  ;;  %v292_v8 = vld [vmem:[%s12081_s18 + $0x80] sm:$0xff]  ;;  %v294_v9 = vld [vmem:[%s12081_s18 + $0x88] sm:$0xff] }
  0x13   : > { %287 = vst [vmem:[%s12089_s19 + $0x28] sm:$0xff] %v286_v5  ;;  %289 = vst [vmem:[%s12089_s19 + $0x30] sm:$0xff] %v288_v6  ;;  %v296_v10 = vld [vmem:[%s12081_s18 + $0x90] sm:$0xff]  ;;  %v298_v11 = vld [vmem:[%s12081_s18 + $0x98] sm:$0xff] }
  0x14   : > { %291 = vst [vmem:[%s12089_s19 + $0x38] sm:$0xff] %v290_v7  ;;  %293 = vst [vmem:[%s12089_s19 + $0x40] sm:$0xff] %v292_v8  ;;  %v300_v12 = vld [vmem:[%s12081_s18 + $0xa0] sm:$0xff]  ;;  %v302_v13 = vld [vmem:[%s12081_s18 + $0xa8] sm:$0xff] }
  0x15   : > { %295 = vst [vmem:[%s12089_s19 + $0x48] sm:$0xff] %v294_v9  ;;  %297 = vst [vmem:[%s12089_s19 + $0x50] sm:$0xff] %v296_v10  ;;  %v304_v14 = vld [vmem:[%s12081_s18 + $0xb0] sm:$0xff]  ;;  %v306_v15 = vld [vmem:[%s12081_s18 + $0xb8] sm:$0xff] }
  0x16   : > { %299 = vst [vmem:[%s12089_s19 + $0x58] sm:$0xff] %v298_v11  ;;  %301 = vst [vmem:[%s12089_s19 + $0x60] sm:$0xff] %v300_v12  ;;  %v308_v16 = vld [vmem:[%s12081_s18 + $0x100] sm:$0xff]  ;;  %v310_v17 = vld [vmem:[%s12081_s18 + $0x108] sm:$0xff] }
  0x17   : > { %303 = vst [vmem:[%s12089_s19 + $0x68] sm:$0xff] %v302_v13  ;;  %305 = vst [vmem:[%s12089_s19 + $0x70] sm:$0xff] %v304_v14  ;;  %v312_v18 = vld [vmem:[%s12081_s18 + $0x110] sm:$0xff]  ;;  %v314_v19 = vld [vmem:[%s12081_s18 + $0x118] sm:$0xff] }
  0x18   : > { %307 = vst [vmem:[%s12089_s19 + $0x78] sm:$0xff] %v306_v15  ;;  %309 = vst [vmem:[%s12089_s19 + $0x80] sm:$0xff] %v308_v16  ;;  %v316_v20 = vld [vmem:[%s12081_s18 + $0x120] sm:$0xff]  ;;  %v318_v21 = vld [vmem:[%s12081_s18 + $0x128] sm:$0xff] }
  0x19   : > { %311 = vst [vmem:[%s12089_s19 + $0x88] sm:$0xff] %v310_v17  ;;  %313 = vst [vmem:[%s12089_s19 + $0x90] sm:$0xff] %v312_v18  ;;  %v320_v22 = vld [vmem:[%s12081_s18 + $0x130] sm:$0xff]  ;;  %v322_v23 = vld [vmem:[%s12081_s18 + $0x138] sm:$0xff] }
  0x1a   : > { %315 = vst [vmem:[%s12089_s19 + $0x98] sm:$0xff] %v314_v19  ;;  %317 = vst [vmem:[%s12089_s19 + $0xa0] sm:$0xff] %v316_v20 }
  0x1b   : > { %319 = vst [vmem:[%s12089_s19 + $0xa8] sm:$0xff] %v318_v21  ;;  %321 = vst [vmem:[%s12089_s19 + $0xb0] sm:$0xff] %v320_v22 }
  0x1c   : > { %323 = vst [vmem:[%s12089_s19 + $0xb8] sm:$0xff] %v322_v23 }
  0x1d PF: > { %p9714_p5 = scmp.ge.s32.totalorder %s11971_s29, 1  ;;  %p328_p6 = scmp.lt.s32.totalorder %s11971_s29, 3 }
  0x1f   : > { %p329_p7 = pnand %p9714_p5, %p328_p6 }
  0x21   : > { %332 = sbr.rel (%p329_p7) target bundleno = 2965 (0xb95), region = 71 }
  0x26   : > { %s335_s20 = sand.u32 1, %s11963_s27   ;;  %s11973_s23 = smov 99   ;;  %vm959_vm0 = vcmask 809984   ;;  %vm883_vm1 = vcmask 818176   ;;  %vm604_vm2 = vcmask 1031168   ;;  %vm686_vm3 = vcmask 801792  }
  0x27   : > { %s10585_s21 = smul.u32 192, %s335_s20  ;;  %s11974_s24 = smov 100   ;;  %vm522_vm4 = vcmask 1039360   ;;  %vm1529_vm5 = vcmask 392192   ;;  %vm850_vm6 = vcmask 785408   ;;  %vm768_vm7 = vcmask 793600  }
  0x28   : > { %s11975_s25 = smov 98   ;;  %s11976_s26 = smov 126   ;;  %vm4005_vm8 = vcmask 1042432   ;;  %vm4006_vm9 = vcmask 1043456   ;;  %vm3986_vm10 = vcmask 318464   ;;  %vm4519_vm11 = vcmask 916480  }
  0x29   : > { %s12136_s22 = scalar_lea.vmem [#allocation2], %s10585_s21  ;;  %s11977_s27 = smov 127   ;;  %vm4605_vm12 = vcmask 900096   ;;  %vm4562_vm13 = vcmask 908288   ;;  %vm4690_vm14 = vcmask 777216   ;;  %vm4733_vm15 = vcmask 769024  }
  0x2a   : > { %v393_v24 = vld [vmem:[%s12136_s22 + $0x88] sm:$0xff]  ;;  %v392_v26 = vld [vmem:[%s12136_s22 + $0x80] sm:$0xff]  ;;  %v394_v48 = vld [vmem:[%s12136_s22 + $0x90] sm:$0xff]  ;;  %s11978_s10 = smov 96   ;;  %s11979_s14 = smov 97  }
  0x2b   : > { %v397_v25 = vld [vmem:[%s12136_s22 + $0xa8] sm:$0xff]  ;;  %v396_v28 = vld [vmem:[%s12136_s22 + $0xa0] sm:$0xff]  ;;  %v398_v49 = vld [vmem:[%s12136_s22 + $0xb0] sm:$0xff]  ;;  %s11983_s21 = smov 110   ;;  %s11985_s11 = smov 95  }
  0x2c   : > { %v12141_v27 = vcombine.high %v393_v24, %v397_v25  ;;  %v12144_v29 = vcombine.high %v392_v26, %v396_v28  ;;  %v12148_v30 = vcombine.low %v392_v26, %v396_v28  ;;  %v385_v31 = vld [vmem:[%s12136_s22 + $0x48] sm:$0xff]  ;;  %v12154_v33 = vcombine.low %v393_v24, %v397_v25  ;;  %v384_v34 = vld [vmem:[%s12136_s22 + $0x40] sm:$0xff]  ;;  %v386_v26 = vld [vmem:[%s12136_s22 + $0x50] sm:$0xff]  ;;  %s11986_s13 = smov 94   ;;  %s11988_s20 = smov 26  }
  0x2d   : > { %v389_v32 = vld [vmem:[%s12136_s22 + $0x68] sm:$0xff]  ;;  %v388_v35 = vld [vmem:[%s12136_s22 + $0x60] sm:$0xff]  ;;  %v12258_v50 = vcombine.low %v394_v48, %v398_v49  ;;  %v12270_v51 = vcombine.high %v394_v48, %v398_v49  ;;  %v390_v28 = vld [vmem:[%s12136_s22 + $0x70] sm:$0xff]  ;;  %s11990_s17 = smov 1   ;;  %s11994_s15 = smov 104  }
  0x2e   : > { %996 = vrot.lane.b32.xlu1 %v12141_v27, %s11973_s23  ;;  %992 = vrot.lane.b32.xlu0 %v12144_v29, %s11973_s23  ;;  %v12160_v36 = vcombine.low %v385_v31, %v389_v32  ;;  %v12164_v37 = vcombine.high %v384_v34, %v388_v35  ;;  %v377_v38 = vld [vmem:[%s12136_s22 + $0x8] sm:$0xff]  ;;  %v12170_v40 = vcombine.low %v384_v34, %v388_v35  ;;  %v376_v41 = vld [vmem:[%s12136_s22] sm:$0xff]  ;;  %s11996_s18 = smov 79   ;;  %s11997_s19 = smov 53  }
  0x2f   : > { %v381_v39 = vld [vmem:[%s12136_s22 + $0x28] sm:$0xff]  ;;  %v380_v42 = vld [vmem:[%s12136_s22 + $0x20] sm:$0xff]  ;;  %v12176_v43 = vcombine.high %v385_v31, %v389_v32  ;;  %19248 = vst [vmem:[#allocation3_spill] sm:$0xff] %v12258_v50  ;;  %v12331_v34 = vcombine.high %v386_v26, %v390_v28 }
  0x30   : > { %v12180_v44 = vcombine.low %v377_v38, %v381_v39  ;;  %v12184_v45 = vcombine.high %v376_v41, %v380_v42  ;;  %v12188_v46 = vcombine.low %v376_v41, %v380_v42  ;;  %v12192_v47 = vcombine.high %v377_v38, %v381_v39 }
  0x31   : > { %v12340_v41 = vcombine.low %v386_v26, %v390_v28  ;;  %v12446_v26 = vld [vmem:[%s18936_s1 + $0xc] ss:$16 sps:$4 sm:$0xff]  }
  0x32   : > { %990 = vrot.lane.b32.xlu1 %v12148_v30, %s11973_s23  ;;  %994 = vrot.lane.b32.xlu0 %v12154_v33, %s11973_s23 }
  0x33   : > { %19249 = vst [vmem:[#allocation4_spill] sm:$0xff] %v12340_v41  ;;  %9765 = vmatprep.mubr.msk.bf16.mxu1 %vm1529_vm5, %v12446_v26 }
  0x36   : > { %971 = vrot.lane.b32.xlu1 %v12160_v36, %s11973_s23  ;;  %969 = vrot.lane.b32.xlu0 %v12164_v37, %s11973_s23 }
  0x3a   : > { %967 = vrot.lane.b32.xlu1 %v12170_v40, %s11973_s23  ;;  %973 = vrot.lane.b32.xlu0 %v12176_v43, %s11973_s23 }
  0x3e   : > { %947 = vrot.lane.b32.xlu1 %v12180_v44, %s11973_s23  ;;  %945 = vrot.lane.b32.xlu0 %v12184_v45, %s11973_s23 }
  0x42   : > { %943 = vrot.lane.b32.xlu1 %v12188_v46, %s11973_s23  ;;  %949 = vrot.lane.b32.xlu0 %v12192_v47, %s11973_s23 }
  0x46   : > { %924 = vrot.lane.b32.xlu1 %v12154_v33, %s11974_s24  ;;  %922 = vrot.lane.b32.xlu0 %v12144_v29, %s11974_s24 }
  0x4a   : > { %920 = vrot.lane.b32.xlu1 %v12148_v30, %s11974_s24  ;;  %926 = vrot.lane.b32.xlu0 %v12141_v27, %s11974_s24 }
  0x4e   : > { %898 = vrot.lane.b32.xlu1 %v12160_v36, %s11974_s24  ;;  %896 = vrot.lane.b32.xlu0 %v12164_v37, %s11974_s24 }
  0x52   : > { %894 = vrot.lane.b32.xlu1 %v12170_v40, %s11974_s24  ;;  %900 = vrot.lane.b32.xlu0 %v12176_v43, %s11974_s24 }
  0x56   : > { %871 = vrot.lane.b32.xlu1 %v12180_v44, %s11974_s24  ;;  %869 = vrot.lane.b32.xlu0 %v12184_v45, %s11974_s24 }
  0x5a   : > { %867 = vrot.lane.b32.xlu1 %v12188_v46, %s11974_s24  ;;  %873 = vrot.lane.b32.xlu0 %v12192_v47, %s11974_s24 }
  0x5e   : > { %731 = vrot.lane.b32.xlu1 %v12154_v33, %s11975_s25  ;;  %729 = vrot.lane.b32.xlu0 %v12144_v29, %s11975_s25 }
  0x62   : > { %727 = vrot.lane.b32.xlu1 %v12148_v30, %s11975_s25  ;;  %733 = vrot.lane.b32.xlu0 %v12141_v27, %s11975_s25 }
  0x66   : > { %704 = vrot.lane.b32.xlu1 %v12160_v36, %s11975_s25  ;;  %702 = vrot.lane.b32.xlu0 %v12164_v37, %s11975_s25 }
  0x6a   : > { %700 = vrot.lane.b32.xlu1 %v12170_v40, %s11975_s25  ;;  %706 = vrot.lane.b32.xlu0 %v12176_v43, %s11975_s25 }
  0x6e   : > { %676 = vrot.lane.b32.xlu1 %v12180_v44, %s11975_s25  ;;  %674 = vrot.lane.b32.xlu0 %v12184_v45, %s11975_s25 }
  0x72   : > { %672 = vrot.lane.b32.xlu1 %v12188_v46, %s11975_s25  ;;  %678 = vrot.lane.b32.xlu0 %v12192_v47, %s11975_s25 }
  0x76   : > { %622 = vrot.lane.b32.xlu1 %v12160_v36, %s11976_s26  ;;  %620 = vrot.lane.b32.xlu0 %v12164_v37, %s11976_s26 }
  0x7a   : > { %594 = vrot.lane.b32.xlu1 %v12180_v44, %s11976_s26  ;;  %618 = vrot.lane.b32.xlu0 %v12170_v40, %s11976_s26 }
  0x7e   : > { %567 = vrot.lane.b32.xlu1 %v12154_v33, %s11977_s27  ;;  %592 = vrot.lane.b32.xlu0 %v12184_v45, %s11976_s26 }
  0x82   : > { %998 = vrot.lane.b32.xlu1 %v12258_v50, %s11973_s23  ;;  %590 = vrot.lane.b32.xlu0 %v12188_v46, %s11976_s26 }
  0x86   : > { %565 = vrot.lane.b32.xlu0 %v12144_v29, %s11977_s27 }
  0x8a   : > { %563 = vrot.lane.b32.xlu0 %v12148_v30, %s11977_s27 }
  0x8e   : > { %1000 = vrot.lane.b32.xlu0 %v12270_v51, %s11973_s23 }
  0xa0   : > { %v12274_v52 = vpop.permute.xlu1 %996  ;;  %v993_v53 = vpop.permute.xlu0 %992 }
  0xa4   : > { %v991_v54 = vpop.permute.xlu1 %990  ;;  %v995_v55 = vpop.permute.xlu0 %994 }
  0xa5   : > { %v1007_v56 = vsel %vm959_vm0, %v993_v53, %v995_v55  ;;  %v1008_v57 = vsel %vm959_vm0, %v995_v55, %v12274_v52  ;;  %v1006_v60 = vsel %vm959_vm0, %v991_v54, %v993_v53  ;;  %v378_v55 = vld [vmem:[%s12136_s22 + $0x10] sm:$0xff] }
  0xa6   : > { %1122 = vrot.lane.b32.xlu0 %v1007_v56, %s11978_s10  ;;  %1124 = vrot.lane.b32.xlu1 %v1008_v57, %s11978_s10  ;;  %v382_v56 = vld [vmem:[%s12136_s22 + $0x30] sm:$0xff] }
  0xa8   : > { %v972_v58 = vpop.permute.xlu1 %971  ;;  %v970_v59 = vpop.permute.xlu0 %969 }
  0xa9   : > { %v984_v61 = vsel %vm959_vm0, %v970_v59, %v972_v58 }
  0xaa   : > { %1120 = vrot.lane.b32.xlu0 %v1006_v60, %s11978_s10  ;;  %1108 = vrot.lane.b32.xlu1 %v984_v61, %s11978_s10 }
  0xac   : > { %v968_v62 = vpop.permute.xlu1 %967  ;;  %v12285_v63 = vpop.permute.xlu0 %973 }
  0xad   : > { %v983_v0 = vsel %vm959_vm0, %v968_v62, %v970_v59  ;;  %v985_v1 = vsel %vm959_vm0, %v972_v58, %v12285_v63  ;;  %v12360_v59 = vcombine.high %v378_v55, %v382_v56  ;;  %v12366_v62 = vcombine.low %v378_v55, %v382_v56 }
  0xae   : > { %1110 = vrot.lane.b32.xlu0 %v985_v1, %s11978_s10  ;;  %1106 = vrot.lane.b32.xlu1 %v983_v0, %s11978_s10 }
  0xaf   : > { %19250 = vst [vmem:[#allocation5_spill] sm:$0xff] %v12366_v62 }
  0xb0   : > { %v948_v2 = vpop.permute.xlu1 %947  ;;  %v946_v3 = vpop.permute.xlu0 %945 }
  0xb1   : > { %v961_v4 = vsel %vm959_vm0, %v946_v3, %v948_v2 }
  0xb2   : > { %1094 = vrot.lane.b32.xlu0 %v961_v4, %s11978_s10 }
  0xb4   : > { %v944_v5 = vpop.permute.xlu1 %943  ;;  %v12294_v6 = vpop.permute.xlu0 %949 }
  0xb5   : > { %v962_v7 = vsel %vm959_vm0, %v948_v2, %v12294_v6  ;;  %v960_v10 = vsel %vm959_vm0, %v944_v5, %v946_v3 }
  0xb6   : > { %1096 = vrot.lane.b32.xlu1 %v962_v7, %s11978_s10 }
  0xb8   : > { %v925_v8 = vpop.permute.xlu1 %924  ;;  %v923_v9 = vpop.permute.xlu0 %922 }
  0xb9   : > { %v937_v11 = vsel %vm883_vm1, %v923_v9, %v925_v8 }
  0xba   : > { %1092 = vrot.lane.b32.xlu1 %v960_v10, %s11978_s10  ;;  %1080 = vrot.lane.b32.xlu0 %v937_v11, %s11978_s10 }
  0xbc   : > { %v921_v12 = vpop.permute.xlu1 %920  ;;  %v12303_v13 = vpop.permute.xlu0 %926 }
  0xbd   : > { %v938_v14 = vsel %vm883_vm1, %v925_v8, %v12303_v13  ;;  %v936_v17 = vsel %vm883_vm1, %v921_v12, %v923_v9 }
  0xbe   : > { %1082 = vrot.lane.b32.xlu1 %v938_v14, %s11978_s10 }
  0xc0   : > { %v899_v15 = vpop.permute.xlu1 %898  ;;  %v897_v16 = vpop.permute.xlu0 %896 }
  0xc1   : > { %v911_v18 = vsel %vm883_vm1, %v897_v16, %v899_v15 }
  0xc2   : > { %1078 = vrot.lane.b32.xlu1 %v936_v17, %s11978_s10  ;;  %1066 = vrot.lane.b32.xlu0 %v911_v18, %s11978_s10 }
  0xc4   : > { %v895_v19 = vpop.permute.xlu1 %894  ;;  %v12312_v20 = vpop.permute.xlu0 %900 }
  0xc5   : > { %v912_v21 = vsel %vm883_vm1, %v899_v15, %v12312_v20  ;;  %v910_v24 = vsel %vm883_vm1, %v895_v19, %v897_v16 }
  0xc6   : > { %1068 = vrot.lane.b32.xlu1 %v912_v21, %s11978_s10  ;;  %538 = vrot.lane.b32.xlu0 %v12164_v37, %s11977_s27 }
  0xc8   : > { %v872_v22 = vpop.permute.xlu1 %871  ;;  %v870_v23 = vpop.permute.xlu0 %869 }
  0xc9   : > { %v885_v25 = vsel %vm883_vm1, %v870_v23, %v872_v22 }
  0xca   : > { %1064 = vrot.lane.b32.xlu1 %v910_v24, %s11978_s10  ;;  %1052 = vrot.lane.b32.xlu0 %v885_v25, %s11978_s10 }
  0xcc   : > { %v868_v31 = vpop.permute.xlu1 %867  ;;  %v12325_v32 = vpop.permute.xlu0 %873 }
  0xcd   : > { %v886_v39 = vsel %vm883_vm1, %v872_v22, %v12325_v32  ;;  %v884_v54 = vsel %vm883_vm1, %v868_v31, %v870_v23 }
  0xce   : > { %540 = vrot.lane.b32.xlu1 %v12160_v36, %s11977_s27  ;;  %536 = vrot.lane.b32.xlu0 %v12170_v40, %s11977_s27 }
  0xd0   : > { %v732_v35 = vpop.permute.xlu1 %731  ;;  %v12333_v38 = vpop.permute.xlu0 %729 }
  0xd1   : > { %v12401_v14 = vsel %vm686_vm3, %v12333_v38, %v732_v35 }
  0xd2   : > { %1054 = vrot.lane.b32.xlu1 %v886_v39, %s11978_s10  ;;  %977 = vrot.lane.b32.xlu0 %v12331_v34, %s11973_s23 }
  0xd4   : > { %v728_v42 = vpop.permute.xlu1 %727  ;;  %v12342_v48 = vpop.permute.xlu0 %733 }
  0xd5   : > { %v12389_v8 = vsel %vm686_vm3, %v732_v35, %v12342_v48  ;;  %v12421_v22 = vsel %vm686_vm3, %v728_v42, %v12333_v38 }
  0xd6   : > { %975 = vrot.lane.b32.xlu1 %v12340_v41, %s11973_s23  ;;  %510 = vrot.lane.b32.xlu0 %v12184_v45, %s11977_s27  ;;  %19251 = vst [vmem:[#allocation6_spill] sm:$0xff] %v12389_v8 }
  0xd8   : > { %v705_v49 = vpop.permute.xlu1 %704  ;;  %v703_v53 = vpop.permute.xlu0 %702 }
  0xd9   : > { %v12409_v16 = vsel %vm686_vm3, %v703_v53, %v705_v49 }
  0xda   : > { %1038 = vrot.lane.b32.xlu0 %v12144_v29, %s11978_s10  ;;  %1050 = vrot.lane.b32.xlu1 %v884_v54, %s11978_s10 }
  0xdc   : > { %v701_v57 = vpop.permute.xlu1 %700  ;;  %v12354_v58 = vpop.permute.xlu0 %706 }
  0xdd   : > { %v12430_v24 = vsel %vm686_vm3, %v705_v49, %v12354_v58  ;;  %v12433_v25 = vsel %vm686_vm3, %v701_v57, %v703_v53 }
  0xde   : > { %508 = vrot.lane.b32.xlu0 %v12188_v46, %s11977_s27  ;;  %512 = vrot.lane.b32.xlu1 %v12180_v44, %s11977_s27  ;;  %19252 = vst [vmem:[#allocation7_spill] sm:$0xff] %v12430_v24 }
  0xe0   : > { %v677_v60 = vpop.permute.xlu1 %676  ;;  %v675_v61 = vpop.permute.xlu0 %674 }
  0xe1   : > { %v12459_v31 = vsel %vm686_vm3, %v675_v61, %v677_v60 }
  0xe2   : > { %953 = vrot.lane.b32.xlu0 %v12360_v59, %s11973_s23  ;;  %1040 = vrot.lane.b32.xlu1 %v12154_v33, %s11978_s10 }
  0xe4   : > { %v673_v0 = vpop.permute.xlu1 %672  ;;  %v12368_v1 = vpop.permute.xlu0 %678 }
  0xe5   : > { %v12450_v28 = vsel %vm686_vm3, %v677_v60, %v12368_v1  ;;  %v12462_v35 = vsel %vm686_vm3, %v673_v0, %v675_v61 }
  0xe6   : > { %1024 = vrot.lane.b32.xlu0 %v12164_v37, %s11978_s10  ;;  %951 = vrot.lane.b32.xlu1 %v12366_v62, %s11973_s23  ;;  %19253 = vst [vmem:[#allocation8_spill] sm:$0xff] %v12450_v28 }
  0xe8   : > { %v12374_v2 = vpop.permute.xlu1 %622  ;;  %v621_v3 = vpop.permute.xlu0 %620 }
  0xe9   : > { %v633_v4 = vsel %vm604_vm2, %v621_v3, %v12374_v2 }
  0xea   : > { %928 = vrot.lane.b32.xlu0 %v12258_v50, %s11974_s24  ;;  %1036 = vrot.lane.b32.xlu1 %v12148_v30, %s11978_s10 }
  0xeb   : > { %1548 = vmatprep.subr.bf16.mxu0 %v633_v4 }
  0xec   : > { %v619_v5 = vpop.permute.xlu0 %618  ;;  %v12391_v9 = vpop.permute.xlu1 %594 }
  0xed   : > { %v632_v7 = vsel %vm604_vm2, %v619_v5, %v621_v3 }
  0xee   : > { %1022 = vrot.lane.b32.xlu0 %v12170_v40, %s11978_s10  ;;  %1026 = vrot.lane.b32.xlu1 %v12160_v36, %s11978_s10 }
  0xef   : > { %1549 = vmatpush1.bf16.msra.mxu0 %v632_v7 }
  0xf0   : > { %v593_v10 = vpop.permute.xlu0 %592  ;;  %v12411_v17 = vpop.permute.xlu1 %567 }
  0xf1   : > { %v606_v11 = vsel %vm604_vm2, %v593_v10, %v12391_v9 }
  0xf2   : > { %930 = vrot.lane.b32.xlu1 %v12270_v51, %s11974_s24  ;;  %1166 = vrot.lane.b32.xlu0 %v12389_v8, %s11978_s10 }
  0xf3   : > { %1550 = vmatprep.subr.bf16.mxu0 %v606_v11 }
  0xf4   : > { %v591_v12 = vpop.permute.xlu0 %590  ;;  %v12474_v39 = vpop.permute.xlu1 %998 }
  0xf5   : > { %v605_v15 = vsel %vm604_vm2, %v591_v12, %v593_v10 }
  0xf6   : > { %904 = vrot.lane.b32.xlu0 %v12331_v34, %s11974_s24  ;;  %1164 = vrot.lane.b32.xlu1 %v12401_v14, %s11978_s10 }
  0xf7   : > { %1551 = vmatpush1.bf16.msra.mxu0 %v605_v15 }
  0xf8   : > { %v566_v18 = vpop.permute.xlu0 %565 }
  0xf9   : > { %v578_v19 = vsel %vm522_vm4, %v566_v18, %v12411_v17 }
  0xfa   : > { %902 = vrot.lane.b32.xlu1 %v12340_v41, %s11974_s24  ;;  %1150 = vrot.lane.b32.xlu0 %v12409_v16, %s11978_s10 }
  0xfb   : > { %1552 = vmatprep.subr.bf16.mxu0 %v578_v19 }
  0xfc   : > { %v564_v21 = vpop.permute.xlu0 %563 }
  0xfd   : > { %v577_v23 = vsel %vm522_vm4, %v564_v21, %v566_v18 }
  0xfe   : > { %1162 = vrot.lane.b32.xlu1 %v12421_v22, %s11978_s10  ;;  %875 = vrot.lane.b32.xlu0 %v12366_v62, %s11974_s24 }
  0xff   : > { %1553 = vmatpush1.bf16.msra.mxu0 %v577_v23 }
 0x100   : > { %v12472_v38 = vpop.permute.xlu0 %1000 }
 0x102   : > { %1152 = vrot.lane.b32.xlu1 %v12430_v24, %s11978_s10  ;;  %1148 = vrot.lane.b32.xlu0 %v12433_v25, %s11978_s10 }
 0x106   : > { %877 = vrot.lane.b32.xlu1 %v12360_v59, %s11974_s24  ;;  %840 = vrot.lane.b32.xlu0 %v12180_v44, %s11978_s10 }
 0x10a   : > { %838 = vrot.lane.b32.xlu1 %v12184_v45, %s11978_s10  ;;  %1138 = vrot.lane.b32.xlu0 %v12450_v28, %s11978_s10 }
 0x10e   : > { %1136 = vrot.lane.b32.xlu1 %v12459_v31, %s11978_s10  ;;  %1134 = vrot.lane.b32.xlu0 %v12462_v35, %s11978_s10 }
 0x112   : > { %836 = vrot.lane.b32.xlu1 %v12188_v46, %s11978_s10  ;;  %626 = vrot.lane.b32.xlu0 %v12340_v41, %s11976_s26 }
 0x116   : > { %624 = vrot.lane.b32.xlu1 %v12176_v43, %s11976_s26  ;;  %813 = vrot.lane.b32.xlu0 %v12154_v33, %s11979_s14 }
 0x118   : > { %v1123_v42 = vpop.permute.xlu0 %1122  ;;  %v12480_v49 = vpop.permute.xlu1 %1124 }
 0x119   : > { %v1219_v53 = vsel %vm850_vm6, %v1123_v42, %v12480_v49 }
 0x11a   : > { %811 = vrot.lane.b32.xlu1 %v12144_v29, %s11979_s14  ;;  %596 = vrot.lane.b32.xlu0 %v12192_v47, %s11976_s26 }
 0x11b   : > { %1641 = vmatprep.subr.bf16.mxu1 %v1219_v53 }
 0x11c   : > { %v1121_v54 = vpop.permute.xlu0 %1120  ;;  %v1109_v55 = vpop.permute.xlu1 %1108 }
 0x11d   : > { %v1218_v56 = vsel %vm850_vm6, %v1121_v54, %v1123_v42  ;;  %v395_v54 = vld [vmem:[%s12136_s22 + $0x98] sm:$0xff] }
 0x11e   : > { %809 = vrot.lane.b32.xlu1 %v12148_v30, %s11979_s14  ;;  %784 = vrot.lane.b32.xlu0 %v12164_v37, %s11979_s14 }
 0x11f   : > { %1642 = vmatpush1.bf16.msra.mxu1 %v1218_v56 }
 0x120   : > { %v12493_v57 = vpop.permute.xlu0 %1110  ;;  %v1107_v60 = vpop.permute.xlu1 %1106 }
 0x121   : > { %v1213_v61 = vsel %vm850_vm6, %v1109_v55, %v12493_v57  ;;  %v1212_v0 = vsel %vm850_vm6, %v1107_v60, %v1109_v55  ;;  %v399_v55 = vld [vmem:[%s12136_s22 + $0xb8] sm:$0xff] }
 0x122   : > { %598 = vrot.lane.b32.xlu1 %v12366_v62, %s11976_s26  ;;  %735 = vrot.lane.b32.xlu0 %v12258_v50, %s11975_s25 }
 0x123   : > { %1643 = vmatprep.subr.bf16.mxu1 %v1213_v61 }
 0x124   : > { %1644 = vmatpush1.bf16.msra.mxu1 %v1212_v0  ;;  %v1095_v3 = vpop.permute.xlu0 %1094  ;;  %v12547_v0 = vcombine.low %v395_v54, %v399_v55 }
 0x126   : > { %786 = vrot.lane.b32.xlu1 %v12160_v36, %s11979_s14  ;;  %782 = vrot.lane.b32.xlu0 %v12170_v40, %s11979_s14 }
 0x128   : > { %v12506_v4 = vpop.permute.xlu1 %1096 }
 0x129   : > { %v1207_v5 = vsel %vm850_vm6, %v1095_v3, %v12506_v4 }
 0x12a   : > { %737 = vrot.lane.b32.xlu1 %v12270_v51, %s11975_s25  ;;  %571 = vrot.lane.b32.xlu0 %v12258_v50, %s11977_s27 }
 0x12b   : > { %1645 = vmatprep.subr.bf16.mxu1 %v1207_v5 }
 0x12c   : > { %v1093_v7 = vpop.permute.xlu1 %1092  ;;  %v1081_v11 = vpop.permute.xlu0 %1080 }
 0x12d   : > { %v1206_v10 = vsel %vm850_vm6, %v1093_v7, %v1095_v3 }
 0x12e   : > { %569 = vrot.lane.b32.xlu1 %v12141_v27, %s11977_s27  ;;  %758 = vrot.lane.b32.xlu0 %v12180_v44, %s11979_s14 }
 0x12f   : > { %1646 = vmatpush1.bf16.msra.mxu1 %v1206_v10 }
 0x130   : > { %v12519_v12 = vpop.permute.xlu1 %1082 }
 0x131   : > { %v1201_v15 = vsel %vm850_vm6, %v1081_v11, %v12519_v12 }
 0x132   : > { %756 = vrot.lane.b32.xlu1 %v12184_v45, %s11979_s14  ;;  %710 = vrot.lane.b32.xlu0 %v12331_v34, %s11975_s25 }
 0x133   : > { %1647 = vmatprep.subr.bf16.mxu1 %v1201_v15 }
 0x134   : > { %v1067_v18 = vpop.permute.xlu0 %1066  ;;  %v1079_v19 = vpop.permute.xlu1 %1078 }
 0x135   : > { %v1200_v21 = vsel %vm850_vm6, %v1079_v19, %v1081_v11  ;;  %v12568_v19 = vcombine.high %v395_v54, %v399_v55 }
 0x136   : > { %708 = vrot.lane.b32.xlu1 %v12340_v41, %s11975_s25  ;;  %542 = vrot.lane.b32.xlu0 %v12176_v43, %s11977_s27 }
 0x137   : > { %1648 = vmatpush1.bf16.msra.mxu1 %v1200_v21  ;;  %v387_v21 = vld [vmem:[%s12136_s22 + $0x58] sm:$0xff] }
 0x138   : > { %v539_v23 = vpop.permute.xlu0 %538  ;;  %v12532_v42 = vpop.permute.xlu1 %1068 }
 0x139   : > { %19254 = vst [vmem:[#allocation9_spill] sm:$0xff] %v12532_v42  ;;  %v1195_v53 = vsel %vm850_vm6, %v1067_v18, %v12532_v42  ;;  %v12596_v42 = vld [vmem:[%s18936_s1 + $0x4] ss:$16 sps:$4 sm:$0xff]  }
 0x13a   : > { %754 = vrot.lane.b32.xlu1 %v12188_v46, %s11979_s14  ;;  %680 = vrot.lane.b32.xlu0 %v12366_v62, %s11975_s25 }
 0x13b   : > { %1649 = vmatprep.subr.bf16.mxu1 %v1195_v53  ;;  %1580 = vmatprep.mubr.bf16.mxu0 %v12596_v42 }
 0x13c   : > { %v1053_v56 = vpop.permute.xlu0 %1052  ;;  %v1065_v60 = vpop.permute.xlu1 %1064 }
 0x13d   : > { %v1194_v61 = vsel %vm850_vm6, %v1065_v60, %v1067_v18 }
 0x13e   : > { %544 = vrot.lane.b32.xlu1 %v12340_v41, %s11977_s27  ;;  %514 = vrot.lane.b32.xlu0 %v12192_v47, %s11977_s27 }
 0x13f   : > { %1650 = vmatpush1.bf16.msra.mxu1 %v1194_v61 }
 0x140   : > { %v537_v3 = vpop.permute.xlu0 %536  ;;  %v12549_v5 = vpop.permute.xlu1 %540 }
 0x141   : > { %v551_v7 = vsel %vm522_vm4, %v539_v23, %v12549_v5  ;;  %v550_v10 = vsel %vm522_vm4, %v537_v3, %v539_v23  ;;  %v391_v23 = vld [vmem:[%s12136_s22 + $0x78] sm:$0xff] }
 0x142   : > { %682 = vrot.lane.b32.xlu1 %v12360_v59, %s11975_s25  ;;  %1002 = vrot.lane.b32.xlu0 %v12547_v0, %s11973_s23  ;;  %v12578_v61 = vcombine.high %v387_v21, %v391_v23  ;;  %v379_v3 = vld [vmem:[%s12136_s22 + $0x18] sm:$0xff]  ;;  %v12585_v55 = vcombine.low %v387_v21, %v391_v23 }
 0x143   : > { %1554 = vmatprep.subr.bf16.mxu0 %v551_v7  ;;  %v383_v7 = vld [vmem:[%s12136_s22 + $0x38] sm:$0xff]  ;;  %s11984_s22 = smov 111  }
 0x144   : > { %1555 = vmatpush1.bf16.msra.mxu0 %v550_v10  ;;  %v12558_v11 = vpop.permute.xlu0 %977  ;;  %v12560_v15 = vpop.permute.xlu1 %1054  ;;  %v12603_v21 = vcombine.low %v379_v3, %v383_v7 }
 0x145   : > { %19255 = vst [vmem:[#allocation10_spill] sm:$0xff] %v12560_v15  ;;  %v1189_v18 = vsel %vm850_vm6, %v1053_v56, %v12560_v15 }
 0x146   : > { %516 = vrot.lane.b32.xlu1 %v12366_v62, %s11977_s27  ;;  %647 = vrot.lane.b32.xlu0 %v12144_v29, %s11976_s26 }
 0x147   : > { %1651 = vmatprep.subr.bf16.mxu1 %v1189_v18  ;;  %v12589_v18 = vcombine.high %v379_v3, %v383_v7  ;;  %v1010_v3 = vsel %vm959_vm0, %v12474_v39, %v12472_v38 }
 0x148   : > { %v511_v53 = vpop.permute.xlu0 %510  ;;  %v12572_v60 = vpop.permute.xlu1 %975 }
 0x14a   : > { %1004 = vrot.lane.b32.xlu1 %v12568_v19, %s11973_s23  ;;  %645 = vrot.lane.b32.xlu0 %v12148_v30, %s11976_s26 }
 0x14c   : > { %v1039_v10 = vpop.permute.xlu0 %1038  ;;  %v1051_v28 = vpop.permute.xlu1 %1050 }
 0x14d   : > { %v1188_v54 = vsel %vm850_vm6, %v1051_v28, %v1053_v56 }
 0x14e   : > { %649 = vrot.lane.b32.xlu1 %v12154_v33, %s11976_s26  ;;  %981 = vrot.lane.b32.xlu0 %v12578_v61, %s11973_s23 }
 0x14f   : > { %1652 = vmatpush1.bf16.msra.mxu1 %v1188_v54 }
 0x150   : > { %v509_v15 = vpop.permute.xlu0 %508  ;;  %v12591_v24 = vpop.permute.xlu1 %512 }
 0x151   : > { %v524_v28 = vsel %vm522_vm4, %v511_v53, %v12591_v24  ;;  %v523_v56 = vsel %vm522_vm4, %v509_v15, %v511_v53 }
 0x152   : > { %979 = vrot.lane.b32.xlu1 %v12585_v55, %s11973_s23  ;;  %957 = vrot.lane.b32.xlu0 %v12589_v18, %s11973_s23 }
 0x153   : > { %1556 = vmatprep.subr.bf16.mxu0 %v524_v28 }
 0x154   : > { %1557 = vmatpush1.bf16.msra.mxu0 %v523_v56  ;;  %v12608_v23 = vpop.permute.xlu0 %953  ;;  %v12610_v54 = vpop.permute.xlu1 %1040 }
 0x155   : > { %v1183_v8 = vsel %vm850_vm6, %v1039_v10, %v12610_v54  ;;  %1558 = vmatprep.subr.bf16.mxu0 %v12144_v29 }
 0x156   : > { %955 = vrot.lane.b32.xlu1 %v12603_v21, %s11973_s23  ;;  %844 = vrot.lane.b32.xlu0 %v12366_v62, %s11978_s10  ;;  %s11991_s23 = smov 52  }
 0x157   : > { %1653 = vmatprep.subr.bf16.mxu1 %v1183_v8 }
 0x158   : > { %v1025_v15 = vpop.permute.xlu0 %1024  ;;  %v952_v53 = vpop.permute.xlu1 %951  ;;  %1559 = vmatpush1.bf16.msra.mxu0 %v12148_v30  ;;  %v1009_v30 = vsel %vm959_vm0, %v12274_v52, %v12474_v39 }
 0x159   : > { %1560 = vmatprep.subr.bf16.mxu0 %v12164_v37 }
 0x15a   : > { %842 = vrot.lane.b32.xlu1 %v12192_v47, %s11978_s10  ;;  %1128 = vrot.lane.b32.xlu0 %v1010_v3, %s11978_s10 }
 0x15c   : > { %v12627_v29 = vpop.permute.xlu0 %928  ;;  %v1037_v7 = vpop.permute.xlu1 %1036  ;;  %1561 = vmatpush1.bf16.msra.mxu0 %v12170_v40 }
 0x15d   : > { %v1182_v8 = vsel %vm850_vm6, %v1037_v7, %v1039_v10  ;;  %1562 = vmatprep.subr.bf16.mxu0 %v12184_v45 }
 0x15e   : > { %934 = vrot.lane.b32.xlu0 %v12568_v19, %s11974_s24  ;;  %1126 = vrot.lane.b32.xlu1 %v1009_v30, %s11978_s10 }
 0x15f   : > { %1654 = vmatpush1.bf16.msra.mxu1 %v1182_v8 }
 0x160   : > { %v1023_v37 = vpop.permute.xlu0 %1022  ;;  %v12638_v28 = vpop.permute.xlu1 %1026  ;;  %1563 = vmatpush1.bf16.msra.mxu0 %v12188_v46  ;;  %v987_v46 = vsel %vm959_vm0, %v12572_v60, %v12558_v11 }
 0x161   : > { %v1177_v40 = vsel %vm850_vm6, %v1025_v15, %v12638_v28  ;;  %v1176_v52 = vsel %vm850_vm6, %v1023_v37, %v1025_v15  ;;  %v986_v15 = vsel %vm959_vm0, %v12285_v63, %v12572_v60  ;;  %v964_v63 = vsel %vm959_vm0, %v952_v53, %v12608_v23 }
 0x162   : > { %817 = vrot.lane.b32.xlu0 %v12258_v50, %s11979_s14  ;;  %932 = vrot.lane.b32.xlu1 %v12547_v0, %s11974_s24 }
 0x163   : > { %1655 = vmatprep.subr.bf16.mxu1 %v1177_v40 }
 0x164   : > { %1656 = vmatpush1.bf16.msra.mxu1 %v1176_v52  ;;  %v12648_v45 = vpop.permute.xlu0 %1166  ;;  %v12650_v39 = vpop.permute.xlu1 %930 }
 0x166   : > { %815 = vrot.lane.b32.xlu1 %v12141_v27, %s11979_s14  ;;  %1114 = vrot.lane.b32.xlu0 %v987_v46, %s11978_s10  ;;  %v963_v46 = vsel %vm959_vm0, %v12294_v6, %v952_v53 }
 0x168   : > { %v12658_v10 = vpop.permute.xlu0 %904  ;;  %v1165_v56 = vpop.permute.xlu1 %1164 }
 0x169   : > { %v1237_v3 = vsel %vm850_vm6, %v1165_v56, %v12648_v45 }
 0x16a   : > { %908 = vrot.lane.b32.xlu0 %v12578_v61, %s11974_s24  ;;  %1112 = vrot.lane.b32.xlu1 %v986_v15, %s11978_s10 }
 0x16b   : > { %1667 = vmatprep.subr.bf16.mxu1 %v1237_v3 }
 0x16c   : > { %v1151_v7 = vpop.permute.xlu0 %1150  ;;  %v903_v30 = vpop.permute.xlu1 %902 }
 0x16e   : > { %790 = vrot.lane.b32.xlu0 %v12340_v41, %s11979_s14  ;;  %906 = vrot.lane.b32.xlu1 %v12585_v55, %s11974_s24 }
 0x170   : > { %v876_v8 = vpop.permute.xlu0 %875  ;;  %v1163_v37 = vpop.permute.xlu1 %1162 }
 0x171   : > { %v1236_v60 = vsel %vm850_vm6, %v1163_v37, %v1165_v56 }
 0x172   : > { %788 = vrot.lane.b32.xlu1 %v12176_v43, %s11979_s14  ;;  %1100 = vrot.lane.b32.xlu0 %v964_v63, %s11978_s10 }
 0x173   : > { %1668 = vmatpush2.bf16.msra.mxu1 %v1236_v60 }
 0x174   : > { %v1149_v40 = vpop.permute.xlu0 %1148  ;;  %v12678_v52 = vpop.permute.xlu1 %1152 }
 0x175   : > { %v1231_v15 = vsel %vm850_vm6, %v1151_v7, %v12678_v52  ;;  %v1230_v3 = vsel %vm850_vm6, %v1149_v40, %v1151_v7  ;;  %v940_v7 = vsel %vm883_vm1, %v12627_v29, %v12650_v39 }
 0x176   : > { %881 = vrot.lane.b32.xlu0 %v12589_v18, %s11974_s24  ;;  %1098 = vrot.lane.b32.xlu1 %v963_v46, %s11978_s10  ;;  %v939_v46 = vsel %vm883_vm1, %v12303_v13, %v12627_v29 }
 0x177   : > { %1669 = vmatprep.subr.bf16.mxu1 %v1231_v15  ;;  %v914_v15 = vsel %vm883_vm1, %v903_v30, %v12658_v10 }
 0x178   : > { %1670 = vmatpush2.bf16.msra.mxu1 %v1230_v3  ;;  %v12688_v56 = vpop.permute.xlu0 %840  ;;  %v12690_v37 = vpop.permute.xlu1 %877 }
 0x17a   : > { %762 = vrot.lane.b32.xlu0 %v12366_v62, %s11979_s14  ;;  %879 = vrot.lane.b32.xlu1 %v12603_v21, %s11974_s24  ;;  %s11987_s24 = smov 77  }
 0x17c   : > { %v12696_v6 = vpop.permute.xlu0 %1138  ;;  %v839_v53 = vpop.permute.xlu1 %838 }
 0x17d   : > { %v852_v63 = vsel %vm850_vm6, %v839_v53, %v12688_v56 }
 0x17e   : > { %760 = vrot.lane.b32.xlu1 %v12192_v47, %s11979_s14  ;;  %1086 = vrot.lane.b32.xlu0 %v940_v7, %s11978_s10  ;;  %v12719_v7 = vld [vmem:[%s18936_s1 + $0x8] ss:$16 sps:$4 sm:$0xff]  }
 0x17f   : > { %1564 = vmatprep.subr.bf16.mxu0 %v852_v63  ;;  %v12726_v63 = vld [vmem:[%s18936_s1 + $0x2c] ss:$16 sps:$4 sm:$0xff]  }
 0x180   : > { %v1135_v60 = vpop.permute.xlu0 %1134  ;;  %v1137_v40 = vpop.permute.xlu1 %1136 }
 0x181   : > { %v1225_v3 = vsel %vm850_vm6, %v1137_v40, %v12696_v6  ;;  %v1224_v62 = vsel %vm850_vm6, %v1135_v60, %v1137_v40  ;;  %v913_v60 = vsel %vm883_vm1, %v12312_v20, %v903_v30  ;;  %v888_v40 = vsel %vm883_vm1, %v876_v8, %v12690_v37 }
 0x182   : > { %1084 = vrot.lane.b32.xlu1 %v939_v46, %s11978_s10  ;;  %1072 = vrot.lane.b32.xlu0 %v914_v15, %s11978_s10  ;;  %v887_v20 = vsel %vm883_vm1, %v12325_v32, %v876_v8 }
 0x183   : > { %1671 = vmatprep.subr.bf16.mxu1 %v1225_v3  ;;  %v12752_v3 = vld [vmem:[%s18936_s1 + $0x28] ss:$16 sps:$4 sm:$0xff]  }
 0x184   : > { %1672 = vmatpush2.bf16.msra.mxu1 %v1224_v62  ;;  %v12721_v13 = vpop.permute.xlu0 %626  ;;  %v837_v29 = vpop.permute.xlu1 %836 }
 0x185   : > { %v851_v46 = vsel %vm850_vm6, %v837_v29, %v839_v53  ;;  %v12757_v29 = vld [vmem:[%s18936_s1 + $0x4c] ss:$16 sps:$4 sm:$0xff]  }
 0x186   : > { %1070 = vrot.lane.b32.xlu1 %v913_v60, %s11978_s10  ;;  %1058 = vrot.lane.b32.xlu0 %v888_v40, %s11978_s10 }
 0x187   : > { %1565 = vmatpush2.bf16.msra.mxu0 %v851_v46  ;;  %1674 = vmatmul.mubr.bf16.vlgmr.msra.gmra.mxu1 %v12719_v7  ;;  %v12776_v46 = vld [vmem:[%s18936_s1 + $0x48] ss:$16 sps:$4 sm:$0xff]  }
 0x188   : > { %v12736_v62 = vpop.permute.xlu0 %813  ;;  %v625_v15 = vpop.permute.xlu1 %624  ;;  %9766 = vmatprep.mubr.msk.bf16.mxu1 %vm1529_vm5, %v12726_v63  ;;  %19256 = vst [vmem:[#allocation11_spill] sm:$0xff] %v12776_v46 }
 0x189   : > { %v635_v30 = vsel %vm604_vm2, %v625_v15, %v12721_v13  ;;  %v634_v53 = vsel %vm604_vm2, %v12374_v2, %v625_v15 }
 0x18a   : > { %1056 = vrot.lane.b32.xlu1 %v887_v20, %s11978_s10  ;;  %1019 = vrot.lane.b32.xlu0 %v12568_v19, %s11975_s25 }
 0x18b   : > { %1734 = vmatprep.subr.bf16.mxu1 %v635_v30  ;;  %v12783_v30 = vld [vmem:[%s18936_s1 + $0x6c] ss:$16 sps:$4 sm:$0xff]  }
 0x18c   : > { %1735 = vmatpush1.bf16.msra.mxu1 %v634_v53  ;;  %v597_v32 = vpop.permute.xlu0 %596  ;;  %v812_v8 = vpop.permute.xlu1 %811  ;;  %19257 = vst [vmem:[#allocation12_spill] sm:$0xff] %v12783_v30 }
 0x18d   : > { %v824_v2 = vsel %vm768_vm7, %v812_v8, %v12736_v62 }
 0x18e   : > { %739 = vrot.lane.b32.xlu1 %v12547_v0, %s11975_s25  ;;  %1044 = vrot.lane.b32.xlu0 %v12258_v50, %s11978_s10 }
 0x18f   : > { %1566 = vmatprep.subr.bf16.mxu0 %v824_v2  ;;  %1684 = vmatmul.mubr.bf16.gmra.mxu1 %v12752_v3 }
 0x190   : > { %v785_v19 = vpop.permute.xlu0 %784  ;;  %v810_v60 = vpop.permute.xlu1 %809  ;;  %9767 = vmatprep.mubr.msk.bf16.mxu1 %vm1529_vm5, %v12757_v29 }
 0x191   : > { %v823_v40 = vsel %vm768_vm7, %v810_v60, %v812_v8 }
 0x192   : > { %1042 = vrot.lane.b32.xlu1 %v12141_v27, %s11978_s10  ;;  %1016 = vrot.lane.b32.xlu0 %v12578_v61, %s11975_s25  ;;  %v607_v61 = vsel %vm604_vm2, %v12391_v9, %v597_v32  ;;  %v12808_v9 = vld [vmem:[%s18936_s1 + $0x68] ss:$16 sps:$4 sm:$0xff]  }
 0x193   : > { %1567 = vmatpush2.bf16.msra.mxu0 %v823_v40  ;;  %19258 = vst [vmem:[#allocation13_spill] sm:$0xff] %v12808_v9 }
 0x194   : > { %v736_v15 = vpop.permute.xlu0 %735  ;;  %v12778_v20 = vpop.permute.xlu1 %598 }
 0x195   : > { %v608_v53 = vsel %vm604_vm2, %v597_v32, %v12778_v20 }
 0x196   : > { %712 = vrot.lane.b32.xlu1 %v12585_v55, %s11975_s25  ;;  %653 = vrot.lane.b32.xlu0 %v12258_v50, %s11976_s26 }
 0x197   : > { %1736 = vmatprep.subr.bf16.mxu1 %v608_v53  ;;  %1694 = vmatmul.mubr.bf16.gmra.mxu1 %v12776_v46  ;;  %v12863_v46 = vsel %vm686_vm3, %v12342_v48, %v736_v15 }
 0x198   : > { %1737 = vmatpush1.bf16.msra.mxu1 %v607_v61  ;;  %v783_v8 = vpop.permute.xlu0 %782  ;;  %v12794_v2 = vpop.permute.xlu1 %786  ;;  %9768 = vmatprep.mubr.msk.bf16.mxu1 %vm1529_vm5, %v12783_v30 }
 0x199   : > { %v797_v60 = vsel %vm768_vm7, %v785_v19, %v12794_v2  ;;  %v796_v40 = vsel %vm768_vm7, %v783_v8, %v785_v19  ;;  %v12817_v19 = vld [vmem:[%s18936_s1 + $0x8c] ss:$16 sps:$4 sm:$0xff]  }
 0x19a   : > { %651 = vrot.lane.b32.xlu1 %v12141_v27, %s11976_s26  ;;  %1030 = vrot.lane.b32.xlu0 %v12340_v41, %s11978_s10  ;;  %19259 = vst [vmem:[#allocation14_spill] sm:$0xff] %v12817_v19 }
 0x19b   : > { %1568 = vmatprep.subr.bf16.mxu0 %v797_v60 }
 0x19c   : > { %1569 = vmatpush2.bf16.msra.mxu0 %v796_v40  ;;  %v12810_v32 = vpop.permute.xlu0 %571  ;;  %v12812_v53 = vpop.permute.xlu1 %737 }
 0x19e   : > { %1028 = vrot.lane.b32.xlu1 %v12176_v43, %s11978_s10  ;;  %1013 = vrot.lane.b32.xlu0 %v12589_v18, %s11975_s25  ;;  %v12839_v18 = vld [vmem:[%s18936_s1 + $0x88] ss:$16 sps:$4 sm:$0xff]  }
 0x19f   : > { %1704 = vmatmul.mubr.bf16.gmra.mxu1 %v12808_v9  ;;  %19260 = vst [vmem:[#allocation15_spill] sm:$0xff] %v12839_v18 }
 0x1a0   : > { %v12824_v61 = vpop.permute.xlu0 %758  ;;  %v570_v8 = vpop.permute.xlu1 %569  ;;  %9769 = vmatprep.mubr.msk.bf16.mxu1 %vm1529_vm5, %v12817_v19 }
 0x1a1   : > { %v580_v60 = vsel %vm522_vm4, %v570_v8, %v12810_v32  ;;  %v579_v40 = vsel %vm522_vm4, %v12411_v17, %v570_v8  ;;  %v12846_v17 = vld [vmem:[%s18936_s1 + $0xac] ss:$16 sps:$4 sm:$0xff]   ;;  %v12850_v8 = vsel %vm686_vm3, %v736_v15, %v12812_v53 }
 0x1a2   : > { %684 = vrot.lane.b32.xlu1 %v12603_v21, %s11975_s25  ;;  %630 = vrot.lane.b32.xlu0 %v12585_v55, %s11976_s26  ;;  %19261 = vst [vmem:[#allocation16_spill] sm:$0xff] %v12846_v17  ;;  %19262 = vst [vmem:[#allocation17_spill] sm:$0xff] %v12850_v8 }
 0x1a3   : > { %1738 = vmatprep.subr.bf16.mxu1 %v580_v60 }
 0x1a4   : > { %1739 = vmatpush1.bf16.msra.mxu1 %v579_v40  ;;  %v12841_v19 = vpop.permute.xlu0 %710  ;;  %v757_v9 = vpop.permute.xlu1 %756 }
 0x1a5   : > { %v770_v60 = vsel %vm768_vm7, %v757_v9, %v12824_v61 }
 0x1a6   : > { %628 = vrot.lane.b32.xlu1 %v12331_v34, %s11976_s26  ;;  %1170 = vrot.lane.b32.xlu0 %v12850_v8, %s11978_s10 }
 0x1a7   : > { %1570 = vmatprep.subr.bf16.mxu0 %v770_v60  ;;  %1714 = vmatmul.mubr.bf16.gmra.mxu1 %v12839_v18  ;;  %v12872_v60 = vld [vmem:[%s18936_s1 + $0xa8] ss:$16 sps:$4 sm:$0xff]  }
 0x1a8   : > { %v543_v40 = vpop.permute.xlu0 %542  ;;  %v709_v30 = vpop.permute.xlu1 %708  ;;  %9770 = vmatprep.mubr.msk.bf16.mxu1 %vm1529_vm5, %v12846_v17 }
 0x1a9   : > { %v12876_v17 = vsel %vm686_vm3, %v709_v30, %v12841_v19  ;;  %v12890_v50 = vsel %vm686_vm3, %v12354_v58, %v709_v30 }
 0x1aa   : > { %1168 = vrot.lane.b32.xlu1 %v12863_v46, %s11978_s10  ;;  %602 = vrot.lane.b32.xlu0 %v12603_v21, %s11976_s26 }
 0x1ac   : > { %v681_v8 = vpop.permute.xlu0 %680  ;;  %v755_v18 = vpop.permute.xlu1 %754 }
 0x1ad   : > { %v769_v48 = vsel %vm768_vm7, %v755_v18, %v757_v9 }
 0x1ae   : > { %600 = vrot.lane.b32.xlu1 %v12360_v59, %s11976_s26  ;;  %1156 = vrot.lane.b32.xlu0 %v12876_v17, %s11978_s10 }
 0x1af   : > { %1571 = vmatpush2.bf16.msra.mxu0 %v769_v48  ;;  %1724 = vmatmul.mubr.bf16.gmra.mxu1 %v12872_v60  ;;  %v12948_v48 = vld [vmem:[%s18936_s1] ss:$16 sps:$4 sm:$0xff]  }
 0x1b0   : > { %1572 = vmatprep.subr.bf16.mxu0 %v12401_v14  ;;  %v515_v15 = vpop.permute.xlu0 %514  ;;  %v12885_v41 = vpop.permute.xlu1 %544  ;;  %1766 = vmatprep.mubr.bf16.mxu1 %v12596_v42  ;;  %v552_v14 = vsel %vm522_vm4, %v12549_v5, %v543_v40  ;;  %v12918_v5 = vsel %vm686_vm3, %v12368_v1, %v681_v8 }
 0x1b1   : > { %v553_v9 = vsel %vm522_vm4, %v543_v40, %v12885_v41 }
 0x1b2   : > { %575 = vrot.lane.b32.xlu0 %v12547_v0, %s11977_s27  ;;  %1154 = vrot.lane.b32.xlu1 %v12890_v50, %s11978_s10 }
 0x1b3   : > { %1573 = vmatpush2.bf16.msra.mxu0 %v12421_v22  ;;  %1740 = vmatprep.subr.bf16.mxu1 %v553_v9 }
 0x1b4   : > { %1574 = vmatprep.subr.bf16.mxu0 %v12409_v16  ;;  %1741 = vmatpush1.bf16.msra.mxu1 %v552_v14  ;;  %v1003_v58 = vpop.permute.xlu0 %1002  ;;  %v12902_v42 = vpop.permute.xlu1 %682 }
 0x1b5   : > { %v12906_v30 = vsel %vm686_vm3, %v681_v8, %v12902_v42  ;;  %v1011_v9 = vsel %vm959_vm0, %v12472_v38, %v1003_v58 }
 0x1b6   : > { %573 = vrot.lane.b32.xlu1 %v12270_v51, %s11977_s27  ;;  %1142 = vrot.lane.b32.xlu0 %v12906_v30, %s11978_s10 }
 0x1b7   : > { %1575 = vmatpush2.bf16.msra.mxu0 %v12433_v25  ;;  %v525_v25 = vsel %vm522_vm4, %v12591_v24, %v515_v15 }
 0x1b8   : > { %1576 = vmatprep.subr.bf16.mxu0 %v12459_v31  ;;  %v648_v22 = vpop.permute.xlu0 %647  ;;  %v12914_v16 = vpop.permute.xlu1 %516 }
 0x1b9   : > { %v526_v18 = vsel %vm522_vm4, %v515_v15, %v12914_v16 }
 0x1ba   : > { %1140 = vrot.lane.b32.xlu1 %v12918_v5, %s11978_s10  ;;  %548 = vrot.lane.b32.xlu0 %v12585_v55, %s11977_s27 }
 0x1bb   : > { %1577 = vmatpush2.bf16.msra.mxu0 %v12462_v35  ;;  %1742 = vmatprep.subr.bf16.mxu1 %v526_v18 }
 0x1bc   : > { %1743 = vmatpush1.bf16.msra.mxu1 %v525_v25  ;;  %v646_v31 = vpop.permute.xlu0 %645  ;;  %v1005_v40 = vpop.permute.xlu1 %1004 }
 0x1bd   : > { %1744 = vmatprep.subr.bf16.mxu1 %v12141_v27  ;;  %v1012_v35 = vsel %vm959_vm0, %v1003_v58, %v1005_v40  ;;  %v659_v27 = vsel %vm604_vm2, %v646_v31, %v648_v22 }
 0x1be   : > { %546 = vrot.lane.b32.xlu1 %v12331_v34, %s11977_s27  ;;  %520 = vrot.lane.b32.xlu0 %v12603_v21, %s11977_s27 }
 0x1c0   : > { %v982_v1 = vpop.permute.xlu0 %981  ;;  %v12934_v8 = vpop.permute.xlu1 %649  ;;  %1745 = vmatpush1.bf16.msra.mxu1 %v12154_v33 }
 0x1c1   : > { %v660_v24 = vsel %vm604_vm2, %v648_v22, %v12934_v8  ;;  %1746 = vmatprep.subr.bf16.mxu1 %v12176_v43  ;;  %v12954_v43 = vld [vmem:[%s18936_s1 + $0x24] ss:$16 sps:$4 sm:$0xff]  }
 0x1c2   : > { %518 = vrot.lane.b32.xlu1 %v12360_v59, %s11977_s27  ;;  %1132 = vrot.lane.b32.xlu0 %v1012_v35, %s11978_s10 }
 0x1c3   : > { %1578 = vmatprep.subr.bf16.mxu0 %v660_v24 }
 0x1c4   : > { %1579 = vmatpush2.bf16.msra.mxu0 %v659_v27  ;;  %v958_v33 = vpop.permute.xlu0 %957  ;;  %v980_v15 = vpop.permute.xlu1 %979  ;;  %1747 = vmatpush1.bf16.msra.mxu1 %v12160_v36 }
 0x1c5   : > { %v989_v14 = vsel %vm959_vm0, %v980_v15, %v982_v1  ;;  %1748 = vmatprep.subr.bf16.mxu1 %v12192_v47  ;;  %v988_v38 = vsel %vm959_vm0, %v12558_v11, %v980_v15  ;;  %v12975_v47 = vld [vmem:[%s18936_s1 + $0x20] ss:$16 sps:$4 sm:$0xff]   ;;  %v13007_v15 = vld [vmem:[%s18936_s1 + $0x64] ss:$16 sps:$4 sm:$0xff]  }
 0x1c6   : > { %1130 = vrot.lane.b32.xlu1 %v1011_v9, %s11978_s10  ;;  %1118 = vrot.lane.b32.xlu0 %v989_v14, %s11978_s10  ;;  %v18959_v14 = vmov 0  }
 0x1c7   : > { %1581 = vmatmul.mubr.bf16.vlgmr.msra.gmra.mxu0 %v12948_v48  ;;  %10640 = vset.pattern.permute.xlu0 %v18959_v14 }
 0x1c8   : > { %v12963_v22 = vpop.permute.xlu0 %844  ;;  %v956_v36 = vpop.permute.xlu1 %955  ;;  %1749 = vmatpush1.bf16.msra.mxu1 %v12180_v44  ;;  %1590 = vmatprep.mubr.bf16.mxu0 %v12954_v43  ;;  %v12982_v44 = vld [vmem:[%s18936_s1 + $0x44] ss:$16 sps:$4 sm:$0xff]  }
 0x1c9   : > { %v966_v58 = vsel %vm959_vm0, %v956_v36, %v958_v33  ;;  %v965_v11 = vsel %vm959_vm0, %v12608_v23, %v956_v36  ;;  %10639 = vset.pattern.permute.xlu1 %v18959_v14  ;;  %vm7260_vm0 = vcmask 629760  }
 0x1ca   : > { %1116 = vrot.lane.b32.xlu1 %v988_v38, %s11978_s10  ;;  %1104 = vrot.lane.b32.xlu0 %v966_v58, %s11978_s10 }
 0x1cc   : > { %v12977_v18 = vpop.permute.xlu0 %1128  ;;  %v843_v25 = vpop.permute.xlu1 %842 }
 0x1cd   : > { %v854_v31 = vsel %vm850_vm6, %v843_v25, %v12963_v22  ;;  %v853_v40 = vsel %vm850_vm6, %v12688_v56, %v843_v25  ;;  %v13000_v56 = vld [vmem:[%s18936_s1 + $0x40] ss:$16 sps:$4 sm:$0xff]  }
 0x1ce   : > { %1102 = vrot.lane.b32.xlu1 %v965_v11, %s11978_s10  ;;  %1750 = vmatprep.subr.bf16.mxu1 %v854_v31  ;;  %v13031_v31 = vld [vmem:[%s18936_s1 + $0x60] ss:$16 sps:$4 sm:$0xff]  }
 0x1cf   : > { %1751 = vmatpush2.bf16.msra.mxu1 %v853_v40  ;;  %1591 = vmatmul.mubr.bf16.gmra.mxu0 %v12975_v47 }
 0x1d0   : > { %v935_v1 = vpop.permute.xlu0 %934  ;;  %v1127_v35 = vpop.permute.xlu1 %1126  ;;  %1600 = vmatprep.mubr.bf16.mxu0 %v12982_v44 }
 0x1d1   : > { %v1221_v24 = vsel %vm850_vm6, %v1127_v35, %v12977_v18  ;;  %v1220_v23 = vsel %vm850_vm6, %v12480_v49, %v1127_v35 }
 0x1d2   : > { %1827 = vmatprep.subr.bf16.mxu0 %v1221_v24 }
 0x1d3   : > { %1828 = vmatpush1.bf16.msra.mxu0 %v1220_v23 }
 0x1d4   : > { %v13002_v27 = vpop.permute.xlu0 %817  ;;  %v933_v33 = vpop.permute.xlu1 %932 }
 0x1d5   : > { %v942_v9 = vsel %vm883_vm1, %v933_v33, %v935_v1  ;;  %v941_v49 = vsel %vm883_vm1, %v12650_v39, %v933_v33  ;;  %v13040_v1 = vld [vmem:[%s18936_s1 + $0x84] ss:$16 sps:$4 sm:$0xff]  }
 0x1d6   : > { %1090 = vrot.lane.b32.xlu0 %v942_v9, %s11978_s10  ;;  %1088 = vrot.lane.b32.xlu1 %v941_v49, %s11978_s10  ;;  %v13056_v49 = vld [vmem:[%s18936_s1 + $0x80] ss:$16 sps:$4 sm:$0xff]  }
 0x1d7   : > { %1601 = vmatmul.mubr.bf16.gmra.mxu0 %v13000_v56 }
 0x1d8   : > { %v13017_v36 = vpop.permute.xlu0 %1114  ;;  %v816_v38 = vpop.permute.xlu1 %815  ;;  %1610 = vmatprep.mubr.bf16.mxu0 %v13007_v15 }
 0x1d9   : > { %v826_v58 = vsel %vm768_vm7, %v816_v38, %v13002_v27  ;;  %v825_v39 = vsel %vm768_vm7, %v12736_v62, %v816_v38 }
 0x1da   : > { %848 = vrot.lane.b32.xlu0 %v12603_v21, %s11978_s10  ;;  %846 = vrot.lane.b32.xlu1 %v12360_v59, %s11978_s10 }
 0x1db   : > { %1752 = vmatprep.subr.bf16.mxu1 %v826_v58  ;;  %v13065_v58 = vld [vmem:[%s18936_s1 + $0xa4] ss:$16 sps:$4 sm:$0xff]  }
 0x1dc   : > { %1753 = vmatpush2.bf16.msra.mxu1 %v825_v39  ;;  %v909_v25 = vpop.permute.xlu0 %908  ;;  %v1113_v11 = vpop.permute.xlu1 %1112 }
 0x1dd   : > { %v1215_v40 = vsel %vm850_vm6, %v1113_v11, %v13017_v36  ;;  %v1214_v62 = vsel %vm850_vm6, %v12493_v57, %v1113_v11 }
 0x1de   : > { %1829 = vmatprep.subr.bf16.mxu0 %v1215_v40 }
 0x1df   : > { %1830 = vmatpush1.bf16.msra.mxu0 %v1214_v62 }
 0x1e0   : > { %v13042_v35 = vpop.permute.xlu0 %790  ;;  %v907_v24 = vpop.permute.xlu1 %906  ;;  %1611 = vmatmul.mubr.bf16.gmra.mxu0 %v13031_v31 }
 0x1e1   : > { %v916_v23 = vsel %vm883_vm1, %v907_v24, %v909_v25  ;;  %v915_v33 = vsel %vm883_vm1, %v12658_v10, %v907_v24  ;;  %1620 = vmatprep.mubr.bf16.mxu0 %v13040_v1  ;;  %v13082_v24 = vld [vmem:[%s18936_s1 + $0xa0] ss:$16 sps:$4 sm:$0xff]  }
 0x1e2   : > { %1076 = vrot.lane.b32.xlu0 %v916_v23, %s11978_s10  ;;  %1074 = vrot.lane.b32.xlu1 %v915_v33, %s11978_s10 }
 0x1e4   : > { %v13051_v57 = vpop.permute.xlu0 %1100  ;;  %v789_v9 = vpop.permute.xlu1 %788 }
 0x1e5   : > { %v799_v38 = vsel %vm768_vm7, %v789_v9, %v13042_v35  ;;  %v798_v10 = vsel %vm768_vm7, %v12794_v2, %v789_v9 }
 0x1e6   : > { %821 = vrot.lane.b32.xlu0 %v12547_v0, %s11979_s14  ;;  %819 = vrot.lane.b32.xlu1 %v12270_v51, %s11979_s14 }
 0x1e7   : > { %1754 = vmatprep.subr.bf16.mxu1 %v799_v38 }
 0x1e8   : > { %1755 = vmatpush2.bf16.msra.mxu1 %v798_v10  ;;  %v882_v39 = vpop.permute.xlu0 %881  ;;  %v1099_v25 = vpop.permute.xlu1 %1098  ;;  %1621 = vmatmul.mubr.bf16.gmra.mxu0 %v13056_v49 }
 0x1e9   : > { %v1209_v2 = vsel %vm850_vm6, %v1099_v25, %v13051_v57  ;;  %v1208_v11 = vsel %vm850_vm6, %v12506_v4, %v1099_v25  ;;  %1630 = vmatprep.mubr.bf16.mxu0 %v13065_v58 }
 0x1ea   : > { %1831 = vmatprep.subr.bf16.mxu0 %v1209_v2 }
 0x1eb   : > { %1832 = vmatpush1.bf16.msra.mxu0 %v1208_v11 }
 0x1ec   : > { %v13077_v40 = vpop.permute.xlu0 %762  ;;  %v880_v62 = vpop.permute.xlu1 %879 }
 0x1ed   : > { %v890_v23 = vsel %vm883_vm1, %v880_v62, %v882_v39  ;;  %v889_v33 = vsel %vm883_vm1, %v12690_v37, %v880_v62  ;;  %v19264_v62 = vld [vmem:[#allocation9_spill] sm:$0xff]  ;;  %vm7269_vm1 = vcmask 211968  }
 0x1ee   : > { %1062 = vrot.lane.b32.xlu0 %v890_v23, %s11978_s10  ;;  %1060 = vrot.lane.b32.xlu1 %v889_v33, %s11978_s10  ;;  %v19265_v23 = vld [vmem:[#allocation7_spill] sm:$0xff] }
 0x1f0   : > { %v13089_v4 = vpop.permute.xlu0 %1086  ;;  %v761_v9 = vpop.permute.xlu1 %760  ;;  %1631 = vmatmul.mubr.bf16.gmra.mxu0 %v13082_v24 }
 0x1f1   : > { %v772_v38 = vsel %vm768_vm7, %v761_v9, %v13077_v40  ;;  %v771_v10 = vsel %vm768_vm7, %v12824_v61, %v761_v9  ;;  %9771 = vmatprep.mubr.msk.bf16.mxu0 %vm1529_vm5, %v12446_v26  ;;  %v19263_v26 = vld [vmem:[#allocation6_spill] sm:$0xff] }
 0x1f2   : > { %794 = vrot.lane.b32.xlu0 %v12585_v55, %s11979_s14  ;;  %792 = vrot.lane.b32.xlu1 %v12331_v34, %s11979_s14 }
 0x1f3   : > { %1756 = vmatprep.subr.bf16.mxu1 %v772_v38  ;;  %v19266_v38 = vld [vmem:[#allocation10_spill] sm:$0xff] }
 0x1f4   : > { %1757 = vmatpush2.bf16.msra.mxu1 %v771_v10  ;;  %v13102_v37 = vpop.permute.xlu0 %1072  ;;  %v1085_v39 = vpop.permute.xlu1 %1084 }
 0x1f5   : > { %1758 = vmatprep.subr.bf16.mxu1 %v12863_v46  ;;  %v1203_v25 = vsel %vm850_vm6, %v1085_v39, %v13089_v4  ;;  %v1202_v61 = vsel %vm850_vm6, %v12519_v12, %v1085_v39  ;;  %v19267_v39 = vld [vmem:[#allocation8_spill] sm:$0xff] }
 0x1f6   : > { %1048 = vrot.lane.b32.xlu0 %v12547_v0, %s11978_s10  ;;  %1046 = vrot.lane.b32.xlu1 %v12270_v51, %s11978_s10 }
 0x1f7   : > { %1833 = vmatprep.subr.bf16.mxu0 %v1203_v25 }
 0x1f8   : > { %1759 = vmatpush2.bf16.msra.mxu1 %v19263_v26  ;;  %1834 = vmatpush1.bf16.msra.mxu0 %v1202_v61  ;;  %v13114_v2 = vpop.permute.xlu0 %1058  ;;  %v1071_v11 = vpop.permute.xlu1 %1070 }
 0x1f9   : > { %1760 = vmatprep.subr.bf16.mxu1 %v12890_v50  ;;  %v1197_v46 = vsel %vm850_vm6, %v1071_v11, %v13102_v37  ;;  %v1196_v12 = vsel %vm850_vm6, %v19264_v62, %v1071_v11 }
 0x1fa   : > { %766 = vrot.lane.b32.xlu0 %v12603_v21, %s11979_s14  ;;  %764 = vrot.lane.b32.xlu1 %v12360_v59, %s11979_s14 }
 0x1fb   : > { %1835 = vmatprep.subr.bf16.mxu0 %v1197_v46 }
 0x1fc   : > { %1761 = vmatpush2.bf16.msra.mxu1 %v19265_v23  ;;  %1836 = vmatpush1.bf16.msra.mxu0 %v1196_v12  ;;  %v1020_v33 = vpop.permute.xlu0 %1019  ;;  %v1057_v9 = vpop.permute.xlu1 %1056 }
 0x1fd   : > { %1762 = vmatprep.subr.bf16.mxu1 %v12918_v5  ;;  %v1191_v50 = vsel %vm850_vm6, %v1057_v9, %v13114_v2  ;;  %v1190_v10 = vsel %vm850_vm6, %v19266_v38, %v1057_v9 }
 0x1fe   : > { %1034 = vrot.lane.b32.xlu0 %v12585_v55, %s11978_s10  ;;  %1032 = vrot.lane.b32.xlu1 %v12331_v34, %s11978_s10 }
 0x1ff   : > { %1837 = vmatprep.subr.bf16.mxu0 %v1191_v50 }
 0x200   : > { %1763 = vmatpush2.bf16.msra.mxu1 %v19267_v39  ;;  %1838 = vmatpush1.bf16.msra.mxu0 %v1190_v10  ;;  %v13136_v25 = vpop.permute.xlu0 %1044  ;;  %v13138_v61 = vpop.permute.xlu1 %739 }
 0x201   : > { %v1021_v5 = vsel %vm686_vm3, %v13138_v61, %v1020_v33  ;;  %v13145_v26 = vsel %vm686_vm3, %v12812_v53, %v13138_v61 }
 0x202   : > { %1174 = vrot.lane.b32.xlu0 %v1021_v5, %s11978_s10  ;;  %1172 = vrot.lane.b32.xlu1 %v13145_v26, %s11978_s10 }
 0x204   : > { %v1017_v11 = vpop.permute.xlu0 %1016  ;;  %v1043_v46 = vpop.permute.xlu1 %1042 }
 0x205   : > { %v1185_v62 = vsel %vm850_vm6, %v1043_v46, %v13136_v25  ;;  %v1184_v12 = vsel %vm850_vm6, %v12610_v54, %v1043_v46 }
 0x206   : > { %1839 = vmatprep.subr.bf16.mxu0 %v1185_v62 }
 0x207   : > { %1840 = vmatpush1.bf16.msra.mxu0 %v1184_v12 }
 0x208   : > { %v13154_v23 = vpop.permute.xlu0 %653  ;;  %v13156_v33 = vpop.permute.xlu1 %712 }
 0x209   : > { %v1018_v53 = vsel %vm686_vm3, %v13156_v33, %v1017_v11  ;;  %v13163_v9 = vsel %vm686_vm3, %v12841_v19, %v13156_v33 }
 0x20a   : > { %1160 = vrot.lane.b32.xlu0 %v1018_v53, %s11978_s10  ;;  %1158 = vrot.lane.b32.xlu1 %v13163_v9, %s11978_s10 }
 0x20c   : > { %v13168_v54 = vpop.permute.xlu0 %1030  ;;  %v652_v50 = vpop.permute.xlu1 %651 }
 0x20d   : > { %v662_v38 = vsel %vm604_vm2, %v652_v50, %v13154_v23  ;;  %v661_v10 = vsel %vm604_vm2, %v12934_v8, %v652_v50 }
 0x20e   : > { %1764 = vmatprep.subr.bf16.mxu1 %v662_v38 }
 0x20f   : > { %1765 = vmatpush2.bf16.msra.mxu1 %v661_v10 }
 0x210   : > { %v1014_v39 = vpop.permute.xlu0 %1013  ;;  %v1029_v5 = vpop.permute.xlu1 %1028 }
 0x211   : > { %v1179_v19 = vsel %vm850_vm6, %v1029_v5, %v13168_v54  ;;  %v1178_v11 = vsel %vm850_vm6, %v12638_v28, %v1029_v5 }
 0x212   : > { %1841 = vmatprep.subr.bf16.mxu0 %v1179_v19  ;;  %1767 = vmatmul.mubr.bf16.vlgmr.msra.gmra.mxu1 %v12948_v48 }
 0x213   : > { %1842 = vmatpush1.bf16.msra.mxu0 %v1178_v11  ;;  %1776 = vmatprep.mubr.bf16.mxu1 %v12954_v43  ;;  %v1347_v11 = vld [vmem:[%s18937_s2 + $0x20] sm:$0xff] }
 0x214   : > { %v13180_v46 = vpop.permute.xlu0 %630  ;;  %v13182_v62 = vpop.permute.xlu1 %684 }
 0x215   : > { %v1015_v8 = vsel %vm686_vm3, %v13182_v62, %v1014_v39  ;;  %v13189_v12 = vsel %vm686_vm3, %v12902_v42, %v13182_v62  ;;  %v1344_v42 = vld [vmem:[%s18937_s2 + $0x8] sm:$0xff] }
 0x216   : > { %1146 = vrot.lane.b32.xlu0 %v1015_v8, %s11978_s10  ;;  %1144 = vrot.lane.b32.xlu1 %v13189_v12, %s11978_s10 }
 0x218   : > { %v13194_v28 = vpop.permute.xlu0 %1170  ;;  %v629_v53 = vpop.permute.xlu1 %628 }
 0x219   : > { %v637_v50 = vsel %vm604_vm2, %v629_v53, %v13180_v46  ;;  %v636_v38 = vsel %vm604_vm2, %v12721_v13, %v629_v53  ;;  %v1343_v13 = vld [vmem:[%s18937_s2] sm:$0xff] }
 0x21a   : > { %657 = vrot.lane.b32.xlu0 %v12547_v0, %s11976_s26  ;;  %655 = vrot.lane.b32.xlu1 %v12270_v51, %s11976_s26 }
 0x21b   : > { %1920 = vmatprep.subr.bf16.mxu1 %v637_v50  ;;  %1777 = vmatmul.mubr.bf16.gmra.mxu1 %v12975_v47  ;;  %v1345_v50 = vld [vmem:[%s18937_s2 + $0x10] sm:$0xff] }
 0x21c   : > { %1921 = vmatpush1.bf16.msra.mxu1 %v636_v38  ;;  %v13208_v10 = vpop.permute.xlu0 %602  ;;  %v1169_v39 = vpop.permute.xlu1 %1168  ;;  %1786 = vmatprep.mubr.bf16.mxu1 %v12982_v44 }
 0x21d   : > { %v1239_v5 = vsel %vm850_vm6, %v1169_v39, %v13194_v28  ;;  %v1238_v19 = vsel %vm850_vm6, %v12648_v45, %v1169_v39 }
 0x21e   : > { %1853 = vmatprep.subr.bf16.mxu0 %v1239_v5  ;;  %1362 = vperm.xlu0 %10640, %v1344_v42   ;;  %v1349_v42 = vld [vmem:[%s18937_s2 + $0x30] sm:$0xff]  ;;  %v1346_v5 = vld [vmem:[%s18937_s2 + $0x18] sm:$0xff] }
 0x21f   : > { %1854 = vmatpush2.bf16.msra.mxu0 %v1238_v19  ;;  %1357 = vperm.xlu1 %10639, %v1343_v13  }
 0x220   : > { %v13221_v8 = vpop.permute.xlu0 %1156  ;;  %v601_v53 = vpop.permute.xlu1 %600 }
 0x221   : > { %v610_v38 = vsel %vm604_vm2, %v601_v53, %v13208_v10  ;;  %v609_v45 = vsel %vm604_vm2, %v12778_v20, %v601_v53 }
 0x222   : > { %1922 = vmatprep.subr.bf16.mxu1 %v610_v38  ;;  %1377 = vperm.xlu0 %10640, %v1347_v11   ;;  %v1351_v11 = vld [vmem:[%s18937_s2 + $0x40] sm:$0xff]  ;;  %v1348_v38 = vld [vmem:[%s18937_s2 + $0x28] sm:$0xff] }
 0x223   : > { %1923 = vmatpush1.bf16.msra.mxu1 %v609_v45  ;;  %1367 = vperm.xlu1 %10639, %v1345_v50  }
 0x224   : > { %v13233_v39 = vpop.permute.xlu0 %575  ;;  %v1155_v13 = vpop.permute.xlu1 %1154  ;;  %1787 = vmatmul.mubr.bf16.gmra.mxu1 %v13000_v56 }
 0x225   : > { %v1233_v20 = vsel %vm850_vm6, %v1155_v13, %v13221_v8  ;;  %v1232_v19 = vsel %vm850_vm6, %v12678_v52, %v1155_v13  ;;  %1796 = vmatprep.mubr.bf16.mxu1 %v13007_v15 }
 0x226   : > { %1855 = vmatprep.subr.bf16.mxu0 %v1233_v20  ;;  %1387 = vperm.xlu0 %10640, %v1349_v42   ;;  %v1353_v42 = vld [vmem:[%s18937_s2 + $0x50] sm:$0xff]  ;;  %v1350_v20 = vld [vmem:[%s18937_s2 + $0x38] sm:$0xff] }
 0x227   : > { %1856 = vmatpush2.bf16.msra.mxu0 %v1232_v19  ;;  %1372 = vperm.xlu1 %10639, %v1346_v5  }
 0x228   : > { %v13247_v53 = vpop.permute.xlu0 %1142  ;;  %v574_v50 = vpop.permute.xlu1 %573 }
 0x229   : > { %v582_v52 = vsel %vm522_vm4, %v574_v50, %v13233_v39  ;;  %v581_v45 = vsel %vm522_vm4, %v12810_v32, %v574_v50 }
 0x22a   : > { %1924 = vmatprep.subr.bf16.mxu1 %v582_v52  ;;  %1397 = vperm.xlu0 %10640, %v1351_v11  }
 0x22b   : > { %1925 = vmatpush1.bf16.msra.mxu1 %v581_v45  ;;  %1382 = vperm.xlu1 %10639, %v1348_v38   ;;  %v1352_v45 = vld [vmem:[%s18937_s2 + $0x48] sm:$0xff] }
 0x22c   : > { %v13259_v13 = vpop.permute.xlu0 %548  ;;  %v1141_v5 = vpop.permute.xlu1 %1140  ;;  %1797 = vmatmul.mubr.bf16.gmra.mxu1 %v13031_v31 }
 0x22d   : > { %v1227_v32 = vsel %vm850_vm6, %v1141_v5, %v13247_v53  ;;  %v1226_v19 = vsel %vm850_vm6, %v12696_v6, %v1141_v5  ;;  %1806 = vmatprep.mubr.bf16.mxu1 %v13040_v1 }
 0x22e   : > { %1857 = vmatprep.subr.bf16.mxu0 %v1227_v32  ;;  %1407 = vperm.xlu0 %10640, %v1353_v42  }
 0x22f   : > { %1858 = vmatpush2.bf16.msra.mxu0 %v1226_v19  ;;  %1392 = vperm.xlu1 %10639, %v1350_v20  }
 0x230   : > { %v13270_v11 = vpop.permute.xlu0 %520  ;;  %v547_v50 = vpop.permute.xlu1 %546 }
 0x231   : > { %v555_v38 = vsel %vm522_vm4, %v547_v50, %v13259_v13  ;;  %v554_v52 = vsel %vm522_vm4, %v12885_v41, %v547_v50  ;;  %v19268_v50 = vld [vmem:[#allocation3_spill] sm:$0xff] }
 0x232   : > { %1860 = vmatmul.mubr.bf16.vlgmr.msra.gmra.mxu0 %v12719_v7  ;;  %1926 = vmatprep.subr.bf16.mxu1 %v555_v38  ;;  %v1354_v7 = vld [vmem:[%s18937_s2 + $0x58] sm:$0xff] }
 0x233   : > { %1927 = vmatpush1.bf16.msra.mxu1 %v554_v52  ;;  %9772 = vmatprep.mubr.msk.bf16.mxu0 %vm1529_vm5, %v12726_v63  ;;  %v19269_v52 = vld [vmem:[#allocation4_spill] sm:$0xff] }
 0x234   : > { %v13282_v6 = vpop.permute.xlu0 %1132  ;;  %v519_v42 = vpop.permute.xlu1 %518  ;;  %1807 = vmatmul.mubr.bf16.gmra.mxu1 %v13056_v49  ;;  %1402 = vperm.xlu1 %10639, %v1352_v45   ;;  %v19270_v45 = vld [vmem:[#allocation11_spill] sm:$0xff] }
 0x235   : > { %v528_v41 = vsel %vm522_vm4, %v519_v42, %v13270_v11  ;;  %v527_v5 = vsel %vm522_vm4, %v12914_v16, %v519_v42  ;;  %1816 = vmatprep.mubr.bf16.mxu1 %v13065_v58  ;;  %v19271_v42 = vld [vmem:[#allocation12_spill] sm:$0xff] }
 0x236   : > { %1928 = vmatprep.subr.bf16.mxu1 %v528_v41  ;;  %v19272_v41 = vld [vmem:[#allocation5_spill] sm:$0xff] }
 0x237   : > { %1929 = vmatpush1.bf16.msra.mxu1 %v527_v5 }
 0x238   : > { %v1131_v63 = vpop.permute.xlu1 %1130  ;;  %1930 = vmatprep.subr.bf16.mxu1 %v12270_v51  ;;  %1412 = vperm.xlu1 %10639, %v1354_v7   ;;  %v13298_v19 = vpop.permute.xlu0 %1118 }
 0x239   : > { %v1223_v20 = vsel %vm850_vm6, %v1131_v63, %v13282_v6  ;;  %v1222_v32 = vsel %vm850_vm6, %v12977_v18, %v1131_v63 }
 0x23a   : > { %1870 = vmatmul.mubr.bf16.gmra.mxu0 %v12752_v3  ;;  %2013 = vmatprep.subr.bf16.mxu0 %v1223_v20  ;;  %v13313_v3 = vld [vmem:[%s18936_s1 + $0x4] ss:$16 sps:$4 sm:$0xff]  }
 0x23b   : > { %2014 = vmatpush1.bf16.msra.mxu0 %v1222_v32  ;;  %9773 = vmatprep.mubr.msk.bf16.mxu0 %vm1529_vm5, %v12757_v29  ;;  %v19273_v20 = vld [vmem:[#allocation13_spill] sm:$0xff] }
 0x23c   : > { %v1117_v16 = vpop.permute.xlu1 %1116  ;;  %1931 = vmatpush1.bf16.msra.mxu1 %v19268_v50  ;;  %v13316_v29 = vpop.permute.xlu0 %1104 }
 0x23d   : > { %v1217_v51 = vsel %vm850_vm6, %v1117_v16, %v13298_v19  ;;  %v1216_v38 = vsel %vm850_vm6, %v13017_v36, %v1117_v16  ;;  %1932 = vmatprep.subr.bf16.mxu1 %v12331_v34  ;;  %1817 = vmatmul.mubr.bf16.gmra.mxu1 %v13082_v24 }
 0x23e   : > { %2015 = vmatprep.subr.bf16.mxu0 %v1217_v51  ;;  %1952 = vmatprep.mubr.bf16.mxu1 %v13313_v3 }
 0x23f   : > { %2016 = vmatpush1.bf16.msra.mxu0 %v1216_v38  ;;  %v19275_v38 = vld [vmem:[#allocation15_spill] sm:$0xff] }
 0x240   : > { %v1103_v18 = vpop.permute.xlu1 %1102  ;;  %1933 = vmatpush1.bf16.msra.mxu1 %v19269_v52 }
 0x241   : > { %v1211_v36 = vsel %vm850_vm6, %v1103_v18, %v13316_v29  ;;  %v1210_v34 = vsel %vm850_vm6, %v13051_v57, %v1103_v18  ;;  %1934 = vmatprep.subr.bf16.mxu1 %v12360_v59  ;;  %v19274_v59 = vld [vmem:[#allocation14_spill] sm:$0xff] }
 0x242   : > { %1880 = vmatmul.mubr.bf16.gmra.mxu0 %v19270_v45  ;;  %2017 = vmatprep.subr.bf16.mxu0 %v1211_v36 }
 0x243   : > { %2018 = vmatpush1.bf16.msra.mxu0 %v1210_v34  ;;  %9774 = vmatprep.mubr.msk.bf16.mxu0 %vm1529_vm5, %v19271_v42 }
 0x244   : > { %1935 = vmatpush1.bf16.msra.mxu1 %v19272_v41 }
 0x248   : > { %v13328_v5 = vpop.permute.xlu0 %1090  ;;  %v1089_v7 = vpop.permute.xlu1 %1088 }
 0x249   : > { %v1205_v63 = vsel %vm850_vm6, %v1089_v7, %v13328_v5  ;;  %v1204_v57 = vsel %vm850_vm6, %v13089_v4, %v1089_v7  ;;  %v19276_v4 = vld [vmem:[#allocation16_spill] sm:$0xff] }
 0x24a   : > { %1890 = vmatmul.mubr.bf16.gmra.mxu0 %v19273_v20  ;;  %2019 = vmatprep.subr.bf16.mxu0 %v1205_v63  ;;  %v13362_v7 = vld [vmem:[%s18936_s1 + $0xc] ss:$16 sps:$4 sm:$0xff]  }
 0x24b   : > { %2020 = vmatpush1.bf16.msra.mxu0 %v1204_v57  ;;  %9775 = vmatprep.mubr.msk.bf16.mxu0 %vm1529_vm5, %v19274_v59 }
 0x24c   : > { %v13337_v32 = vpop.permute.xlu0 %848  ;;  %v847_v16 = vpop.permute.xlu1 %846 }
 0x24d   : > { %v856_v50 = vsel %vm850_vm6, %v847_v16, %v13337_v32  ;;  %v855_v51 = vsel %vm850_vm6, %v12963_v22, %v847_v16 }
 0x24e   : > { %1936 = vmatprep.subr.bf16.mxu1 %v856_v50 }
 0x24f   : > { %1937 = vmatpush2.bf16.msra.mxu1 %v855_v51 }
 0x252   : > { %1900 = vmatmul.mubr.bf16.gmra.mxu0 %v19275_v38 }
 0x253   : > { %9776 = vmatprep.mubr.msk.bf16.mxu0 %vm1529_vm5, %v19276_v4 }
 0x254   : > { %v13346_v18 = vpop.permute.xlu0 %1076  ;;  %v1075_v52 = vpop.permute.xlu1 %1074 }
 0x255   : > { %v1199_v36 = vsel %vm850_vm6, %v1075_v52, %v13346_v18  ;;  %v1198_v34 = vsel %vm850_vm6, %v13102_v37, %v1075_v52 }
 0x256   : > { %2021 = vmatprep.subr.bf16.mxu0 %v1199_v36 }
 0x257   : > { %2022 = vmatpush1.bf16.msra.mxu0 %v1198_v34  ;;  %v13390_v34 = vpop.f32.mrf.mxu1 }
 0x258   : > { %v13352_v45 = vpop.permute.xlu0 %821  ;;  %v820_v22 = vpop.permute.xlu1 %819 }
 0x259   : > { %v828_v42 = vsel %vm768_vm7, %v820_v22, %v13352_v45  ;;  %v827_v41 = vsel %vm768_vm7, %v13002_v27, %v820_v22 }
 0x25a   : > { %1910 = vmatmul.mubr.bf16.gmra.mxu0 %v12872_v60  ;;  %1938 = vmatprep.subr.bf16.mxu1 %v828_v42 }
 0x25b   : > { %1939 = vmatpush2.bf16.msra.mxu1 %v827_v41  ;;  %9777 = vmatprep.mubr.msk.bf16.mxu0 %vm1529_vm5, %v13362_v7 }
 0x260   : > { %v13366_v37 = vpop.permute.xlu0 %1062  ;;  %v1061_v63 = vpop.permute.xlu1 %1060 }
 0x261   : > { %v1193_v57 = vsel %vm850_vm6, %v1061_v63, %v13366_v37  ;;  %v1192_v27 = vsel %vm850_vm6, %v13114_v2, %v1061_v63  ;;  %v19277_v63 = vld [vmem:[#allocation17_spill] sm:$0xff] }
 0x262   : > { %2023 = vmatprep.subr.bf16.mxu0 %v1193_v57 }
 0x263   : > { %2024 = vmatpush1.bf16.msra.mxu0 %v1192_v27 }
 0x264   : > { %v13372_v60 = vpop.permute.xlu0 %794  ;;  %v793_v20 = vpop.permute.xlu1 %792 }
 0x265   : > { %v801_v59 = vsel %vm768_vm7, %v793_v20, %v13372_v60  ;;  %v800_v16 = vsel %vm768_vm7, %v13042_v35, %v793_v20 }
 0x266   : > { %1940 = vmatprep.subr.bf16.mxu1 %v801_v59 }
 0x267   : > { %1941 = vmatpush2.bf16.msra.mxu1 %v800_v16 }
 0x268   : > { %v13378_v50 = vpop.permute.xlu0 %1048  ;;  %v1047_v51 = vpop.permute.xlu1 %1046 }
 0x269   : > { %v1187_v38 = vsel %vm850_vm6, %v1047_v51, %v13378_v50  ;;  %v1186_v2 = vsel %vm850_vm6, %v13136_v25, %v1047_v51 }
 0x26a   : > { %2025 = vmatprep.subr.bf16.mxu0 %v1187_v38 }
 0x26b   : > { %2026 = vmatpush1.bf16.msra.mxu0 %v1186_v2 }
 0x26c   : > { %v13384_v4 = vpop.permute.xlu0 %766  ;;  %v765_v52 = vpop.permute.xlu1 %764 }
 0x26d   : > { %v774_v36 = vsel %vm768_vm7, %v765_v52, %v13384_v4  ;;  %v773_v35 = vsel %vm768_vm7, %v13077_v40, %v765_v52  ;;  %v13400_v40 = vpop.f32.mrf.mxu1  ;;  %vm7320_vm7 = vcmask 850944  }
 0x26e   : > { %1942 = vmatprep.subr.bf16.mxu1 %v774_v36 }
 0x26f   : > { %1943 = vmatpush2.bf16.msra.mxu1 %v773_v35 }
 0x270   : > { %v13392_v22 = vpop.permute.xlu0 %1034  ;;  %1944 = vmatprep.subr.bf16.mxu1 %v13145_v26  ;;  %v1033_v25 = vpop.permute.xlu1 %1032 }
 0x271   : > { %v1181_v42 = vsel %vm850_vm6, %v1033_v25, %v13392_v22  ;;  %v1180_v41 = vsel %vm850_vm6, %v13168_v54, %v1033_v25  ;;  %v13410_v54 = vpop.f32.mrf.mxu1 }
 0x272   : > { %2027 = vmatprep.subr.bf16.mxu0 %v1181_v42 }
 0x273   : > { %1945 = vmatpush2.bf16.msra.mxu1 %v19277_v63  ;;  %2028 = vmatpush1.bf16.msra.mxu0 %v1180_v41  ;;  %v13414_v59 = vpop.f32.mrf.mxu1 }
 0x274   : > { %v13402_v57 = vpop.permute.xlu0 %1174  ;;  %1946 = vmatprep.subr.bf16.mxu1 %v13163_v9  ;;  %v1173_v27 = vpop.permute.xlu1 %1172 }
 0x275   : > { %v1241_v26 = vsel %vm850_vm6, %v1173_v27, %v13402_v57  ;;  %v1240_v20 = vsel %vm850_vm6, %v13194_v28, %v1173_v27 }
 0x276   : > { %2039 = vmatprep.subr.bf16.mxu0 %v1241_v26 }
 0x277   : > { %1947 = vmatpush2.bf16.msra.mxu1 %v12876_v17  ;;  %2040 = vmatpush2.bf16.msra.mxu0 %v1240_v20  ;;  %v13422_v17 = vpop.f32.mrf.mxu1 }
 0x278   : > { %1948 = vmatprep.subr.bf16.mxu1 %v13189_v12 }
 0x279   : > { %v13424_v38 = vpop.f32.mrf.mxu1 }
 0x27b   : > { %1949 = vmatpush2.bf16.msra.mxu1 %v12906_v30  ;;  %v13426_v12 = vpop.f32.mrf.mxu1 }
 0x27c   : > { %v13416_v9 = vpop.permute.xlu0 %1160  ;;  %v1159_v16 = vpop.permute.xlu1 %1158 }
 0x27d   : > { %v1235_v51 = vsel %vm850_vm6, %v1159_v16, %v13416_v9  ;;  %v1234_v28 = vsel %vm850_vm6, %v13221_v8, %v1159_v16  ;;  %v13436_v8 = vpop.f32.mrf.mxu1 }
 0x27e   : > { %2041 = vmatprep.subr.bf16.mxu0 %v1235_v51 }
 0x27f   : > { %2042 = vmatpush2.bf16.msra.mxu0 %v1234_v28  ;;  %v13456_v16 = vpop.f32.mrf.mxu1 }
 0x287   : > { %v1582_v30 = vpop.f32.mrf.mxu0 }
 0x288   : > { %v13428_v2 = vpop.permute.xlu0 %1146  ;;  %v1145_v52 = vpop.permute.xlu1 %1144 }
 0x289   : > { %v1229_v36 = vsel %vm850_vm6, %v1145_v52, %v13428_v2  ;;  %v1228_v35 = vsel %vm850_vm6, %v13247_v53, %v1145_v52  ;;  %v13434_v25 = vpop.f32.mrf.mxu0  ;;  %v13450_v53 = vld [vmem:[%s18936_s1 + $0x8] ss:$16 sps:$4 sm:$0xff]  }
 0x28a   : > { %2043 = vmatprep.subr.bf16.mxu0 %v1229_v36  ;;  %v13480_v52 = vld [vmem:[%s18936_s1 + $0x28] ss:$16 sps:$4 sm:$0xff]  }
 0x28b   : > { %2044 = vmatpush2.bf16.msra.mxu0 %v1228_v35  ;;  %v1586_v42 = vpop.f32.mrf.mxu0 }
 0x28c   : > { %v13438_v41 = vpop.permute.xlu0 %657  ;;  %10236 = vmatprep.subr.bf16.mxu0 %v13337_v32  ;;  %v656_v63 = vpop.permute.xlu1 %655 }
 0x28d   : > { %v664_v27 = vsel %vm604_vm2, %v656_v63, %v13438_v41  ;;  %v663_v26 = vsel %vm604_vm2, %v13154_v23, %v656_v63  ;;  %v13445_v20 = vpop.f32.mrf.mxu0  ;;  %v13461_v23 = vld [vmem:[%s18936_s1 + $0x2c] ss:$16 sps:$4 sm:$0xff]  }
 0x28e   : > { %1950 = vmatprep.subr.bf16.mxu1 %v664_v27  ;;  %2046 = vmatmul.mubr.bf16.vlgmr.msra.gmra.mxu0 %v13450_v53 }
 0x28f   : > { %1951 = vmatpush2.bf16.msra.mxu1 %v663_v26  ;;  %10237 = vmatpush3.bf16.msra.mxu0 %v13180_v46  ;;  %v1592_v32 = vpop.f32.mrf.mxu0  ;;  %v13540_v26 = vld [vmem:[%s18936_s1 + $0x6c] ss:$16 sps:$4 sm:$0xff]  }
 0x290   : > { %10238 = vmatprep.subr.bf16.mxu0 %v13352_v45  ;;  %2187 = vmatprep.subr.bf16.mxu1 %v18959_v14  ;;  %v13472_v45 = vpop.f32.mrf.mxu1 }
 0x291   : > { %9778 = vmatprep.mubr.msk.bf16.mxu0 %vm1529_vm5, %v13461_v23  ;;  %v13465_v51 = vpop.f32.mrf.mxu0 }
 0x292   : > { %1953 = vmatmul.mubr.bf16.vlgmr.msra.gmra.mxu1 %v12948_v48 }
 0x293   : > { %10239 = vmatpush3.bf16.msra.mxu0 %v13208_v10  ;;  %2188 = vmatpush1.bf16.msra.mxu1 %v13282_v6  ;;  %v1596_v46 = vpop.f32.mrf.mxu0  ;;  %v13487_v10 = vpop.f32.mrf.mxu1 }
 0x294   : > { %10240 = vmatprep.subr.bf16.mxu0 %v13372_v60  ;;  %2189 = vmatprep.subr.bf16.mxu1 %v18959_v14 }
 0x295   : > { %1962 = vmatprep.mubr.bf16.mxu1 %v12954_v43  ;;  %v13475_v28 = vpop.f32.mrf.mxu0  ;;  %v13492_v43 = vld [vmem:[%s18936_s1 + $0x4c] ss:$16 sps:$4 sm:$0xff]   ;;  %v13509_v35 = vpop.f32.mrf.mxu1 }
 0x296   : > { %2056 = vmatmul.mubr.bf16.gmra.mxu0 %v13480_v52 }
 0x297   : > { %10241 = vmatpush3.bf16.msra.mxu0 %v13233_v39  ;;  %2190 = vmatpush1.bf16.msra.mxu1 %v13298_v19  ;;  %v1602_v48 = vpop.f32.mrf.mxu0 }
 0x298   : > { %10242 = vmatprep.subr.bf16.mxu0 %v13384_v4  ;;  %2191 = vmatprep.subr.bf16.mxu1 %v18959_v14 }
 0x299   : > { %9779 = vmatprep.mubr.msk.bf16.mxu0 %vm1529_vm5, %v13492_v43  ;;  %v13496_v6 = vpop.permute.xlu0 %1362  ;;  %v13498_v39 = vpop.f32.mrf.mxu0 }
 0x29a   : > { %1963 = vmatmul.mubr.bf16.gmra.mxu1 %v12975_v47  ;;  %v13501_v19 = vpop.permute.xlu1 %1357  ;;  %v1587_v60 = vadd.f32 %v1586_v42, %v13496_v6 }
 0x29b   : > { %10243 = vmatpush3.bf16.msra.mxu0 %v13259_v13  ;;  %2192 = vmatpush1.bf16.msra.mxu1 %v13316_v29  ;;  %v1606_v4 = vpop.f32.mrf.mxu0  ;;  %v1583_v36 = vadd.f32 %v1582_v30, %v13501_v19 }
 0x29c   : > { %10244 = vmatprep.subr.bf16.mxu0 %v13138_v61  ;;  %2193 = vmatprep.subr.bf16.mxu1 %v18959_v14  ;;  %v13512_v63 = vadd.f32 %v13410_v54, %v1587_v60  ;;  %v13525_v61 = vld [vmem:[%s18936_s1 + $0x48] ss:$16 sps:$4 sm:$0xff]   ;;  %v1705_v60 = vpop.f32.mrf.mxu1 }
 0x29d   : > { %1972 = vmatprep.mubr.bf16.mxu1 %v12982_v44  ;;  %v13515_v27 = vpop.f32.mrf.mxu0  ;;  %v13518_v13 = vadd.f32 %v13390_v34, %v1583_v36  ;;  %v13520_v29 = vpop.permute.xlu0 %1377 }
 0x29e   : > { %2066 = vmatmul.mubr.bf16.gmra.mxu0 %v13525_v61  ;;  %v18963_v30 = vmax.f32 %v13512_v63, 0.0  ;;  %v13529_v54 = vpop.permute.xlu1 %1367 }
 0x29f   : > { %19278 = vst [vmem:[#allocation6_spill] sm:$0xff] %v13518_v13  ;;  %10245 = vmatpush3.bf16.msra.mxu0 %v13270_v11  ;;  %2194 = vmatpush1.bf16.msra.mxu1 %v13328_v5  ;;  %v18962_v34 = vmax.f32 %v13518_v13, 0.0  ;;  %v1593_v42 = vadd.f32 %v1592_v32, %v13529_v54 }
 0x2a0   : > { %10246 = vmatprep.subr.bf16.mxu0 %v13156_v33  ;;  %2195 = vmatprep.subr.bf16.mxu1 %v18959_v14  ;;  %v1612_v11 = vpop.f32.mrf.mxu0  ;;  %v1603_v33 = vadd.f32 %v1602_v48, %v13520_v29 }
 0x2a1   : > { %9780 = vmatprep.mubr.msk.bf16.mxu0 %vm1529_vm5, %v13540_v26  ;;  %v10641_v5 = vpack.i.bf16 %v18963_v30, %v18962_v34  ;;  %v13549_v32 = vadd.f32 %v13422_v17, %v1593_v42  ;;  %v13555_v14 = vpop.permute.xlu0 %1387  ;;  %v19280_v34 = vmov 0   ;;  %v13563_v17 = vpop.f32.mrf.mxu1 }
 0x2a2   : > { %1973 = vmatmul.mubr.bf16.gmra.mxu1 %v13000_v56  ;;  %v13553_v36 = vpop.permute.xlu1 %1372 }
 0x2a3   : > { %19279 = vst [vmem:[#allocation9_spill] sm:$0xff] %v13549_v32  ;;  %10247 = vmatpush3.bf16.msra.mxu0 %v12547_v0  ;;  %2196 = vmatpush1.bf16.msra.mxu1 %v13346_v18  ;;  %v1597_v13 = vadd.f32 %v1596_v46, %v13553_v36  ;;  %v18970_v42 = vmax.f32 %v13549_v32, 0.0  ;;  %v13571_v0 = vadd.f32 %v13456_v16, %v1603_v33  ;;  %v13580_v46 = vpop.f32.mrf.mxu0 }
 0x2a4   : > { %10248 = vmatprep.subr.bf16.mxu0 %v13182_v62  ;;  %2197 = vmatprep.subr.bf16.mxu1 %v19280_v34  ;;  %v1613_v18 = vadd.f32 %v1612_v11, %v13555_v14  ;;  %v13577_v62 = vld [vmem:[%s18936_s1 + $0x68] ss:$16 sps:$4 sm:$0xff]   ;;  %v1709_v11 = vpop.f32.mrf.mxu1 }
 0x2a5   : > { %1982 = vmatprep.mubr.bf16.mxu1 %v13007_v15  ;;  %10642 = vrot.lane.b32.xlu1 %v10641_v5, %s11977_s27  ;;  %v13567_v48 = vadd.f32 %v13426_v12, %v1597_v13  ;;  %19281 = vst [vmem:[#allocation7_spill] sm:$0xff] %v13571_v0  ;;  %v13593_v13 = vld [vmem:[%s18936_s1 + $0x8c] ss:$16 sps:$4 sm:$0xff]   ;;  %v1616_v33 = vpop.f32.mrf.mxu0 }
 0x2a6   : > { %2076 = vmatmul.mubr.bf16.gmra.mxu0 %v13577_v62  ;;  %v13582_v5 = vpop.permute.xlu1 %1382 }
 0x2a7   : > { %10249 = vmatpush3.bf16.msra.mxu0 %v12585_v55  ;;  %2198 = vmatpush1.bf16.msra.mxu1 %v13366_v37  ;;  %v18965_v12 = vmax.f32 %v13567_v48, 0.0  ;;  %v1607_v16 = vadd.f32 %v1606_v4, %v13582_v5  ;;  %v13605_v4 = vadd.f32 %v1705_v60, %v1613_v18  ;;  %v11944_v18 = vld [vmem:[%s18936_s1 + $0x88] ss:$16 sps:$4 sm:$0xff]  }
 0x2a8   : > { %10250 = vmatprep.subr.bf16.mxu0 %v13438_v41  ;;  %2199 = vmatprep.subr.bf16.mxu1 %v19280_v34  ;;  %v18969_v41 = vmax.f32 %v13571_v0, 0.0 }
 0x2a9   : > { %9781 = vmatprep.mubr.msk.bf16.mxu0 %vm1529_vm5, %v13593_v13  ;;  %v10646_v55 = vpack.i.bf16 %v18965_v12, %v18970_v42  ;;  %v13602_v37 = vadd.f32 %v13487_v10, %v1607_v16  ;;  %19283 = vst [vmem:[#allocation8_spill] sm:$0xff] %v13605_v4  ;;  %v13627_v16 = vpop.f32.mrf.mxu1 }
 0x2aa   : > { %1983 = vmatmul.mubr.bf16.gmra.mxu1 %v13031_v31  ;;  %v13608_v30 = vpop.permute.xlu1 %1392 }
 0x2ab   : > { %19282 = vst [vmem:[#allocation10_spill] sm:$0xff] %v13602_v37  ;;  %2200 = vmatpush1.bf16.msra.mxu1 %v13378_v50  ;;  %1992 = vmatprep.mubr.bf16.mxu1 %v13040_v1  ;;  %v18968_v32 = vmax.f32 %v13602_v37, 0.0  ;;  %v1617_v12 = vadd.f32 %v1616_v33, %v13608_v30  ;;  %v18967_v50 = vmax.f32 %v13605_v4, 0.0 }
 0x2ac   : > { %2201 = vmatprep.subr.bf16.mxu1 %v19280_v34  ;;  %10251 = vmatpush3.bf16.msra.mxu0 %v12603_v21  ;;  %v11945_v21 = vld [vmem:[%s18936_s1 + $0xac] ss:$16 sps:$4 sm:$0xff]  }
 0x2ad   : > { %10647 = vrot.lane.b32.xlu1 %v10646_v55, %s11977_s27  ;;  %v10651_v10 = vpack.i.bf16 %v18968_v32, %v18969_v41  ;;  %v13621_v60 = vadd.f32 %v1709_v11, %v1617_v12  ;;  %v11946_v55 = vld [vmem:[%s18936_s1 + $0xa8] ss:$16 sps:$4 sm:$0xff]  }
 0x2ae   : > { %2086 = vmatmul.mubr.bf16.gmra.mxu0 %v11944_v18 }
 0x2af   : > { %19284 = vst [vmem:[#allocation3_spill] sm:$0xff] %v13621_v60  ;;  %2202 = vmatpush1.bf16.msra.mxu1 %v13392_v22  ;;  %9782 = vmatprep.mubr.msk.bf16.mxu0 %vm1529_vm5, %v11945_v21  ;;  %v18966_v12 = vmax.f32 %v13621_v60, 0.0  ;;  %v13642_v22 = vpop.f32.mrf.mxu1 }
 0x2b0   : > { %2213 = vmatprep.subr.bf16.mxu1 %v19280_v34 }
 0x2b1   : > { %10652 = vrot.lane.b32.xlu1 %v10651_v10, %s11977_s27  ;;  %v10656_v11 = vpack.i.bf16 %v18966_v12, %v18967_v50  ;;  %v13651_v33 = vpop.f32.mrf.mxu1  ;;  %v11947_v10 = vld [vmem:[%s18936_s1] ss:$16 sps:$4 sm:$0xff]   ;;  %v1585_v50 = vadd.f32 %v13434_v25, %v13501_v19 }
 0x2b2   : > { %1993 = vmatmul.mubr.bf16.gmra.mxu1 %v13056_v49 }
 0x2b3   : > { %2214 = vmatpush2.bf16.msra.mxu1 %v13402_v57  ;;  %2002 = vmatprep.mubr.bf16.mxu1 %v13065_v58  ;;  %v13657_v57 = vpop.f32.mrf.mxu1  ;;  %v13725_v41 = vadd.f32 %v13400_v40, %v1585_v50 }
 0x2b4   : > { %2215 = vmatprep.subr.bf16.mxu1 %v19280_v34 }
 0x2b5   : > { %10657 = vrot.lane.b32.xlu1 %v10656_v11, %s11977_s27  ;;  %v13665_v11 = vpop.f32.mrf.mxu1 }
 0x2b6   : > { %2096 = vmatmul.mubr.bf16.gmra.mxu0 %v11946_v55 }
 0x2b7   : > { %2216 = vmatpush2.bf16.msra.mxu1 %v13416_v9  ;;  %2138 = vmatprep.mubr.bf16.mxu0 %v13313_v3  ;;  %v11948_v3 = vld [vmem:[%s18936_s1 + $0x24] ss:$16 sps:$4 sm:$0xff]   ;;  %v13671_v9 = vpop.f32.mrf.mxu1 }
 0x2b8   : > { %2217 = vmatprep.subr.bf16.mxu1 %v19280_v34 }
 0x2ba   : > { %2003 = vmatmul.mubr.bf16.gmra.mxu1 %v13082_v24 }
 0x2bb   : > { %2218 = vmatpush2.bf16.msra.mxu1 %v13428_v2  ;;  %9783 = vmatprep.mubr.msk.bf16.mxu1 %vm1529_vm5, %v13362_v7  ;;  %v13676_v7 = vpop.f32.mrf.mxu1 }
 0x2bd   : > { %v13680_v2 = vpop.f32.mrf.mxu1 }
 0x2be   : > { %2139 = vmatmul.mubr.bf16.vlgmr.msra.gmra.mxu0 %v11947_v10 }
 0x2bf   : > { %2146 = vmatprep.mubr.bf16.mxu0 %v11948_v3  ;;  %v13687_v10 = vpop.f32.mrf.mxu1 }
 0x2c2   : > { %2220 = vmatmul.mubr.bf16.vlgmr.msra.gmra.mxu1 %v13450_v53  ;;  %v13685_v53 = vpop.f32.mrf.mxu0 }
 0x2c3   : > { %9784 = vmatprep.mubr.msk.bf16.mxu1 %vm1529_vm5, %v13461_v23 }
 0x2c6   : > { %2147 = vmatmul.mubr.bf16.gmra.mxu0 %v12975_v47  ;;  %v13691_v47 = vpop.f32.mrf.mxu0 }
 0x2c7   : > { %2154 = vmatprep.mubr.bf16.mxu0 %v12982_v44 }
 0x2ca   : > { %2228 = vmatmul.mubr.bf16.gmra.mxu1 %v13480_v52  ;;  %v13696_v52 = vpop.f32.mrf.mxu0 }
 0x2cb   : > { %9785 = vmatprep.mubr.msk.bf16.mxu1 %vm1529_vm5, %v13492_v43 }
 0x2ce   : > { %2155 = vmatmul.mubr.bf16.gmra.mxu0 %v13000_v56 }
 0x2cf   : > { %2162 = vmatprep.mubr.bf16.mxu0 %v13007_v15  ;;  %v13700_v15 = vpop.f32.mrf.mxu0 }
 0x2d2   : > { %2236 = vmatmul.mubr.bf16.gmra.mxu1 %v13525_v61  ;;  %v1768_v44 = vpop.f32.mrf.mxu1 }
 0x2d3   : > { %9786 = vmatprep.mubr.msk.bf16.mxu1 %vm1529_vm5, %v13540_v26  ;;  %v13705_v26 = vpop.f32.mrf.mxu0 }
 0x2d4   : > { %v1770_v23 = vpop.f32.mrf.mxu1 }
 0x2d5   : > { %v13708_v3 = vpop.f32.mrf.mxu0 }
 0x2d6   : > { %2163 = vmatmul.mubr.bf16.gmra.mxu0 %v13031_v31  ;;  %v1772_v56 = vpop.f32.mrf.mxu1 }
 0x2d7   : > { %2170 = vmatprep.mubr.bf16.mxu0 %v13040_v1  ;;  %v1773_v34 = vadd.f32 %v1772_v56, %v13496_v6  ;;  %v1599_v56 = vadd.f32 %v13475_v28, %v13553_v36 }
 0x2d8   : > { %v1774_v43 = vpop.f32.mrf.mxu1 }
 0x2da   : > { %2244 = vmatmul.mubr.bf16.gmra.mxu1 %v13577_v62  ;;  %v13712_v62 = vpop.f32.mrf.mxu0 }
 0x2db   : > { %9787 = vmatprep.mubr.msk.bf16.mxu1 %vm1529_vm5, %v13593_v13  ;;  %v1778_v61 = vpop.f32.mrf.mxu1 }
 0x2dc   : > { %v13714_v13 = vpop.f32.mrf.mxu0 }
 0x2dd   : > { %v1780_v31 = vpop.f32.mrf.mxu1 }
 0x2de   : > { %2171 = vmatmul.mubr.bf16.gmra.mxu0 %v13056_v49  ;;  %v1781_v40 = vadd.f32 %v1780_v31, %v13529_v54 }
 0x2df   : > { %2178 = vmatprep.mubr.bf16.mxu0 %v13065_v58  ;;  %v1782_v1 = vpop.f32.mrf.mxu1  ;;  %v13718_v58 = vpop.f32.mrf.mxu0 }
 0x2e0   : > { %v1783_v31 = vadd.f32 %v1782_v1, %v13553_v36 }
 0x2e1   : > { %v1784_v12 = vpop.f32.mrf.mxu1 }
 0x2e2   : > { %2252 = vmatmul.mubr.bf16.gmra.mxu1 %v11944_v18  ;;  %v1589_v18 = vadd.f32 %v13445_v20, %v13496_v6  ;;  %v1775_v20 = vadd.f32 %v1774_v43, %v13496_v6 }
 0x2e3   : > { %9788 = vmatprep.mubr.msk.bf16.mxu1 %vm1529_vm5, %v11945_v21  ;;  %v1769_v21 = vadd.f32 %v1768_v44, %v13501_v19  ;;  %v18976_v44 = vmax.f32 %v13725_v41, 0.0  ;;  %vm7303_vm5 = vcmask 637952  }
 0x2e4   : > { %v1788_v49 = vpop.f32.mrf.mxu1  ;;  %v13728_v42 = vadd.f32 %v13414_v59, %v1589_v18  ;;  %v1595_v59 = vadd.f32 %v13465_v51, %v13529_v54  ;;  %v1779_v18 = vadd.f32 %v1778_v61, %v13529_v54 }
 0x2e6   : > { %2179 = vmatmul.mubr.bf16.gmra.mxu0 %v13082_v24  ;;  %v1790_v32 = vpop.f32.mrf.mxu1  ;;  %v1771_v24 = vadd.f32 %v1770_v23, %v13501_v19  ;;  %v19286_v51 = vmax.f32 %v13728_v42, 0.0 }
 0x2e8   : > { %v1792_v60 = vpop.f32.mrf.mxu1 }
 0x2ea   : > { %2260 = vmatmul.mubr.bf16.gmra.mxu1 %v11946_v55 }
 0x2f2   : > { %v1861_v55 = vpop.f32.mrf.mxu0 }
 0x2f3   : > { %v13731_v25 = vadd.f32 %v1861_v55, %v1769_v21 }
 0x2f4   : > { %v1863_v4 = vpop.f32.mrf.mxu0 }
 0x2f5   : > { %v18977_v37 = vmax.f32 %v13731_v25, 0.0  ;;  %v13736_v23 = vadd.f32 %v1863_v4, %v1771_v24  ;;  %v1794_v24 = vpop.f32.mrf.mxu1 }
 0x2f6   : > { %v1865_v50 = vpop.f32.mrf.mxu0 }
 0x2f7   : > { %19285 = vst [vmem:[#allocation4_spill] sm:$0xff] %v13736_v23  ;;  %v10661_v43 = vpack.i.bf16 %v18977_v37, %v18976_v44  ;;  %v18979_v21 = vmax.f32 %v13736_v23, 0.0  ;;  %v13749_v4 = vadd.f32 %v1865_v50, %v1773_v34  ;;  %v13761_v44 = vadd.f32 %v13424_v38, %v1595_v59 }
 0x2f8   : > { %v1867_v55 = vpop.f32.mrf.mxu0  ;;  %v13764_v50 = vadd.f32 %v13436_v8, %v1599_v56 }
 0x2f9   : > { %v10666_v28 = vpack.i.bf16 %v19286_v51, %v18979_v21  ;;  %v18981_v61 = vmax.f32 %v13749_v4, 0.0  ;;  %v13757_v0 = vadd.f32 %v1867_v55, %v1775_v20  ;;  %10662 = vrot.lane.b32.xlu0 %v10661_v43, %s11977_s27  ;;  %v1798_v51 = vpop.f32.mrf.mxu1  ;;  %v1785_v55 = vadd.f32 %v1784_v12, %v13553_v36 }
 0x2fa   : > { %v1871_v34 = vpop.f32.mrf.mxu0  ;;  %v18991_v1 = vmax.f32 %v13761_v44, 0.0  ;;  %v18987_v56 = vmax.f32 %v13764_v50, 0.0  ;;  %v1605_v43 = vadd.f32 %v13498_v39, %v13520_v29 }
 0x2fb   : > { %19287 = vst [vmem:[#allocation11_spill] sm:$0xff] %v13757_v0  ;;  %v18980_v37 = vmax.f32 %v13757_v0, 0.0  ;;  %v13768_v23 = vadd.f32 %v1871_v34, %v1779_v18  ;;  %10667 = vrot.lane.b32.xlu1 %v10666_v28, %s11977_s27  ;;  %v1789_v28 = vadd.f32 %v1788_v49, %v13520_v29  ;;  %v1800_v34 = vpop.f32.mrf.mxu1 }
 0x2fc   : > { %v1873_v20 = vpop.f32.mrf.mxu0 }
 0x2fd   : > { %19288 = vst [vmem:[#allocation12_spill] sm:$0xff] %v13768_v23  ;;  %v10671_v38 = vpack.i.bf16 %v18980_v37, %v18981_v61  ;;  %v18988_v8 = vmax.f32 %v13768_v23, 0.0  ;;  %v13777_v59 = vadd.f32 %v1873_v20, %v1781_v40  ;;  %v1609_v40 = vadd.f32 %v13515_v27, %v13582_v5  ;;  %v1802_v61 = vpop.f32.mrf.mxu1 }
 0x2fe   : > { %v1875_v18 = vpop.f32.mrf.mxu0  ;;  %v1791_v20 = vadd.f32 %v1790_v32, %v13520_v29  ;;  %v1793_v32 = vadd.f32 %v1792_v60, %v13582_v5 }
 0x2ff   : > { %19289 = vst [vmem:[#allocation5_spill] sm:$0xff] %v13777_v59  ;;  %v18984_v12 = vmax.f32 %v13777_v59, 0.0  ;;  %v13785_v21 = vadd.f32 %v1875_v18, %v1783_v31  ;;  %10672 = vrot.lane.b32.xlu0 %v10671_v38, %s11977_s27  ;;  %v10676_v39 = vpack.i.bf16 %v18988_v8, %v18991_v1  ;;  %v13803_v38 = vadd.f32 %v13472_v45, %v1605_v43  ;;  %v13852_v8 = vpop.permute.xlu0 %1397 }
 0x300   : > { %v1877_v37 = vpop.f32.mrf.mxu0 }
 0x301   : > { %19290 = vst [vmem:[#allocation13_spill] sm:$0xff] %v13785_v21  ;;  %v10681_v49 = vpack.i.bf16 %v18987_v56, %v18984_v12  ;;  %v18986_v31 = vmax.f32 %v13785_v21, 0.0  ;;  %v13800_v18 = vadd.f32 %v1877_v37, %v1785_v55  ;;  %v13812_v12 = vadd.f32 %v13509_v35, %v1609_v40  ;;  %v1804_v40 = vpop.f32.mrf.mxu1 }
 0x302   : > { %v1881_v27 = vpop.f32.mrf.mxu0  ;;  %v1795_v55 = vadd.f32 %v1794_v24, %v13582_v5  ;;  %v1619_v35 = vadd.f32 %v13685_v53, %v13608_v30  ;;  %v1799_v24 = vadd.f32 %v1798_v51, %v13555_v14 }
 0x303   : > { %19291 = vst [vmem:[#allocation14_spill] sm:$0xff] %v13800_v18  ;;  %v18985_v0 = vmax.f32 %v13800_v18, 0.0  ;;  %v13807_v23 = vadd.f32 %v1881_v27, %v1789_v28  ;;  %10677 = vrot.lane.b32.xlu0 %v10676_v39, %s11977_s27  ;;  %10682 = vrot.lane.b32.xlu1 %v10681_v49, %s11977_s27  ;;  %19292 = vst [vmem:[#allocation15_spill] sm:$0xff] %v13812_v12  ;;  %v18990_v28 = vmax.f32 %v13803_v38, 0.0 }
 0x304   : > { %v1883_v37 = vpop.f32.mrf.mxu0  ;;  %v1615_v49 = vadd.f32 %v13580_v46, %v13555_v14 }
 0x305   : > { %v10686_v45 = vpack.i.bf16 %v18985_v0, %v18986_v31  ;;  %v18989_v60 = vmax.f32 %v13807_v23, 0.0  ;;  %v13820_v43 = vadd.f32 %v1883_v37, %v1791_v20  ;;  %v18993_v0 = vmax.f32 %v13812_v12, 0.0 }
 0x306   : > { %v1885_v39 = vpop.f32.mrf.mxu0  ;;  %v1801_v20 = vadd.f32 %v1800_v34, %v13555_v14  ;;  %v13849_v34 = vadd.f32 %v13627_v16, %v1619_v35 }
 0x307   : > { %19293 = vst [vmem:[#allocation16_spill] sm:$0xff] %v13820_v43  ;;  %v18992_v27 = vmax.f32 %v13820_v43, 0.0  ;;  %v13830_v31 = vadd.f32 %v1885_v39, %v1793_v32  ;;  %10687 = vrot.lane.b32.xlu0 %v10686_v45, %s11977_s27  ;;  %v10691_v46 = vpack.i.bf16 %v18989_v60, %v18990_v28  ;;  %v13846_v32 = vadd.f32 %v13563_v17, %v1615_v49  ;;  %v1808_v60 = vpop.f32.mrf.mxu1 }
 0x308   : > { %v1887_v37 = vpop.f32.mrf.mxu0  ;;  %19297 = vst [vmem:[#allocation20_spill] sm:$0xff] %v13849_v34  ;;  %v1803_v39 = vadd.f32 %v1802_v61, %v13608_v30  ;;  %v1805_v49 = vadd.f32 %v1804_v40, %v13608_v30 }
 0x309   : > { %19294 = vst [vmem:[#allocation17_spill] sm:$0xff] %v13830_v31  ;;  %v10696_v53 = vpack.i.bf16 %v18993_v0, %v18992_v27  ;;  %v18995_v51 = vmax.f32 %v13830_v31, 0.0  ;;  %v13843_v56 = vadd.f32 %v1887_v37, %v1795_v55  ;;  %19296 = vst [vmem:[#allocation19_spill] sm:$0xff] %v13846_v32  ;;  %v13859_v55 = vpop.permute.xlu1 %1402  ;;  %v19005_v37 = vmax.f32 %v13849_v34, 0.0  ;;  %v1810_v40 = vpop.f32.mrf.mxu1 }
 0x30a   : > { %v1891_v45 = vpop.f32.mrf.mxu0  ;;  %v1627_v34 = vadd.f32 %v13700_v15, %v13859_v55 }
 0x30b   : > { %19295 = vst [vmem:[#allocation18_spill] sm:$0xff] %v13843_v56  ;;  %v18994_v28 = vmax.f32 %v13843_v56, 0.0  ;;  %v13855_v1 = vadd.f32 %v1891_v45, %v1799_v24  ;;  %10692 = vrot.lane.b32.xlu0 %v10691_v46, %s11977_s27  ;;  %10697 = vrot.lane.b32.xlu1 %v10696_v53, %s11977_s27  ;;  %v18998_v24 = vmax.f32 %v13846_v32, 0.0  ;;  %v1625_v53 = vadd.f32 %v13696_v52, %v13852_v8  ;;  %v11420_v56 = vld [vmem:[%s18938_s3 + $0x60] ss:$8 sps:$4 sm:$0xff]  }
 0x30c   : > { %v1893_v17 = vpop.f32.mrf.mxu0  ;;  %v1809_v45 = vadd.f32 %v1808_v60, %v13852_v8 }
 0x30d   : > { %19298 = vst [vmem:[#allocation21_spill] sm:$0xff] %v13855_v1  ;;  %v10701_v16 = vpack.i.bf16 %v18994_v28, %v18995_v51  ;;  %v18996_v61 = vmax.f32 %v13855_v1, 0.0  ;;  %v13867_v35 = vadd.f32 %v1893_v17, %v1801_v20  ;;  %v1629_v20 = vadd.f32 %v13705_v26, %v13859_v55 }
 0x30e   : > { %v1895_v46 = vpop.f32.mrf.mxu0  ;;  %v1811_v17 = vadd.f32 %v1810_v40, %v13852_v8  ;;  %v13894_v40 = vadd.f32 %v13651_v33, %v1625_v53 }
 0x30f   : > { %19299 = vst [vmem:[#allocation22_spill] sm:$0xff] %v13867_v35  ;;  %v18997_v27 = vmax.f32 %v13867_v35, 0.0  ;;  %v13875_v0 = vadd.f32 %v1895_v46, %v1803_v39  ;;  %10702 = vrot.lane.b32.xlu0 %v10701_v16, %s11977_s27  ;;  %v10706_v52 = vpack.i.bf16 %v18996_v61, %v18998_v24  ;;  %v13901_v61 = vadd.f32 %v13665_v11, %v1629_v20 }
 0x310   : > { %v1897_v28 = vpop.f32.mrf.mxu0  ;;  %19302 = vst [vmem:[#allocation25_spill] sm:$0xff] %v13894_v40  ;;  %v19002_v33 = vmax.f32 %v13894_v40, 0.0 }
 0x311   : > { %19300 = vst [vmem:[#allocation23_spill] sm:$0xff] %v13875_v0  ;;  %v10711_v60 = vpack.i.bf16 %v19005_v37, %v18997_v27  ;;  %v19004_v39 = vmax.f32 %v13875_v0, 0.0  ;;  %v13890_v46 = vadd.f32 %v1897_v28, %v1805_v49  ;;  %19304 = vst [vmem:[#allocation27_spill] sm:$0xff] %v13901_v61  ;;  %v1623_v0 = vadd.f32 %v13691_v47, %v13852_v8  ;;  %v11425_v47 = vld [vmem:[%s18938_s3 + $0x54] ss:$8 sps:$4 sm:$0xff]  }
 0x312   : > { %v1901_v16 = vpop.f32.mrf.mxu0 }
 0x313   : > { %19301 = vst [vmem:[#allocation24_spill] sm:$0xff] %v13890_v46  ;;  %v18999_v26 = vmax.f32 %v13890_v46, 0.0  ;;  %v13896_v51 = vadd.f32 %v1901_v16, %v1809_v45  ;;  %10707 = vrot.lane.b32.xlu0 %v10706_v52, %s11977_s27  ;;  %10712 = vrot.lane.b32.xlu1 %v10711_v60, %s11977_s27  ;;  %v19003_v45 = vmax.f32 %v13901_v61, 0.0  ;;  %v1812_v60 = vpop.f32.mrf.mxu1  ;;  %v13944_v46 = vpop.permute.xlu1 %1412  ;;  %v13985_v21 = vadd.f32 %v13642_v22, %v1623_v0  ;;  %v11426_v0 = vld [vmem:[%s18938_s3 + $0x40] ss:$8 sps:$4 sm:$0xff]  }
 0x314   : > { %v1903_v27 = vpop.f32.mrf.mxu0  ;;  %v1813_v1 = vadd.f32 %v1812_v60, %v13859_v55  ;;  %v11428_v22 = vld [vmem:[%s18938_s3 + $0x44] ss:$8 sps:$4 sm:$0xff]  }
 0x315   : > { %19303 = vst [vmem:[#allocation26_spill] sm:$0xff] %v13896_v51  ;;  %v10716_v28 = vpack.i.bf16 %v18999_v26, %v19004_v39  ;;  %v19001_v49 = vmax.f32 %v13896_v51, 0.0  ;;  %v13908_v24 = vadd.f32 %v1903_v27, %v1811_v17  ;;  %v11417_v27 = vld [vmem:[%s18938_s3 + $0x70] ss:$8 sps:$4 sm:$0xff]   ;;  %v11419_v17 = vld [vmem:[%s18938_s3 + $0x74] ss:$8 sps:$4 sm:$0xff]  }
 0x316   : > { %4015 = vmatprep.subr.bf16.mxu0 %v11419_v17  ;;  %v1905_v52 = vpop.f32.mrf.mxu0  ;;  %v11422_v51 = vld [vmem:[%s18938_s3 + $0x64] ss:$8 sps:$4 sm:$0xff]   ;;  %19309 = vst [vmem:[#allocation32_spill] sm:$0xff] %v13985_v21 }
 0x317   : > { %19305 = vst [vmem:[#allocation28_spill] sm:$0xff] %v13908_v24  ;;  %v19000_v53 = vmax.f32 %v13908_v24, 0.0  ;;  %10717 = vrot.lane.b32.xlu0 %v10716_v28, %s11977_s27  ;;  %v10721_v11 = vpack.i.bf16 %v19001_v49, %v19002_v33  ;;  %4016 = vmatpush1.bf16.msra.mxu0 %v11417_v27  ;;  %v1814_v28 = vpop.f32.mrf.mxu1  ;;  %v13964_v12 = vpop.permute.xlu1 %10642 }
 0x318   : > { %v1907_v16 = vpop.f32.mrf.mxu0  ;;  %v1815_v43 = vadd.f32 %v1814_v28, %v13859_v55  ;;  %4017 = vmatprep.subr.bf16.mxu0 %v11422_v51  ;;  %v11423_v51 = vld [vmem:[%s18938_s3 + $0x50] ss:$8 sps:$4 sm:$0xff]  }
 0x319   : > { %v10726_v20 = vpack.i.bf16 %v19003_v45, %v19000_v53  ;;  %v1818_v53 = vpop.f32.mrf.mxu1 }
 0x31a   : > { %v13930_v26 = vpop.f32.mrf.mxu0  ;;  %v13962_v31 = vadd.f32 %v1907_v16, %v1815_v43  ;;  %v13977_v43 = vpop.permute.xlu0 %1407 }
 0x31b   : > { %10722 = vrot.lane.b32.xlu0 %v10721_v11, %s11977_s27  ;;  %10727 = vrot.lane.b32.xlu1 %v10726_v20, %s11977_s27  ;;  %v13934_v20 = vpop.f32.mrf.mxu1 }
 0x31c   : > { %v13932_v11 = vpop.f32.mrf.mxu0  ;;  %4018 = vmatpush1.bf16.msra.mxu0 %v11420_v56  ;;  %19307 = vst [vmem:[#allocation30_spill] sm:$0xff] %v13962_v31 }
 0x31d   : > { %v13938_v33 = vpop.f32.mrf.mxu1  ;;  %4019 = vmatprep.subr.bf16.mxu0 %v11425_v47 }
 0x31e   : > { %v13936_v49 = vpop.f32.mrf.mxu0 }
 0x31f   : > { %v13942_v17 = vpop.f32.mrf.mxu1 }
 0x320   : > { %v13940_v45 = vpop.f32.mrf.mxu0  ;;  %4020 = vmatpush1.bf16.msra.mxu0 %v11423_v51 }
 0x321   : > { %4021 = vmatprep.subr.bf16.mxu0 %v11428_v22 }
 0x324   : > { %4022 = vmatpush1.bf16.msra.mxu0 %v11426_v0  ;;  %v11431_v0 = vld [vmem:[%s18938_s3 + $0x34] ss:$8 sps:$4 sm:$0xff]  }
 0x325   : > { %4023 = vmatprep.subr.bf16.mxu0 %v11431_v0  ;;  %v11434_v0 = vld [vmem:[%s18938_s3 + $0x24] ss:$8 sps:$4 sm:$0xff]  }
 0x34e   : > { %v2047_v39 = vpop.f32.mrf.mxu0 }
 0x350   : > { %v2049_v27 = vpop.f32.mrf.mxu0 }
 0x352   : > { %v1954_v37 = vpop.f32.mrf.mxu1  ;;  %v2051_v24 = vpop.f32.mrf.mxu0 }
 0x353   : > { %v1955_v35 = vadd.f32 %v1954_v37, %v13501_v19 }
 0x354   : > { %v1956_v40 = vpop.f32.mrf.mxu1  ;;  %v2053_v61 = vpop.f32.mrf.mxu0 }
 0x355   : > { %v13954_v18 = vadd.f32 %v2047_v39, %v1955_v35  ;;  %v1957_v59 = vadd.f32 %v1956_v40, %v13501_v19  ;;  %v13975_v40 = vadd.f32 %v1905_v52, %v1813_v1  ;;  %v13988_v1 = vadd.f32 %v13657_v57, %v1627_v34 }
 0x356   : > { %v1958_v37 = vpop.f32.mrf.mxu1  ;;  %v2057_v32 = vpop.f32.mrf.mxu0  ;;  %v1819_v57 = vadd.f32 %v1818_v53, %v13977_v43 }
 0x357   : > { %19306 = vst [vmem:[#allocation29_spill] sm:$0xff] %v13954_v18  ;;  %v13966_v35 = vadd.f32 %v2049_v27, %v1957_v59  ;;  %v1959_v39 = vadd.f32 %v1958_v37, %v13496_v6  ;;  %v19024_v60 = vmax.f32 %v13954_v18, 0.0  ;;  %19310 = vst [vmem:[#allocation33_spill] sm:$0xff] %v13988_v1 }
 0x358   : > { %v1960_v15 = vpop.f32.mrf.mxu1  ;;  %v2059_v56 = vpop.f32.mrf.mxu0  ;;  %v14017_v53 = vadd.f32 %v13930_v26, %v1819_v57  ;;  %v11429_v57 = vld [vmem:[%s18938_s3 + $0x30] ss:$8 sps:$4 sm:$0xff]  }
 0x359   : > { %19308 = vst [vmem:[#allocation31_spill] sm:$0xff] %v13966_v35  ;;  %v19023_v59 = vmax.f32 %v13966_v35, 0.0  ;;  %v13981_v16 = vadd.f32 %v2051_v24, %v1959_v39  ;;  %v1961_v28 = vadd.f32 %v1960_v15, %v13496_v6  ;;  %v13998_v15 = vpop.permute.xlu1 %10647  ;;  %4024 = vmatpush1.bf16.msra.mxu0 %v11429_v57  ;;  %v1633_v57 = vadd.f32 %v13708_v3, %v13977_v43 }
 0x35a   : > { %v1964_v27 = vpop.f32.mrf.mxu1  ;;  %v2061_v37 = vpop.f32.mrf.mxu0  ;;  %19312 = vst [vmem:[#allocation35_spill] sm:$0xff] %v14017_v53  ;;  %4025 = vmatprep.subr.bf16.mxu0 %v11434_v0 }
 0x35b   : > { %v10731_v24 = vpack.i.bf16 %v19023_v59, %v19024_v60  ;;  %v13995_v39 = vadd.f32 %v2053_v61, %v1961_v28  ;;  %v1965_v47 = vadd.f32 %v1964_v27, %v13529_v54  ;;  %v1635_v61 = vadd.f32 %v13712_v62, %v13977_v43 }
 0x35c   : > { %v1966_v51 = vpop.f32.mrf.mxu1  ;;  %v2063_v28 = vpop.f32.mrf.mxu0  ;;  %v19313_v27 = vmax.f32 %v13975_v40, 0.0 }
 0x35d   : > { %19311 = vst [vmem:[#allocation34_spill] sm:$0xff] %v13995_v39  ;;  %v19027_v59 = vmax.f32 %v13995_v39, 0.0  ;;  %v14012_v60 = vadd.f32 %v2057_v32, %v1965_v47  ;;  %v1967_v52 = vadd.f32 %v1966_v51, %v13529_v54  ;;  %10732 = vrot.lane.b32.xlu0 %v10731_v24, %s11977_s27  ;;  %v19314_v32 = vmax.f32 %v13962_v31, 0.0 }
 0x35e   : > { %v1968_v34 = vpop.f32.mrf.mxu1  ;;  %v2067_v35 = vpop.f32.mrf.mxu0  ;;  %v19315_v51 = vmax.f32 %v13981_v16, 0.0  ;;  %v14133_v31 = vadd.f32 %v13671_v9, %v1633_v57 }
 0x35f   : > { %v10736_v47 = vpack.i.bf16 %v19314_v32, %v19313_v27  ;;  %v14029_v22 = vadd.f32 %v2059_v56, %v1967_v52  ;;  %v1969_v26 = vadd.f32 %v1968_v34, %v13553_v36  ;;  %v1821_v27 = vadd.f32 %v13934_v20, %v13977_v43  ;;  %v14052_v20 = vpop.permute.xlu1 %10652 }
 0x360   : > { %v10741_v24 = vpack.i.bf16 %v19027_v59, %v19315_v51  ;;  %v14041_v32 = vadd.f32 %v13676_v7, %v1635_v61  ;;  %v1639_v56 = vadd.f32 %v13718_v58, %v13944_v46  ;;  %v1970_v52 = vpop.f32.mrf.mxu1  ;;  %v2069_v51 = vpop.f32.mrf.mxu0  ;;  %v19030_v34 = vmax.f32 %v14012_v60, 0.0  ;;  %19329 = vst [vmem:[#allocation44_spill] sm:$0xff] %v14133_v31 }
 0x361   : > { %19316 = vst [vmem:[#allocation36_spill] sm:$0xff] %v14029_v22  ;;  %v19029_v59 = vmax.f32 %v14029_v22, 0.0  ;;  %v14047_v18 = vadd.f32 %v2061_v37, %v1969_v26  ;;  %v1971_v62 = vadd.f32 %v1970_v52, %v13553_v36  ;;  %10737 = vrot.lane.b32.xlu0 %v10736_v47, %s11977_s27  ;;  %v14056_v58 = vadd.f32 %v13932_v11, %v1821_v27  ;;  %v11432_v11 = vld [vmem:[%s18938_s3 + $0x20] ss:$8 sps:$4 sm:$0xff]  }
 0x362   : > { %19317 = vst [vmem:[#allocation37_spill] sm:$0xff] %v14041_v32  ;;  %10742 = vrot.lane.b32.xlu1 %v10741_v24, %s11977_s27  ;;  %v1974_v61 = vpop.f32.mrf.mxu1  ;;  %v2071_v39 = vpop.f32.mrf.mxu0  ;;  %v19320_v24 = vmax.f32 %v13985_v21, 0.0  ;;  %v19321_v52 = vmax.f32 %v13988_v1, 0.0  ;;  %v14079_v27 = vadd.f32 %v13687_v10, %v1639_v56  ;;  %v1823_v10 = vadd.f32 %v13938_v33, %v13944_v46  ;;  %4026 = vmatpush1.bf16.msra.mxu0 %v11432_v11 }
 0x363   : > { %19318 = vst [vmem:[#allocation38_spill] sm:$0xff] %v14056_v58  ;;  %v10751_v37 = vpack.i.bf16 %v19029_v59, %v19030_v34  ;;  %v14062_v26 = vadd.f32 %v2063_v28, %v1971_v62  ;;  %v1975_v47 = vadd.f32 %v1974_v61, %v13520_v29  ;;  %v1825_v28 = vadd.f32 %v13942_v17, %v13944_v46 }
 0x364   : > { %v10746_v7 = vpack.i.bf16 %v19321_v52, %v19320_v24  ;;  %v19032_v62 = vmax.f32 %v14041_v32, 0.0  ;;  %19322 = vst [vmem:[#allocation40_spill] sm:$0xff] %v14079_v27  ;;  %v1976_v61 = vpop.f32.mrf.mxu1  ;;  %v2073_v59 = vpop.f32.mrf.mxu0  ;;  %v19323_v17 = vmax.f32 %v14017_v53, 0.0  ;;  %v19035_v56 = vmax.f32 %v14056_v58, 0.0 }
 0x365   : > { %19319 = vst [vmem:[#allocation39_spill] sm:$0xff] %v14062_v26  ;;  %v14085_v34 = vadd.f32 %v2067_v35, %v1975_v47  ;;  %v1977_v22 = vadd.f32 %v1976_v61, %v13520_v29  ;;  %10752 = vrot.lane.b32.xlu0 %v10751_v37, %s11977_s27  ;;  %v1637_v35 = vadd.f32 %v13714_v13, %v13944_v46  ;;  %v19326_v33 = vmax.f32 %v14062_v26, 0.0  ;;  %v11435_v13 = vld [vmem:[%s18938_s3 + $0x10] ss:$8 sps:$4 sm:$0xff]  }
 0x366   : > { %10747 = vrot.lane.b32.xlu1 %v10746_v7, %s11977_s27  ;;  %v10756_v3 = vpack.i.bf16 %v19323_v17, %v19032_v62  ;;  %v1978_v24 = vpop.f32.mrf.mxu1  ;;  %v2077_v52 = vpop.f32.mrf.mxu0  ;;  %v14100_v37 = vadd.f32 %v13940_v45, %v1825_v28  ;;  %v19325_v7 = vmax.f32 %v14047_v18, 0.0  ;;  %v11437_v45 = vld [vmem:[%s18938_s3 + $0x14] ss:$8 sps:$4 sm:$0xff]   ;;  %v19036_v0 = vmax.f32 %v14079_v27, 0.0 }
 0x367   : > { %v14106_v61 = vadd.f32 %v2069_v51, %v1977_v22  ;;  %v1979_v17 = vadd.f32 %v1978_v24, %v13582_v5  ;;  %v14109_v62 = vpop.permute.xlu1 %10657  ;;  %v14119_v28 = vadd.f32 %v13936_v49, %v1823_v10  ;;  %v19037_v24 = vmax.f32 %v14085_v34, 0.0  ;;  %4027 = vmatprep.subr.bf16.mxu0 %v11437_v45 }
 0x368   : > { %19324 = vst [vmem:[#allocation41_spill] sm:$0xff] %v14100_v37  ;;  %v10761_v47 = vpack.i.bf16 %v19326_v33, %v19325_v7  ;;  %v1980_v22 = vpop.f32.mrf.mxu1  ;;  %v2079_v51 = vpop.f32.mrf.mxu0  ;;  %v10766_v49 = vpack.i.bf16 %v19036_v0, %v19035_v56  ;;  %v14136_v7 = vadd.f32 %v13680_v2, %v1637_v35  ;;  %4028 = vmatpush1.bf16.msra.mxu0 %v11435_v13  ;;  %v11438_v2 = vld [vmem:[%s18938_s3] ss:$8 sps:$4 sm:$0xff]   ;;  %v11440_v35 = vld [vmem:[%s18938_s3 + $0x4] ss:$8 sps:$4 sm:$0xff]  }
 0x369   : > { %19327 = vst [vmem:[#allocation42_spill] sm:$0xff] %v14106_v61  ;;  %19328 = vst [vmem:[#allocation43_spill] sm:$0xff] %v14119_v28  ;;  %v14123_v11 = vadd.f32 %v2071_v39, %v1979_v17  ;;  %v1981_v33 = vadd.f32 %v1980_v22, %v13582_v5  ;;  %10757 = vrot.lane.b32.xlu0 %v10756_v3, %s11977_s27  ;;  %v19331_v3 = vmax.f32 %v14106_v61, 0.0  ;;  %4029 = vmatprep.subr.bf16.mxu0 %v11440_v35  ;;  %v11443_v35 = vld [vmem:[%s18938_s3 + $0xf4] ss:$8 sps:$4 sm:$0xff]  }
 0x36a   : > { %10762 = vrot.lane.b32.xlu1 %v10761_v47, %s11977_s27  ;;  %v1984_v10 = vpop.f32.mrf.mxu1  ;;  %v2081_v26 = vpop.f32.mrf.mxu0  ;;  %19330 = vst [vmem:[#allocation45_spill] sm:$0xff] %v14136_v7 }
 0x36b   : > { %v10771_v47 = vpack.i.bf16 %v19331_v3, %v19037_v24  ;;  %v14143_v17 = vadd.f32 %v2073_v59, %v1981_v33  ;;  %v1985_v22 = vadd.f32 %v1984_v10, %v13555_v14  ;;  %v14146_v56 = vpop.permute.xlu0 %10662  ;;  %v19333_v33 = vmax.f32 %v14119_v28, 0.0  ;;  %v11441_v59 = vld [vmem:[%s18938_s3 + $0xf0] ss:$8 sps:$4 sm:$0xff]  }
 0x36c   : > { %v1986_v9 = vpop.f32.mrf.mxu1  ;;  %v2083_v57 = vpop.f32.mrf.mxu0  ;;  %v19335_v61 = vmax.f32 %v14123_v11, 0.0  ;;  %4030 = vmatpush1.bf16.msra.mxu0 %v11438_v2  ;;  %v19340_v28 = vunpack.i.l.bf16 %v14146_v56 }
 0x36d   : > { %19332 = vst [vmem:[#allocation46_spill] sm:$0xff] %v14143_v17  ;;  %v1987_v10 = vadd.f32 %v1986_v9, %v13555_v14  ;;  %10772 = vrot.lane.b32.xlu0 %v10771_v47, %s11977_s27  ;;  %v14160_v13 = vpop.permute.xlu1 %10667  ;;  %v14162_v3 = vadd.f32 %v2077_v52, %v1985_v22  ;;  %v19334_v9 = vmax.f32 %v14100_v37, 0.0  ;;  %v19336_v52 = vmax.f32 %v14143_v17, 0.0  ;;  %4031 = vmatprep.subr.bf16.mxu0 %v11443_v35 }
 0x36e   : > { %10767 = vrot.lane.b32.xlu1 %v10766_v49, %s11977_s27  ;;  %v1988_v24 = vpop.f32.mrf.mxu1  ;;  %v2087_v39 = vpop.f32.mrf.mxu0  ;;  %v10645_v49 = vunpack.i.h.bf16 %v13964_v12  ;;  %v10644_v17 = vunpack.i.l.bf16 %v13964_v12  ;;  %v19345_v35 = vmax.f32 %v13512_v63, 0.0 }
 0x36f   : > { %v10776_v47 = vpack.i.bf16 %v19334_v9, %v19333_v33  ;;  %v10781_v22 = vpack.i.bf16 %v19336_v52, %v19335_v61  ;;  %v14183_v45 = vadd.f32 %v2079_v51, %v1987_v10  ;;  %v1989_v33 = vadd.f32 %v1988_v24, %v13608_v30 }
 0x370   : > { %v1990_v9 = vpop.f32.mrf.mxu1  ;;  %v2089_v37 = vpop.f32.mrf.mxu0  ;;  %v19338_v61 = vunpack.i.h.bf16 %v14160_v13  ;;  %4032 = vmatpush2.bf16.msra.mxu0 %v11441_v59  ;;  %v10649_v59 = vunpack.i.l.bf16 %v13998_v15 }
 0x371   : > { %19337 = vst [vmem:[#allocation47_spill] sm:$0xff] %v14183_v45  ;;  %v1991_v52 = vadd.f32 %v1990_v9, %v13608_v30  ;;  %v14191_v0 = vpop.permute.xlu0 %10672  ;;  %10777 = vrot.lane.b32.xlu0 %v10776_v47, %s11977_s27  ;;  %v19044_v24 = vmax.f32 %v14183_v45, 0.0  ;;  %v14197_v10 = vadd.f32 %v2081_v26, %v1989_v33  ;;  %v19342_v47 = vmax.f32 %v14133_v31, 0.0 }
 0x372   : > { %v2611_v2 = vsel %vm522_vm4, %v10645_v49, %v19338_v61  ;;  %10782 = vrot.lane.b32.xlu1 %v10781_v22, %s11977_s27  ;;  %v1994_v58 = vpop.f32.mrf.mxu1  ;;  %v2091_v12 = vpop.f32.mrf.mxu0  ;;  %v2605_v49 = vsel %vm522_vm4, %v10644_v17, %v19340_v28  ;;  %v19343_v22 = vmax.f32 %v14136_v7, 0.0  ;;  %v19344_v26 = vmax.f32 %v14162_v3, 0.0 }
 0x373   : > { %19339 = vst [vmem:[#allocation48_spill] sm:$0xff] %v14197_v10  ;;  %v14202_v9 = vadd.f32 %v2083_v57, %v1991_v52  ;;  %v1995_v61 = vadd.f32 %v1994_v58, %v13852_v8  ;;  %v14215_v27 = vmax.f32 %v19345_v35, %v2611_v2  ;;  %v11444_v58 = vld [vmem:[%s18938_s3 + $0xe0] ss:$8 sps:$4 sm:$0xff]   ;;  %v11446_v57 = vld [vmem:[%s18938_s3 + $0xe4] ss:$8 sps:$4 sm:$0xff]   ;;  %v19348_v2 = vld [vmem:[#allocation6_spill] sm:$0xff] }
 0x374   : > { %v10786_v51 = vpack.i.bf16 %v19343_v22, %v19342_v47  ;;  %v10791_v33 = vpack.i.bf16 %v19044_v24, %v19344_v26  ;;  %v1996_v28 = vpop.f32.mrf.mxu1  ;;  %v2093_v17 = vpop.f32.mrf.mxu0  ;;  %v19349_v26 = vmax.f32 %v19348_v2, 0.0  ;;  %4033 = vmatprep.subr.bf16.mxu0 %v11446_v57  ;;  %v11447_v57 = vld [vmem:[%s18938_s3 + $0xd0] ss:$8 sps:$4 sm:$0xff]  }
 0x375   : > { %19341 = vst [vmem:[#allocation49_spill] sm:$0xff] %v14202_v9  ;;  %19346 = vst [vmem:[#allocation50_spill] sm:$0xff] %v14215_v27  ;;  %v14225_v47 = vadd.f32 %v2087_v39, %v1995_v61  ;;  %v14227_v22 = vpop.permute.xlu0 %10677  ;;  %v14230_v63 = vpop.permute.xlu1 %10682  ;;  %v1997_v24 = vadd.f32 %v1996_v28, %v13852_v8  ;;  %v19352_v7 = vmax.f32 %v14202_v9, 0.0  ;;  %4034 = vmatpush2.bf16.msra.mxu0 %v11444_v58  ;;  %v10650_v28 = vunpack.i.h.bf16 %v13998_v15 }
 0x376   : > { %10787 = vrot.lane.b32.xlu1 %v10786_v51, %s11977_s27  ;;  %v14234_v35 = vmax.f32 %v19349_v26, %v2605_v49  ;;  %10792 = vrot.lane.b32.xlu0 %v10791_v33, %s11977_s27  ;;  %v1998_v39 = vpop.f32.mrf.mxu1  ;;  %v2097_v61 = vpop.f32.mrf.mxu0  ;;  %v19351_v51 = vmax.f32 %v14197_v10, 0.0  ;;  %v19354_v58 = vunpack.i.l.bf16 %v14227_v22 }
 0x377   : > { %19347 = vst [vmem:[#allocation51_spill] sm:$0xff] %v14225_v47  ;;  %v1999_v49 = vadd.f32 %v1998_v39, %v13859_v55  ;;  %v14247_v26 = vadd.f32 %v2089_v37, %v1997_v24 }
 0x378   : > { %19350 = vst [vmem:[#allocation6_spill] sm:$0xff] %v14234_v35  ;;  %v10801_v2 = vpack.i.bf16 %v19352_v7, %v19351_v51  ;;  %v2000_v33 = vpop.f32.mrf.mxu1  ;;  %v2099_v45 = vpop.f32.mrf.mxu0  ;;  %v10796_v52 = vpack.i.bf16 %v14215_v27, %v14234_v35  ;;  %v11449_v7 = vld [vmem:[%s18938_s3 + $0xd4] ss:$8 sps:$4 sm:$0xff]   ;;  %v2617_v15 = vsel %vm522_vm4, %v10649_v59, %v19354_v58  ;;  %v19355_v51 = vunpack.i.h.bf16 %v14230_v63 }
 0x379   : > { %19353 = vst [vmem:[#allocation52_spill] sm:$0xff] %v14247_v26  ;;  %v14261_v37 = vpop.permute.xlu0 %10687  ;;  %v19053_v24 = vmax.f32 %v14247_v26, 0.0  ;;  %v14268_v27 = vadd.f32 %v2091_v12, %v1999_v49  ;;  %v2001_v35 = vadd.f32 %v2000_v33, %v13859_v55  ;;  %4035 = vmatprep.subr.bf16.mxu0 %v11449_v7  ;;  %v19357_v58 = vmax.f32 %v14225_v47, 0.0  ;;  %v19359_v33 = vld [vmem:[#allocation9_spill] sm:$0xff] }
 0x37a   : > { %10802 = vrot.lane.b32.xlu1 %v10801_v2, %s11977_s27  ;;  %v2623_v9 = vsel %vm522_vm4, %v10650_v28, %v19355_v51  ;;  %10797 = vrot.lane.b32.xlu0 %v10796_v52, %s11975_s25  ;;  %v2004_v39 = vpop.f32.mrf.mxu1  ;;  %v2101_v31 = vpop.f32.mrf.mxu0  ;;  %v19360_v51 = vmax.f32 %v19359_v33, 0.0  ;;  %v19362_v7 = vmax.f32 %v13567_v48, 0.0  ;;  %v19365_v33 = vunpack.i.l.bf16 %v14160_v13 }
 0x37b   : > { %19356 = vst [vmem:[#allocation53_spill] sm:$0xff] %v14268_v27  ;;  %v2005_v59 = vadd.f32 %v2004_v39, %v13977_v43  ;;  %4036 = vmatpush2.bf16.msra.mxu0 %v11447_v57  ;;  %v10806_v32 = vpack.i.bf16 %v19053_v24, %v19357_v58  ;;  %v14278_v28 = vadd.f32 %v2093_v17, %v2001_v35  ;;  %v11450_v17 = vld [vmem:[%s18938_s3 + $0xc0] ss:$8 sps:$4 sm:$0xff]   ;;  %v11452_v35 = vld [vmem:[%s18938_s3 + $0xc4] ss:$8 sps:$4 sm:$0xff]   ;;  %v19057_v48 = vmax.f32 %v14268_v27, 0.0 }
 0x37c   : > { %v2006_v12 = vpop.f32.mrf.mxu1  ;;  %v2103_v49 = vpop.f32.mrf.mxu0  ;;  %v14282_v52 = vmax.f32 %v19360_v51, %v2617_v15  ;;  %v14286_v1 = vmax.f32 %v19362_v7, %v2623_v9  ;;  %v10665_v15 = vunpack.i.h.bf16 %v14146_v56  ;;  %4037 = vmatprep.subr.bf16.mxu0 %v11452_v35  ;;  %v19366_v35 = vunpack.i.l.bf16 %v14146_v56 }
 0x37d   : > { %19358 = vst [vmem:[#allocation54_spill] sm:$0xff] %v14278_v28  ;;  %v14288_v57 = vadd.f32 %v2097_v61, %v2005_v59  ;;  %v2007_v39 = vadd.f32 %v2006_v12, %v13977_v43  ;;  %v14291_v2 = vpop.permute.xlu0 %10692  ;;  %v19056_v9 = vmax.f32 %v14278_v28, 0.0  ;;  %v14305_v12 = vpop.permute.xlu1 %10697 }
 0x37e   : > { %19361 = vst [vmem:[#allocation9_spill] sm:$0xff] %v14282_v52  ;;  %19363 = vst [vmem:[#allocation55_spill] sm:$0xff] %v14286_v1  ;;  %10807 = vrot.lane.b32.xlu0 %v10806_v32, %s11977_s27  ;;  %v2008_v61 = vpop.f32.mrf.mxu1  ;;  %v10252_v59 = vpop.f32.mrf.mxu0  ;;  %v2607_v51 = vsel %vm522_vm4, %v10665_v15, %v19365_v33  ;;  %v10811_v47 = vpack.i.bf16 %v14286_v1, %v14282_v52  ;;  %v11453_v33 = vld [vmem:[%s18938_s3 + $0xb0] ss:$8 sps:$4 sm:$0xff]  }
 0x37f   : > { %v14303_v58 = vadd.f32 %v2099_v45, %v2007_v39  ;;  %v10816_v7 = vpack.i.bf16 %v19056_v9, %v19057_v48  ;;  %v2009_v24 = vadd.f32 %v2008_v61, %v13944_v46  ;;  %4038 = vmatpush2.bf16.msra.mxu0 %v11450_v17  ;;  %v11455_v61 = vld [vmem:[%s18938_s3 + $0xb4] ss:$8 sps:$4 sm:$0xff]   ;;  %v10654_v9 = vunpack.i.l.bf16 %v14052_v20 }
 0x380   : > { %v2010_v26 = vpop.f32.mrf.mxu1  ;;  %v10253_v32 = vpop.f32.mrf.mxu0  ;;  %v2606_v45 = vsel %vm522_vm4, %v19366_v35, %v10665_v15  ;;  %v19367_v28 = vmax.f32 %v14288_v57, 0.0  ;;  %v10655_v17 = vunpack.i.h.bf16 %v14052_v20  ;;  %4039 = vmatprep.subr.bf16.mxu0 %v11455_v61  ;;  %v19371_v35 = vunpack.i.l.bf16 %v14291_v2 }
 0x381   : > { %19364 = vst [vmem:[#allocation56_spill] sm:$0xff] %v14303_v58  ;;  %10817 = vrot.lane.b32.xlu1 %v10816_v7, %s11977_s27  ;;  %v19368_v1 = vmax.f32 %v14303_v58, 0.0  ;;  %v14336_v27 = vadd.f32 %v2101_v31, %v2009_v24  ;;  %v2011_v21 = vadd.f32 %v2010_v26, %v13944_v46  ;;  %v19369_v7 = vmax.f32 %v13731_v25, 0.0 }
 0x382   : > { %v10255_v48 = vpop.f32.mrf.mxu0  ;;  %v2221_v39 = vpop.f32.mrf.mxu1  ;;  %10812 = vrot.lane.b32.xlu0 %v10811_v47, %s11975_s25  ;;  %v10254_v56 = vadd.f32 %v10253_v32, %v10252_v59  ;;  %v19373_v47 = vmax.f32 %v13725_v41, 0.0  ;;  %v19374_v25 = vunpack.i.h.bf16 %v14305_v12  ;;  %v19081_v32 = vunpack.i.h.bf16 %v14191_v0  ;;  %v11456_v41 = vld [vmem:[%s18938_s3 + $0xa0] ss:$8 sps:$4 sm:$0xff]  }
 0x383   : > { %v10821_v52 = vpack.i.bf16 %v19368_v1, %v19367_v28  ;;  %v14343_v10 = vmax.f32 %v19369_v7, %v2607_v51  ;;  %v2629_v1 = vsel %vm522_vm4, %v10654_v9, %v19371_v35  ;;  %v14348_v31 = vadd.f32 %v2103_v49, %v2011_v21  ;;  %4040 = vmatpush2.bf16.msra.mxu0 %v11453_v33  ;;  %v19375_v49 = vld [vmem:[#allocation7_spill] sm:$0xff]  ;;  %v19378_v7 = vld [vmem:[#allocation10_spill] sm:$0xff] }
 0x384   : > { %v10256_v53 = vpop.f32.mrf.mxu0  ;;  %v2223_v15 = vpop.f32.mrf.mxu1  ;;  %v14352_v26 = vmax.f32 %v19373_v47, %v2606_v45  ;;  %v2635_v20 = vsel %vm522_vm4, %v10655_v17, %v19374_v25  ;;  %v2141_v28 = vadd.f32 %v10254_v56, %v13501_v19  ;;  %v19066_v9 = vmax.f32 %v14336_v27, 0.0 }
 0x385   : > { %19370 = vst [vmem:[#allocation57_spill] sm:$0xff] %v14343_v10  ;;  %19372 = vst [vmem:[#allocation58_spill] sm:$0xff] %v14348_v31  ;;  %v10257_v24 = vadd.f32 %v10256_v53, %v10255_v48  ;;  %v19065_v21 = vmax.f32 %v14348_v31, 0.0  ;;  %v11458_v53 = vld [vmem:[%s18938_s3 + $0xa4] ss:$8 sps:$4 sm:$0xff]   ;;  %v10674_v19 = vunpack.i.l.bf16 %v14191_v0  ;;  %v19376_v48 = vmax.f32 %v19375_v49, 0.0 }
 0x386   : > { %v10258_v59 = vpop.f32.mrf.mxu0  ;;  %v2224_v51 = vpop.f32.mrf.mxu1  ;;  %10822 = vrot.lane.b32.xlu0 %v10821_v52, %s11977_s27  ;;  %v10836_v52 = vpack.i.bf16 %v14343_v10, %v14352_v26  ;;  %v19379_v56 = vmax.f32 %v19378_v7, 0.0  ;;  %v14384_v47 = vadd.f32 %v2221_v39, %v2141_v28  ;;  %4041 = vmatprep.subr.bf16.mxu0 %v11458_v53  ;;  %v19408_v58 = vunpack.i.l.bf16 %v14160_v13 }
 0x387   : > { %v14371_v45 = vmax.f32 %v19376_v48, %v2629_v1  ;;  %v2144_v61 = vadd.f32 %v10257_v24, %v13496_v6  ;;  %v10826_v35 = vpack.i.bf16 %v19065_v21, %v19066_v9  ;;  %4042 = vmatpush2.bf16.msra.mxu0 %v11456_v41  ;;  %v19381_v24 = vunpack.i.h.bf16 %v14160_v13 }
 0x388   : > { %v10259_v33 = vpop.f32.mrf.mxu0  ;;  %v2226_v17 = vpop.f32.mrf.mxu1  ;;  %v14378_v15 = vmax.f32 %v19379_v56, %v2635_v20  ;;  %v2613_v39 = vsel %vm522_vm4, %v10674_v19, %v19081_v32  ;;  %v19067_v41 = vmax.f32 %v14384_v47, 0.0  ;;  %v11464_v56 = vld [vmem:[%s18938_s3 + $0x84] ss:$8 sps:$4 sm:$0xff]  }
 0x389   : > { %19377 = vst [vmem:[#allocation7_spill] sm:$0xff] %v14371_v45  ;;  %v10260_v1 = vadd.f32 %v10259_v33, %v10258_v59  ;;  %v14386_v6 = vadd.f32 %v2224_v51, %v2144_v61  ;;  %10827 = vrot.lane.b32.xlu1 %v10826_v35, %s11977_s27  ;;  %v2612_v20 = vsel %vm522_vm4, %v19381_v24, %v10674_v19  ;;  %v11459_v61 = vld [vmem:[%s18938_s3 + $0x90] ss:$8 sps:$4 sm:$0xff]   ;;  %v11461_v19 = vld [vmem:[%s18938_s3 + $0x94] ss:$8 sps:$4 sm:$0xff]   ;;  %v19382_v35 = vmax.f32 %v13728_v42, 0.0 }
 0x38a   : > { %19380 = vst [vmem:[#allocation10_spill] sm:$0xff] %v14378_v15  ;;  %v10261_v25 = vpop.f32.mrf.mxu0  ;;  %v2229_v49 = vpop.f32.mrf.mxu1  ;;  %10837 = vrot.lane.b32.xlu0 %v10836_v52, %s11975_s25  ;;  %v10841_v33 = vpack.i.bf16 %v14378_v15, %v14371_v45  ;;  %v10680_v52 = vunpack.i.h.bf16 %v14227_v22  ;;  %4043 = vmatprep.subr.bf16.mxu0 %v11461_v19  ;;  %v19421_v15 = vunpack.i.h.bf16 %v14191_v0 }
 0x38b   : > { %v2149_v59 = vadd.f32 %v10260_v1, %v13529_v54  ;;  %v19070_v51 = vmax.f32 %v14386_v6, 0.0  ;;  %v19080_v54 = vunpack.i.l.bf16 %v14230_v63  ;;  %v14414_v1 = vmax.f32 %v19382_v35, %v2612_v20  ;;  %4044 = vmatpush2.bf16.msra.mxu0 %v11459_v61 }
 0x38c   : > { %v10262_v28 = vpop.f32.mrf.mxu0  ;;  %v2231_v53 = vpop.f32.mrf.mxu1  ;;  %4045 = vmatprep.subr.bf16.mxu0 %v11464_v56  ;;  %v19073_v61 = vunpack.i.l.bf16 %v14305_v12  ;;  %v19386_v56 = vmax.f32 %v13761_v44, 0.0  ;;  %v11467_v44 = vld [vmem:[%s18938_s3 + $0x174] ss:$8 sps:$4 sm:$0xff]  }
 0x38d   : > { %v10263_v48 = vadd.f32 %v10262_v28, %v10261_v25  ;;  %v19383_v25 = vmax.f32 %v13749_v4, 0.0  ;;  %v10831_v28 = vpack.i.bf16 %v19070_v51, %v19067_v41  ;;  %v14425_v53 = vadd.f32 %v2229_v49, %v2149_v59  ;;  %v11462_v4 = vld [vmem:[%s18938_s3 + $0x80] ss:$8 sps:$4 sm:$0xff]   ;;  %4108 = vmatprep.subr.bf16.mxu1 %v11467_v44 }
 0x38e   : > { %v10264_v17 = vpop.f32.mrf.mxu0  ;;  %v2232_v7 = vpop.f32.mrf.mxu1  ;;  %10842 = vrot.lane.b32.xlu0 %v10841_v33, %s11975_s25  ;;  %v2619_v49 = vsel %vm522_vm4, %v10680_v52, %v19080_v54  ;;  %v10695_v33 = vunpack.i.h.bf16 %v14291_v2 }
 0x38f   : > { %v14418_v24 = vmax.f32 %v19383_v25, %v2613_v39  ;;  %v2152_v9 = vadd.f32 %v10263_v48, %v13553_v36  ;;  %10832 = vrot.lane.b32.xlu1 %v10831_v28, %s11977_s27  ;;  %v19385_v39 = vunpack.i.l.bf16 %v14227_v22  ;;  %v19068_v19 = vmax.f32 %v14425_v53, 0.0  ;;  %4046 = vmatpush2.bf16.msra.mxu0 %v11462_v4 }
 0x390   : > { %v10265_v21 = vpop.f32.mrf.mxu0  ;;  %v2234_v42 = vpop.f32.mrf.mxu1 }
 0x391   : > { %19384 = vst [vmem:[#allocation59_spill] sm:$0xff] %v14418_v24  ;;  %v10266_v20 = vadd.f32 %v10265_v21, %v10264_v17  ;;  %v2618_v35 = vsel %vm522_vm4, %v19385_v39, %v10680_v52  ;;  %v14438_v59 = vadd.f32 %v2232_v7, %v2152_v9  ;;  %v10851_v21 = vpack.i.bf16 %v14418_v24, %v14414_v1  ;;  %v19387_v42 = vld [vmem:[#allocation12_spill] sm:$0xff] }
 0x392   : > { %v10267_v36 = vpop.f32.mrf.mxu0  ;;  %v2237_v48 = vpop.f32.mrf.mxu1  ;;  %v10689_v9 = vunpack.i.l.bf16 %v14261_v37  ;;  %v14451_v28 = vmax.f32 %v19386_v56, %v2618_v35  ;;  %v19388_v39 = vmax.f32 %v19387_v42, 0.0  ;;  %v19390_v35 = vunpack.i.l.bf16 %v14291_v2  ;;  %v19409_v24 = vld [vmem:[#allocation4_spill] sm:$0xff] }
 0x393   : > { %v2157_v22 = vadd.f32 %v10266_v20, %v13520_v29  ;;  %v19069_v17 = vmax.f32 %v14438_v59, 0.0  ;;  %10852 = vrot.lane.b32.xlu1 %v10851_v21, %s11975_s25  ;;  %v19075_v29 = vunpack.i.h.bf16 %v14261_v37  ;;  %v2631_v21 = vsel %vm522_vm4, %v10695_v33, %v19073_v61 }
 0x394   : > { %v10268_v25 = vpop.f32.mrf.mxu0  ;;  %v2239_v52 = vpop.f32.mrf.mxu1  ;;  %v14455_v41 = vmax.f32 %v19388_v39, %v2619_v49  ;;  %v2630_v49 = vsel %vm522_vm4, %v19390_v35, %v10695_v33  ;;  %v19392_v33 = vmax.f32 %v13803_v38, 0.0  ;;  %v19410_v10 = vmax.f32 %v19409_v24, 0.0 }
 0x395   : > { %v10269_v7 = vadd.f32 %v10268_v25, %v10267_v36  ;;  %v10846_v4 = vpack.i.bf16 %v19069_v17, %v19068_v19  ;;  %v11465_v36 = vld [vmem:[%s18938_s3 + $0x170] ss:$8 sps:$4 sm:$0xff]   ;;  %v14474_v25 = vadd.f32 %v2237_v48, %v2157_v22  ;;  %v19391_v19 = vunpack.i.h.bf16 %v14230_v63 }
 0x396   : > { %19389 = vst [vmem:[#allocation12_spill] sm:$0xff] %v14455_v41  ;;  %v10270_v20 = vpop.f32.mrf.mxu0  ;;  %v2240_v52 = vpop.f32.mrf.mxu1  ;;  %4109 = vmatpush1.bf16.msra.mxu1 %v11465_v36  ;;  %v2625_v48 = vsel %vm522_vm4, %v10689_v9, %v19075_v29  ;;  %v19393_v22 = vmax.f32 %v13807_v23, 0.0  ;;  %v19395_v23 = vmax.f32 %v13764_v50, 0.0  ;;  %v11470_v50 = vld [vmem:[%s18938_s3 + $0x164] ss:$8 sps:$4 sm:$0xff]  }
 0x397   : > { %v2160_v56 = vadd.f32 %v10269_v7, %v13582_v5  ;;  %10847 = vrot.lane.b32.xlu0 %v10846_v4, %s11977_s27  ;;  %v2624_v17 = vsel %vm522_vm4, %v19391_v19, %v10689_v9  ;;  %v14488_v5 = vmax.f32 %v19392_v33, %v2630_v49  ;;  %v10856_v19 = vpack.i.bf16 %v14455_v41, %v14451_v28 }
 0x398   : > { %v10271_v42 = vpop.f32.mrf.mxu0  ;;  %v2242_v39 = vpop.f32.mrf.mxu1  ;;  %v14492_v7 = vmax.f32 %v19393_v22, %v2631_v21  ;;  %v19071_v36 = vmax.f32 %v14474_v25, 0.0  ;;  %v14504_v49 = vmax.f32 %v19395_v23, %v2624_v17  ;;  %v19396_v21 = vld [vmem:[#allocation13_spill] sm:$0xff]  ;;  %4110 = vmatprep.subr.bf16.mxu1 %v11470_v50 }
 0x399   : > { %v10272_v2 = vadd.f32 %v10271_v42, %v10270_v20  ;;  %v14481_v51 = vadd.f32 %v2240_v52, %v2160_v56  ;;  %v14496_v52 = vpop.permute.xlu0 %10702  ;;  %v19397_v56 = vmax.f32 %v19396_v21, 0.0 }
 0x39a   : > { %19394 = vst [vmem:[#allocation60_spill] sm:$0xff] %v14492_v7  ;;  %v10273_v4 = vpop.f32.mrf.mxu0  ;;  %v2245_v20 = vpop.f32.mrf.mxu1  ;;  %v19074_v17 = vunpack.i.h.bf16 %v14496_v52  ;;  %v10871_v22 = vpack.i.bf16 %v14492_v7, %v14488_v5 }
 0x39b   : > { %v19072_v44 = vmax.f32 %v14481_v51, 0.0  ;;  %v2165_v9 = vadd.f32 %v10272_v2, %v13555_v14  ;;  %10857 = vrot.lane.b32.xlu0 %v10856_v19, %s11975_s25  ;;  %v14508_v42 = vmax.f32 %v19397_v56, %v2625_v48  ;;  %v11468_v14 = vld [vmem:[%s18938_s3 + $0x160] ss:$8 sps:$4 sm:$0xff]   ;;  %v10704_v2 = vunpack.i.l.bf16 %v14496_v52  ;;  %v11471_v56 = vld [vmem:[%s18938_s3 + $0x150] ss:$8 sps:$4 sm:$0xff]  }
 0x39c   : > { %v10274_v38 = vpop.f32.mrf.mxu0  ;;  %v2247_v35 = vpop.f32.mrf.mxu1  ;;  %4111 = vmatpush1.bf16.msra.mxu1 %v11468_v14 }
 0x39d   : > { %19398 = vst [vmem:[#allocation13_spill] sm:$0xff] %v14508_v42  ;;  %v10861_v39 = vpack.i.bf16 %v19072_v44, %v19071_v36  ;;  %v10275_v33 = vadd.f32 %v10274_v38, %v10273_v4  ;;  %v11473_v4 = vld [vmem:[%s18938_s3 + $0x154] ss:$8 sps:$4 sm:$0xff]   ;;  %v14527_v38 = vadd.f32 %v2245_v20, %v2165_v9  ;;  %v10866_v20 = vpack.i.bf16 %v14508_v42, %v14504_v49 }
 0x39e   : > { %v10276_v48 = vpop.f32.mrf.mxu0  ;;  %v2248_v19 = vpop.f32.mrf.mxu1  ;;  %4112 = vmatprep.subr.bf16.mxu1 %v11473_v4  ;;  %v19399_v9 = vunpack.i.h.bf16 %v14305_v12 }
 0x39f   : > { %10862 = vrot.lane.b32.xlu1 %v10861_v39, %s11977_s27  ;;  %v2168_v35 = vadd.f32 %v10275_v33, %v13608_v30  ;;  %10872 = vrot.lane.b32.xlu0 %v10871_v22, %s11975_s25  ;;  %v2637_v39 = vsel %vm522_vm4, %v10704_v2, %v19074_v17  ;;  %v19078_v50 = vmax.f32 %v14527_v38, 0.0 }
 0x3a0   : > { %v10277_v23 = vpop.f32.mrf.mxu0  ;;  %v2250_v21 = vpop.f32.mrf.mxu1  ;;  %v2636_v30 = vsel %vm522_vm4, %v19399_v9, %v10704_v2  ;;  %4113 = vmatpush1.bf16.msra.mxu1 %v11471_v56  ;;  %v19402_v9 = vld [vmem:[#allocation17_spill] sm:$0xff] }
 0x3a1   : > { %v10278_v36 = vadd.f32 %v10277_v23, %v10276_v48  ;;  %v14535_v44 = vadd.f32 %v2248_v19, %v2168_v35  ;;  %v19400_v35 = vld [vmem:[#allocation15_spill] sm:$0xff]  ;;  %v19403_v61 = vmax.f32 %v19402_v9, 0.0  ;;  %v11485_v9 = vld [vmem:[%s18938_s3 + $0x114] ss:$8 sps:$4 sm:$0xff]  }
 0x3a2   : > { %v10279_v33 = vpop.f32.mrf.mxu0  ;;  %v2253_v14 = vpop.f32.mrf.mxu1  ;;  %v19401_v23 = vmax.f32 %v19400_v35, 0.0  ;;  %v11480_v35 = vld [vmem:[%s18938_s3 + $0x120] ss:$8 sps:$4 sm:$0xff]  }
 0x3a3   : > { %v19079_v48 = vmax.f32 %v14535_v44, 0.0  ;;  %10867 = vrot.lane.b32.xlu1 %v10866_v20, %s11975_s25  ;;  %v2173_v22 = vadd.f32 %v10278_v36, %v13852_v8  ;;  %v14555_v2 = vmax.f32 %v19403_v61, %v2637_v39  ;;  %v11474_v8 = vld [vmem:[%s18938_s3 + $0x140] ss:$8 sps:$4 sm:$0xff]   ;;  %v11476_v36 = vld [vmem:[%s18938_s3 + $0x144] ss:$8 sps:$4 sm:$0xff]  }
 0x3a4   : > { %v10280_v19 = vpop.f32.mrf.mxu0  ;;  %v2255_v4 = vpop.f32.mrf.mxu1  ;;  %v14551_v21 = vmax.f32 %v19401_v23, %v2636_v30  ;;  %v11479_v61 = vld [vmem:[%s18938_s3 + $0x134] ss:$8 sps:$4 sm:$0xff]   ;;  %4114 = vmatprep.subr.bf16.mxu1 %v11476_v36 }
 0x3a5   : > { %19404 = vst [vmem:[#allocation15_spill] sm:$0xff] %v14555_v2  ;;  %v10876_v17 = vpack.i.bf16 %v19079_v48, %v19078_v50  ;;  %v10281_v29 = vadd.f32 %v10280_v19, %v10279_v33  ;;  %v14570_v20 = vadd.f32 %v2253_v14, %v2173_v22  ;;  %4115 = vmatpush1.bf16.msra.mxu1 %v11474_v8  ;;  %v11477_v33 = vld [vmem:[%s18938_s3 + $0x130] ss:$8 sps:$4 sm:$0xff]   ;;  %v11482_v14 = vld [vmem:[%s18938_s3 + $0x124] ss:$8 sps:$4 sm:$0xff]  }
 0x3a6   : > { %v2256_v56 = vpop.f32.mrf.mxu1  ;;  %v10881_v4 = vpack.i.bf16 %v14555_v2, %v14551_v21  ;;  %4116 = vmatprep.subr.bf16.mxu1 %v11479_v61  ;;  %v11503_v36 = vld [vmem:[%s18938_s3 + $0x274] ss:$8 sps:$4 sm:$0xff]   ;;  %v11483_v61 = vld [vmem:[%s18938_s3 + $0x110] ss:$8 sps:$4 sm:$0xff]  }
 0x3a7   : > { %19405 = vst [vmem:[#allocation17_spill] sm:$0xff] %v14570_v20  ;;  %10877 = vrot.lane.b32.xlu1 %v10876_v17, %s11977_s27  ;;  %v2176_v30 = vadd.f32 %v10281_v29, %v13859_v55  ;;  %v19076_v55 = vmax.f32 %v14570_v20, 0.0  ;;  %4201 = vmatprep.subr.bf16.mxu0 %v11503_v36  ;;  %v11500_v36 = vld [vmem:[%s18938_s3 + $0x1c4] ss:$8 sps:$4 sm:$0xff]  }
 0x3a8   : > { %v2258_v39 = vpop.f32.mrf.mxu1 }
 0x3a9   : > { %v14577_v19 = vadd.f32 %v2256_v56, %v2176_v30  ;;  %4117 = vmatpush1.bf16.msra.mxu1 %v11477_v33  ;;  %v11488_v30 = vld [vmem:[%s18938_s3 + $0x104] ss:$8 sps:$4 sm:$0xff]   ;;  %v11486_v39 = vld [vmem:[%s18938_s3 + $0x100] ss:$8 sps:$4 sm:$0xff]   ;;  %v11491_v33 = vld [vmem:[%s18938_s3 + $0x1f4] ss:$8 sps:$4 sm:$0xff]  }
 0x3aa   : > { %v14584_v17 = vpop.f32.mrf.mxu1  ;;  %4118 = vmatprep.subr.bf16.mxu1 %v11482_v14  ;;  %v11494_v14 = vld [vmem:[%s18938_s3 + $0x1e4] ss:$8 sps:$4 sm:$0xff]  }
 0x3ab   : > { %19406 = vst [vmem:[#allocation61_spill] sm:$0xff] %v14577_v19  ;;  %v19077_v29 = vmax.f32 %v14577_v19, 0.0  ;;  %10882 = vrot.lane.b32.xlu1 %v10881_v4, %s11975_s25  ;;  %v11489_v4 = vld [vmem:[%s18938_s3 + $0x1f0] ss:$8 sps:$4 sm:$0xff]  }
 0x3ac   : > { %v2263_v22 = vpop.f32.mrf.mxu1 }
 0x3ad   : > { %v10886_v23 = vpack.i.bf16 %v19077_v29, %v19076_v55  ;;  %4119 = vmatpush1.bf16.msra.mxu1 %v11480_v35  ;;  %v11492_v22 = vld [vmem:[%s18938_s3 + $0x1e0] ss:$8 sps:$4 sm:$0xff]   ;;  %v11497_v35 = vld [vmem:[%s18938_s3 + $0x1d4] ss:$8 sps:$4 sm:$0xff]  }
 0x3ae   : > { %v14599_v8 = vpop.f32.mrf.mxu1  ;;  %4120 = vmatprep.subr.bf16.mxu1 %v11485_v9  ;;  %v11495_v9 = vld [vmem:[%s18938_s3 + $0x1d0] ss:$8 sps:$4 sm:$0xff]  }
 0x3af   : > { %10887 = vrot.lane.b32.xlu1 %v10886_v23, %s11977_s27  ;;  %v14629_v23 = vpop.permute.xlu0 %10707 }
 0x3b0   : > { %v2266_v56 = vpop.f32.mrf.mxu1  ;;  %v10709_v50 = vunpack.i.l.bf16 %v14629_v23 }
 0x3b1   : > { %4121 = vmatpush1.bf16.msra.mxu1 %v11483_v61  ;;  %v10282_v56 = vpop.f32.mrf.mxu0  ;;  %v11498_v61 = vld [vmem:[%s18938_s3 + $0x1c0] ss:$8 sps:$4 sm:$0xff]  }
 0x3b2   : > { %4122 = vmatprep.subr.bf16.mxu1 %v11488_v30 }
 0x3b3   : > { %v14640_v30 = vpop.permute.xlu0 %10717 }
 0x3b4   : > { %v10719_v55 = vunpack.i.l.bf16 %v14640_v30  ;;  %v19407_v41 = vunpack.i.h.bf16 %v14640_v30 }
 0x3b5   : > { %4123 = vmatpush1.bf16.msra.mxu1 %v11486_v39  ;;  %v11506_v39 = vld [vmem:[%s18938_s3 + $0x1b4] ss:$8 sps:$4 sm:$0xff]  }
 0x3b6   : > { %4124 = vmatprep.subr.bf16.mxu1 %v11491_v33  ;;  %v10283_v33 = vpop.f32.mrf.mxu0 }
 0x3b7   : > { %v10284_v31 = vadd.f32 %v10283_v33, %v10282_v56  ;;  %v19416_v33 = vld [vmem:[#allocation20_spill] sm:$0xff] }
 0x3b8   : > { %v11524_v56 = vld [vmem:[%s18938_s3 + $0x184] ss:$8 sps:$4 sm:$0xff]  }
 0x3b9   : > { %4125 = vmatpush2.bf16.msra.mxu1 %v11489_v4  ;;  %v11504_v4 = vld [vmem:[%s18938_s3 + $0x1b0] ss:$8 sps:$4 sm:$0xff]  }
 0x3ba   : > { %4126 = vmatprep.subr.bf16.mxu1 %v11494_v14  ;;  %v10285_v14 = vpop.f32.mrf.mxu0 }
 0x3bc   : > { %v10286_v29 = vpop.f32.mrf.mxu0 }
 0x3bd   : > { %4127 = vmatpush2.bf16.msra.mxu1 %v11492_v22  ;;  %v14648_v22 = vpop.permute.xlu1 %10712  ;;  %v10287_v7 = vadd.f32 %v10286_v29, %v10285_v14  ;;  %v19412_v29 = vld [vmem:[#allocation29_spill] sm:$0xff] }
 0x3be   : > { %4128 = vmatprep.subr.bf16.mxu1 %v11497_v35  ;;  %v14650_v35 = vpop.permute.xlu0 %10722  ;;  %v10715_v54 = vunpack.i.h.bf16 %v14648_v22  ;;  %v19413_v14 = vmax.f32 %v19412_v29, 0.0  ;;  %v19418_v29 = vld [vmem:[#allocation23_spill] sm:$0xff] }
 0x3c0   : > { %v2648_v42 = vsel %vm522_vm4, %v10715_v54, %v10719_v55 }
 0x3c1   : > { %4129 = vmatpush2.bf16.msra.mxu1 %v11495_v9  ;;  %v11510_v9 = vld [vmem:[%s18938_s3 + $0x1a0] ss:$8 sps:$4 sm:$0xff]   ;;  %v14662_v48 = vpop.permute.xlu1 %10727 }
 0x3c2   : > { %4130 = vmatprep.subr.bf16.mxu1 %v11500_v36  ;;  %v11512_v36 = vld [vmem:[%s18938_s3 + $0x1a4] ss:$8 sps:$4 sm:$0xff]  }
 0x3c5   : > { %4131 = vmatpush2.bf16.msra.mxu1 %v11498_v61 }
 0x3c6   : > { %4132 = vmatprep.subr.bf16.mxu1 %v11506_v39  ;;  %v10710_v39 = vunpack.i.h.bf16 %v14629_v23  ;;  %v2649_v23 = vsel %vm522_vm4, %v10719_v55, %v19407_v41 }
 0x3c8   : > { %v2642_v13 = vsel %vm522_vm4, %v10709_v50, %v10710_v39 }
 0x3c9   : > { %4133 = vmatpush2.bf16.msra.mxu1 %v11504_v4 }
 0x3ca   : > { %4134 = vmatprep.subr.bf16.mxu1 %v11512_v36 }
 0x3cd   : > { %4135 = vmatpush2.bf16.msra.mxu1 %v11510_v9 }
 0x3cf   : > { %v14664_v4 = vpop.permute.xlu0 %10732 }
 0x3d0   : > { %v19092_v2 = vunpack.i.h.bf16 %v14664_v4  ;;  %v10734_v61 = vunpack.i.l.bf16 %v14664_v4 }
 0x3d2   : > { %v2608_v36 = vsel %vm522_vm4, %v19408_v58, %v10734_v61  ;;  %v2609_v32 = vsel %vm522_vm4, %v10734_v61, %v19092_v2  ;;  %v19415_v58 = vunpack.i.l.bf16 %v14648_v22  ;;  %v19417_v61 = vmax.f32 %v19416_v33, 0.0 }
 0x3d3   : > { %v14682_v20 = vmax.f32 %v19410_v10, %v2608_v36  ;;  %v14686_v9 = vmax.f32 %v19413_v14, %v2609_v32  ;;  %v14688_v19 = vpop.permute.xlu0 %10737  ;;  %v11516_v10 = vld [vmem:[%s18938_s3 + $0x190] ss:$8 sps:$4 sm:$0xff]   ;;  %v11518_v32 = vld [vmem:[%s18938_s3 + $0x194] ss:$8 sps:$4 sm:$0xff]   ;;  %v19419_v14 = vmax.f32 %v19418_v29, 0.0 }
 0x3d4   : > { %v14690_v41 = vpop.permute.xlu1 %10742  ;;  %v2643_v55 = vsel %vm522_vm4, %v10710_v39, %v19415_v58  ;;  %v14706_v36 = vmax.f32 %v19417_v61, %v2648_v42  ;;  %v2184_v39 = vadd.f32 %v10287_v7, %v13944_v46  ;;  %4136 = vmatprep.subr.bf16.mxu1 %v11518_v32  ;;  %v2181_v46 = vadd.f32 %v10284_v31, %v13977_v43  ;;  %v19423_v7 = vld [vmem:[#allocation11_spill] sm:$0xff] }
 0x3d5   : > { %19411 = vst [vmem:[#allocation4_spill] sm:$0xff] %v14682_v20  ;;  %19414 = vst [vmem:[#allocation29_spill] sm:$0xff] %v14686_v9  ;;  %v10744_v24 = vunpack.i.l.bf16 %v14690_v41  ;;  %v14710_v2 = vmax.f32 %v19419_v14, %v2649_v23  ;;  %v10891_v58 = vpack.i.bf16 %v14686_v9, %v14682_v20  ;;  %v19422_v42 = vunpack.i.h.bf16 %v14690_v41  ;;  %v19429_v20 = vld [vmem:[#allocation21_spill] sm:$0xff]  ;;  %4137 = vmatpush2.bf16.msra.mxu1 %v11516_v10 }
 0x3d6   : > { %v10659_v23 = vunpack.i.l.bf16 %v14109_v62  ;;  %v19424_v61 = vmax.f32 %v19423_v7, 0.0  ;;  %v19425_v14 = vmax.f32 %v13981_v16, 0.0  ;;  %v19430_v43 = vmax.f32 %v19429_v20, 0.0  ;;  %4138 = vmatprep.subr.bf16.mxu1 %v11524_v56 }
 0x3d7   : > { %19420 = vst [vmem:[#allocation20_spill] sm:$0xff] %v14710_v2  ;;  %v2614_v45 = vsel %vm522_vm4, %v19421_v15, %v10744_v24  ;;  %v2615_v33 = vsel %vm522_vm4, %v10744_v24, %v19422_v42  ;;  %v14734_v0 = vpop.permute.xlu0 %10752  ;;  %10892 = vrot.lane.b32.xlu1 %v10891_v58, %s11975_s25  ;;  %v19427_v24 = vld [vmem:[#allocation19_spill] sm:$0xff]  ;;  %v10660_v7 = vunpack.i.h.bf16 %v14109_v62  ;;  %v14754_v58 = vadd.f32 %v14599_v8, %v2184_v39 }
 0x3d8   : > { %v14728_v29 = vmax.f32 %v19424_v61, %v2614_v45  ;;  %v14732_v9 = vmax.f32 %v19425_v14, %v2615_v33  ;;  %v14736_v15 = vpop.permute.xlu1 %10747  ;;  %v19428_v32 = vmax.f32 %v19427_v24, 0.0  ;;  %v14745_v31 = vmax.f32 %v19430_v43, %v2643_v55  ;;  %v11522_v33 = vld [vmem:[%s18938_s3 + $0x180] ss:$8 sps:$4 sm:$0xff]   ;;  %v19433_v14 = vld [vmem:[#allocation5_spill] sm:$0xff] }
 0x3d9   : > { %v19097_v45 = vunpack.i.h.bf16 %v14734_v0  ;;  %v10754_v16 = vunpack.i.l.bf16 %v14734_v0  ;;  %v2641_v55 = vsel %vm522_vm4, %v10659_v23, %v10709_v50  ;;  %v19432_v10 = vunpack.i.l.bf16 %v14230_v63  ;;  %4139 = vmatpush2.bf16.msra.mxu1 %v11522_v33 }
 0x3da   : > { %19426 = vst [vmem:[#allocation23_spill] sm:$0xff] %v14732_v9  ;;  %v14741_v42 = vmax.f32 %v19428_v32, %v2642_v13  ;;  %19431 = vst [vmem:[#allocation11_spill] sm:$0xff] %v14745_v31  ;;  %v10906_v13 = vpack.i.bf16 %v14710_v2, %v14706_v36  ;;  %v10896_v20 = vpack.i.bf16 %v14732_v9, %v14728_v29  ;;  %v19434_v24 = vmax.f32 %v19433_v14, 0.0 }
 0x3db   : > { %v2620_v61 = vsel %vm522_vm4, %v19432_v10, %v10754_v16  ;;  %v2621_v62 = vsel %vm522_vm4, %v10754_v16, %v19097_v45  ;;  %v2647_v8 = vsel %vm522_vm4, %v10660_v7, %v10715_v54  ;;  %v14769_v39 = vadd.f32 %v14584_v17, %v2181_v46  ;;  %v14779_v63 = vpop.permute.xlu0 %10757 }
 0x3dc   : > { %v14773_v32 = vmax.f32 %v19434_v24, %v2620_v61  ;;  %v19435_v56 = vmax.f32 %v14012_v60, 0.0  ;;  %v14781_v23 = vpop.permute.xlu1 %10762  ;;  %10907 = vrot.lane.b32.xlu1 %v10906_v13, %s11975_s25  ;;  %v10725_v43 = vunpack.i.h.bf16 %v14650_v35  ;;  %10897 = vrot.lane.b32.xlu0 %v10896_v20, %s11975_s25  ;;  %v10901_v46 = vpack.i.bf16 %v14745_v31, %v14741_v42 }
 0x3dd   : > { %v19098_v54 = vunpack.i.h.bf16 %v14781_v23  ;;  %v10764_v17 = vunpack.i.l.bf16 %v14781_v23  ;;  %v10739_v7 = vunpack.i.l.bf16 %v14688_v19  ;;  %v19101_v24 = vmax.f32 %v14769_v39, 0.0 }
 0x3de   : > { %v14777_v50 = vmax.f32 %v19435_v56, %v2621_v62  ;;  %v19437_v62 = vunpack.i.h.bf16 %v14261_v37  ;;  %v19438_v56 = vld [vmem:[#allocation14_spill] sm:$0xff]  ;;  %v19440_v10 = vmax.f32 %v14047_v18, 0.0  ;;  %v19443_v18 = vunpack.i.h.bf16 %v14662_v48 }
 0x3df   : > { %v2627_v33 = vsel %vm522_vm4, %v10764_v17, %v19098_v54  ;;  %v19439_v45 = vmax.f32 %v19438_v56, 0.0  ;;  %v14813_v61 = vpop.permute.xlu0 %10772  ;;  %v19445_v54 = vld [vmem:[#allocation8_spill] sm:$0xff] }
 0x3e0   : > { %19436 = vst [vmem:[#allocation19_spill] sm:$0xff] %v14777_v50  ;;  %v10911_v13 = vpack.i.bf16 %v14777_v50, %v14773_v32  ;;  %v2626_v20 = vsel %vm522_vm4, %v19437_v62, %v10764_v17  ;;  %v14811_v60 = vmax.f32 %v19440_v10, %v2627_v33  ;;  %v14815_v37 = vpop.permute.xlu1 %10767  ;;  %v10774_v62 = vunpack.i.l.bf16 %v14813_v61  ;;  %10902 = vrot.lane.b32.xlu0 %v10901_v46, %s11975_s25  ;;  %v19447_v46 = vld [vmem:[#allocation3_spill] sm:$0xff] }
 0x3e1   : > { %v14807_v16 = vmax.f32 %v19439_v45, %v2626_v20  ;;  %v19442_v45 = vmax.f32 %v14754_v58, 0.0  ;;  %v2660_v10 = vsel %vm522_vm4, %v19443_v18, %v10739_v7  ;;  %v19444_v33 = vunpack.i.h.bf16 %v14688_v19 }
 0x3e2   : > { %19441 = vst [vmem:[#allocation21_spill] sm:$0xff] %v14811_v60  ;;  %10912 = vrot.lane.b32.xlu1 %v10911_v13, %s11975_s25  ;;  %v19446_v14 = vmax.f32 %v19445_v54, 0.0  ;;  %v19448_v50 = vmax.f32 %v19447_v46, 0.0  ;;  %v19451_v18 = vunpack.i.h.bf16 %v14813_v61  ;;  %v19453_v54 = vunpack.i.l.bf16 %v14662_v48 }
 0x3e3   : > { %v10926_v20 = vpack.i.bf16 %v19442_v45, %v19101_v24  ;;  %v2661_v56 = vsel %vm522_vm4, %v10739_v7, %v19444_v33  ;;  %v10916_v13 = vpack.i.bf16 %v14811_v60, %v14807_v16  ;;  %v19450_v45 = vunpack.i.l.bf16 %v14305_v12 }
 0x3e4   : > { %v14835_v17 = vmax.f32 %v19446_v14, %v2641_v55  ;;  %v14839_v9 = vmax.f32 %v19448_v50, %v2647_v8  ;;  %v2633_v2 = vsel %vm522_vm4, %v10774_v62, %v19451_v18  ;;  %v19452_v7 = vunpack.i.l.bf16 %v14650_v35  ;;  %v19454_v14 = vld [vmem:[#allocation16_spill] sm:$0xff]  ;;  %v14863_v60 = vpop.permute.xlu1 %10782 }
 0x3e5   : > { %v2632_v24 = vsel %vm522_vm4, %v19450_v45, %v10774_v62  ;;  %v2655_v55 = vsel %vm522_vm4, %v10725_v43, %v19453_v54  ;;  %v19455_v46 = vmax.f32 %v19454_v14, 0.0  ;;  %v19457_v12 = vmax.f32 %v14085_v34, 0.0  ;;  %v14861_v45 = vpop.permute.xlu0 %10777  ;;  %v19459_v62 = vld [vmem:[#allocation27_spill] sm:$0xff]  ;;  %10917 = vrot.lane.b32.xlu0 %v10916_v13, %s11975_s25  ;;  %v19464_v14 = vld [vmem:[#allocation25_spill] sm:$0xff] }
 0x3e6   : > { %19449 = vst [vmem:[#allocation5_spill] sm:$0xff] %v14839_v9  ;;  %v2654_v33 = vsel %vm522_vm4, %v19452_v7, %v10725_v43  ;;  %10927 = vrot.lane.b32.xlu1 %v10926_v20, %s11977_s27  ;;  %v19460_v18 = vmax.f32 %v19459_v62, 0.0  ;;  %v19462_v43 = vmax.f32 %v13975_v40, 0.0  ;;  %v10784_v34 = vunpack.i.l.bf16 %v14863_v60  ;;  %v19468_v62 = vld [vmem:[#allocation26_spill] sm:$0xff] }
 0x3e7   : > { %v14855_v8 = vmax.f32 %v19455_v46, %v2632_v24  ;;  %v14859_v50 = vmax.f32 %v19457_v12, %v2633_v2  ;;  %v19105_v24 = vunpack.i.h.bf16 %v14863_v60  ;;  %v19465_v46 = vmax.f32 %v19464_v14, 0.0  ;;  %v19471_v14 = vld [vmem:[#allocation18_spill] sm:$0xff] }
 0x3e8   : > { %v14868_v7 = vmax.f32 %v19460_v18, %v2660_v10  ;;  %v14872_v54 = vmax.f32 %v19462_v43, %v2661_v56  ;;  %v19467_v10 = vunpack.i.h.bf16 %v14496_v52  ;;  %v10921_v56 = vpack.i.bf16 %v14839_v9, %v14835_v17 }
 0x3e9   : > { %19456 = vst [vmem:[#allocation14_spill] sm:$0xff] %v14855_v8  ;;  %19458 = vst [vmem:[#allocation8_spill] sm:$0xff] %v14859_v50  ;;  %v10931_v2 = vpack.i.bf16 %v14859_v50, %v14855_v8  ;;  %v14881_v20 = vmax.f32 %v19465_v46, %v2654_v33  ;;  %v2639_v40 = vsel %vm522_vm4, %v10784_v34, %v19105_v24  ;;  %v19469_v13 = vmax.f32 %v19468_v62, 0.0  ;;  %v10788_v50 = vpop.permute.xlu1 %10787  ;;  %v14908_v62 = vpop.permute.xlu0 %10792  ;;  %v19496_v8 = vld [vmem:[#allocation33_spill] sm:$0xff] }
 0x3ea   : > { %19461 = vst [vmem:[#allocation3_spill] sm:$0xff] %v14868_v7  ;;  %19463 = vst [vmem:[#allocation16_spill] sm:$0xff] %v14872_v54  ;;  %v2638_v12 = vsel %vm522_vm4, %v19467_v10, %v10784_v34  ;;  %v19110_v43 = vunpack.i.l.bf16 %v14815_v37  ;;  %v19472_v33 = vmax.f32 %v19471_v14, 0.0  ;;  %v19474_v52 = vmax.f32 %v14123_v11, 0.0  ;;  %10922 = vrot.lane.b32.xlu0 %v10921_v56, %s11975_s25 }
 0x3eb   : > { %19466 = vst [vmem:[#allocation27_spill] sm:$0xff] %v14881_v20  ;;  %v14893_v18 = vmax.f32 %v19469_v13, %v2655_v55  ;;  %10932 = vrot.lane.b32.xlu1 %v10931_v2, %s11975_s25  ;;  %v10750_v34 = vunpack.i.h.bf16 %v14736_v15  ;;  %v10749_v24 = vunpack.i.l.bf16 %v14736_v15  ;;  %v10760_v55 = vunpack.i.h.bf16 %v14779_v63 }
 0x3ec   : > { %v14898_v46 = vmax.f32 %v19472_v33, %v2638_v12  ;;  %v14902_v10 = vmax.f32 %v19474_v52, %v2639_v40  ;;  %v10946_v12 = vpack.i.bf16 %v14872_v54, %v14868_v7  ;;  %v10759_v11 = vunpack.i.l.bf16 %v14779_v63  ;;  %v19477_v52 = vld [vmem:[#allocation22_spill] sm:$0xff] }
 0x3ed   : > { %19470 = vst [vmem:[#allocation25_spill] sm:$0xff] %v14893_v18  ;;  %v19111_v40 = vunpack.i.h.bf16 %v14908_v62  ;;  %v10794_v13 = vunpack.i.l.bf16 %v14908_v62  ;;  %v2667_v15 = vsel %vm522_vm4, %v10760_v55, %v19110_v43  ;;  %v19476_v14 = vunpack.i.l.bf16 %v14648_v22  ;;  %v14927_v63 = vpop.permute.xlu1 %10802  ;;  %v14941_v43 = vpop.permute.xlu0 %10797 }
 0x3ee   : > { %19473 = vst [vmem:[#allocation26_spill] sm:$0xff] %v14898_v46  ;;  %19475 = vst [vmem:[#allocation18_spill] sm:$0xff] %v14902_v10  ;;  %v10936_v2 = vpack.i.bf16 %v14902_v10, %v14898_v46  ;;  %v19478_v54 = vmax.f32 %v19477_v52, 0.0  ;;  %v19480_v10 = vmax.f32 %v14162_v3, 0.0  ;;  %v19483_v52 = vunpack.i.h.bf16 %v14662_v48 }
 0x3ef   : > { %v2644_v56 = vsel %vm522_vm4, %v19476_v14, %v10794_v13  ;;  %v2645_v33 = vsel %vm522_vm4, %v10794_v13, %v19111_v40  ;;  %10947 = vrot.lane.b32.xlu1 %v10946_v12, %s11975_s25  ;;  %v10804_v14 = vunpack.i.l.bf16 %v14927_v63  ;;  %v19482_v13 = vunpack.i.l.bf16 %v14650_v35 }
 0x3f0   : > { %v14932_v31 = vmax.f32 %v19478_v54, %v2644_v56  ;;  %v14936_v7 = vmax.f32 %v19480_v10, %v2645_v33  ;;  %10937 = vrot.lane.b32.xlu0 %v10936_v2, %s11975_s25  ;;  %v2659_v54 = vsel %vm522_vm4, %v10750_v34, %v19483_v52  ;;  %v2666_v3 = vsel %vm522_vm4, %v10759_v11, %v10760_v55  ;;  %v19484_v56 = vld [vmem:[#allocation35_spill] sm:$0xff]  ;;  %v19489_v52 = vld [vmem:[#allocation24_spill] sm:$0xff] }
 0x3f1   : > { %v2653_v12 = vsel %vm522_vm4, %v10749_v24, %v19482_v13  ;;  %v10941_v10 = vpack.i.bf16 %v14893_v18, %v14881_v20  ;;  %v19485_v33 = vmax.f32 %v19484_v56, 0.0  ;;  %v19487_v2 = vunpack.i.h.bf16 %v14640_v30  ;;  %v19491_v56 = vld [vmem:[#allocation48_spill] sm:$0xff] }
 0x3f2   : > { %19479 = vst [vmem:[#allocation22_spill] sm:$0xff] %v14932_v31  ;;  %19481 = vst [vmem:[#allocation62_spill] sm:$0xff] %v14936_v7  ;;  %v19488_v35 = vunpack.i.h.bf16 %v14927_v63  ;;  %v10951_v34 = vpack.i.bf16 %v14936_v7, %v14932_v31  ;;  %v10790_v13 = vunpack.i.h.bf16 %v10788_v50  ;;  %v10789_v55 = vunpack.i.l.bf16 %v10788_v50  ;;  %v19494_v30 = vld [vmem:[#allocation32_spill] sm:$0xff] }
 0x3f3   : > { %v14954_v40 = vmax.f32 %v19485_v33, %v2667_v15  ;;  %v2650_v22 = vsel %vm522_vm4, %v19487_v2, %v10804_v14  ;;  %v19490_v46 = vmax.f32 %v19489_v52, 0.0  ;;  %v19492_v15 = vmax.f32 %v19491_v56, 0.0  ;;  %v19502_v52 = vld [vmem:[#allocation28_spill] sm:$0xff] }
 0x3f4   : > { %v2651_v24 = vsel %vm522_vm4, %v10804_v14, %v19488_v35  ;;  %v19495_v20 = vmax.f32 %v19494_v30, 0.0  ;;  %v19497_v9 = vmax.f32 %v19496_v8, 0.0  ;;  %v19498_v35 = vld [vmem:[#allocation37_spill] sm:$0xff]  ;;  %v10770_v50 = vunpack.i.h.bf16 %v14815_v37  ;;  %10952 = vrot.lane.b32.xlu1 %v10951_v34, %s11975_s25  ;;  %10942 = vrot.lane.b32.xlu0 %v10941_v10, %s11975_s25 }
 0x3f5   : > { %19486 = vst [vmem:[#allocation35_spill] sm:$0xff] %v14954_v40  ;;  %v14966_v18 = vmax.f32 %v19490_v46, %v2650_v22  ;;  %v14970_v33 = vmax.f32 %v19492_v15, %v2651_v24  ;;  %v19499_v7 = vmax.f32 %v19498_v35, 0.0  ;;  %v14987_v46 = vpop.permute.xlu0 %10807  ;;  %v10779_v22 = vunpack.i.l.bf16 %v14861_v45 }
 0x3f6   : > { %v14974_v2 = vmax.f32 %v19495_v20, %v2653_v12  ;;  %v14978_v14 = vmax.f32 %v19497_v9, %v2659_v54  ;;  %v19120_v20 = vunpack.i.h.bf16 %v14987_v46  ;;  %v10809_v8 = vunpack.i.l.bf16 %v14987_v46 }
 0x3f7   : > { %19493 = vst [vmem:[#allocation24_spill] sm:$0xff] %v14970_v33  ;;  %v14982_v31 = vmax.f32 %v19499_v7, %v2666_v3  ;;  %v10956_v9 = vpack.i.bf16 %v14970_v33, %v14966_v18  ;;  %v10780_v7 = vunpack.i.h.bf16 %v14861_v45  ;;  %v2665_v54 = vsel %vm522_vm4, %v10789_v55, %v10759_v11  ;;  %v19504_v45 = vld [vmem:[#allocation51_spill] sm:$0xff]  ;;  %v15013_v33 = vpop.permute.xlu1 %10817 }
 0x3f8   : > { %v2671_v3 = vsel %vm522_vm4, %v10790_v13, %v10770_v50  ;;  %v19501_v10 = vunpack.i.l.bf16 %v14662_v48  ;;  %v2657_v34 = vsel %vm522_vm4, %v10809_v8, %v19120_v20  ;;  %v19503_v56 = vmax.f32 %v19502_v52, 0.0 }
 0x3f9   : > { %19500 = vst [vmem:[#allocation48_spill] sm:$0xff] %v14982_v31  ;;  %v10966_v12 = vpack.i.bf16 %v14954_v40, %v14982_v31  ;;  %v19505_v30 = vmax.f32 %v19504_v45, 0.0  ;;  %10957 = vrot.lane.b32.xlu0 %v10956_v9, %s11975_s25  ;;  %v2672_v48 = vsel %vm522_vm4, %v10770_v50, %v10779_v22  ;;  %v19125_v11 = vunpack.i.h.bf16 %v15013_v33  ;;  %v15020_v55 = vpop.permute.xlu0 %10812 }
 0x3fa   : > { %v2656_v24 = vsel %vm522_vm4, %v19501_v10, %v10809_v8  ;;  %v10819_v13 = vunpack.i.l.bf16 %v15013_v33  ;;  %v10961_v8 = vpack.i.bf16 %v14978_v14, %v14974_v2  ;;  %v2673_v10 = vsel %vm522_vm4, %v10779_v22, %v10780_v7  ;;  %v19512_v22 = vld [vmem:[#allocation30_spill] sm:$0xff] }
 0x3fb   : > { %v15007_v15 = vmax.f32 %v19503_v56, %v2656_v24  ;;  %v15011_v35 = vmax.f32 %v19505_v30, %v2657_v34  ;;  %10967 = vrot.lane.b32.xlu1 %v10966_v12, %s11975_s25  ;;  %v19507_v24 = vld [vmem:[#allocation44_spill] sm:$0xff]  ;;  %v19509_v12 = vld [vmem:[#allocation45_spill] sm:$0xff]  ;;  %v19511_v45 = vunpack.i.h.bf16 %v14688_v19  ;;  %v19513_v40 = vmax.f32 %v19512_v22, 0.0  ;;  %v15078_v22 = vpop.permute.xlu1 %10827 }
 0x3fc   : > { %v19508_v34 = vmax.f32 %v19507_v24, 0.0  ;;  %v19510_v56 = vmax.f32 %v19509_v12, 0.0  ;;  %v2663_v20 = vsel %vm522_vm4, %v10819_v13, %v19125_v11 }
 0x3fd   : > { %19506 = vst [vmem:[#allocation32_spill] sm:$0xff] %v15011_v35  ;;  %v10971_v50 = vpack.i.bf16 %v15011_v35, %v15007_v15  ;;  %v2662_v30 = vsel %vm522_vm4, %v19511_v45, %v10819_v13  ;;  %10962 = vrot.lane.b32.xlu0 %v10961_v8, %s11975_s25  ;;  %v19520_v45 = vld [vmem:[#allocation43_spill] sm:$0xff]  ;;  %v15059_v13 = vpop.permute.xlu0 %10822 }
 0x3fe   : > { %v15027_v52 = vmax.f32 %v19508_v34, %v2665_v54  ;;  %v15031_v9 = vmax.f32 %v19510_v56, %v2671_v3  ;;  %v15043_v24 = vmax.f32 %v19513_v40, %v2662_v30  ;;  %v19514_v54 = vld [vmem:[#allocation53_spill] sm:$0xff]  ;;  %v19517_v3 = vld [vmem:[#allocation40_spill] sm:$0xff]  ;;  %v19521_v35 = vmax.f32 %v19520_v45, 0.0 }
 0x3ff   : > { %v19515_v34 = vmax.f32 %v19514_v54, 0.0  ;;  %10972 = vrot.lane.b32.xlu1 %v10971_v50, %s11975_s25  ;;  %v19518_v19 = vmax.f32 %v19517_v3, 0.0  ;;  %v19124_v40 = vunpack.i.h.bf16 %v15059_v13  ;;  %v10824_v30 = vunpack.i.l.bf16 %v15059_v13  ;;  %v19524_v54 = vld [vmem:[#allocation38_spill] sm:$0xff] }
 0x400   : > { %v15057_v31 = vmax.f32 %v19521_v35, %v2673_v10  ;;  %v10986_v8 = vpack.i.bf16 %v15031_v9, %v15027_v52  ;;  %v19523_v50 = vunpack.i.l.bf16 %v14815_v37  ;;  %v3480_v10 = vld [vmem:[%s18938_s3 + $0x320] sm:$0xff] }
 0x401   : > { %v15047_v12 = vmax.f32 %v19515_v34, %v2663_v20  ;;  %v15053_v56 = vmax.f32 %v19518_v19, %v2672_v48  ;;  %v2669_v35 = vsel %vm522_vm4, %v10824_v30, %v19124_v40  ;;  %v19525_v34 = vmax.f32 %v19524_v54, 0.0  ;;  %v15096_v54 = vpop.permute.xlu0 %10837 }
 0x402   : > { %19522 = vst [vmem:[#allocation28_spill] sm:$0xff] %v15057_v31  ;;  %v2668_v48 = vsel %vm522_vm4, %v19523_v50, %v10824_v30  ;;  %v19526_v19 = vmax.f32 %v14288_v57, 0.0  ;;  %v19129_v30 = vunpack.i.h.bf16 %v15078_v22  ;;  %v9890_v50 = vcombine.high %v3480_v10, %v3480_v10  ;;  %v19528_v57 = vld [vmem:[#allocation41_spill] sm:$0xff] }
 0x403   : > { %19516 = vst [vmem:[#allocation33_spill] sm:$0xff] %v15047_v12  ;;  %19519 = vst [vmem:[#allocation37_spill] sm:$0xff] %v15053_v56  ;;  %v10976_v20 = vpack.i.bf16 %v15047_v12, %v15043_v24  ;;  %10987 = vrot.lane.b32.xlu1 %v10986_v8, %s11975_s25  ;;  %v10981_v37 = vpack.i.bf16 %v15057_v31, %v15053_v56  ;;  %v15084_v3 = vmax.f32 %v19525_v34, %v2668_v48  ;;  %v11981_v40 = vmov 65535   ;;  %v10833_v56 = vpop.permute.xlu1 %10832 }
 0x404   : > { %v15088_v45 = vmax.f32 %v19526_v19, %v2669_v35  ;;  %v9889_v8 = vcombine.low %v3480_v10, %v3480_v10  ;;  %v4007_v11 = vsel %vm4005_vm8, 4294967295, %v11981_v40  ;;  %v19529_v35 = vmax.f32 %v19528_v57, 0.0 }
 0x405   : > { %10977 = vrot.lane.b32.xlu0 %v10976_v20, %s11975_s25  ;;  %v10829_v20 = vunpack.i.l.bf16 %v15078_v22  ;;  %v19531_v19 = vmax.f32 %v14336_v27, 0.0  ;;  %v10839_v31 = vunpack.i.l.bf16 %v15096_v54  ;;  %v10835_v57 = vunpack.i.h.bf16 %v10833_v56 }
 0x406   : > { %19527 = vst [vmem:[#allocation51_spill] sm:$0xff] %v15088_v45  ;;  %v10991_v40 = vpack.i.bf16 %v15088_v45, %v15084_v3  ;;  %v10799_v27 = vunpack.i.l.bf16 %v14941_v43  ;;  %vm7338_vm8 = vcmask 15360  }
 0x407   : > { %v2674_v12 = vsel %vm522_vm4, %v10780_v7, %v10829_v20  ;;  %v2675_v48 = vsel %vm522_vm4, %v10829_v20, %v19129_v30  ;;  %v4008_v7 = vsel %vm4006_vm9, %v4007_v11, 0  ;;  %v15118_v11 = vpop.permute.xlu0 %10842  ;;  %vm7346_vm9 = vcmask 646144  }
 0x408   : > { %v15101_v34 = vmax.f32 %v19529_v35, %v2674_v12  ;;  %v15105_v10 = vmax.f32 %v19531_v19, %v2675_v48  ;;  %v15112_v30 = vand.u32 %v9889_v8, %v4008_v7  ;;  %v10834_v12 = vunpack.i.l.bf16 %v10833_v56 }
 0x409   : > { %10982 = vrot.lane.b32.xlu0 %v10981_v37, %s11975_s25  ;;  %v4013_v37 = vand.u32 %v9890_v50, %v4008_v7  ;;  %v19533_v35 = vmax.f32 %v14386_v6, 0.0  ;;  %v19534_v8 = vunpack.i.h.bf16 %v14664_v4  ;;  %v19535_v56 = vunpack.i.h.bf16 %v14690_v41  ;;  %v19540_v6 = vld [vmem:[#allocation34_spill] sm:$0xff]  ;;  %v15143_v4 = vpop.permute.xlu1 %10852 }
 0x40a   : > { %19530 = vst [vmem:[#allocation44_spill] sm:$0xff] %v15101_v34  ;;  %19532 = vst [vmem:[#allocation45_spill] sm:$0xff] %v15105_v10  ;;  %v10996_v20 = vpack.i.bf16 %v15105_v10, %v15101_v34  ;;  %v19536_v7 = vmax.f32 %v14384_v47, 0.0  ;;  %v10800_v41 = vunpack.i.h.bf16 %v14941_v43  ;;  %v10854_v47 = vunpack.i.l.bf16 %v15143_v4 }
 0x40b   : > { %4304 = vmatprep.subr.bf16.mxu1 %v4013_v37  ;;  %v15122_v19 = vmax.f32 %v19533_v35, %v10835_v57  ;;  %v2610_v50 = vsel %vm522_vm4, %v19534_v8, %v10834_v12  ;;  %v19537_v37 = vld [vmem:[#allocation31_spill] sm:$0xff]  ;;  %v19541_v35 = vmax.f32 %v19540_v6, 0.0 }
 0x40c   : > { %10997 = vrot.lane.b32.xlu1 %v10996_v20, %s11975_s25  ;;  %v15132_v48 = vmax.f32 %v19536_v7, %v10834_v12  ;;  %v3098_v20 = vsel %vm686_vm3, %v10799_v27, %v10839_v31  ;;  %v19538_v10 = vmax.f32 %v19537_v37, 0.0  ;;  %v10848_v7 = vpop.permute.xlu0 %10847  ;;  %v19545_v37 = vld [vmem:[#allocation50_spill] sm:$0xff] }
 0x40d   : > { %10992 = vrot.lane.b32.xlu0 %v10991_v40, %s11975_s25  ;;  %v2616_v40 = vsel %vm522_vm4, %v19535_v56, %v10835_v57  ;;  %v19137_v57 = vunpack.i.h.bf16 %v15143_v4 }
 0x40e   : > { %v15137_v45 = vmax.f32 %v19538_v10, %v2610_v50  ;;  %v15141_v34 = vmax.f32 %v19541_v35, %v2616_v40  ;;  %v19543_v10 = vunpack.i.h.bf16 %v15096_v54  ;;  %v19544_v50 = vld [vmem:[#allocation6_spill] sm:$0xff]  ;;  %v3104_v40 = vsel %vm686_vm3, %v10800_v41, %v10854_v47 }
 0x40f   : > { %v3254_v56 = vmax.f32 %v19544_v50, %v3098_v20  ;;  %v3105_v43 = vsel %vm686_vm3, %v10854_v47, %v19137_v57  ;;  %v3261_v6 = vmax.f32 %v19545_v37, %v3104_v40  ;;  %v10850_v35 = vunpack.i.h.bf16 %v10848_v7  ;;  %v11519_v57 = vld [vmem:[%s18938_s3 + $0x240] ss:$8 sps:$4 sm:$0xff]  }
 0x410   : > { %19539 = vst [vmem:[#allocation30_spill] sm:$0xff] %v15137_v45  ;;  %19542 = vst [vmem:[#allocation53_spill] sm:$0xff] %v15141_v34  ;;  %v11001_v12 = vpack.i.bf16 %v15132_v48, %v15137_v45  ;;  %v11006_v27 = vpack.i.bf16 %v15122_v19, %v15141_v34  ;;  %v3099_v8 = vsel %vm686_vm3, %v10839_v31, %v19543_v10  ;;  %v10849_v45 = vunpack.i.l.bf16 %v10848_v7 }
 0x411   : > { %v3262_v34 = vmax.f32 %v14414_v1, %v3105_v43  ;;  %v3255_v31 = vmax.f32 %v14352_v26, %v3099_v8  ;;  %v3338_v20 = vpack.c.bf16 %v3261_v6, %v3254_v56  ;;  %v19546_v41 = vunpack.i.h.bf16 %v14781_v23  ;;  %v19551_v1 = vld [vmem:[#allocation36_spill] sm:$0xff]  ;;  %v15187_v56 = vpop.permute.xlu0 %10857 }
 0x412   : > { %11002 = vrot.lane.b32.xlu0 %v11001_v12, %s11975_s25  ;;  %11007 = vrot.lane.b32.xlu1 %v11006_v27, %s11975_s25  ;;  %v19547_v50 = vmax.f32 %v14438_v59, 0.0  ;;  %v19548_v40 = vunpack.i.h.bf16 %v14734_v0  ;;  %v19549_v12 = vld [vmem:[#allocation39_spill] sm:$0xff]  ;;  %v19552_v43 = vmax.f32 %v19551_v1, 0.0  ;;  %v19553_v23 = vmax.f32 %v14425_v53, 0.0  ;;  %v11501_v0 = vld [vmem:[%s18938_s3 + $0x270] ss:$8 sps:$4 sm:$0xff]  }
 0x413   : > { %v2628_v10 = vsel %vm522_vm4, %v19546_v41, %v10850_v35  ;;  %v19550_v37 = vmax.f32 %v19549_v12, 0.0  ;;  %v3339_v59 = vpack.c.bf16 %v3262_v34, %v3255_v31  ;;  %v11509_v53 = vld [vmem:[%s18938_s3 + $0x264] ss:$8 sps:$4 sm:$0xff]   ;;  %v10859_v41 = vunpack.i.l.bf16 %v15187_v56  ;;  %v10863_v34 = vpop.permute.xlu1 %10862 }
 0x414   : > { %v15170_v47 = vmax.f32 %v19547_v50, %v10850_v35  ;;  %v2622_v7 = vsel %vm522_vm4, %v19548_v40, %v10849_v45  ;;  %v15185_v8 = vmax.f32 %v19553_v23, %v10849_v45  ;;  %v19135_v45 = vunpack.i.h.bf16 %v15187_v56  ;;  %v11507_v40 = vld [vmem:[%s18938_s3 + $0x260] ss:$8 sps:$4 sm:$0xff]  }
 0x415   : > { %v15177_v27 = vmax.f32 %v19550_v37, %v2628_v10  ;;  %v15181_v26 = vmax.f32 %v19552_v43, %v2622_v7  ;;  %4047 = vmatprep.mubr.bf16.mxu0 %v3339_v59  ;;  %v10865_v31 = vunpack.i.h.bf16 %v10863_v34  ;;  %v10864_v10 = vunpack.i.l.bf16 %v10863_v34 }
 0x416   : > { %4048 = vmatmul.mubr.bf16.vlgmr.msra.gmra.mxu0 %v3338_v20  ;;  %v10814_v50 = vunpack.i.l.bf16 %v15020_v55  ;;  %v19554_v7 = vunpack.i.h.bf16 %v14863_v60  ;;  %v19555_v20 = vmax.f32 %v14481_v51, 0.0  ;;  %v19556_v1 = vunpack.i.h.bf16 %v14813_v61  ;;  %v19558_v60 = vld [vmem:[#allocation46_spill] sm:$0xff] }
 0x417   : > { %v11011_v6 = vpack.i.bf16 %v15185_v8, %v15181_v26  ;;  %v11016_v35 = vpack.i.bf16 %v15170_v47, %v15177_v27  ;;  %4202 = vmatpush1.bf16.msra.mxu0 %v11501_v0  ;;  %v19557_v23 = vmax.f32 %v14474_v25, 0.0  ;;  %v11515_v0 = vld [vmem:[%s18938_s3 + $0x254] ss:$8 sps:$4 sm:$0xff]   ;;  %v15232_v61 = vpop.permute.xlu1 %10867  ;;  %v3111_v25 = vsel %vm686_vm3, %v10859_v41, %v19135_v45 }
 0x418   : > { %v2640_v12 = vsel %vm522_vm4, %v19554_v7, %v10865_v31  ;;  %v15212_v37 = vmax.f32 %v19555_v20, %v10865_v31  ;;  %v2634_v43 = vsel %vm522_vm4, %v19556_v1, %v10864_v10  ;;  %4203 = vmatprep.subr.bf16.mxu0 %v11509_v53  ;;  %v19560_v51 = vld [vmem:[#allocation42_spill] sm:$0xff]  ;;  %v3110_v53 = vsel %vm686_vm3, %v10814_v50, %v10859_v41  ;;  %v15239_v7 = vpop.permute.xlu0 %10872 }
 0x419   : > { %11012 = vrot.lane.b32.xlu0 %v11011_v6, %s11975_s25  ;;  %11017 = vrot.lane.b32.xlu1 %v11016_v35, %s11975_s25  ;;  %v15219_v59 = vmax.f32 %v19557_v23, %v10864_v10  ;;  %v19559_v6 = vmax.f32 %v19558_v60, 0.0  ;;  %v19561_v34 = vmax.f32 %v19560_v51, 0.0  ;;  %v10815_v10 = vunpack.i.h.bf16 %v15020_v55  ;;  %v11513_v23 = vld [vmem:[%s18938_s3 + $0x250] ss:$8 sps:$4 sm:$0xff]   ;;  %v11521_v51 = vld [vmem:[%s18938_s3 + $0x244] ss:$8 sps:$4 sm:$0xff]  }
 0x41a   : > { %v19136_v20 = vunpack.i.h.bf16 %v15232_v61  ;;  %v3269_v41 = vmax.f32 %v14451_v28, %v3111_v25  ;;  %v19562_v60 = vld [vmem:[#allocation9_spill] sm:$0xff]  ;;  %v19563_v25 = vld [vmem:[#allocation55_spill] sm:$0xff] }
 0x41b   : > { %v15226_v35 = vmax.f32 %v19559_v6, %v2640_v12  ;;  %v15230_v31 = vmax.f32 %v19561_v34, %v2634_v43  ;;  %v10869_v12 = vunpack.i.l.bf16 %v15232_v61  ;;  %4204 = vmatpush1.bf16.msra.mxu0 %v11507_v40  ;;  %v3268_v6 = vmax.f32 %v19562_v60, %v3110_v53  ;;  %v10878_v45 = vpop.permute.xlu1 %10877 }
 0x41c   : > { %4205 = vmatprep.subr.bf16.mxu0 %v11515_v0  ;;  %v10874_v34 = vunpack.i.l.bf16 %v15239_v7  ;;  %v10879_v53 = vunpack.i.l.bf16 %v10878_v45  ;;  %v10844_v0 = vunpack.i.l.bf16 %v15118_v11  ;;  %v19564_v40 = vunpack.i.h.bf16 %v14927_v63  ;;  %v19568_v63 = vld [vmem:[#allocation49_spill] sm:$0xff] }
 0x41d   : > { %v11021_v1 = vpack.i.bf16 %v15219_v59, %v15230_v31  ;;  %v11026_v43 = vpack.i.bf16 %v15212_v37, %v15226_v35  ;;  %v3117_v55 = vsel %vm686_vm3, %v10869_v12, %v19136_v20  ;;  %v3116_v50 = vsel %vm686_vm3, %v10815_v10, %v10869_v12 }
 0x41e   : > { %v3276_v28 = vmax.f32 %v14504_v49, %v3117_v55  ;;  %v3275_v10 = vmax.f32 %v19563_v25, %v3116_v50  ;;  %v10880_v12 = vunpack.i.h.bf16 %v10878_v45  ;;  %v19566_v55 = vunpack.i.h.bf16 %v14908_v62 }
 0x41f   : > { %11022 = vrot.lane.b32.xlu0 %v11021_v1, %s11975_s25  ;;  %11027 = vrot.lane.b32.xlu1 %v11026_v43, %s11975_s25  ;;  %v19565_v43 = vmax.f32 %v14535_v44, 0.0  ;;  %v19570_v44 = vld [vmem:[#allocation47_spill] sm:$0xff]  ;;  %v15294_v62 = vpop.permute.xlu1 %10882 }
 0x420   : > { %v3346_v60 = vpack.c.bf16 %v3276_v28, %v3269_v41  ;;  %v3345_v20 = vpack.c.bf16 %v3275_v10, %v3268_v6  ;;  %4206 = vmatpush1.bf16.msra.mxu0 %v11513_v23  ;;  %v2652_v1 = vsel %vm522_vm4, %v19564_v40, %v10880_v12  ;;  %v2646_v45 = vsel %vm522_vm4, %v19566_v55, %v10879_v53  ;;  %v11527_v23 = vld [vmem:[%s18938_s3 + $0x234] ss:$8 sps:$4 sm:$0xff]  }
 0x421   : > { %v15274_v49 = vmax.f32 %v19565_v43, %v10880_v12  ;;  %v19567_v41 = vmax.f32 %v14527_v38, 0.0  ;;  %4207 = vmatprep.subr.bf16.mxu0 %v11521_v51  ;;  %v19569_v6 = vmax.f32 %v19568_v63, 0.0  ;;  %v19571_v28 = vmax.f32 %v19570_v44, 0.0 }
 0x422   : > { %4057 = vmatprep.mubr.bf16.mxu0 %v3346_v60  ;;  %v19572_v38 = vunpack.i.h.bf16 %v15239_v7  ;;  %v10845_v51 = vunpack.i.h.bf16 %v15118_v11  ;;  %v19139_v12 = vunpack.i.h.bf16 %v15294_v62  ;;  %v11525_v60 = vld [vmem:[%s18938_s3 + $0x230] ss:$8 sps:$4 sm:$0xff]  }
 0x423   : > { %v15281_v50 = vmax.f32 %v19567_v41, %v10879_v53  ;;  %v15288_v40 = vmax.f32 %v19569_v6, %v2652_v1  ;;  %v15292_v25 = vmax.f32 %v19571_v28, %v2646_v45  ;;  %v10884_v53 = vunpack.i.l.bf16 %v15294_v62  ;;  %4058 = vmatmul.mubr.bf16.gmra.mxu0 %v3345_v20  ;;  %v19573_v41 = vld [vmem:[#allocation7_spill] sm:$0xff]  ;;  %v19574_v6 = vld [vmem:[#allocation10_spill] sm:$0xff] }
 0x424   : > { %v3123_v10 = vsel %vm686_vm3, %v10874_v34, %v19572_v38  ;;  %v3122_v1 = vsel %vm686_vm3, %v10844_v0, %v10874_v34  ;;  %4208 = vmatpush1.bf16.msra.mxu0 %v11519_v57  ;;  %v11530_v34 = vld [vmem:[%s18938_s3 + $0x224] ss:$8 sps:$4 sm:$0xff]   ;;  %v10888_v0 = vpop.permute.xlu1 %10887 }
 0x425   : > { %v11031_v43 = vpack.i.bf16 %v15281_v50, %v15292_v25  ;;  %v11036_v55 = vpack.i.bf16 %v15274_v49, %v15288_v40  ;;  %v3129_v11 = vsel %vm686_vm3, %v10884_v53, %v19139_v12  ;;  %v3283_v45 = vmax.f32 %v14488_v5, %v3123_v10  ;;  %4209 = vmatprep.subr.bf16.mxu0 %v11527_v23  ;;  %v11528_v23 = vld [vmem:[%s18938_s3 + $0x220] ss:$8 sps:$4 sm:$0xff]  }
 0x426   : > { %v3128_v20 = vsel %vm686_vm3, %v10845_v51, %v10884_v53  ;;  %v3290_v57 = vmax.f32 %v14551_v21, %v3129_v11  ;;  %v3282_v63 = vmax.f32 %v19573_v41, %v3122_v1  ;;  %v10890_v28 = vunpack.i.h.bf16 %v10888_v0 }
 0x427   : > { %11032 = vrot.lane.b32.xlu0 %v11031_v43, %s11975_s25  ;;  %11037 = vrot.lane.b32.xlu1 %v11036_v55, %s11975_s25  ;;  %v3289_v44 = vmax.f32 %v19574_v6, %v3128_v20  ;;  %v10889_v5 = vunpack.i.l.bf16 %v10888_v0  ;;  %v19575_v51 = vunpack.i.h.bf16 %v15013_v33  ;;  %v19576_v43 = vld [vmem:[#allocation61_spill] sm:$0xff]  ;;  %v19579_v1 = vunpack.i.h.bf16 %v14987_v46  ;;  %v19582_v33 = vld [vmem:[#allocation54_spill] sm:$0xff] }
 0x428   : > { %v3353_v38 = vpack.c.bf16 %v3290_v57, %v3283_v45  ;;  %4210 = vmatpush1.bf16.msra.mxu0 %v11525_v60  ;;  %v19577_v55 = vmax.f32 %v19576_v43, 0.0  ;;  %v19580_v20 = vld [vmem:[#allocation17_spill] sm:$0xff]  ;;  %v19583_v57 = vmax.f32 %v19582_v33, 0.0  ;;  %v11552_v33 = vld [vmem:[%s18938_s3 + $0x2a0] ss:$8 sps:$4 sm:$0xff]  }
 0x429   : > { %v3352_v10 = vpack.c.bf16 %v3289_v44, %v3282_v63  ;;  %v2664_v53 = vsel %vm522_vm4, %v19575_v51, %v10890_v28  ;;  %v2658_v11 = vsel %vm522_vm4, %v19579_v1, %v10889_v5  ;;  %v19581_v45 = vmax.f32 %v19580_v20, 0.0  ;;  %4211 = vmatprep.subr.bf16.mxu0 %v11530_v34  ;;  %v11533_v60 = vld [vmem:[%s18938_s3 + $0x214] ss:$8 sps:$4 sm:$0xff]   ;;  %v19584_v63 = vld [vmem:[#allocation52_spill] sm:$0xff] }
 0x42a   : > { %v15331_v21 = vmax.f32 %v19577_v55, %v10890_v28  ;;  %v15345_v41 = vmax.f32 %v19583_v57, %v2664_v53  ;;  %v19585_v6 = vmax.f32 %v19584_v63, 0.0  ;;  %4067 = vmatprep.mubr.bf16.mxu0 %v3353_v38  ;;  %v11531_v28 = vld [vmem:[%s18938_s3 + $0x210] ss:$8 sps:$4 sm:$0xff]   ;;  %v11534_v38 = vld [vmem:[%s18938_s3 + $0x200] ss:$8 sps:$4 sm:$0xff]  }
 0x42b   : > { %v15338_v0 = vmax.f32 %v19581_v45, %v10889_v5  ;;  %4068 = vmatmul.mubr.bf16.gmra.mxu0 %v3352_v10  ;;  %v11536_v5 = vld [vmem:[%s18938_s3 + $0x204] ss:$8 sps:$4 sm:$0xff]   ;;  %v11539_v10 = vld [vmem:[%s18938_s3 + $0x2f4] ss:$8 sps:$4 sm:$0xff]   ;;  %v11540_v53 = vld [vmem:[%s18938_s3 + $0x2e0] ss:$8 sps:$4 sm:$0xff]  }
 0x42c   : > { %19578 = vst [vmem:[#allocation40_spill] sm:$0xff] %v15331_v21  ;;  %v15349_v44 = vmax.f32 %v19585_v6, %v2658_v11  ;;  %v11046_v34 = vpack.i.bf16 %v15331_v21, %v15345_v41  ;;  %4212 = vmatpush1.bf16.msra.mxu0 %v11528_v23  ;;  %v11537_v23 = vld [vmem:[%s18938_s3 + $0x2f0] ss:$8 sps:$4 sm:$0xff]   ;;  %v11542_v51 = vld [vmem:[%s18938_s3 + $0x2e4] ss:$8 sps:$4 sm:$0xff]  }
 0x42d   : > { %4213 = vmatprep.subr.bf16.mxu0 %v11533_v60  ;;  %v11545_v43 = vld [vmem:[%s18938_s3 + $0x2d4] ss:$8 sps:$4 sm:$0xff]   ;;  %v11543_v55 = vld [vmem:[%s18938_s3 + $0x2d0] ss:$8 sps:$4 sm:$0xff]   ;;  %v11548_v1 = vld [vmem:[%s18938_s3 + $0x2c4] ss:$8 sps:$4 sm:$0xff]  }
 0x42e   : > { %v11041_v46 = vpack.i.bf16 %v15338_v0, %v15349_v44  ;;  %11047 = vrot.lane.b32.xlu1 %v11046_v34, %s11975_s25  ;;  %v11546_v11 = vld [vmem:[%s18938_s3 + $0x2c0] ss:$8 sps:$4 sm:$0xff]   ;;  %v11551_v20 = vld [vmem:[%s18938_s3 + $0x2b4] ss:$8 sps:$4 sm:$0xff]   ;;  %v11549_v45 = vld [vmem:[%s18938_s3 + $0x2b0] ss:$8 sps:$4 sm:$0xff]  }
 0x42f   : > { %v11554_v60 = vld [vmem:[%s18938_s3 + $0x2a4] ss:$8 sps:$4 sm:$0xff]   ;;  %v11559_v57 = vld [vmem:[%s18938_s3 + $0x294] ss:$8 sps:$4 sm:$0xff]   ;;  %v11557_v63 = vld [vmem:[%s18938_s3 + $0x290] ss:$8 sps:$4 sm:$0xff]  }
 0x430   : > { %11042 = vrot.lane.b32.xlu0 %v11041_v46, %s11975_s25  ;;  %4214 = vmatpush1.bf16.msra.mxu0 %v11531_v28  ;;  %v11565_v6 = vld [vmem:[%s18938_s3 + $0x284] ss:$8 sps:$4 sm:$0xff]  }
 0x431   : > { %4215 = vmatprep.subr.bf16.mxu0 %v11536_v5  ;;  %v11563_v5 = vld [vmem:[%s18938_s3 + $0x280] ss:$8 sps:$4 sm:$0xff]  }
 0x434   : > { %4216 = vmatpush1.bf16.msra.mxu0 %v11534_v38 }
 0x435   : > { %4217 = vmatprep.subr.bf16.mxu0 %v11539_v10  ;;  %v19586_v10 = vunpack.i.h.bf16 %v15096_v54  ;;  %v19588_v54 = vunpack.i.h.bf16 %v15143_v4 }
 0x438   : > { %4218 = vmatpush2.bf16.msra.mxu0 %v11537_v23 }
 0x439   : > { %4219 = vmatprep.subr.bf16.mxu0 %v11542_v51 }
 0x43c   : > { %4220 = vmatpush2.bf16.msra.mxu0 %v11540_v53 }
 0x43d   : > { %4221 = vmatprep.subr.bf16.mxu0 %v11545_v43 }
 0x440   : > { %4222 = vmatpush2.bf16.msra.mxu0 %v11543_v55 }
 0x441   : > { %4223 = vmatprep.subr.bf16.mxu0 %v11548_v1 }
 0x444   : > { %4224 = vmatpush2.bf16.msra.mxu0 %v11546_v11 }
 0x445   : > { %4225 = vmatprep.subr.bf16.mxu0 %v11551_v20  ;;  %v19587_v20 = vld [vmem:[#allocation57_spill] sm:$0xff] }
 0x448   : > { %4226 = vmatpush2.bf16.msra.mxu0 %v11549_v45 }
 0x449   : > { %4227 = vmatprep.subr.bf16.mxu0 %v11554_v60  ;;  %v15411_v46 = vpop.permute.xlu1 %10892 }
 0x44a   : > { %v19138_v34 = vunpack.i.h.bf16 %v15411_v46  ;;  %v10894_v28 = vunpack.i.l.bf16 %v15411_v46 }
 0x44c   : > { %4228 = vmatpush2.bf16.msra.mxu0 %v11552_v33  ;;  %v3100_v23 = vsel %vm686_vm3, %v19586_v10, %v10894_v28  ;;  %v3101_v53 = vsel %vm686_vm3, %v10894_v28, %v19138_v34  ;;  %v19590_v28 = vld [vmem:[#allocation59_spill] sm:$0xff] }
 0x44d   : > { %4229 = vmatprep.subr.bf16.mxu0 %v11559_v57  ;;  %v3256_v45 = vmax.f32 %v19587_v20, %v3100_v23 }
 0x44e   : > { %v15418_v38 = vpop.permute.xlu1 %10907  ;;  %v15423_v51 = vpop.permute.xlu0 %10897 }
 0x44f   : > { %v19143_v43 = vunpack.i.h.bf16 %v15418_v38  ;;  %v19145_v55 = vunpack.i.l.bf16 %v15418_v38  ;;  %v19140_v1 = vunpack.i.h.bf16 %v15423_v51  ;;  %v10899_v11 = vunpack.i.l.bf16 %v15423_v51 }
 0x450   : > { %4230 = vmatpush2.bf16.msra.mxu0 %v11557_v63  ;;  %v19589_v63 = vld [vmem:[#allocation4_spill] sm:$0xff] }
 0x451   : > { %4231 = vmatprep.subr.bf16.mxu0 %v11565_v6  ;;  %v3106_v60 = vsel %vm686_vm3, %v19588_v54, %v10899_v11  ;;  %v3107_v57 = vsel %vm686_vm3, %v10899_v11, %v19140_v1  ;;  %v3257_v6 = vmax.f32 %v19589_v63, %v3101_v53  ;;  %v3141_v53 = vsel %vm686_vm3, %v19145_v55, %v19143_v43 }
 0x452   : > { %v3263_v10 = vmax.f32 %v19590_v28, %v3106_v60  ;;  %v15445_v12 = vpop.permute.xlu0 %10902  ;;  %v3264_v4 = vmax.f32 %v14728_v29, %v3107_v57  ;;  %v11562_v57 = vld [vmem:[%s18938_s3 + $0x314] ss:$8 sps:$4 sm:$0xff]   ;;  %v19591_v43 = vunpack.i.h.bf16 %v15187_v56 }
 0x453   : > { %v19144_v23 = vunpack.i.h.bf16 %v15445_v12  ;;  %v10904_v20 = vunpack.i.l.bf16 %v15445_v12 }
 0x454   : > { %4232 = vmatpush2.bf16.msra.mxu0 %v11563_v5  ;;  %v15436_v33 = vpop.permute.xlu1 %10912  ;;  %v3340_v11 = vpack.c.bf16 %v3263_v10, %v3256_v45  ;;  %v3341_v54 = vpack.c.bf16 %v3264_v4, %v3257_v6  ;;  %v3304_v6 = vmax.f32 %v14706_v36, %v3141_v53  ;;  %v19594_v36 = vunpack.i.h.bf16 %v15059_v13 }
 0x455   : > { %v19142_v34 = vunpack.i.h.bf16 %v15436_v33  ;;  %v10914_v5 = vunpack.i.l.bf16 %v15436_v33  ;;  %v3135_v29 = vsel %vm686_vm3, %v10904_v20, %v19144_v23 }
 0x456   : > { %4140 = vmatprep.mubr.bf16.mxu1 %v3341_v54  ;;  %v3297_v45 = vmax.f32 %v14741_v42, %v3135_v29  ;;  %v19593_v54 = vmax.f32 %v14754_v58, 0.0  ;;  %v19598_v58 = vld [vmem:[#allocation56_spill] sm:$0xff] }
 0x457   : > { %v3113_v60 = vsel %vm686_vm3, %v10914_v5, %v19142_v34  ;;  %v15464_v21 = vpop.permute.xlu0 %10917  ;;  %4141 = vmatmul.mubr.bf16.vlgmr.msra.gmra.mxu1 %v3340_v11  ;;  %v3112_v23 = vsel %vm686_vm3, %v19591_v43, %v10914_v5  ;;  %v19595_v11 = vmax.f32 %v14769_v39, 0.0  ;;  %v19599_v5 = vmax.f32 %v19598_v58, 0.0  ;;  %v19602_v58 = vld [vmem:[#allocation13_spill] sm:$0xff] }
 0x458   : > { %v10928_v63 = vpop.permute.xlu1 %10927  ;;  %v19150_v10 = vunpack.i.h.bf16 %v15464_v21  ;;  %v10919_v4 = vunpack.i.l.bf16 %v15464_v21  ;;  %v3271_v34 = vmax.f32 %v14773_v32, %v3113_v60  ;;  %4305 = vmatpush1.bf16.msra.mxu1 %v15112_v30  ;;  %v11560_v32 = vld [vmem:[%s18938_s3 + $0x310] ss:$8 sps:$4 sm:$0xff]  }
 0x459   : > { %v10930_v28 = vunpack.i.h.bf16 %v10928_v63  ;;  %v10929_v1 = vunpack.i.l.bf16 %v10928_v63  ;;  %v19592_v63 = vunpack.i.h.bf16 %v15078_v22  ;;  %v19596_v22 = vld [vmem:[#allocation58_spill] sm:$0xff]  ;;  %4306 = vmatprep.subr.bf16.mxu1 %v11562_v57 }
 0x45a   : > { %v19597_v56 = vmax.f32 %v19596_v22, 0.0  ;;  %v3119_v39 = vsel %vm686_vm3, %v10919_v4, %v19150_v10 }
 0x45b   : > { %v2676_v55 = vsel %vm522_vm4, %v19592_v63, %v10930_v28  ;;  %v15479_v42 = vmax.f32 %v19593_v54, %v10930_v28  ;;  %v2670_v53 = vsel %vm522_vm4, %v19594_v36, %v10929_v1  ;;  %v15486_v29 = vmax.f32 %v19595_v11, %v10929_v1 }
 0x45c   : > { %v15494_v43 = vmax.f32 %v19597_v56, %v2676_v55  ;;  %v15498_v60 = vmax.f32 %v19599_v5, %v2670_v53  ;;  %v3360_v28 = vpack.c.bf16 %v3304_v6, %v3297_v45  ;;  %v10923_v63 = vpop.permute.xlu0 %10922  ;;  %v3278_v55 = vmax.f32 %v14807_v16, %v3119_v39  ;;  %v11568_v45 = vld [vmem:[%s18938_s3 + $0x304] ss:$8 sps:$4 sm:$0xff]   ;;  %4307 = vmatpush1.bf16.msra.mxu1 %v11560_v32 }
 0x45d   : > { %v15500_v13 = vpop.permute.xlu1 %10932  ;;  %v19600_v54 = vunpack.i.h.bf16 %v15232_v61  ;;  %v10925_v6 = vunpack.i.h.bf16 %v10923_v63  ;;  %v10924_v53 = vunpack.i.l.bf16 %v10923_v63  ;;  %v19601_v56 = vld [vmem:[#allocation12_spill] sm:$0xff]  ;;  %4308 = vmatprep.subr.bf16.mxu1 %v11568_v45 }
 0x45e   : > { %v19147_v30 = vunpack.i.h.bf16 %v15500_v13  ;;  %v10934_v1 = vunpack.i.l.bf16 %v15500_v13  ;;  %4077 = vmatprep.mubr.bf16.mxu0 %v3360_v28  ;;  %v11051_v57 = vpack.i.bf16 %v15486_v29, %v15498_v60  ;;  %v11056_v11 = vpack.i.bf16 %v15479_v42, %v15494_v43 }
 0x45f   : > { %v3118_v36 = vsel %vm686_vm3, %v19600_v54, %v10919_v4  ;;  %v3348_v22 = vpack.c.bf16 %v3278_v55, %v3271_v34  ;;  %v3270_v16 = vmax.f32 %v19601_v56, %v3112_v23  ;;  %v3134_v5 = vsel %vm686_vm3, %v10924_v53, %v10904_v20  ;;  %v11566_v23 = vld [vmem:[%s18938_s3 + $0x300] ss:$8 sps:$4 sm:$0xff]   ;;  %v19604_v53 = vld [vmem:[#allocation5_spill] sm:$0xff] }
 0x460   : > { %v3277_v61 = vmax.f32 %v19602_v58, %v3118_v36  ;;  %11052 = vrot.lane.b32.xlu0 %v11051_v57, %s11975_s25  ;;  %11057 = vrot.lane.b32.xlu1 %v11056_v11, %s11975_s25  ;;  %v19603_v28 = vunpack.i.l.bf16 %v15418_v38  ;;  %v3125_v34 = vsel %vm686_vm3, %v10934_v1, %v19147_v30  ;;  %v3296_v54 = vmax.f32 %v14835_v17, %v3134_v5  ;;  %s11982_s25 = smov 112  }
 0x461   : > { %v15520_v4 = vpop.permute.xlu1 %10947  ;;  %4150 = vmatprep.mubr.bf16.mxu1 %v3348_v22  ;;  %v19605_v11 = vunpack.i.h.bf16 %v15239_v7  ;;  %v19607_v17 = vunpack.i.h.bf16 %v15294_v62  ;;  %4309 = vmatpush1.bf16.msra.mxu1 %v11566_v23 }
 0x462   : > { %v3140_v39 = vsel %vm686_vm3, %v10925_v6, %v19603_v28  ;;  %v10950_v32 = vunpack.i.h.bf16 %v15520_v4  ;;  %v10949_v63 = vunpack.i.l.bf16 %v15520_v4  ;;  %v15536_v55 = vpop.permute.xlu0 %10937  ;;  %v3347_v20 = vpack.c.bf16 %v3277_v61, %v3270_v16  ;;  %v19606_v16 = vld [vmem:[#allocation14_spill] sm:$0xff] }
 0x463   : > { %v19146_v36 = vunpack.i.h.bf16 %v15536_v55  ;;  %v10939_v6 = vunpack.i.l.bf16 %v15536_v55  ;;  %v3303_v57 = vmax.f32 %v19604_v53, %v3140_v39  ;;  %v3124_v56 = vsel %vm686_vm3, %v19605_v11, %v10934_v1  ;;  %v19608_v39 = vld [vmem:[#allocation26_spill] sm:$0xff]  ;;  %v19609_v53 = vld [vmem:[#allocation60_spill] sm:$0xff] }
 0x464   : > { %4151 = vmatmul.mubr.bf16.gmra.mxu1 %v3347_v20  ;;  %v3285_v61 = vmax.f32 %v19606_v16, %v3125_v34  ;;  %v3284_v1 = vmax.f32 %v19609_v53, %v3124_v56  ;;  %v19610_v20 = vld [vmem:[#allocation15_spill] sm:$0xff] }
 0x465   : > { %v3359_v58 = vpack.c.bf16 %v3303_v57, %v3296_v54  ;;  %v3131_v22 = vsel %vm686_vm3, %v10939_v6, %v19146_v36  ;;  %v3130_v45 = vsel %vm686_vm3, %v19607_v17, %v10939_v6  ;;  %v3153_v57 = vsel %vm686_vm3, %v10949_v63, %v10950_v32  ;;  %v19612_v53 = vld [vmem:[#allocation3_spill] sm:$0xff] }
 0x466   : > { %v15552_v5 = vpop.permute.xlu1 %10952  ;;  %v10943_v28 = vpop.permute.xlu0 %10942  ;;  %v3292_v7 = vmax.f32 %v19608_v39, %v3131_v22  ;;  %v3291_v54 = vmax.f32 %v19610_v20, %v3130_v45  ;;  %v19611_v45 = vld [vmem:[#allocation27_spill] sm:$0xff]  ;;  %v3318_v20 = vmax.f32 %v19612_v53, %v3153_v57 }
 0x467   : > { %v19148_v34 = vunpack.i.h.bf16 %v15552_v5  ;;  %v10954_v62 = vunpack.i.l.bf16 %v15552_v5  ;;  %v10945_v11 = vunpack.i.h.bf16 %v10943_v28  ;;  %v10944_v6 = vunpack.i.l.bf16 %v10943_v28  ;;  %4078 = vmatmul.mubr.bf16.gmra.mxu0 %v3359_v58 }
 0x468   : > { %v3355_v23 = vpack.c.bf16 %v3292_v7, %v3285_v61  ;;  %v3354_v16 = vpack.c.bf16 %v3291_v54, %v3284_v1  ;;  %v19613_v61 = vunpack.i.h.bf16 %v15445_v12  ;;  %v19614_v54 = vunpack.i.h.bf16 %v15418_v38 }
 0x469   : > { %v3147_v17 = vsel %vm686_vm3, %v10944_v6, %v10945_v11  ;;  %v3137_v58 = vsel %vm686_vm3, %v10954_v62, %v19148_v34  ;;  %v19616_v34 = vld [vmem:[#allocation11_spill] sm:$0xff] }
 0x46a   : > { %4160 = vmatprep.mubr.bf16.mxu1 %v3355_v23  ;;  %v3311_v39 = vmax.f32 %v19611_v45, %v3147_v17  ;;  %v3136_v28 = vsel %vm686_vm3, %v19613_v61, %v10954_v62  ;;  %v19615_v45 = vld [vmem:[#allocation22_spill] sm:$0xff] }
 0x46b   : > { %v15565_v56 = vpop.permute.xlu0 %10957  ;;  %v3299_v53 = vmax.f32 %v19615_v45, %v3137_v58  ;;  %v3298_v62 = vmax.f32 %v19616_v34, %v3136_v28 }
 0x46c   : > { %v19149_v36 = vunpack.i.h.bf16 %v15565_v56  ;;  %v10959_v30 = vunpack.i.l.bf16 %v15565_v56  ;;  %4161 = vmatmul.mubr.bf16.gmra.mxu1 %v3354_v16  ;;  %v3367_v7 = vpack.c.bf16 %v3318_v20, %v3311_v39  ;;  %v19617_v16 = vld [vmem:[#allocation20_spill] sm:$0xff] }
 0x46d   : > { %v15563_v22 = vpop.permute.xlu1 %10967 }
 0x46e   : > { %v3143_v1 = vsel %vm686_vm3, %v10959_v30, %v19149_v36  ;;  %v3142_v57 = vsel %vm686_vm3, %v19614_v54, %v10959_v30  ;;  %4087 = vmatprep.mubr.bf16.mxu0 %v3367_v7  ;;  %v10970_v54 = vunpack.i.h.bf16 %v15563_v22  ;;  %v10969_v7 = vunpack.i.l.bf16 %v15563_v22 }
 0x46f   : > { %v10963_v23 = vpop.permute.xlu0 %10962  ;;  %v3306_v12 = vmax.f32 %v14966_v18, %v3143_v1  ;;  %v3305_v39 = vmax.f32 %v19617_v16, %v3142_v57 }
 0x470   : > { %v10965_v20 = vunpack.i.h.bf16 %v10963_v23  ;;  %v10964_v61 = vunpack.i.l.bf16 %v10963_v23 }
 0x471   : > { %v15583_v17 = vpop.permute.xlu1 %10972  ;;  %v3362_v10 = vpack.c.bf16 %v3306_v12, %v3299_v53  ;;  %v3361_v30 = vpack.c.bf16 %v3305_v39, %v3298_v62  ;;  %v19619_v62 = vld [vmem:[#allocation16_spill] sm:$0xff] }
 0x472   : > { %v10975_v36 = vunpack.i.h.bf16 %v15583_v17  ;;  %v10974_v38 = vunpack.i.l.bf16 %v15583_v17  ;;  %v3152_v58 = vsel %vm686_vm3, %v10965_v20, %v10949_v63  ;;  %v3146_v18 = vsel %vm686_vm3, %v10964_v61, %v10944_v6 }
 0x473   : > { %v3317_v34 = vmax.f32 %v14978_v14, %v3152_v58  ;;  %v3310_v28 = vmax.f32 %v14974_v2, %v3146_v18  ;;  %4170 = vmatprep.mubr.bf16.mxu1 %v3362_v10  ;;  %v3159_v10 = vsel %vm686_vm3, %v10969_v7, %v10970_v54 }
 0x474   : > { %v3148_v1 = vsel %vm686_vm3, %v10945_v11, %v10974_v38  ;;  %v3149_v63 = vsel %vm686_vm3, %v10974_v38, %v10975_v36  ;;  %4171 = vmatmul.mubr.bf16.gmra.mxu1 %v3361_v30  ;;  %v19618_v11 = vld [vmem:[#allocation25_spill] sm:$0xff] }
 0x475   : > { %v10988_v23 = vpop.permute.xlu1 %10987  ;;  %v3366_v6 = vpack.c.bf16 %v3317_v34, %v3310_v28  ;;  %v3312_v22 = vmax.f32 %v19618_v11, %v3148_v1  ;;  %v3313_v20 = vmax.f32 %v15007_v15, %v3149_v63  ;;  %v19620_v15 = vld [vmem:[#allocation48_spill] sm:$0xff] }
 0x476   : > { %v10989_v12 = vunpack.i.l.bf16 %v10988_v23  ;;  %v10990_v38 = vunpack.i.h.bf16 %v10988_v23  ;;  %v19621_v23 = vld [vmem:[#allocation37_spill] sm:$0xff] }
 0x477   : > { %v15598_v57 = vpop.permute.xlu0 %10977  ;;  %4088 = vmatmul.mubr.bf16.gmra.mxu0 %v3366_v6 }
 0x478   : > { %v10980_v45 = vunpack.i.h.bf16 %v15598_v57  ;;  %v10979_v53 = vunpack.i.l.bf16 %v15598_v57  ;;  %v3158_v4 = vsel %vm686_vm3, %v10989_v12, %v10969_v7  ;;  %v19646_v57 = vld [vmem:[#allocation40_spill] sm:$0xff] }
 0x479   : > { %v3324_v1 = vmax.f32 %v15027_v52, %v3158_v4 }
 0x47a   : > { %v3154_v2 = vsel %vm686_vm3, %v10950_v32, %v10979_v53  ;;  %v3155_v14 = vsel %vm686_vm3, %v10979_v53, %v10980_v45 }
 0x47b   : > { %v3319_v16 = vmax.f32 %v19619_v62, %v3154_v2  ;;  %v10983_v39 = vpop.permute.xlu0 %10982  ;;  %v3320_v61 = vmax.f32 %v15043_v24, %v3155_v14  ;;  %v3325_v24 = vmax.f32 %v19620_v15, %v3159_v10  ;;  %v19622_v62 = vld [vmem:[#allocation35_spill] sm:$0xff] }
 0x47c   : > { %v10985_v32 = vunpack.i.h.bf16 %v10983_v39  ;;  %v10984_v30 = vunpack.i.l.bf16 %v10983_v39 }
 0x47d   : > { %v3369_v58 = vpack.c.bf16 %v3320_v61, %v3313_v20  ;;  %v3368_v18 = vpack.c.bf16 %v3319_v16, %v3312_v22 }
 0x47e   : > { %v3164_v34 = vsel %vm686_vm3, %v10990_v38, %v10984_v30  ;;  %v3165_v28 = vsel %vm686_vm3, %v10984_v30, %v10985_v32  ;;  %v15627_v2 = vpop.permute.xlu1 %10997  ;;  %v19623_v38 = vld [vmem:[#allocation28_spill] sm:$0xff] }
 0x47f   : > { %v3331_v53 = vmax.f32 %v15031_v9, %v3164_v34  ;;  %v15621_v6 = vpop.permute.xlu0 %10992  ;;  %4180 = vmatprep.mubr.bf16.mxu1 %v3369_v58  ;;  %v3332_v63 = vmax.f32 %v19621_v23, %v3165_v28  ;;  %v11000_v14 = vunpack.i.h.bf16 %v15627_v2  ;;  %v10999_v11 = vunpack.i.l.bf16 %v15627_v2  ;;  %v19624_v30 = vld [vmem:[#allocation44_spill] sm:$0xff] }
 0x480   : > { %v10995_v7 = vunpack.i.h.bf16 %v15621_v6  ;;  %v10994_v12 = vunpack.i.l.bf16 %v15621_v6  ;;  %4181 = vmatmul.mubr.bf16.gmra.mxu1 %v3368_v18 }
 0x481   : > { %v3374_v52 = vpack.c.bf16 %v3332_v63, %v3325_v24  ;;  %v3373_v9 = vpack.c.bf16 %v3331_v53, %v3324_v1  ;;  %v3166_v39 = vsel %vm686_vm3, %v10985_v32, %v10999_v11  ;;  %v3167_v20 = vsel %vm686_vm3, %v10999_v11, %v11000_v14 }
 0x482   : > { %v3160_v22 = vsel %vm686_vm3, %v10970_v54, %v10994_v12  ;;  %v3161_v10 = vsel %vm686_vm3, %v10994_v12, %v10995_v7  ;;  %v3333_v4 = vmax.f32 %v19623_v38, %v3166_v39  ;;  %v3334_v54 = vmax.f32 %v19624_v30, %v3167_v20  ;;  %v19627_v12 = vld [vmem:[#allocation29_spill] sm:$0xff]  ;;  %v19630_v39 = vld [vmem:[#allocation30_spill] sm:$0xff] }
 0x483   : > { %v3326_v16 = vmax.f32 %v19622_v62, %v3160_v22  ;;  %4097 = vmatprep.mubr.bf16.mxu0 %v3374_v52  ;;  %v3327_v61 = vmax.f32 %v15084_v3, %v3161_v10  ;;  %v19625_v24 = vunpack.i.h.bf16 %v15411_v46  ;;  %v19626_v3 = vunpack.i.h.bf16 %v15423_v51  ;;  %v19628_v52 = vld [vmem:[#allocation23_spill] sm:$0xff]  ;;  %v19631_v51 = vld [vmem:[#allocation53_spill] sm:$0xff] }
 0x484   : > { %4098 = vmatmul.mubr.bf16.gmra.mxu0 %v3373_v9  ;;  %v11003_v58 = vpop.permute.xlu0 %11002  ;;  %v11008_v18 = vpop.permute.xlu1 %11007  ;;  %v19629_v62 = vmov 0  }
 0x485   : > { %v3376_v34 = vpack.c.bf16 %v3334_v54, %v3327_v61  ;;  %v3375_v28 = vpack.c.bf16 %v3333_v4, %v3326_v16  ;;  %v11005_v1 = vunpack.i.h.bf16 %v11003_v58  ;;  %v11004_v53 = vunpack.i.l.bf16 %v11003_v58 }
 0x486   : > { %v11010_v15 = vunpack.i.h.bf16 %v11008_v18  ;;  %v11009_v32 = vunpack.i.l.bf16 %v11008_v18 }
 0x487   : > { %4190 = vmatprep.mubr.bf16.mxu1 %v3376_v34  ;;  %v3102_v23 = vsel %vm686_vm3, %v19625_v24, %v11004_v53  ;;  %v3103_v22 = vsel %vm686_vm3, %v11004_v53, %v11005_v1  ;;  %v3260_v16 = vmax.f32 %v15132_v48, %v11005_v1 }
 0x488   : > { %v3108_v63 = vsel %vm686_vm3, %v19626_v3, %v11009_v32  ;;  %4191 = vmatmul.mubr.bf16.gmra.mxu1 %v3375_v28  ;;  %v3258_v11 = vmax.f32 %v19627_v12, %v3102_v23  ;;  %v3109_v10 = vsel %vm686_vm3, %v11009_v32, %v11010_v15  ;;  %v3267_v46 = vmax.f32 %v15122_v19, %v11010_v15  ;;  %v19634_v15 = vld [vmem:[#allocation19_spill] sm:$0xff]  ;;  %v19635_v23 = vld [vmem:[#allocation21_spill] sm:$0xff] }
 0x489   : > { %v3265_v9 = vmax.f32 %v19628_v52, %v3108_v63  ;;  %4326 = vmatprep.mubr.bf16.mxu1 %v19629_v62  ;;  %v3259_v20 = vmax.f32 %v19630_v39, %v3103_v22  ;;  %v3266_v61 = vmax.f32 %v19631_v51, %v3109_v10  ;;  %v19632_v32 = vunpack.i.h.bf16 %v15436_v33 }
 0x48a   : > { %v3344_v53 = vpack.c.bf16 %v3267_v46, %v3260_v16  ;;  %v19633_v19 = vunpack.i.h.bf16 %v15464_v21 }
 0x48b   : > { %v3342_v38 = vpack.c.bf16 %v3265_v9, %v3258_v11  ;;  %v11013_v4 = vpop.permute.xlu0 %11012  ;;  %v11018_v30 = vpop.permute.xlu1 %11017  ;;  %v3343_v54 = vpack.c.bf16 %v3266_v61, %v3259_v20 }
 0x48c   : > { %v11015_v58 = vunpack.i.h.bf16 %v11013_v4  ;;  %v11014_v18 = vunpack.i.l.bf16 %v11013_v4  ;;  %v11020_v34 = vunpack.i.h.bf16 %v11018_v30  ;;  %v11019_v28 = vunpack.i.l.bf16 %v11018_v30  ;;  %v19638_v4 = vld [vmem:[#allocation8_spill] sm:$0xff]  ;;  %v19639_v30 = vld [vmem:[#allocation18_spill] sm:$0xff] }
 0x48d   : > { %4233 = vmatprep.mubr.bf16.mxu0 %v3343_v54 }
 0x48e   : > { %v3114_v48 = vsel %vm686_vm3, %v19632_v32, %v11014_v18  ;;  %v3120_v1 = vsel %vm686_vm3, %v19633_v19, %v11019_v28  ;;  %4234 = vmatmul.mubr.bf16.vlgmr.msra.gmra.mxu0 %v3342_v38  ;;  %v3115_v63 = vsel %vm686_vm3, %v11014_v18, %v11015_v58  ;;  %v3121_v12 = vsel %vm686_vm3, %v11019_v28, %v11020_v34 }
 0x48f   : > { %v3272_v24 = vmax.f32 %v19634_v15, %v3114_v48  ;;  %v3279_v3 = vmax.f32 %v19635_v23, %v3120_v1  ;;  %v3273_v11 = vmax.f32 %v15181_v26, %v3115_v63  ;;  %v3280_v33 = vmax.f32 %v15177_v27, %v3121_v12  ;;  %v19642_v12 = vld [vmem:[#allocation62_spill] sm:$0xff] }
 0x490   : > { %9891 = vmatmul.mubr.msk.bf16.vlgmr.msra.gmra.mxu1 %vm3986_vm10, %v3344_v53  ;;  %v3274_v21 = vmax.f32 %v15185_v8, %v11015_v58  ;;  %v3281_v52 = vmax.f32 %v15170_v47, %v11020_v34  ;;  %v19636_v26 = vunpack.i.h.bf16 %v15500_v13  ;;  %v19637_v38 = vunpack.i.h.bf16 %v15536_v55 }
 0x491   : > { %4336 = vmatprep.mubr.bf16.mxu1 %v19629_v62  ;;  %v11023_v9 = vpop.permute.xlu0 %11022  ;;  %v11028_v22 = vpop.permute.xlu1 %11027  ;;  %v3350_v10 = vpack.c.bf16 %v3280_v33, %v3273_v11  ;;  %v3349_v16 = vpack.c.bf16 %v3279_v3, %v3272_v24  ;;  %v19641_v63 = vunpack.i.h.bf16 %v15565_v56  ;;  %v19643_v11 = vld [vmem:[#allocation24_spill] sm:$0xff] }
 0x492   : > { %v11025_v46 = vunpack.i.h.bf16 %v11023_v9  ;;  %v11024_v39 = vunpack.i.l.bf16 %v11023_v9  ;;  %v11030_v20 = vunpack.i.h.bf16 %v11028_v22  ;;  %v11029_v51 = vunpack.i.l.bf16 %v11028_v22 }
 0x493   : > { %4243 = vmatprep.mubr.bf16.mxu0 %v3350_v10  ;;  %v3351_v61 = vpack.c.bf16 %v3281_v52, %v3274_v21 }
 0x494   : > { %v3126_v27 = vsel %vm686_vm3, %v19636_v26, %v11024_v39  ;;  %v3132_v8 = vsel %vm686_vm3, %v19637_v38, %v11029_v51  ;;  %v3127_v58 = vsel %vm686_vm3, %v11024_v39, %v11025_v46  ;;  %v3133_v18 = vsel %vm686_vm3, %v11029_v51, %v11030_v20  ;;  %v19645_v38 = vld [vmem:[#allocation33_spill] sm:$0xff] }
 0x495   : > { %v3286_v47 = vmax.f32 %v19638_v4, %v3126_v27  ;;  %v3293_v54 = vmax.f32 %v19639_v30, %v3132_v8  ;;  %v3287_v34 = vmax.f32 %v15230_v31, %v3127_v58  ;;  %v3294_v13 = vmax.f32 %v15226_v35, %v3133_v18 }
 0x496   : > { %4244 = vmatmul.mubr.bf16.gmra.mxu0 %v3349_v16  ;;  %v3288_v55 = vmax.f32 %v15219_v59, %v11025_v46  ;;  %v3295_v28 = vmax.f32 %v15212_v37, %v11030_v20  ;;  %v19640_v31 = vunpack.i.h.bf16 %v15552_v5 }
 0x497   : > { %v3357_v53 = vpack.c.bf16 %v3294_v13, %v3287_v34  ;;  %v3356_v19 = vpack.c.bf16 %v3293_v54, %v3286_v47 }
 0x498   : > { %9892 = vmatmul.mubr.msk.bf16.gmra.mxu1 %vm3986_vm10, %v3351_v61  ;;  %v3358_v3 = vpack.c.bf16 %v3295_v28, %v3288_v55 }
 0x499   : > { %4346 = vmatprep.mubr.bf16.mxu1 %v19629_v62  ;;  %v11033_v32 = vpop.permute.xlu0 %11032  ;;  %v11038_v48 = vpop.permute.xlu1 %11037  ;;  %4253 = vmatprep.mubr.bf16.mxu0 %v3357_v53 }
 0x49a   : > { %v11035_v1 = vunpack.i.h.bf16 %v11033_v32  ;;  %v11034_v15 = vunpack.i.l.bf16 %v11033_v32  ;;  %v11040_v24 = vunpack.i.h.bf16 %v11038_v48  ;;  %v11039_v23 = vunpack.i.l.bf16 %v11038_v48 }
 0x49c   : > { %v3138_v35 = vsel %vm686_vm3, %v19640_v31, %v11034_v15  ;;  %v3144_v59 = vsel %vm686_vm3, %v19641_v63, %v11039_v23  ;;  %v3139_v21 = vsel %vm686_vm3, %v11034_v15, %v11035_v1  ;;  %v3145_v52 = vsel %vm686_vm3, %v11039_v23, %v11040_v24  ;;  %v19648_v15 = vld [vmem:[#allocation45_spill] sm:$0xff] }
 0x49d   : > { %v3300_v37 = vmax.f32 %v19642_v12, %v3138_v35  ;;  %v3307_v33 = vmax.f32 %v19643_v11, %v3144_v59  ;;  %v3301_v9 = vmax.f32 %v15292_v25, %v3139_v21  ;;  %v3308_v5 = vmax.f32 %v15288_v40, %v3145_v52  ;;  %v19644_v25 = vld [vmem:[#allocation32_spill] sm:$0xff] }
 0x49e   : > { %4254 = vmatmul.mubr.bf16.gmra.mxu0 %v3356_v19  ;;  %v3302_v56 = vmax.f32 %v15281_v50, %v11035_v1  ;;  %v3309_v22 = vmax.f32 %v15274_v49, %v11040_v24  ;;  %v19647_v19 = vld [vmem:[#allocation51_spill] sm:$0xff] }
 0x49f   : > { %v3364_v10 = vpack.c.bf16 %v3308_v5, %v3301_v9  ;;  %v3363_v39 = vpack.c.bf16 %v3307_v33, %v3300_v37 }
 0x4a0   : > { %9893 = vmatmul.mubr.msk.bf16.gmra.mxu1 %vm3986_vm10, %v3358_v3  ;;  %v11048_v46 = vpop.permute.xlu1 %11047  ;;  %v3365_v27 = vpack.c.bf16 %v3309_v22, %v3302_v56 }
 0x4a1   : > { %4356 = vmatprep.mubr.bf16.mxu1 %v19629_v62  ;;  %v11050_v61 = vunpack.i.h.bf16 %v11048_v46  ;;  %v11049_v26 = vunpack.i.l.bf16 %v11048_v46  ;;  %4263 = vmatprep.mubr.bf16.mxu0 %v3364_v10 }
 0x4a2   : > { %v11043_v16 = vpop.permute.xlu0 %11042 }
 0x4a3   : > { %v11045_v20 = vunpack.i.h.bf16 %v11043_v16  ;;  %v11044_v51 = vunpack.i.l.bf16 %v11043_v16  ;;  %v3156_v50 = vsel %vm686_vm3, %v10980_v45, %v11049_v26  ;;  %v3157_v47 = vsel %vm686_vm3, %v11049_v26, %v11050_v61 }
 0x4a4   : > { %v3321_v8 = vmax.f32 %v19645_v38, %v3156_v50  ;;  %v3322_v17 = vmax.f32 %v15345_v41, %v3157_v47  ;;  %v3323_v45 = vmax.f32 %v19646_v57, %v11050_v61 }
 0x4a5   : > { %v3150_v40 = vsel %vm686_vm3, %v10975_v36, %v11044_v51  ;;  %v3151_v4 = vsel %vm686_vm3, %v11044_v51, %v11045_v20  ;;  %v3316_v36 = vmax.f32 %v15338_v0, %v11045_v20 }
 0x4a6   : > { %v3314_v49 = vmax.f32 %v19644_v25, %v3150_v40  ;;  %4264 = vmatmul.mubr.bf16.gmra.mxu0 %v3363_v39  ;;  %v3315_v30 = vmax.f32 %v15349_v44, %v3151_v4 }
 0x4a7   : > { %v3372_v18 = vpack.c.bf16 %v3323_v45, %v3316_v36 }
 0x4a8   : > { %9894 = vmatmul.mubr.msk.bf16.gmra.mxu1 %vm3986_vm10, %v3365_v27  ;;  %v3371_v54 = vpack.c.bf16 %v3322_v17, %v3315_v30  ;;  %v3370_v58 = vpack.c.bf16 %v3321_v8, %v3314_v49 }
 0x4a9   : > { %4366 = vmatprep.mubr.bf16.mxu1 %v19629_v62 }
 0x4aa   : > { %4273 = vmatprep.mubr.bf16.mxu0 %v3371_v54 }
 0x4ae   : > { %4274 = vmatmul.mubr.bf16.gmra.mxu0 %v3370_v58 }
 0x4b0   : > { %9895 = vmatmul.mubr.msk.bf16.gmra.mxu1 %vm3986_vm10, %v3372_v18 }
 0x4b1   : > { %4376 = vmatprep.mubr.bf16.mxu1 %v19629_v62 }
 0x4d2   : > { %v11053_v34 = vpop.permute.xlu0 %11052  ;;  %v11058_v13 = vpop.permute.xlu1 %11057 }
 0x4d3   : > { %v11055_v44 = vunpack.i.h.bf16 %v11053_v34  ;;  %v11054_v55 = vunpack.i.l.bf16 %v11053_v34  ;;  %v11060_v41 = vunpack.i.h.bf16 %v11058_v13  ;;  %v11059_v28 = vunpack.i.l.bf16 %v11058_v13 }
 0x4d5   : > { %v3330_v53 = vmax.f32 %v15486_v29, %v11055_v44  ;;  %v3162_v0 = vsel %vm686_vm3, %v10995_v7, %v11054_v55  ;;  %v3337_v32 = vmax.f32 %v15479_v42, %v11060_v41  ;;  %v3168_v48 = vsel %vm686_vm3, %v11000_v14, %v11059_v28 }
 0x4d6   : > { %v3328_v1 = vmax.f32 %v19647_v19, %v3162_v0  ;;  %v3335_v24 = vmax.f32 %v19648_v15, %v3168_v48  ;;  %v3163_v23 = vsel %vm686_vm3, %v11054_v55, %v11055_v44  ;;  %v3169_v3 = vsel %vm686_vm3, %v11059_v28, %v11060_v41  ;;  %v4049_v2 = vpop.f32.mrf.mxu0 }
 0x4d7   : > { %v3379_v31 = vpack.c.bf16 %v3337_v32, %v3330_v53  ;;  %v3329_v29 = vmax.f32 %v15498_v60, %v3163_v23  ;;  %v3336_v6 = vmax.f32 %v15494_v43, %v3169_v3  ;;  %vm7295_vm3 = vcmask 7168  }
 0x4d8   : > { %v3377_v7 = vpack.c.bf16 %v3335_v24, %v3328_v1  ;;  %v4051_v14 = vpop.f32.mrf.mxu0 }
 0x4d9   : > { %9896 = vmatmul.mubr.msk.bf16.gmra.mxu1 %vm3986_vm10, %v3379_v31  ;;  %v3378_v42 = vpack.c.bf16 %v3336_v6, %v3329_v29  ;;  %vm7329_vm10 = vcmask 433152  }
 0x4da   : > { %v4053_v35 = vpop.f32.mrf.mxu0 }
 0x4db   : > { %4283 = vmatprep.mubr.bf16.mxu0 %v3378_v42 }
 0x4dc   : > { %4284 = vmatmul.mubr.bf16.gmra.mxu0 %v3377_v7  ;;  %v15739_v63 = vpop.f32.mrf.mxu0 }
 0x4e3   : > { %v15741_v59 = vpop.f32.mrf.mxu0 }
 0x4e5   : > { %v15743_v12 = vpop.f32.mrf.mxu0 }
 0x4e7   : > { %v15745_v37 = vpop.f32.mrf.mxu0 }
 0x4e9   : > { %v15747_v60 = vpop.f32.mrf.mxu0 }
 0x4eb   : > { %v15749_v43 = vpop.f32.mrf.mxu0 }
 0x4ed   : > { %v15751_v21 = vpop.f32.mrf.mxu0 }
 0x4ef   : > { %v15755_v5 = vpop.f32.mrf.mxu0 }
 0x4f1   : > { %v15757_v22 = vpop.f32.mrf.mxu0 }
 0x517   : > { %v4142_v11 = vpop.f32.mrf.mxu1 }
 0x518   : > { %v4143_v32 = vadd.f32 %v4142_v11, %v4049_v2 }
 0x519   : > { %v4144_v33 = vpop.f32.mrf.mxu1 }
 0x51a   : > { %v4145_v1 = vadd.f32 %v4144_v33, %v4051_v14 }
 0x51b   : > { %v4146_v52 = vpop.f32.mrf.mxu1 }
 0x51c   : > { %v4147_v3 = vadd.f32 %v4146_v52, %v4053_v35 }
 0x51d   : > { %v15753_v9 = vpop.f32.mrf.mxu1 }
 0x524   : > { %v4152_v56 = vpop.f32.mrf.mxu1 }
 0x525   : > { %v4153_v14 = vadd.f32 %v4152_v56, %v15741_v59 }
 0x526   : > { %v15759_v10 = vpop.f32.mrf.mxu1 }
 0x527   : > { %v4079_v16 = vpop.f32.mrf.mxu0 }
 0x528   : > { %v4156_v46 = vpop.f32.mrf.mxu1 }
 0x529   : > { %v4081_v20 = vpop.f32.mrf.mxu0  ;;  %v4157_v52 = vadd.f32 %v4156_v46, %v15745_v37 }
 0x52a   : > { %v15761_v39 = vpop.f32.mrf.mxu1 }
 0x52b   : > { %v4083_v26 = vpop.f32.mrf.mxu0 }
 0x52c   : > { %v4162_v51 = vpop.f32.mrf.mxu1 }
 0x52d   : > { %v15769_v50 = vpop.f32.mrf.mxu0  ;;  %v4163_v56 = vadd.f32 %v4162_v51, %v15749_v43 }
 0x52e   : > { %v15763_v61 = vpop.f32.mrf.mxu1 }
 0x530   : > { %v15765_v27 = vpop.f32.mrf.mxu1 }
 0x531   : > { %v4167_v37 = vadd.f32 %v15765_v27, %v15755_v5 }
 0x532   : > { %v15767_v40 = vpop.f32.mrf.mxu1 }
 0x534   : > { %v4172_v25 = vpop.f32.mrf.mxu1 }
 0x535   : > { %v15771_v49 = vadd.f32 %v4172_v25, %v4079_v16 }
 0x536   : > { %v4174_v38 = vpop.f32.mrf.mxu1 }
 0x537   : > { %v15773_v8 = vpop.f32.mrf.mxu0  ;;  %v15775_v4 = vadd.f32 %v4174_v38, %v4081_v20 }
 0x538   : > { %v4176_v47 = vpop.f32.mrf.mxu1 }
 0x539   : > { %v15777_v30 = vpop.f32.mrf.mxu0  ;;  %v15779_v17 = vadd.f32 %v4176_v47, %v4083_v26 }
 0x53a   : > { %v15781_v36 = vpop.f32.mrf.mxu1 }
 0x53b   : > { %v15783_v57 = vpop.f32.mrf.mxu0 }
 0x53d   : > { %v15787_v54 = vpop.f32.mrf.mxu0 }
 0x540   : > { %v15785_v45 = vpop.f32.mrf.mxu1 }
 0x542   : > { %v15789_v58 = vpop.f32.mrf.mxu1 }
 0x544   : > { %v15791_v18 = vpop.f32.mrf.mxu0  ;;  %v15793_v34 = vpop.f32.mrf.mxu1 }
 0x546   : > { %v15795_v13 = vpop.f32.mrf.mxu0  ;;  %v15797_v44 = vpop.f32.mrf.mxu1 }
 0x548   : > { %v15799_v55 = vpop.f32.mrf.mxu1  ;;  %v15801_v41 = vpop.f32.mrf.mxu0 }
 0x54a   : > { %v15803_v28 = vpop.f32.mrf.mxu1  ;;  %v15807_v0 = vpop.f32.mrf.mxu0 }
 0x54c   : > { %v15805_v53 = vpop.f32.mrf.mxu1 }
 0x54e   : > { %v15809_v48 = vpop.f32.mrf.mxu1  ;;  %v4235_v19 = vpop.f32.mrf.mxu0 }
 0x54f   : > { %v4236_v15 = vadd.f32 %v4235_v19, %v4143_v32 }
 0x550   : > { %v4328_v24 = vpop.f32.mrf.mxu1  ;;  %v4237_v23 = vpop.f32.mrf.mxu0 }
 0x551   : > { %v4238_v31 = vadd.f32 %v4237_v23, %v4145_v1  ;;  %v4329_v29 = vadd.f32 %v4328_v24, %v4236_v15 }
 0x552   : > { %v4330_v6 = vpop.f32.mrf.mxu1  ;;  %v4239_v7 = vpop.f32.mrf.mxu0 }
 0x553   : > { %v4240_v42 = vadd.f32 %v4239_v7, %v4147_v3  ;;  %v15811_v16 = vadd.f32 %v4330_v6, %v4238_v31 }
 0x554   : > { %v4332_v20 = vpop.f32.mrf.mxu1  ;;  %v15813_v26 = vpop.f32.mrf.mxu0 }
 0x555   : > { %19649 = vst [vmem:[#allocation43_spill] sm:$0xff] %v15811_v16  ;;  %v4333_v25 = vadd.f32 %v4332_v20, %v4240_v42 }
 0x556   : > { %v15815_v2 = vpop.f32.mrf.mxu1  ;;  %v4245_v11 = vpop.f32.mrf.mxu0 }
 0x557   : > { %19650 = vst [vmem:[#allocation38_spill] sm:$0xff] %v15815_v2  ;;  %v15818_v33 = vpack.c.bf16 %v4333_v25, %v4329_v29  ;;  %v4246_v47 = vadd.f32 %v4245_v11, %v4153_v14 }
 0x558   : > { %v4338_v38 = vpop.f32.mrf.mxu1  ;;  %v15820_v35 = vpop.f32.mrf.mxu0 }
 0x559   : > { %19651 = vst [vmem:[#allocation41_spill] sm:$0xff] %v15818_v33  ;;  %v4339_v23 = vadd.f32 %v4338_v38, %v4246_v47 }
 0x55a   : > { %v15823_v32 = vpop.f32.mrf.mxu1  ;;  %v4249_v19 = vpop.f32.mrf.mxu0 }
 0x55b   : > { %19652 = vst [vmem:[#allocation31_spill] sm:$0xff] %v15823_v32  ;;  %v4250_v1 = vadd.f32 %v4249_v19, %v4157_v52 }
 0x55c   : > { %v4342_v15 = vpop.f32.mrf.mxu1  ;;  %v15825_v24 = vpop.f32.mrf.mxu0 }
 0x55d   : > { %v4343_v3 = vadd.f32 %v4342_v15, %v4250_v1 }
 0x55e   : > { %v15827_v31 = vpop.f32.mrf.mxu1  ;;  %v4255_v59 = vpop.f32.mrf.mxu0 }
 0x55f   : > { %19653 = vst [vmem:[#allocation34_spill] sm:$0xff] %v15827_v31  ;;  %v15830_v29 = vpack.c.bf16 %v4343_v3, %v4339_v23  ;;  %v4256_v46 = vadd.f32 %v4255_v59, %v4163_v56 }
 0x560   : > { %v4348_v6 = vpop.f32.mrf.mxu1  ;;  %v15832_v7 = vpop.f32.mrf.mxu0 }
 0x561   : > { %19654 = vst [vmem:[#allocation6_spill] sm:$0xff] %v15830_v29  ;;  %v4349_v38 = vadd.f32 %v4348_v6, %v4256_v46 }
 0x562   : > { %v15836_v42 = vpop.f32.mrf.mxu1  ;;  %v4259_v20 = vpop.f32.mrf.mxu0 }
 0x563   : > { %v4260_v25 = vadd.f32 %v4259_v20, %v4167_v37 }
 0x564   : > { %v4352_v11 = vpop.f32.mrf.mxu1  ;;  %v15838_v14 = vpop.f32.mrf.mxu0 }
 0x565   : > { %v4353_v52 = vadd.f32 %v4352_v11, %v4260_v25 }
 0x566   : > { %v15840_v47 = vpop.f32.mrf.mxu1  ;;  %v4265_v43 = vpop.f32.mrf.mxu0 }
 0x567   : > { %v15842_v51 = vpack.c.bf16 %v4353_v52, %v4349_v38  ;;  %v4266_v15 = vadd.f32 %v4265_v43, %v15771_v49 }
 0x568   : > { %v4358_v19 = vpop.f32.mrf.mxu1  ;;  %v4267_v1 = vpop.f32.mrf.mxu0 }
 0x569   : > { %19655 = vst [vmem:[#allocation50_spill] sm:$0xff] %v15842_v51  ;;  %v4359_v59 = vadd.f32 %v4358_v19, %v4266_v15  ;;  %v4187_v15 = vadd.f32 %v15793_v34, %v15783_v57 }
 0x56a   : > { %v15845_v5 = vpop.f32.mrf.mxu1  ;;  %v4269_v27 = vpop.f32.mrf.mxu0 }
 0x56b   : > { %v4270_v23 = vadd.f32 %v4269_v27, %v15779_v17  ;;  %v4193_v17 = vadd.f32 %v15799_v55, %v15791_v18  ;;  %v4195_v27 = vadd.f32 %v15803_v28, %v15795_v13  ;;  %v4199_v18 = vadd.f32 %v15809_v48, %v15807_v0 }
 0x56c   : > { %v4362_v3 = vpop.f32.mrf.mxu1  ;;  %v4271_v46 = vpop.f32.mrf.mxu0  ;;  %v4185_v13 = vadd.f32 %v15789_v58, %v15777_v30  ;;  %v4169_v58 = vadd.f32 %v15767_v40, %v15757_v22  ;;  %v4159_v22 = vadd.f32 %v15761_v39, %v15747_v60  ;;  %v4149_v60 = vadd.f32 %v15753_v9, %v15739_v63  ;;  %v19659_v63 = vld [vmem:[#allocation38_spill] sm:$0xff] }
 0x56d   : > { %v4363_v56 = vadd.f32 %v4362_v3, %v4270_v23  ;;  %v4197_v23 = vadd.f32 %v15805_v53, %v15801_v41 }
 0x56e   : > { %v4364_v6 = vpop.f32.mrf.mxu1  ;;  %v4275_v25 = vpop.f32.mrf.mxu0 }
 0x56f   : > { %v15848_v37 = vpack.c.bf16 %v4363_v56, %v4359_v59  ;;  %v4183_v59 = vadd.f32 %v15785_v45, %v15773_v8  ;;  %v4189_v56 = vadd.f32 %v15797_v44, %v15787_v54  ;;  %v4179_v45 = vadd.f32 %v15781_v36, %v15769_v50 }
 0x570   : > { %v4368_v20 = vpop.f32.mrf.mxu1  ;;  %v4277_v38 = vpop.f32.mrf.mxu0  ;;  %v4268_v50 = vadd.f32 %v4267_v1, %v15775_v4  ;;  %v19657_v1 = vld [vmem:[#allocation50_spill] sm:$0xff] }
 0x571   : > { %v4276_v28 = vadd.f32 %v4275_v25, %v4183_v59  ;;  %v4278_v54 = vadd.f32 %v4277_v38, %v4185_v13  ;;  %v4272_v48 = vadd.f32 %v4271_v46, %v4179_v45  ;;  %v19662_v25 = vld [vmem:[#allocation41_spill] sm:$0xff] }
 0x572   : > { %v4370_v11 = vpop.f32.mrf.mxu1  ;;  %v4279_v62 = vpop.f32.mrf.mxu0  ;;  %v4361_v4 = vadd.f32 %v15845_v5, %v4268_v50  ;;  %v19658_v5 = vld [vmem:[#allocation31_spill] sm:$0xff] }
 0x573   : > { %v4280_v55 = vadd.f32 %v4279_v62, %v4187_v15  ;;  %v4371_v36 = vadd.f32 %v4370_v11, %v4278_v54  ;;  %v11571_v11 = vld [vmem:[%s18939_s4 + $0xc] ss:$28 sps:$4 sm:$0xff]  }
 0x574   : > { %v4372_v52 = vpop.f32.mrf.mxu1  ;;  %v4281_v43 = vpop.f32.mrf.mxu0  ;;  %5906 = vmatprep.mubr.bf16.mxu0 %v11571_v11  ;;  %v11574_v11 = vld [vmem:[%s18939_s4 + $0x44] ss:$28 sps:$4 sm:$0xff]  }
 0x575   : > { %v4282_v53 = vadd.f32 %v4281_v43, %v4189_v56  ;;  %v4373_v51 = vadd.f32 %v4372_v52, %v4280_v55  ;;  %v11595_v52 = vld [vmem:[%s18939_s4 + $0x4] ss:$28 sps:$4 sm:$0xff]  }
 0x576   : > { %v4374_v33 = vpop.f32.mrf.mxu1  ;;  %5713 = vmatprep.mubr.bf16.mxu1 %v11595_v52 }
 0x599   : > { %v4378_v49 = vpop.f32.mrf.mxu1 }
 0x59b   : > { %v4380_v29 = vpop.f32.mrf.mxu1 }
 0x59c   : > { %v4285_v16 = vpop.f32.mrf.mxu0 }
 0x59d   : > { %v4286_v3 = vadd.f32 %v4285_v16, %v4193_v17  ;;  %v4382_v2 = vpop.f32.mrf.mxu1 }
 0x59e   : > { %v4287_v19 = vpop.f32.mrf.mxu0 }
 0x59f   : > { %v4288_v57 = vadd.f32 %v4287_v19, %v4195_v27  ;;  %v4379_v16 = vadd.f32 %v4378_v49, %v4286_v3  ;;  %v4384_v44 = vpop.f32.mrf.mxu1  ;;  %v4375_v19 = vadd.f32 %v4374_v33, %v4282_v53  ;;  %v4165_v33 = vadd.f32 %v15763_v61, %v15751_v21 }
 0x5a0   : > { %v4289_v32 = vpop.f32.mrf.mxu0  ;;  %v4155_v21 = vadd.f32 %v15759_v10, %v15743_v12  ;;  %v4252_v61 = vadd.f32 %v15825_v24, %v4159_v22  ;;  %v4242_v12 = vadd.f32 %v15813_v26, %v4149_v60  ;;  %v19656_v10 = vld [vmem:[#allocation34_spill] sm:$0xff]  ;;  %v19661_v26 = vld [vmem:[#allocation43_spill] sm:$0xff] }
 0x5a1   : > { %v4290_v34 = vadd.f32 %v4289_v32, %v4197_v23  ;;  %v4381_v31 = vadd.f32 %v4380_v29, %v4288_v57  ;;  %v4369_v32 = vadd.f32 %v4368_v20, %v4276_v28  ;;  %v4365_v29 = vadd.f32 %v4364_v6, %v4272_v48 }
 0x5a2   : > { %v4291_v41 = vpop.f32.mrf.mxu0  ;;  %v15884_v46 = vpack.c.bf16 %v4375_v19, %v4371_v36  ;;  %v4258_v40 = vadd.f32 %v15832_v7, %v4165_v33  ;;  %v4248_v39 = vadd.f32 %v15820_v35, %v4155_v21  ;;  %v4345_v24 = vadd.f32 %v19656_v10, %v4252_v61 }
 0x5a3   : > { %v4383_v17 = vadd.f32 %v4382_v2, %v4290_v34  ;;  %v4292_v8 = vadd.f32 %v4291_v41, %v4199_v18  ;;  %v15877_v2 = vpack.c.bf16 %v4373_v51, %v4369_v32  ;;  %v15898_v51 = vpack.c.bf16 %v4365_v29, %v4361_v4 }
 0x5a4   : > { %v4351_v7 = vadd.f32 %v15836_v42, %v4258_v40  ;;  %v4341_v6 = vadd.f32 %v19658_v5, %v4248_v39  ;;  %v4335_v9 = vadd.f32 %v19659_v63, %v4242_v12  ;;  %v19660_v42 = vld [vmem:[#allocation6_spill] sm:$0xff] }
 0x5a5   : > { %v15868_v0 = vpack.c.bf16 %v4383_v17, %v4379_v16  ;;  %v4385_v62 = vadd.f32 %v4384_v44, %v4292_v8 }
 0x5a6   : > { %v15918_v35 = vpack.c.bf16 %v4345_v24, %v4341_v6  ;;  %v15925_v20 = vpack.c.bf16 %v4335_v9, %v19661_v26  ;;  %v11569_v9 = vld [vmem:[%s18939_s4 + $0x8] ss:$28 sps:$4 sm:$0xff]  }
 0x5a7   : > { %v15870_v30 = vpack.c.bf16 %v4385_v62, %v4381_v31  ;;  %4515 = vrot.lane.b32.xlu0 %v15868_v0, %s11982_s25  ;;  %v4262_v31 = vadd.f32 %v15838_v14, %v4169_v58 }
 0x5a9   : > { %4517 = vrot.lane.b32.xlu1 %v15870_v30, %s11982_s25  ;;  %v4355_v14 = vadd.f32 %v15840_v47, %v4262_v31 }
 0x5ab   : > { %4511 = vrot.lane.b32.xlu0 %v15877_v2, %s11982_s25  ;;  %v15910_v47 = vpack.c.bf16 %v4355_v14, %v4351_v7 }
 0x5ad   : > { %4513 = vrot.lane.b32.xlu1 %v15884_v46, %s11982_s25 }
 0x5af   : > { %4507 = vrot.lane.b32.xlu0 %v15848_v37, %s11982_s25 }
 0x5b1   : > { %4509 = vrot.lane.b32.xlu1 %v15898_v51, %s11982_s25 }
 0x5b3   : > { %4503 = vrot.lane.b32.xlu0 %v19657_v1, %s11982_s25 }
 0x5b5   : > { %4505 = vrot.lane.b32.xlu1 %v15910_v47, %s11982_s25 }
 0x5b7   : > { %4499 = vrot.lane.b32.xlu0 %v19660_v42, %s11982_s25 }
 0x5b9   : > { %4501 = vrot.lane.b32.xlu1 %v15918_v35, %s11982_s25 }
 0x5bb   : > { %4495 = vrot.lane.b32.xlu0 %v19662_v25, %s11982_s25 }
 0x5bd   : > { %4497 = vrot.lane.b32.xlu1 %v15925_v20, %s11982_s25 }
 0x5bf   : > { %4473 = vrot.lane.b32.xlu0 %v15868_v0, %s11976_s26 }
 0x5c1   : > { %4475 = vrot.lane.b32.xlu1 %v15870_v30, %s11976_s26 }
 0x5c3   : > { %4469 = vrot.lane.b32.xlu0 %v15877_v2, %s11976_s26 }
 0x5c5   : > { %4471 = vrot.lane.b32.xlu1 %v15884_v46, %s11976_s26 }
 0x5c7   : > { %4585 = vrot.lane.b32.xlu0 %v19660_v42, %s11983_s21 }
 0x5c9   : > { %4587 = vrot.lane.b32.xlu1 %v15918_v35, %s11983_s21 }
 0x5cb   : > { %4581 = vrot.lane.b32.xlu0 %v19662_v25, %s11983_s21 }
 0x5cd   : > { %4583 = vrot.lane.b32.xlu1 %v15925_v20, %s11983_s21 }
 0x5cf   : > { %4558 = vrot.lane.b32.xlu0 %v15868_v0, %s11984_s22 }
 0x5d1   : > { %4560 = vrot.lane.b32.xlu1 %v15870_v30, %s11984_s22 }
 0x5d3   : > { %4554 = vrot.lane.b32.xlu0 %v15877_v2, %s11984_s22 }
 0x5d5   : > { %4556 = vrot.lane.b32.xlu1 %v15884_v46, %s11984_s22 }
 0x5d7   : > { %4550 = vrot.lane.b32.xlu0 %v15848_v37, %s11984_s22 }
 0x5d9   : > { %4552 = vrot.lane.b32.xlu1 %v15898_v51, %s11984_s22 }
 0x5db   : > { %4546 = vrot.lane.b32.xlu0 %v19657_v1, %s11984_s22 }
 0x5dd   : > { %4548 = vrot.lane.b32.xlu1 %v15910_v47, %s11984_s22 }
 0x5df   : > { %4542 = vrot.lane.b32.xlu0 %v19660_v42, %s11984_s22 }
 0x5e1   : > { %4544 = vrot.lane.b32.xlu1 %v15918_v35, %s11984_s22 }
 0x5e3   : > { %4538 = vrot.lane.b32.xlu0 %v19662_v25, %s11984_s22 }
 0x5e5   : > { %4540 = vrot.lane.b32.xlu1 %v15925_v20, %s11984_s22  ;;  %s12001_s22 = smov 3  }
 0x5e7   : > { %4415 = vrot.lane.b32.xlu0 %v19660_v42, %s11977_s27 }
 0x5e9   : > { %4417 = vrot.lane.b32.xlu1 %v15918_v35, %s11977_s27 }
 0x5eb   : > { %4411 = vrot.lane.b32.xlu0 %v19662_v25, %s11977_s27 }
 0x5ed   : > { %4413 = vrot.lane.b32.xlu1 %v15925_v20, %s11977_s27 }
 0x5ef   : > { %4465 = vrot.lane.b32.xlu0 %v15848_v37, %s11976_s26 }
 0x5f1   : > { %4467 = vrot.lane.b32.xlu1 %v15898_v51, %s11976_s26 }
 0x5f3   : > { %4461 = vrot.lane.b32.xlu0 %v19657_v1, %s11976_s26 }
 0x5f5   : > { %4463 = vrot.lane.b32.xlu1 %v15910_v47, %s11976_s26 }
 0x5f7   : > { %4457 = vrot.lane.b32.xlu0 %v19660_v42, %s11976_s26 }
 0x5f9   : > { %4459 = vrot.lane.b32.xlu1 %v15918_v35, %s11976_s26 }
 0x5fb   : > { %4453 = vrot.lane.b32.xlu0 %v19662_v25, %s11976_s26 }
 0x5fd   : > { %4455 = vrot.lane.b32.xlu1 %v15925_v20, %s11976_s26 }
 0x5ff   : > { %4431 = vrot.lane.b32.xlu0 %v15868_v0, %s11977_s27 }
 0x601   : > { %4433 = vrot.lane.b32.xlu1 %v15870_v30, %s11977_s27 }
 0x603   : > { %4427 = vrot.lane.b32.xlu0 %v15877_v2, %s11977_s27 }
 0x605   : > { %4429 = vrot.lane.b32.xlu1 %v15884_v46, %s11977_s27 }
 0x607   : > { %4423 = vrot.lane.b32.xlu0 %v15848_v37, %s11977_s27 }
 0x609   : > { %4425 = vrot.lane.b32.xlu1 %v15898_v51, %s11977_s27 }
 0x60b   : > { %4419 = vrot.lane.b32.xlu0 %v19657_v1, %s11977_s27 }
 0x60d   : > { %4421 = vrot.lane.b32.xlu1 %v15910_v47, %s11977_s27 }
 0x60f   : > { %4636 = vrot.lane.b32.xlu0 %v15848_v37, %s11978_s10 }
 0x611   : > { %4638 = vrot.lane.b32.xlu1 %v15898_v51, %s11978_s10 }
 0x613   : > { %4632 = vrot.lane.b32.xlu0 %v19657_v1, %s11978_s10 }
 0x615   : > { %4634 = vrot.lane.b32.xlu1 %v15910_v47, %s11978_s10 }
 0x617   : > { %4628 = vrot.lane.b32.xlu0 %v19660_v42, %s11978_s10 }
 0x619   : > { %v4516_v38 = vpop.permute.xlu0 %4515  ;;  %4630 = vrot.lane.b32.xlu1 %v15918_v35, %s11978_s10 }
 0x61b   : > { %4624 = vrot.lane.b32.xlu0 %v19662_v25, %s11978_s10  ;;  %v4518_v49 = vpop.permute.xlu1 %4517 }
 0x61c   : > { %5874 = vmatprep.subr.bf16.mxu0 %v4518_v49  ;;  %v4525_v43 = vsel %vm4519_vm11, %v4516_v38, %v4518_v49 }
 0x61d   : > { %v4512_v15 = vpop.permute.xlu0 %4511  ;;  %4626 = vrot.lane.b32.xlu1 %v15925_v20, %s11978_s10  ;;  %5875 = vmatpush1.bf16.msra.mxu0 %v4525_v43 }
 0x61f   : > { %4601 = vrot.lane.b32.xlu0 %v15868_v0, %s11983_s21  ;;  %v4514_v27 = vpop.permute.xlu1 %4513 }
 0x620   : > { %5876 = vmatprep.subr.bf16.mxu0 %v4514_v27  ;;  %v4524_v23 = vsel %vm4519_vm11, %v4512_v15, %v4514_v27  ;;  %v11572_v27 = vld [vmem:[%s18939_s4 + $0x40] ss:$28 sps:$4 sm:$0xff]  }
 0x621   : > { %v4508_v3 = vpop.permute.xlu0 %4507  ;;  %4603 = vrot.lane.b32.xlu1 %v15870_v30, %s11983_s21  ;;  %5877 = vmatpush1.bf16.msra.mxu0 %v4524_v23 }
 0x623   : > { %4597 = vrot.lane.b32.xlu0 %v15877_v2, %s11983_s21  ;;  %v4510_v59 = vpop.permute.xlu1 %4509 }
 0x624   : > { %5878 = vmatprep.subr.bf16.mxu0 %v4510_v59  ;;  %v4523_v56 = vsel %vm4519_vm11, %v4508_v3, %v4510_v59  ;;  %v11577_v3 = vld [vmem:[%s18939_s4 + $0x7c] ss:$28 sps:$4 sm:$0xff]  }
 0x625   : > { %v4504_v18 = vpop.permute.xlu0 %4503  ;;  %4599 = vrot.lane.b32.xlu1 %v15884_v46, %s11983_s21  ;;  %5879 = vmatpush1.bf16.msra.mxu0 %v4523_v56  ;;  %v4882_v56 = vld [vmem:[%s18940_s5 + $0x10] sm:$0xff] }
 0x627   : > { %4593 = vrot.lane.b32.xlu0 %v15848_v37, %s11983_s21  ;;  %v4506_v55 = vpop.permute.xlu1 %4505 }
 0x628   : > { %5880 = vmatprep.subr.bf16.mxu0 %v4506_v55  ;;  %v4522_v57 = vsel %vm4519_vm11, %v4504_v18, %v4506_v55 }
 0x629   : > { %v4500_v34 = vpop.permute.xlu0 %4499  ;;  %4595 = vrot.lane.b32.xlu1 %v15898_v51, %s11983_s21  ;;  %5881 = vmatpush1.bf16.msra.mxu0 %v4522_v57  ;;  %v4884_v57 = vld [vmem:[%s18940_s5 + $0x20] sm:$0xff] }
 0x62b   : > { %4589 = vrot.lane.b32.xlu0 %v19657_v1, %s11983_s21  ;;  %v4502_v13 = vpop.permute.xlu1 %4501 }
 0x62c   : > { %5882 = vmatprep.subr.bf16.mxu0 %v4502_v13  ;;  %v4521_v28 = vsel %vm4519_vm11, %v4500_v34, %v4502_v13  ;;  %v11575_v34 = vld [vmem:[%s18939_s4 + $0x78] ss:$28 sps:$4 sm:$0xff]  }
 0x62d   : > { %v4496_v41 = vpop.permute.xlu0 %4495  ;;  %4591 = vrot.lane.b32.xlu1 %v15910_v47, %s11983_s21  ;;  %5883 = vmatpush1.bf16.msra.mxu0 %v4521_v28  ;;  %s11993_s21 = smov 27  }
 0x62f   : > { %4686 = vrot.lane.b32.xlu0 %v15868_v0, %s11985_s11  ;;  %v4498_v53 = vpop.permute.xlu1 %4497 }
 0x630   : > { %5884 = vmatprep.subr.bf16.mxu0 %v4498_v53  ;;  %v4520_v16 = vsel %vm4519_vm11, %v4496_v41, %v4498_v53  ;;  %v4886_v41 = vld [vmem:[%s18940_s5 + $0x30] sm:$0xff] }
 0x631   : > { %v4474_v17 = vpop.permute.xlu0 %4473  ;;  %4688 = vrot.lane.b32.xlu1 %v15870_v30, %s11985_s11  ;;  %5885 = vmatpush1.bf16.msra.mxu0 %v4520_v16  ;;  %v4880_v16 = vld [vmem:[%s18940_s5] sm:$0xff] }
 0x633   : > { %4682 = vrot.lane.b32.xlu0 %v15877_v2, %s11985_s11  ;;  %v4476_v8 = vpop.permute.xlu1 %4475 }
 0x634   : > { %5886 = vmatprep.subr.bf16.mxu0 %v4476_v8  ;;  %v4482_v45 = vsel %vm604_vm2, %v4474_v17, %v4476_v8  ;;  %v11578_v17 = vld [vmem:[%s18939_s4 + $0xb0] ss:$28 sps:$4 sm:$0xff]  }
 0x635   : > { %v4470_v54 = vpop.permute.xlu0 %4469  ;;  %4684 = vrot.lane.b32.xlu1 %v15884_v46, %s11985_s11  ;;  %5887 = vmatpush1.bf16.msra.mxu0 %v4482_v45 }
 0x637   : > { %4678 = vrot.lane.b32.xlu0 %v15848_v37, %s11985_s11  ;;  %v4472_v44 = vpop.permute.xlu1 %4471 }
 0x638   : > { %5888 = vmatprep.subr.bf16.mxu0 %v4472_v44  ;;  %v4481_v62 = vsel %vm604_vm2, %v4470_v54, %v4472_v44  ;;  %v4890_v54 = vld [vmem:[%s18940_s5 + $0x50] sm:$0xff] }
 0x639   : > { %v4586_v48 = vpop.permute.xlu0 %4585  ;;  %4680 = vrot.lane.b32.xlu1 %v15898_v51, %s11985_s11  ;;  %5889 = vmatpush1.bf16.msra.mxu0 %v4481_v62  ;;  %v4892_v62 = vld [vmem:[%s18940_s5 + $0x60] sm:$0xff] }
 0x63b   : > { %4674 = vrot.lane.b32.xlu0 %v19657_v1, %s11985_s11  ;;  %v4588_v32 = vpop.permute.xlu1 %4587 }
 0x63c   : > { %5890 = vmatprep.subr.bf16.mxu0 %v4588_v32  ;;  %v4607_v19 = vsel %vm4605_vm12, %v4586_v48, %v4588_v32  ;;  %v11581_v48 = vld [vmem:[%s18939_s4 + $0xe8] ss:$28 sps:$4 sm:$0xff]  }
 0x63d   : > { %v4582_v58 = vpop.permute.xlu0 %4581  ;;  %4676 = vrot.lane.b32.xlu1 %v15910_v47, %s11985_s11  ;;  %5891 = vmatpush2.bf16.msra.mxu0 %v4607_v19 }
 0x63f   : > { %4670 = vrot.lane.b32.xlu0 %v19660_v42, %s11985_s11  ;;  %v4584_v50 = vpop.permute.xlu1 %4583 }
 0x640   : > { %5892 = vmatprep.subr.bf16.mxu0 %v4584_v50  ;;  %v4606_v36 = vsel %vm4605_vm12, %v4582_v58, %v4584_v50 }
 0x641   : > { %v4559_v33 = vpop.permute.xlu0 %4558  ;;  %4672 = vrot.lane.b32.xlu1 %v15918_v35, %s11985_s11  ;;  %5893 = vmatpush2.bf16.msra.mxu0 %v4606_v36  ;;  %v4889_v36 = vld [vmem:[%s18940_s5 + $0x48] sm:$0xff] }
 0x643   : > { %4666 = vrot.lane.b32.xlu0 %v19662_v25, %s11985_s11  ;;  %v4561_v31 = vpop.permute.xlu1 %4560 }
 0x644   : > { %5894 = vmatprep.subr.bf16.mxu0 %v4561_v31  ;;  %v4568_v29 = vsel %vm4562_vm13, %v4559_v33, %v4561_v31 }
 0x645   : > { %v4555_v22 = vpop.permute.xlu0 %4554  ;;  %4668 = vrot.lane.b32.xlu1 %v15925_v20, %s11985_s11  ;;  %5895 = vmatpush2.bf16.msra.mxu0 %v4568_v29  ;;  %v11584_v29 = vld [vmem:[%s18939_s4 + $0x120] ss:$28 sps:$4 sm:$0xff]  }
 0x647   : > { %4644 = vrot.lane.b32.xlu0 %v15868_v0, %s11978_s10  ;;  %v4557_v40 = vpop.permute.xlu1 %4556 }
 0x648   : > { %5896 = vmatprep.subr.bf16.mxu0 %v4557_v40  ;;  %v4567_v4 = vsel %vm4562_vm13, %v4555_v22, %v4557_v40  ;;  %v11589_v40 = vld [vmem:[%s18939_s4 + $0x15c] ss:$28 sps:$4 sm:$0xff]  }
 0x649   : > { %v4551_v21 = vpop.permute.xlu0 %4550  ;;  %4646 = vrot.lane.b32.xlu1 %v15870_v30, %s11978_s10  ;;  %5897 = vmatpush2.bf16.msra.mxu0 %v4567_v4 }
 0x64b   : > { %4640 = vrot.lane.b32.xlu0 %v15877_v2, %s11978_s10  ;;  %v4553_v61 = vpop.permute.xlu1 %4552 }
 0x64c   : > { %5898 = vmatprep.subr.bf16.mxu0 %v4553_v61  ;;  %v4566_v14 = vsel %vm4562_vm13, %v4551_v21, %v4553_v61 }
 0x64d   : > { %v4547_v60 = vpop.permute.xlu0 %4546  ;;  %4642 = vrot.lane.b32.xlu1 %v15884_v46, %s11978_s10  ;;  %5899 = vmatpush2.bf16.msra.mxu0 %v4566_v14  ;;  %s11989_s10 = smov 103  }
 0x64f   : > { %4729 = vrot.lane.b32.xlu0 %v15868_v0, %s11986_s13  ;;  %v4549_v39 = vpop.permute.xlu1 %4548 }
 0x650   : > { %5900 = vmatprep.subr.bf16.mxu0 %v4549_v39  ;;  %v4565_v7 = vsel %vm4562_vm13, %v4547_v60, %v4549_v39 }
 0x651   : > { %v4543_v12 = vpop.permute.xlu0 %4542  ;;  %4731 = vrot.lane.b32.xlu1 %v15870_v30, %s11986_s13  ;;  %5901 = vmatpush2.bf16.msra.mxu0 %v4565_v7 }
 0x653   : > { %4725 = vrot.lane.b32.xlu0 %v15877_v2, %s11986_s13  ;;  %v4545_v10 = vpop.permute.xlu1 %4544 }
 0x654   : > { %5902 = vmatprep.subr.bf16.mxu0 %v4545_v10  ;;  %v4564_v24 = vsel %vm4562_vm13, %v4543_v12, %v4545_v10  ;;  %v11587_v12 = vld [vmem:[%s18939_s4 + $0x158] ss:$28 sps:$4 sm:$0xff]  }
 0x655   : > { %v4539_v5 = vpop.permute.xlu0 %4538  ;;  %4727 = vrot.lane.b32.xlu1 %v15884_v46, %s11986_s13  ;;  %5903 = vmatpush2.bf16.msra.mxu0 %v4564_v24  ;;  %v11592_v24 = vld [vmem:[%s18939_s4 + $0x194] ss:$28 sps:$4 sm:$0xff]  }
 0x657   : > { %4721 = vrot.lane.b32.xlu0 %v15848_v37, %s11986_s13  ;;  %v4541_v6 = vpop.permute.xlu1 %4540 }
 0x658   : > { %5904 = vmatprep.subr.bf16.mxu0 %v4541_v6  ;;  %v4563_v63 = vsel %vm4562_vm13, %v4539_v5, %v4541_v6  ;;  %vm7372_vm13 = vcmask 441344  }
 0x659   : > { %v4416_v26 = vpop.permute.xlu0 %4415  ;;  %4723 = vrot.lane.b32.xlu1 %v15898_v51, %s11986_s13  ;;  %5905 = vmatpush2.bf16.msra.mxu0 %v4563_v63 }
 0x65b   : > { %4717 = vrot.lane.b32.xlu0 %v19657_v1, %s11986_s13  ;;  %v4418_v38 = vpop.permute.xlu1 %4417 }
 0x65c   : > { %5681 = vmatprep.subr.bf16.mxu1 %v4418_v38  ;;  %5907 = vmatmul.mubr.bf16.vlgmr.msra.gmra.mxu0 %v11569_v9  ;;  %v4436_v52 = vsel %vm522_vm4, %v4416_v26, %v4418_v38 }
 0x65d   : > { %v4412_v49 = vpop.permute.xlu0 %4411  ;;  %4719 = vrot.lane.b32.xlu1 %v15910_v47, %s11986_s13  ;;  %5682 = vmatpush1.bf16.msra.mxu1 %v4436_v52  ;;  %v11590_v52 = vld [vmem:[%s18939_s4 + $0x190] ss:$28 sps:$4 sm:$0xff]  }
 0x65e   : > { %5916 = vmatprep.mubr.bf16.mxu0 %v11574_v11 }
 0x65f   : > { %4713 = vrot.lane.b32.xlu0 %v19660_v42, %s11986_s13  ;;  %v4414_v43 = vpop.permute.xlu1 %4413 }
 0x660   : > { %5683 = vmatprep.subr.bf16.mxu1 %v4414_v43  ;;  %v4435_v15 = vsel %vm522_vm4, %v4412_v49, %v4414_v43  ;;  %v11598_v43 = vld [vmem:[%s18939_s4 + $0x1cc] ss:$28 sps:$4 sm:$0xff]  }
 0x661   : > { %v16114_v23 = vpop.permute.xlu0 %4465  ;;  %4715 = vrot.lane.b32.xlu1 %v15918_v35, %s11986_s13  ;;  %5684 = vmatpush1.bf16.msra.mxu1 %v4435_v15 }
 0x662   : > { %5685 = vmatprep.subr.bf16.mxu1 %v15870_v30  ;;  %v4883_v30 = vld [vmem:[%s18940_s5 + $0x18] sm:$0xff] }
 0x663   : > { %4709 = vrot.lane.b32.xlu0 %v19662_v25, %s11986_s13  ;;  %v16124_v59 = vpop.permute.xlu1 %4467 }
 0x664   : > { %5917 = vmatmul.mubr.bf16.gmra.mxu0 %v11572_v27  ;;  %v4480_v58 = vsel %vm604_vm2, %v16114_v23, %v16124_v59 }
 0x665   : > { %v16129_v18 = vpop.permute.xlu0 %4461  ;;  %4711 = vrot.lane.b32.xlu1 %v15925_v20, %s11986_s13  ;;  %5686 = vmatpush1.bf16.msra.mxu1 %v15868_v0  ;;  %v4885_v0 = vld [vmem:[%s18940_s5 + $0x28] sm:$0xff] }
 0x666   : > { %5687 = vmatprep.subr.bf16.mxu1 %v15884_v46  ;;  %5926 = vmatprep.mubr.bf16.mxu0 %v11577_v3  ;;  %v11580_v46 = vld [vmem:[%s18939_s4 + $0xb4] ss:$28 sps:$4 sm:$0xff]  }
 0x667   : > { %4924 = vperm.xlu0 %10640, %v4882_v56   ;;  %v16138_v55 = vpop.permute.xlu1 %4463 }
 0x668   : > { %v4479_v31 = vsel %vm604_vm2, %v16129_v18, %v16138_v55 }
 0x669   : > { %v16146_v13 = vpop.permute.xlu0 %4457  ;;  %4929 = vperm.xlu1 %10639, %v4883_v30   ;;  %5688 = vmatpush1.bf16.msra.mxu1 %v15877_v2  ;;  %v4887_v2 = vld [vmem:[%s18940_s5 + $0x38] sm:$0xff] }
 0x66a   : > { %5689 = vmatprep.subr.bf16.mxu1 %v15898_v51  ;;  %v11593_v30 = vld [vmem:[%s18939_s4] ss:$28 sps:$4 sm:$0xff]  }
 0x66b   : > { %4934 = vperm.xlu0 %10640, %v4884_v57   ;;  %v16156_v28 = vpop.permute.xlu1 %4459 }
 0x66c   : > { %5927 = vmatmul.mubr.bf16.gmra.mxu0 %v11575_v34  ;;  %v4478_v21 = vsel %vm604_vm2, %v16146_v13, %v16156_v28  ;;  %v11601_v13 = vld [vmem:[%s18939_s4 + $0x3c] ss:$28 sps:$4 sm:$0xff]  }
 0x66d   : > { %v16161_v53 = vpop.permute.xlu0 %4453  ;;  %4939 = vperm.xlu1 %10639, %v4885_v0   ;;  %5690 = vmatpush1.bf16.msra.mxu1 %v15848_v37  ;;  %v4881_v37 = vld [vmem:[%s18940_s5 + $0x8] sm:$0xff]  ;;  %v11604_v0 = vld [vmem:[%s18939_s4 + $0x204] ss:$28 sps:$4 sm:$0xff]  }
 0x66e   : > { %5691 = vmatprep.subr.bf16.mxu1 %v15910_v47  ;;  %5936 = vmatprep.mubr.bf16.mxu0 %v11580_v46  ;;  %v11583_v47 = vld [vmem:[%s18939_s4 + $0xec] ss:$28 sps:$4 sm:$0xff]  }
 0x66f   : > { %4944 = vperm.xlu0 %10640, %v4886_v41   ;;  %v4456_v51 = vpop.permute.xlu1 %4455 }
 0x670   : > { %v4477_v39 = vsel %vm604_vm2, %v16161_v53, %v4456_v51  ;;  %vm7277_vm2 = vcmask 842752  }
 0x671   : > { %v16174_v8 = vpop.permute.xlu0 %4431  ;;  %4949 = vperm.xlu1 %10639, %v4887_v2   ;;  %5692 = vmatpush1.bf16.msra.mxu1 %v19657_v1  ;;  %v4891_v1 = vld [vmem:[%s18940_s5 + $0x58] sm:$0xff] }
 0x672   : > { %5693 = vmatprep.subr.bf16.mxu1 %v15918_v35  ;;  %v11599_v2 = vld [vmem:[%s18939_s4 + $0x38] ss:$28 sps:$4 sm:$0xff]  }
 0x673   : > { %4914 = vperm.xlu0 %10640, %v4880_v16   ;;  %v16184_v45 = vpop.permute.xlu1 %4433 }
 0x674   : > { %5937 = vmatmul.mubr.bf16.gmra.mxu0 %v11578_v17  ;;  %v4440_v6 = vsel %vm522_vm4, %v16174_v8, %v16184_v45  ;;  %v11607_v8 = vld [vmem:[%s18939_s4 + $0x74] ss:$28 sps:$4 sm:$0xff]  }
 0x675   : > { %v16189_v44 = vpop.permute.xlu0 %4427  ;;  %4919 = vperm.xlu1 %10639, %v4881_v37   ;;  %5694 = vmatpush1.bf16.msra.mxu1 %v19660_v42  ;;  %v4893_v42 = vld [vmem:[%s18940_s5 + $0x68] sm:$0xff]  ;;  %v11610_v37 = vld [vmem:[%s18939_s4 + $0x23c] ss:$28 sps:$4 sm:$0xff]  }
 0x676   : > { %5695 = vmatprep.subr.bf16.mxu1 %v15925_v20  ;;  %5946 = vmatprep.mubr.bf16.mxu0 %v11583_v47  ;;  %v11586_v20 = vld [vmem:[%s18939_s4 + $0x124] ss:$28 sps:$4 sm:$0xff]  }
 0x677   : > { %4964 = vperm.xlu0 %10640, %v4890_v54   ;;  %v4430_v35 = vpop.permute.xlu1 %4429 }
 0x678   : > { %v4439_v11 = vsel %vm522_vm4, %v16189_v44, %v4430_v35 }
 0x679   : > { %v16202_v32 = vpop.permute.xlu0 %4423  ;;  %4969 = vperm.xlu1 %10639, %v4891_v1   ;;  %5696 = vmatpush1.bf16.msra.mxu1 %v19662_v25  ;;  %v4888_v25 = vld [vmem:[%s18940_s5 + $0x40] sm:$0xff]  ;;  %v11605_v1 = vld [vmem:[%s18939_s4 + $0x70] ss:$28 sps:$4 sm:$0xff]  }
 0x67a   : > { %5697 = vmatprep.subr.bf16.mxu1 %v16124_v59 }
 0x67b   : > { %4974 = vperm.xlu0 %10640, %v4892_v62   ;;  %v16212_v19 = vpop.permute.xlu1 %4425 }
 0x67c   : > { %5947 = vmatmul.mubr.bf16.gmra.mxu0 %v11581_v48  ;;  %v4438_v27 = vsel %vm522_vm4, %v16202_v32, %v16212_v19  ;;  %v11613_v32 = vld [vmem:[%s18939_s4 + $0xac] ss:$28 sps:$4 sm:$0xff]  }
 0x67d   : > { %v16220_v50 = vpop.permute.xlu0 %4419  ;;  %4979 = vperm.xlu1 %10639, %v4893_v42   ;;  %5698 = vmatpush2.bf16.msra.mxu1 %v4480_v58  ;;  %v11616_v42 = vld [vmem:[%s18939_s4 + $0x274] ss:$28 sps:$4 sm:$0xff]  }
 0x67e   : > { %5699 = vmatprep.subr.bf16.mxu1 %v16138_v55  ;;  %5956 = vmatprep.mubr.bf16.mxu0 %v11586_v20  ;;  %v11596_v55 = vld [vmem:[%s18939_s4 + $0x1c8] ss:$28 sps:$4 sm:$0xff]  }
 0x67f   : > { %4954 = vperm.xlu0 %10640, %v4888_v25   ;;  %v4422_v33 = vpop.permute.xlu1 %4421 }
 0x680   : > { %v4437_v56 = vsel %vm522_vm4, %v16220_v50, %v4422_v33  ;;  %v11611_v50 = vld [vmem:[%s18939_s4 + $0xa8] ss:$28 sps:$4 sm:$0xff]  }
 0x681   : > { %v4637_v22 = vpop.permute.xlu0 %4636  ;;  %4959 = vperm.xlu1 %10639, %v4889_v36   ;;  %5700 = vmatpush2.bf16.msra.mxu1 %v4479_v31  ;;  %v11614_v36 = vld [vmem:[%s18939_s4 + $0x270] ss:$28 sps:$4 sm:$0xff]  }
 0x682   : > { %5701 = vmatprep.subr.bf16.mxu1 %v16156_v28 }
 0x683   : > { %v4639_v4 = vpop.permute.xlu1 %4638 }
 0x684   : > { %5957 = vmatmul.mubr.bf16.gmra.mxu0 %v11584_v29  ;;  %6067 = vmatprep.subr.bf16.mxu0 %v4639_v4  ;;  %v16240_v61 = vsel %vm850_vm6, %v4637_v22, %v4639_v4  ;;  %v11619_v29 = vld [vmem:[%s18939_s4 + $0xe4] ss:$28 sps:$4 sm:$0xff]   ;;  %v11622_v22 = vld [vmem:[%s18939_s4 + $0x2ac] ss:$28 sps:$4 sm:$0xff]  }
 0x685   : > { %v4633_v14 = vpop.permute.xlu0 %4632  ;;  %5702 = vmatpush2.bf16.msra.mxu1 %v4478_v21  ;;  %6068 = vmatpush1.bf16.msra.mxu0 %v16240_v61 }
 0x686   : > { %5703 = vmatprep.subr.bf16.mxu1 %v4456_v51  ;;  %5966 = vmatprep.mubr.bf16.mxu0 %v11589_v40  ;;  %v11602_v51 = vld [vmem:[%s18939_s4 + $0x200] ss:$28 sps:$4 sm:$0xff]  }
 0x687   : > { %v4635_v60 = vpop.permute.xlu1 %4634 }
 0x688   : > { %6069 = vmatprep.subr.bf16.mxu0 %v4635_v60  ;;  %v16246_v7 = vsel %vm850_vm6, %v4633_v14, %v4635_v60  ;;  %v11617_v14 = vld [vmem:[%s18939_s4 + $0xe0] ss:$28 sps:$4 sm:$0xff]  }
 0x689   : > { %v4629_v10 = vpop.permute.xlu0 %4628  ;;  %5704 = vmatpush2.bf16.msra.mxu1 %v4477_v39  ;;  %6070 = vmatpush1.bf16.msra.mxu0 %v16246_v7 }
 0x68a   : > { %5705 = vmatprep.subr.bf16.mxu1 %v16184_v45 }
 0x68b   : > { %v4631_v5 = vpop.permute.xlu1 %4630 }
 0x68c   : > { %5967 = vmatmul.mubr.bf16.gmra.mxu0 %v11587_v12  ;;  %6071 = vmatprep.subr.bf16.mxu0 %v4631_v5  ;;  %v16260_v63 = vsel %vm850_vm6, %v4629_v10, %v4631_v5  ;;  %v11625_v12 = vld [vmem:[%s18939_s4 + $0x11c] ss:$28 sps:$4 sm:$0xff]   ;;  %v11628_v10 = vld [vmem:[%s18939_s4 + $0x2e4] ss:$28 sps:$4 sm:$0xff]  }
 0x68d   : > { %v4625_v9 = vpop.permute.xlu0 %4624  ;;  %5706 = vmatpush2.bf16.msra.mxu1 %v4440_v6  ;;  %6072 = vmatpush1.bf16.msra.mxu0 %v16260_v63 }
 0x68e   : > { %5707 = vmatprep.subr.bf16.mxu1 %v4430_v35  ;;  %5976 = vmatprep.mubr.bf16.mxu0 %v11592_v24  ;;  %v11608_v35 = vld [vmem:[%s18939_s4 + $0x238] ss:$28 sps:$4 sm:$0xff]  }
 0x68f   : > { %v4627_v26 = vpop.permute.xlu1 %4626 }
 0x690   : > { %6073 = vmatprep.subr.bf16.mxu0 %v4627_v26  ;;  %v16266_v38 = vsel %vm850_vm6, %v4625_v9, %v4627_v26  ;;  %v11623_v9 = vld [vmem:[%s18939_s4 + $0x118] ss:$28 sps:$4 sm:$0xff]  }
 0x691   : > { %v4602_v49 = vpop.permute.xlu0 %4601  ;;  %5708 = vmatpush2.bf16.msra.mxu1 %v4439_v11  ;;  %6074 = vmatpush1.bf16.msra.mxu0 %v16266_v38  ;;  %v11631_v11 = vld [vmem:[%s18939_s4 + $0x154] ss:$28 sps:$4 sm:$0xff]  }
 0x692   : > { %5709 = vmatprep.subr.bf16.mxu1 %v16212_v19 }
 0x693   : > { %v16276_v15 = vpop.permute.xlu1 %4603 }
 0x694   : > { %5977 = vmatmul.mubr.bf16.gmra.mxu0 %v11590_v52  ;;  %6075 = vmatprep.subr.bf16.mxu0 %v16276_v15  ;;  %v16284_v23 = vsel %vm4605_vm12, %v4602_v49, %v16276_v15  ;;  %v11634_v52 = vld [vmem:[%s18939_s4 + $0x31c] ss:$28 sps:$4 sm:$0xff]   ;;  %v11629_v49 = vld [vmem:[%s18939_s4 + $0x150] ss:$28 sps:$4 sm:$0xff]  }
 0x695   : > { %v4598_v3 = vpop.permute.xlu0 %4597  ;;  %5710 = vmatpush2.bf16.msra.mxu1 %v4438_v27  ;;  %6076 = vmatpush1.bf16.msra.mxu0 %v16284_v23  ;;  %v11640_v27 = vld [vmem:[%s18939_s4 + $0x354] ss:$28 sps:$4 sm:$0xff]  }
 0x696   : > { %5711 = vmatprep.subr.bf16.mxu1 %v4422_v33  ;;  %5986 = vmatprep.mubr.bf16.mxu0 %v11598_v43  ;;  %v11632_v43 = vld [vmem:[%s18939_s4 + $0x318] ss:$28 sps:$4 sm:$0xff]  }
 0x697   : > { %v16287_v59 = vpop.permute.xlu1 %4599 }
 0x698   : > { %6077 = vmatprep.subr.bf16.mxu0 %v16287_v59  ;;  %v16294_v18 = vsel %vm4605_vm12, %v4598_v3, %v16287_v59  ;;  %v11638_v3 = vld [vmem:[%s18939_s4 + $0x350] ss:$28 sps:$4 sm:$0xff]  }
 0x699   : > { %v4594_v57 = vpop.permute.xlu0 %4593  ;;  %5712 = vmatpush2.bf16.msra.mxu1 %v4437_v56  ;;  %6078 = vmatpush1.bf16.msra.mxu0 %v16294_v18  ;;  %v11643_v56 = vld [vmem:[%s18939_s4 + $0x1c4] ss:$28 sps:$4 sm:$0xff]  }
 0x69a   : > { %10552 = vmatprep.subr.bf16.mxu1 %v4639_v4 }
 0x69b   : > { %v16303_v34 = vpop.permute.xlu1 %4595 }
 0x69c   : > { %5714 = vmatmul.mubr.bf16.vlgmr.msra.gmra.mxu1 %v11593_v30  ;;  %5987 = vmatmul.mubr.bf16.gmra.mxu0 %v11596_v55  ;;  %v16313_v46 = vsel %vm4605_vm12, %v4594_v57, %v16303_v34  ;;  %v11641_v57 = vld [vmem:[%s18939_s4 + $0x1c0] ss:$28 sps:$4 sm:$0xff]  }
 0x69d   : > { %6079 = vmatprep.subr.bf16.mxu0 %v16303_v34  ;;  %v4590_v28 = vpop.permute.xlu0 %4589  ;;  %10568 = vmatpush1.bf16.msra.mxu1 %v16240_v61 }
 0x69e   : > { %6080 = vmatpush1.bf16.msra.mxu0 %v16313_v46  ;;  %10553 = vmatprep.subr.bf16.mxu1 %v4635_v60  ;;  %v11620_v60 = vld [vmem:[%s18939_s4 + $0x2a8] ss:$28 sps:$4 sm:$0xff]  }
 0x69f   : > { %v16318_v41 = vpop.permute.xlu1 %4591  ;;  %5723 = vmatprep.mubr.bf16.mxu1 %v11601_v13  ;;  %5996 = vmatprep.mubr.bf16.mxu0 %v11604_v0  ;;  %v11649_v13 = vld [vmem:[%s18939_s4 + $0x1fc] ss:$28 sps:$4 sm:$0xff]   ;;  %v11652_v0 = vld [vmem:[%s18939_s4 + $0x4c] ss:$28 sps:$4 sm:$0xff]  }
 0x6a0   : > { %6081 = vmatprep.subr.bf16.mxu0 %v16318_v41  ;;  %v16323_v53 = vsel %vm4605_vm12, %v4590_v28, %v16318_v41  ;;  %vm7363_vm12 = vcmask 859136  }
 0x6a1   : > { %v4687_v16 = vpop.permute.xlu0 %4686  ;;  %10569 = vmatpush1.bf16.msra.mxu1 %v16246_v7 }
 0x6a2   : > { %6082 = vmatpush1.bf16.msra.mxu0 %v16323_v53  ;;  %10554 = vmatprep.subr.bf16.mxu1 %v4631_v5 }
 0x6a3   : > { %v16333_v17 = vpop.permute.xlu1 %4688 }
 0x6a4   : > { %5724 = vmatmul.mubr.bf16.gmra.mxu1 %v11599_v2  ;;  %5997 = vmatmul.mubr.bf16.gmra.mxu0 %v11602_v51  ;;  %v16343_v47 = vsel %vm4690_vm14, %v4687_v16, %v16333_v17  ;;  %v11647_v2 = vld [vmem:[%s18939_s4 + $0x1f8] ss:$28 sps:$4 sm:$0xff]   ;;  %v11650_v51 = vld [vmem:[%s18939_s4 + $0x48] ss:$28 sps:$4 sm:$0xff]  }
 0x6a5   : > { %6083 = vmatprep.subr.bf16.mxu0 %v16333_v17  ;;  %v4683_v45 = vpop.permute.xlu0 %4682  ;;  %10570 = vmatpush1.bf16.msra.mxu1 %v16260_v63 }
 0x6a6   : > { %6084 = vmatpush2.bf16.msra.mxu0 %v16343_v47  ;;  %10555 = vmatprep.subr.bf16.mxu1 %v4627_v26  ;;  %v11626_v26 = vld [vmem:[%s18939_s4 + $0x2e0] ss:$28 sps:$4 sm:$0xff]  }
 0x6a7   : > { %v16348_v54 = vpop.permute.xlu1 %4684  ;;  %5733 = vmatprep.mubr.bf16.mxu1 %v11607_v8  ;;  %6006 = vmatprep.mubr.bf16.mxu0 %v11610_v37  ;;  %v11658_v8 = vld [vmem:[%s18939_s4 + $0x84] ss:$28 sps:$4 sm:$0xff]  }
 0x6a8   : > { %6085 = vmatprep.subr.bf16.mxu0 %v16348_v54  ;;  %v16353_v44 = vsel %vm4690_vm14, %v4683_v45, %v16348_v54 }
 0x6a9   : > { %v4679_v62 = vpop.permute.xlu0 %4678  ;;  %10571 = vmatpush1.bf16.msra.mxu1 %v16266_v38 }
 0x6aa   : > { %6086 = vmatpush2.bf16.msra.mxu0 %v16353_v44  ;;  %10556 = vmatprep.subr.bf16.mxu1 %v16276_v15  ;;  %v11637_v15 = vld [vmem:[%s18939_s4 + $0x18c] ss:$28 sps:$4 sm:$0xff]  }
 0x6ab   : > { %v16364_v48 = vpop.permute.xlu1 %4680 }
 0x6ac   : > { %5734 = vmatmul.mubr.bf16.gmra.mxu1 %v11605_v1  ;;  %6007 = vmatmul.mubr.bf16.gmra.mxu0 %v11608_v35  ;;  %v16374_v20 = vsel %vm4690_vm14, %v4679_v62, %v16364_v48  ;;  %v11656_v1 = vld [vmem:[%s18939_s4 + $0x80] ss:$28 sps:$4 sm:$0xff]   ;;  %v11661_v62 = vld [vmem:[%s18939_s4 + $0x26c] ss:$28 sps:$4 sm:$0xff]  }
 0x6ad   : > { %6087 = vmatprep.subr.bf16.mxu0 %v16364_v48  ;;  %v4675_v19 = vpop.permute.xlu0 %4674  ;;  %10572 = vmatpush1.bf16.msra.mxu1 %v16284_v23  ;;  %v11635_v23 = vld [vmem:[%s18939_s4 + $0x188] ss:$28 sps:$4 sm:$0xff]  }
 0x6ae   : > { %6088 = vmatpush2.bf16.msra.mxu0 %v16374_v20  ;;  %10557 = vmatprep.subr.bf16.mxu1 %v16287_v59 }
 0x6af   : > { %v4677_v58 = vpop.permute.xlu1 %4676  ;;  %5743 = vmatprep.mubr.bf16.mxu1 %v11613_v32  ;;  %6016 = vmatprep.mubr.bf16.mxu0 %v11616_v42  ;;  %v19663_v42 = vmov 0  }
 0x6b0   : > { %6089 = vmatprep.subr.bf16.mxu0 %v4677_v58  ;;  %v4693_v25 = vsel %vm4690_vm14, %v4675_v19, %v4677_v58 }
 0x6b1   : > { %v4671_v33 = vpop.permute.xlu0 %4670  ;;  %10573 = vmatpush1.bf16.msra.mxu1 %v16294_v18  ;;  %v11646_v18 = vld [vmem:[%s18939_s4 + $0x14] ss:$28 sps:$4 sm:$0xff]  }
 0x6b2   : > { %6090 = vmatpush2.bf16.msra.mxu0 %v4693_v25  ;;  %10558 = vmatprep.subr.bf16.mxu1 %v16303_v34  ;;  %v11644_v34 = vld [vmem:[%s18939_s4 + $0x10] ss:$28 sps:$4 sm:$0xff]  }
 0x6b3   : > { %v4673_v31 = vpop.permute.xlu1 %4672 }
 0x6b4   : > { %5744 = vmatmul.mubr.bf16.gmra.mxu1 %v11611_v50  ;;  %6017 = vmatmul.mubr.bf16.gmra.mxu0 %v11614_v36  ;;  %v4692_v40 = vsel %vm4690_vm14, %v4671_v33, %v4673_v31  ;;  %v11665_v50 = vld [vmem:[%s18939_s4 + $0x2a4] ss:$28 sps:$4 sm:$0xff]   ;;  %v11666_v33 = vld [vmem:[%s18939_s4 + $0x50] ss:$28 sps:$4 sm:$0xff]  }
 0x6b5   : > { %6091 = vmatprep.subr.bf16.mxu0 %v4673_v31  ;;  %v4667_v4 = vpop.permute.xlu0 %4666  ;;  %10574 = vmatpush1.bf16.msra.mxu1 %v16313_v46  ;;  %v11663_v36 = vld [vmem:[%s18939_s4 + $0x2a0] ss:$28 sps:$4 sm:$0xff]  }
 0x6b6   : > { %6092 = vmatpush2.bf16.msra.mxu0 %v4692_v40  ;;  %10559 = vmatprep.subr.bf16.mxu1 %v16318_v41 }
 0x6b7   : > { %v4669_v21 = vpop.permute.xlu1 %4668  ;;  %5753 = vmatprep.mubr.bf16.mxu1 %v11619_v29  ;;  %6026 = vmatprep.mubr.bf16.mxu0 %v11622_v22  ;;  %v11667_v29 = vld [vmem:[%s18939_s4 + $0x2d8] ss:$28 sps:$4 sm:$0xff]   ;;  %v11670_v22 = vld [vmem:[%s18939_s4 + $0x88] ss:$28 sps:$4 sm:$0xff]  }
 0x6b8   : > { %6093 = vmatprep.subr.bf16.mxu0 %v4669_v21  ;;  %v4691_v61 = vsel %vm4690_vm14, %v4667_v4, %v4669_v21  ;;  %v11671_v4 = vld [vmem:[%s18939_s4 + $0x310] ss:$28 sps:$4 sm:$0xff]   ;;  %vm7381_vm14 = vcmask 23552  }
 0x6b9   : > { %v4645_v39 = vpop.permute.xlu0 %4644  ;;  %10575 = vmatpush1.bf16.msra.mxu1 %v16323_v53 }
 0x6ba   : > { %6094 = vmatpush2.bf16.msra.mxu0 %v4691_v61  ;;  %10560 = vmatprep.subr.bf16.mxu1 %v16333_v17  ;;  %v11655_v17 = vld [vmem:[%s18939_s4 + $0x234] ss:$28 sps:$4 sm:$0xff]  }
 0x6bb   : > { %v4647_v7 = vpop.permute.xlu1 %4646 }
 0x6bc   : > { %5754 = vmatmul.mubr.bf16.gmra.mxu1 %v11617_v14  ;;  %6027 = vmatmul.mubr.bf16.gmra.mxu0 %v11620_v60  ;;  %v4653_v24 = vsel %vm850_vm6, %v4645_v39, %v4647_v7  ;;  %v11674_v14 = vld [vmem:[%s18939_s4 + $0x348] ss:$28 sps:$4 sm:$0xff]   ;;  %v11684_v60 = vld [vmem:[%s18939_s4 + $0xf8] ss:$28 sps:$4 sm:$0xff]  }
 0x6bd   : > { %6095 = vmatprep.subr.bf16.mxu0 %v4647_v7  ;;  %10576 = vmatpush2.bf16.msra.mxu1 %v16343_v47  ;;  %v4641_v5 = vpop.permute.xlu0 %4640  ;;  %v11679_v39 = vld [vmem:[%s18939_s4 + $0xbc] ss:$28 sps:$4 sm:$0xff]  }
 0x6be   : > { %6096 = vmatpush2.bf16.msra.mxu0 %v4653_v24  ;;  %10561 = vmatprep.subr.bf16.mxu1 %v16348_v54 }
 0x6bf   : > { %v4643_v6 = vpop.permute.xlu1 %4642  ;;  %5763 = vmatprep.mubr.bf16.mxu1 %v11625_v12  ;;  %6036 = vmatprep.mubr.bf16.mxu0 %v11628_v10  ;;  %v11688_v12 = vld [vmem:[%s18939_s4 + $0x130] ss:$28 sps:$4 sm:$0xff]  }
 0x6c0   : > { %6097 = vmatprep.subr.bf16.mxu0 %v4643_v6  ;;  %v4652_v63 = vsel %vm850_vm6, %v4641_v5, %v4643_v6  ;;  %v11683_v10 = vld [vmem:[%s18939_s4 + $0xf4] ss:$28 sps:$4 sm:$0xff]  }
 0x6c1   : > { %10577 = vmatpush2.bf16.msra.mxu1 %v16353_v44  ;;  %v4730_v59 = vpop.permute.xlu0 %4729  ;;  %v11653_v44 = vld [vmem:[%s18939_s4 + $0x230] ss:$28 sps:$4 sm:$0xff]  }
 0x6c2   : > { %6098 = vmatpush2.bf16.msra.mxu0 %v4652_v63  ;;  %10562 = vmatprep.subr.bf16.mxu1 %v16364_v48 }
 0x6c3   : > { %v4732_v38 = vpop.permute.xlu1 %4731 }
 0x6c4   : > { %5764 = vmatmul.mubr.bf16.gmra.mxu1 %v11623_v9  ;;  %6037 = vmatmul.mubr.bf16.gmra.mxu0 %v11626_v26  ;;  %v4739_v28 = vsel %vm4733_vm15, %v4730_v59, %v4732_v38  ;;  %v11692_v9 = vld [vmem:[%s18939_s4 + $0x168] ss:$28 sps:$4 sm:$0xff]  }
 0x6c5   : > { %6264 = vmatprep.subr.bf16.mxu0 %v4732_v38  ;;  %10578 = vmatpush2.bf16.msra.mxu1 %v16374_v20  ;;  %v4726_v55 = vpop.permute.xlu0 %4725  ;;  %v11687_v26 = vld [vmem:[%s18939_s4 + $0x12c] ss:$28 sps:$4 sm:$0xff]  }
 0x6c6   : > { %10563 = vmatprep.subr.bf16.mxu1 %v4677_v58  ;;  %5773 = vmatprep.mubr.bf16.mxu1 %v11631_v11  ;;  %v11659_v58 = vld [vmem:[%s18939_s4 + $0x268] ss:$28 sps:$4 sm:$0xff]  }
 0x6c7   : > { %6046 = vmatprep.mubr.bf16.mxu0 %v11634_v52  ;;  %v4728_v30 = vpop.permute.xlu1 %4727 }
 0x6c8   : > { %v4738_v53 = vsel %vm4733_vm15, %v4726_v55, %v4728_v30  ;;  %v11695_v55 = vld [vmem:[%s18939_s4 + $0x19c] ss:$28 sps:$4 sm:$0xff]  }
 0x6c9   : > { %10579 = vmatpush2.bf16.msra.mxu1 %v4693_v25  ;;  %v4722_v41 = vpop.permute.xlu0 %4721  ;;  %v11662_v25 = vld [vmem:[%s18939_s4 + $0x18] ss:$28 sps:$4 sm:$0xff]  }
 0x6ca   : > { %10564 = vmatprep.subr.bf16.mxu1 %v4673_v31  ;;  %v11669_v31 = vld [vmem:[%s18939_s4 + $0x2dc] ss:$28 sps:$4 sm:$0xff]  }
 0x6cb   : > { %v4724_v46 = vpop.permute.xlu1 %4723 }
 0x6cc   : > { %5774 = vmatmul.mubr.bf16.gmra.mxu1 %v11629_v49  ;;  %6047 = vmatmul.mubr.bf16.gmra.mxu0 %v11632_v43  ;;  %v4737_v47 = vsel %vm4733_vm15, %v4722_v41, %v4724_v46  ;;  %v11685_v43 = vld [vmem:[%s18939_s4 + $0x128] ss:$28 sps:$4 sm:$0xff]   ;;  %v11699_v41 = vld [vmem:[%s18939_s4 + $0x1d4] ss:$28 sps:$4 sm:$0xff]  }
 0x6cd   : > { %10580 = vmatpush2.bf16.msra.mxu1 %v4692_v40  ;;  %5783 = vmatprep.mubr.bf16.mxu1 %v11637_v15  ;;  %v4718_v37 = vpop.permute.xlu0 %4717  ;;  %v11673_v40 = vld [vmem:[%s18939_s4 + $0x314] ss:$28 sps:$4 sm:$0xff]   ;;  %v11696_v15 = vld [vmem:[%s18939_s4 + $0x1a0] ss:$28 sps:$4 sm:$0xff]  }
 0x6ce   : > { %10565 = vmatprep.subr.bf16.mxu1 %v4669_v21  ;;  %6056 = vmatprep.mubr.bf16.mxu0 %v11640_v27  ;;  %v11680_v21 = vld [vmem:[%s18939_s4 + $0xc0] ss:$28 sps:$4 sm:$0xff]  }
 0x6cf   : > { %v4720_v16 = vpop.permute.xlu1 %4719  ;;  %v11691_v27 = vld [vmem:[%s18939_s4 + $0x164] ss:$28 sps:$4 sm:$0xff]  }
 0x6d0   : > { %v4736_v54 = vsel %vm4733_vm15, %v4718_v37, %v4720_v16  ;;  %v11703_v37 = vld [vmem:[%s18939_s4 + $0x20c] ss:$28 sps:$4 sm:$0xff]  }
 0x6d1   : > { %10581 = vmatpush2.bf16.msra.mxu1 %v4691_v61  ;;  %v4714_v35 = vpop.permute.xlu0 %4713  ;;  %v11676_v61 = vld [vmem:[%s18939_s4 + $0x34c] ss:$28 sps:$4 sm:$0xff]  }
 0x6d2   : > { %10566 = vmatprep.subr.bf16.mxu1 %v4647_v7  ;;  %v11677_v7 = vld [vmem:[%s18939_s4 + $0xb8] ss:$28 sps:$4 sm:$0xff]  }
 0x6d3   : > { %v4716_v45 = vpop.permute.xlu1 %4715 }
 0x6d4   : > { %5784 = vmatmul.mubr.bf16.gmra.mxu1 %v11635_v23  ;;  %6057 = vmatmul.mubr.bf16.gmra.mxu0 %v11638_v3  ;;  %v4735_v48 = vsel %vm4733_vm15, %v4714_v35, %v4716_v45  ;;  %v11712_v35 = vld [vmem:[%s18939_s4 + $0x280] ss:$28 sps:$4 sm:$0xff]  }
 0x6d5   : > { %10582 = vmatpush2.bf16.msra.mxu1 %v4653_v24  ;;  %5793 = vmatprep.mubr.bf16.mxu1 %v11643_v56  ;;  %v4710_v20 = vpop.permute.xlu0 %4709 }
 0x6d6   : > { %10567 = vmatprep.subr.bf16.mxu1 %v4643_v6  ;;  %6099 = vmatprep.mubr.bf16.mxu0 %v11646_v18  ;;  %v11689_v18 = vld [vmem:[%s18939_s4 + $0x160] ss:$28 sps:$4 sm:$0xff]  }
 0x6d7   : > { %v4712_v32 = vpop.permute.xlu1 %4711 }
 0x6d8   : > { %v4734_v19 = vsel %vm4733_vm15, %v4710_v20, %v4712_v32  ;;  %vm9105_vm15 = vcmask 654336  }
 0x6d9   : > { %10583 = vmatpush2.bf16.msra.mxu1 %v4652_v63  ;;  %v11681_v63 = vld [vmem:[%s18939_s4 + $0xf0] ss:$28 sps:$4 sm:$0xff]  }
 0x6dc   : > { %5794 = vmatmul.mubr.bf16.gmra.mxu1 %v11641_v57  ;;  %6100 = vmatmul.mubr.bf16.vlgmr.msra.gmra.mxu0 %v11644_v34 }
 0x6dd   : > { %6265 = vmatpush1.bf16.msra.mxu0 %v4739_v28  ;;  %5803 = vmatprep.mubr.bf16.mxu1 %v11649_v13  ;;  %v11704_v28 = vld [vmem:[%s18939_s4 + $0x210] ss:$28 sps:$4 sm:$0xff]  }
 0x6de   : > { %6266 = vmatprep.subr.bf16.mxu0 %v4728_v30  ;;  %6109 = vmatprep.mubr.bf16.mxu0 %v11652_v0  ;;  %v11700_v30 = vld [vmem:[%s18939_s4 + $0x1d8] ss:$28 sps:$4 sm:$0xff]  }
 0x6e1   : > { %6267 = vmatpush1.bf16.msra.mxu0 %v4738_v53 }
 0x6e2   : > { %6268 = vmatprep.subr.bf16.mxu0 %v4724_v46  ;;  %v11693_v46 = vld [vmem:[%s18939_s4 + $0x198] ss:$28 sps:$4 sm:$0xff]  }
 0x6e4   : > { %5804 = vmatmul.mubr.bf16.gmra.mxu1 %v11647_v2  ;;  %6110 = vmatmul.mubr.bf16.gmra.mxu0 %v11650_v51 }
 0x6e5   : > { %6269 = vmatpush1.bf16.msra.mxu0 %v4737_v47  ;;  %5813 = vmatprep.mubr.bf16.mxu1 %v11655_v17  ;;  %v11697_v17 = vld [vmem:[%s18939_s4 + $0x1d0] ss:$28 sps:$4 sm:$0xff]  }
 0x6e6   : > { %6270 = vmatprep.subr.bf16.mxu0 %v4720_v16  ;;  %6119 = vmatprep.mubr.bf16.mxu0 %v11658_v8  ;;  %v11708_v8 = vld [vmem:[%s18939_s4 + $0x248] ss:$28 sps:$4 sm:$0xff]  }
 0x6e9   : > { %6271 = vmatpush1.bf16.msra.mxu0 %v4736_v54 }
 0x6ea   : > { %6272 = vmatprep.subr.bf16.mxu0 %v4716_v45 }
 0x6ec   : > { %5814 = vmatmul.mubr.bf16.gmra.mxu1 %v11653_v44  ;;  %6120 = vmatmul.mubr.bf16.gmra.mxu0 %v11656_v1  ;;  %v11701_v1 = vld [vmem:[%s18939_s4 + $0x208] ss:$28 sps:$4 sm:$0xff]  }
 0x6ed   : > { %6273 = vmatpush1.bf16.msra.mxu0 %v4735_v48  ;;  %5823 = vmatprep.mubr.bf16.mxu1 %v11661_v62  ;;  %v11707_v62 = vld [vmem:[%s18939_s4 + $0x244] ss:$28 sps:$4 sm:$0xff]  }
 0x6ee   : > { %6274 = vmatprep.subr.bf16.mxu0 %v4712_v32  ;;  %6292 = vmatprep.mubr.bf16.mxu0 %v19663_v42 }
 0x6f1   : > { %6275 = vmatpush1.bf16.msra.mxu0 %v4734_v19 }
 0x6f4   : > { %5824 = vmatmul.mubr.bf16.gmra.mxu1 %v11659_v58  ;;  %10009 = vmatmul.mubr.msk.bf16.vlgmr.msra.gmra.mxu0 %vm850_vm6, %v11662_v25  ;;  %v11705_v58 = vld [vmem:[%s18939_s4 + $0x240] ss:$28 sps:$4 sm:$0xff]  }
 0x6f5   : > { %5833 = vmatprep.mubr.bf16.mxu1 %v11665_v50  ;;  %6302 = vmatprep.mubr.bf16.mxu0 %v19663_v42  ;;  %v11711_v25 = vld [vmem:[%s18939_s4 + $0x27c] ss:$28 sps:$4 sm:$0xff]  }
 0x6fc   : > { %5834 = vmatmul.mubr.bf16.gmra.mxu1 %v11663_v36  ;;  %10010 = vmatmul.mubr.msk.bf16.gmra.mxu0 %vm850_vm6, %v11666_v33 }
 0x6fd   : > { %5843 = vmatprep.mubr.bf16.mxu1 %v11669_v31  ;;  %6312 = vmatprep.mubr.bf16.mxu0 %v19663_v42 }
 0x704   : > { %5844 = vmatmul.mubr.bf16.gmra.mxu1 %v11667_v29  ;;  %10011 = vmatmul.mubr.msk.bf16.gmra.mxu0 %vm850_vm6, %v11670_v22  ;;  %v11709_v29 = vld [vmem:[%s18939_s4 + $0x278] ss:$28 sps:$4 sm:$0xff]  }
 0x705   : > { %5853 = vmatprep.mubr.bf16.mxu1 %v11673_v40  ;;  %6322 = vmatprep.mubr.bf16.mxu0 %v19663_v42 }
 0x70c   : > { %5854 = vmatmul.mubr.bf16.gmra.mxu1 %v11671_v4  ;;  %10012 = vmatmul.mubr.msk.bf16.gmra.mxu0 %vm850_vm6, %v11680_v21 }
 0x70d   : > { %5863 = vmatprep.mubr.bf16.mxu1 %v11676_v61  ;;  %6332 = vmatprep.mubr.bf16.mxu0 %v19663_v42 }
 0x714   : > { %5864 = vmatmul.mubr.bf16.gmra.mxu1 %v11674_v14  ;;  %10013 = vmatmul.mubr.msk.bf16.gmra.mxu0 %vm850_vm6, %v11684_v60 }
 0x715   : > { %6129 = vmatprep.mubr.bf16.mxu1 %v11679_v39  ;;  %6342 = vmatprep.mubr.bf16.mxu0 %v19663_v42 }
 0x71c   : > { %v16560_v24 = vpop.f32.mrf.mxu0  ;;  %6130 = vmatmul.mubr.bf16.vlgmr.msra.gmra.mxu1 %v11677_v7  ;;  %10014 = vmatmul.mubr.msk.bf16.gmra.mxu0 %vm850_vm6, %v11688_v12 }
 0x71d   : > { %6139 = vmatprep.mubr.bf16.mxu1 %v11683_v10  ;;  %6352 = vmatprep.mubr.bf16.mxu0 %v19663_v42 }
 0x71e   : > { %v16564_v5 = vpop.f32.mrf.mxu0 }
 0x720   : > { %v16566_v6 = vpop.f32.mrf.mxu0 }
 0x722   : > { %v16577_v11 = vpop.f32.mrf.mxu0 }
 0x724   : > { %v16579_v38 = vpop.f32.mrf.mxu0  ;;  %6140 = vmatmul.mubr.bf16.gmra.mxu1 %v11681_v63  ;;  %10015 = vmatmul.mubr.msk.bf16.gmra.mxu0 %vm850_vm6, %v11692_v9 }
 0x725   : > { %6149 = vmatprep.mubr.bf16.mxu1 %v11687_v26  ;;  %6362 = vmatprep.mubr.bf16.mxu0 %v19663_v42 }
 0x726   : > { %v16583_v52 = vpop.f32.mrf.mxu0 }
 0x728   : > { %v16585_v49 = vpop.f32.mrf.mxu0 }
 0x72a   : > { %v16596_v23 = vpop.f32.mrf.mxu0 }
 0x72c   : > { %v16598_v3 = vpop.f32.mrf.mxu0  ;;  %6150 = vmatmul.mubr.bf16.gmra.mxu1 %v11685_v43  ;;  %10016 = vmatmul.mubr.msk.bf16.gmra.mxu0 %vm850_vm6, %v11696_v15 }
 0x72d   : > { %6159 = vmatprep.mubr.bf16.mxu1 %v11691_v27  ;;  %6372 = vmatprep.mubr.bf16.mxu0 %v19663_v42 }
 0x72e   : > { %v16602_v59 = vpop.f32.mrf.mxu0 }
 0x730   : > { %v16604_v56 = vpop.f32.mrf.mxu0 }
 0x732   : > { %v16615_v57 = vpop.f32.mrf.mxu0 }
 0x734   : > { %v16617_v34 = vpop.f32.mrf.mxu0  ;;  %6160 = vmatmul.mubr.bf16.gmra.mxu1 %v11689_v18  ;;  %10017 = vmatmul.mubr.msk.bf16.gmra.mxu0 %vm850_vm6, %v11700_v30 }
 0x735   : > { %6169 = vmatprep.mubr.bf16.mxu1 %v11695_v55  ;;  %6382 = vmatprep.mubr.bf16.mxu0 %v19663_v42 }
 0x736   : > { %v16621_v13 = vpop.f32.mrf.mxu0 }
 0x738   : > { %v16623_v0 = vpop.f32.mrf.mxu0 }
 0x73a   : > { %v16634_v53 = vpop.f32.mrf.mxu0 }
 0x73c   : > { %v16636_v2 = vpop.f32.mrf.mxu0  ;;  %6170 = vmatmul.mubr.bf16.gmra.mxu1 %v11693_v46  ;;  %10018 = vmatmul.mubr.msk.bf16.gmra.mxu0 %vm850_vm6, %v11704_v28 }
 0x73d   : > { %6179 = vmatprep.mubr.bf16.mxu1 %v11699_v41  ;;  %6392 = vmatprep.mubr.bf16.mxu0 %v19663_v42 }
 0x73e   : > { %v16640_v51 = vpop.f32.mrf.mxu0 }
 0x740   : > { %v16642_v16 = vpop.f32.mrf.mxu0 }
 0x742   : > { %v16653_v47 = vpop.f32.mrf.mxu0 }
 0x744   : > { %v16655_v45 = vpop.f32.mrf.mxu0  ;;  %6180 = vmatmul.mubr.bf16.gmra.mxu1 %v11697_v17  ;;  %10019 = vmatmul.mubr.msk.bf16.gmra.mxu0 %vm850_vm6, %v11708_v8 }
 0x745   : > { %19664 = vst [vmem:[#allocation39_spill] sm:$0xff] %v16655_v45  ;;  %6189 = vmatprep.mubr.bf16.mxu1 %v11703_v37  ;;  %6402 = vmatprep.mubr.bf16.mxu0 %v19663_v42 }
 0x746   : > { %v16659_v54 = vpop.f32.mrf.mxu0 }
 0x747   : > { %19665 = vst [vmem:[#allocation36_spill] sm:$0xff] %v16659_v54 }
 0x748   : > { %v16661_v44 = vpop.f32.mrf.mxu0 }
 0x749   : > { %19666 = vst [vmem:[#allocation46_spill] sm:$0xff] %v16661_v44 }
 0x74a   : > { %v16672_v48 = vpop.f32.mrf.mxu0 }
 0x74b   : > { %19667 = vst [vmem:[#allocation42_spill] sm:$0xff] %v16672_v48 }
 0x74c   : > { %v16674_v32 = vpop.f32.mrf.mxu0  ;;  %6190 = vmatmul.mubr.bf16.gmra.mxu1 %v11701_v1  ;;  %10020 = vmatmul.mubr.msk.bf16.gmra.mxu0 %vm850_vm6, %v11712_v35 }
 0x74d   : > { %19668 = vst [vmem:[#allocation9_spill] sm:$0xff] %v16674_v32  ;;  %6199 = vmatprep.mubr.bf16.mxu1 %v11707_v62  ;;  %6412 = vmatprep.mubr.bf16.mxu0 %v19663_v42 }
 0x74e   : > { %v16678_v20 = vpop.f32.mrf.mxu0 }
 0x74f   : > { %19669 = vst [vmem:[#allocation55_spill] sm:$0xff] %v16678_v20 }
 0x750   : > { %v16680_v19 = vpop.f32.mrf.mxu0 }
 0x751   : > { %19670 = vst [vmem:[#allocation49_spill] sm:$0xff] %v16680_v19 }
 0x752   : > { %v16688_v50 = vpop.f32.mrf.mxu0 }
 0x753   : > { %19671 = vst [vmem:[#allocation47_spill] sm:$0xff] %v16688_v50 }
 0x754   : > { %v16690_v36 = vpop.f32.mrf.mxu0  ;;  %6200 = vmatmul.mubr.bf16.gmra.mxu1 %v11705_v58 }
 0x755   : > { %19672 = vst [vmem:[#allocation7_spill] sm:$0xff] %v16690_v36  ;;  %6209 = vmatprep.mubr.bf16.mxu1 %v11711_v25 }
 0x756   : > { %v16692_v33 = vpop.f32.mrf.mxu0 }
 0x757   : > { %19673 = vst [vmem:[#allocation10_spill] sm:$0xff] %v16692_v33 }
 0x758   : > { %v16694_v31 = vpop.f32.mrf.mxu0 }
 0x759   : > { %19674 = vst [vmem:[#allocation61_spill] sm:$0xff] %v16694_v31 }
 0x75a   : > { %v16699_v22 = vpop.f32.mrf.mxu0 }
 0x75b   : > { %19675 = vst [vmem:[#allocation17_spill] sm:$0xff] %v16699_v22 }
 0x75c   : > { %v16701_v40 = vpop.f32.mrf.mxu1  ;;  %v16703_v4 = vpop.f32.mrf.mxu0  ;;  %6210 = vmatmul.mubr.bf16.gmra.mxu1 %v11709_v29 }
 0x75d   : > { %19676 = vst [vmem:[#allocation54_spill] sm:$0xff] %v16703_v4 }
 0x75e   : > { %v16705_v21 = vpop.f32.mrf.mxu1  ;;  %v16707_v61 = vpop.f32.mrf.mxu0 }
 0x75f   : > { %19677 = vst [vmem:[#allocation52_spill] sm:$0xff] %v16707_v61  ;;  %v16805_v61 = vpop.permute.xlu1 %4929 }
 0x760   : > { %v16709_v14 = vpop.f32.mrf.mxu1  ;;  %v16711_v60 = vpop.f32.mrf.mxu0 }
 0x761   : > { %19678 = vst [vmem:[#allocation57_spill] sm:$0xff] %v16711_v60 }
 0x762   : > { %v16713_v39 = vpop.f32.mrf.mxu1  ;;  %v16715_v7 = vpop.f32.mrf.mxu0 }
 0x763   : > { %19679 = vst [vmem:[#allocation4_spill] sm:$0xff] %v16715_v7 }
 0x764   : > { %v16717_v12 = vpop.f32.mrf.mxu1  ;;  %v16719_v10 = vpop.f32.mrf.mxu0 }
 0x765   : > { %19680 = vst [vmem:[#allocation59_spill] sm:$0xff] %v16719_v10 }
 0x766   : > { %v16721_v63 = vpop.f32.mrf.mxu1  ;;  %v16723_v9 = vpop.f32.mrf.mxu0 }
 0x767   : > { %19681 = vst [vmem:[#allocation58_spill] sm:$0xff] %v16723_v9 }
 0x768   : > { %v16725_v26 = vpop.f32.mrf.mxu1  ;;  %v16727_v43 = vpop.f32.mrf.mxu0 }
 0x769   : > { %19682 = vst [vmem:[#allocation56_spill] sm:$0xff] %v16727_v43 }
 0x76a   : > { %v16729_v15 = vpop.f32.mrf.mxu1  ;;  %v16731_v27 = vpop.f32.mrf.mxu0 }
 0x76b   : > { %19683 = vst [vmem:[#allocation12_spill] sm:$0xff] %v16731_v27 }
 0x76c   : > { %v16733_v18 = vpop.f32.mrf.mxu1  ;;  %v16735_v30 = vpop.f32.mrf.mxu0 }
 0x76d   : > { %19684 = vst [vmem:[#allocation13_spill] sm:$0xff] %v16735_v30 }
 0x76e   : > { %v16737_v55 = vpop.f32.mrf.mxu1  ;;  %v16739_v46 = vpop.f32.mrf.mxu0 }
 0x76f   : > { %19685 = vst [vmem:[#allocation5_spill] sm:$0xff] %v16739_v46 }
 0x770   : > { %v16741_v28 = vpop.f32.mrf.mxu1  ;;  %v16743_v41 = vpop.f32.mrf.mxu0 }
 0x771   : > { %19686 = vst [vmem:[#allocation14_spill] sm:$0xff] %v16743_v41 }
 0x772   : > { %v16745_v17 = vpop.f32.mrf.mxu1  ;;  %v16747_v8 = vpop.f32.mrf.mxu0 }
 0x773   : > { %19687 = vst [vmem:[#allocation26_spill] sm:$0xff] %v16747_v8 }
 0x774   : > { %v16749_v37 = vpop.f32.mrf.mxu1  ;;  %v16751_v1 = vpop.f32.mrf.mxu0 }
 0x775   : > { %19688 = vst [vmem:[#allocation60_spill] sm:$0xff] %v16751_v1 }
 0x776   : > { %v16753_v35 = vpop.f32.mrf.mxu1  ;;  %v16755_v62 = vpop.f32.mrf.mxu0 }
 0x777   : > { %19689 = vst [vmem:[#allocation15_spill] sm:$0xff] %v16755_v62 }
 0x778   : > { %v16757_v58 = vpop.f32.mrf.mxu1  ;;  %v16759_v25 = vpop.f32.mrf.mxu0 }
 0x779   : > { %19690 = vst [vmem:[#allocation27_spill] sm:$0xff] %v16759_v25  ;;  %v11713_v25 = vld [vmem:[%s18939_s4 + $0x2b0] ss:$28 sps:$4 sm:$0xff]  }
 0x77a   : > { %v16761_v29 = vpop.f32.mrf.mxu1  ;;  %v16763_v10 = vpop.f32.mrf.mxu0 }
 0x77b   : > { %19691 = vst [vmem:[#allocation3_spill] sm:$0xff] %v16763_v10  ;;  %v11715_v10 = vld [vmem:[%s18939_s4 + $0x2b4] ss:$28 sps:$4 sm:$0xff]  }
 0x77c   : > { %v16765_v43 = vpop.f32.mrf.mxu1  ;;  %v16767_v9 = vpop.f32.mrf.mxu0  ;;  %6219 = vmatprep.mubr.bf16.mxu1 %v11715_v10  ;;  %v11720_v10 = vld [vmem:[%s18939_s4 + $0x2f0] ss:$28 sps:$4 sm:$0xff]  }
 0x77d   : > { %19692 = vst [vmem:[#allocation22_spill] sm:$0xff] %v16767_v9  ;;  %v11716_v9 = vld [vmem:[%s18939_s4 + $0x2b8] ss:$28 sps:$4 sm:$0xff]   ;;  %6220 = vmatmul.mubr.bf16.gmra.mxu1 %v11713_v25  ;;  %v11717_v25 = vld [vmem:[%s18939_s4 + $0x2e8] ss:$28 sps:$4 sm:$0xff]  }
 0x77e   : > { %v16769_v27 = vpop.f32.mrf.mxu1  ;;  %v16771_v46 = vpop.f32.mrf.mxu0  ;;  %10021 = vmatmul.mubr.msk.bf16.gmra.mxu0 %vm850_vm6, %v11716_v9 }
 0x77f   : > { %19693 = vst [vmem:[#allocation11_spill] sm:$0xff] %v16771_v46  ;;  %v16793_v46 = vpop.permute.xlu0 %4924  ;;  %6422 = vmatprep.mubr.bf16.mxu0 %v19663_v42 }
 0x780   : > { %v16773_v1 = vpop.f32.mrf.mxu1  ;;  %v16775_v30 = vpop.f32.mrf.mxu0 }
 0x781   : > { %19694 = vst [vmem:[#allocation20_spill] sm:$0xff] %v16775_v30  ;;  %v11719_v30 = vld [vmem:[%s18939_s4 + $0x2ec] ss:$28 sps:$4 sm:$0xff]  }
 0x782   : > { %v16786_v62 = vpop.f32.mrf.mxu1  ;;  %v16788_v8 = vpop.f32.mrf.mxu0  ;;  %6229 = vmatprep.mubr.bf16.mxu1 %v11719_v30 }
 0x783   : > { %19695 = vst [vmem:[#allocation25_spill] sm:$0xff] %v16788_v8 }
 0x784   : > { %v16796_v41 = vpop.f32.mrf.mxu1  ;;  %v16798_v7 = vpop.f32.mrf.mxu0 }
 0x785   : > { %19696 = vst [vmem:[#allocation16_spill] sm:$0xff] %v16798_v7  ;;  %v16817_v7 = vpop.permute.xlu0 %4934  ;;  %6230 = vmatmul.mubr.bf16.gmra.mxu1 %v11717_v25 }
 0x786   : > { %v16801_v60 = vpop.f32.mrf.mxu1  ;;  %v16803_v8 = vpop.f32.mrf.mxu0  ;;  %10022 = vmatmul.mubr.msk.bf16.gmra.mxu0 %vm850_vm6, %v11720_v10 }
 0x787   : > { %19697 = vst [vmem:[#allocation48_spill] sm:$0xff] %v16803_v8  ;;  %6432 = vmatprep.mubr.bf16.mxu0 %v19663_v42 }
 0x788   : > { %v16810_v22 = vpop.f32.mrf.mxu1  ;;  %v16812_v9 = vpop.f32.mrf.mxu0 }
 0x789   : > { %19698 = vst [vmem:[#allocation37_spill] sm:$0xff] %v16812_v9  ;;  %v16829_v9 = vpop.permute.xlu1 %4939  ;;  %v16835_v19 = vpop.permute.xlu0 %4944 }
 0x78a   : > { %v16819_v30 = vpop.f32.mrf.mxu1  ;;  %v16821_v31 = vpop.f32.mrf.mxu0 }
 0x78b   : > { %19699 = vst [vmem:[#allocation35_spill] sm:$0xff] %v16819_v30  ;;  %19700 = vst [vmem:[#allocation28_spill] sm:$0xff] %v16821_v31 }
 0x78c   : > { %v16824_v8 = vpop.f32.mrf.mxu1  ;;  %v16826_v4 = vpop.f32.mrf.mxu0 }
 0x78d   : > { %19701 = vst [vmem:[#allocation44_spill] sm:$0xff] %v16824_v8  ;;  %19702 = vst [vmem:[#allocation29_spill] sm:$0xff] %v16826_v4  ;;  %v16845_v4 = vpop.permute.xlu1 %4949  ;;  %v4915_v8 = vpop.permute.xlu0 %4914 }
 0x78e   : > { %v16831_v33 = vpop.f32.mrf.mxu1  ;;  %v16833_v36 = vpop.f32.mrf.mxu0  ;;  %v5716_v48 = vadd.f32 %v16701_v40, %v4915_v8 }
 0x78f   : > { %19703 = vst [vmem:[#allocation23_spill] sm:$0xff] %v16831_v33  ;;  %19704 = vst [vmem:[#allocation30_spill] sm:$0xff] %v16833_v36 }
 0x790   : > { %v16837_v50 = vpop.f32.mrf.mxu1  ;;  %v16839_v31 = vpop.f32.mrf.mxu0 }
 0x791   : > { %19705 = vst [vmem:[#allocation53_spill] sm:$0xff] %v16837_v50  ;;  %19706 = vst [vmem:[#allocation19_spill] sm:$0xff] %v16839_v31 }
 0x792   : > { %v16841_v10 = vpop.f32.mrf.mxu1  ;;  %v16843_v32 = vpop.f32.mrf.mxu0 }
 0x793   : > { %19707 = vst [vmem:[#allocation21_spill] sm:$0xff] %v16841_v10  ;;  %19708 = vst [vmem:[#allocation8_spill] sm:$0xff] %v16843_v32  ;;  %v16860_v10 = vpop.permute.xlu1 %4919  ;;  %v5718_v32 = vadd.f32 %v16705_v21, %v4915_v8 }
 0x794   : > { %v16847_v25 = vpop.f32.mrf.mxu1  ;;  %v16849_v20 = vpop.f32.mrf.mxu0 }
 0x795   : > { %19709 = vst [vmem:[#allocation18_spill] sm:$0xff] %v16847_v25  ;;  %19710 = vst [vmem:[#allocation62_spill] sm:$0xff] %v16849_v20  ;;  %v5720_v20 = vadd.f32 %v16709_v14, %v16860_v10 }
 0x796   : > { %v16851_v33 = vpop.f32.mrf.mxu1  ;;  %v16853_v36 = vpop.f32.mrf.mxu0 }
 0x797   : > { %19711 = vst [vmem:[#allocation24_spill] sm:$0xff] %v16851_v33  ;;  %19712 = vst [vmem:[#allocation32_spill] sm:$0xff] %v16853_v36  ;;  %v5909_v33 = vadd.f32 %v16560_v24, %v5716_v48  ;;  %v5913_v8 = vadd.f32 %v16566_v6, %v5720_v20 }
 0x798   : > { %v16856_v50 = vpop.f32.mrf.mxu1  ;;  %v16858_v31 = vpop.f32.mrf.mxu0 }
 0x799   : > { %19713 = vst [vmem:[#allocation33_spill] sm:$0xff] %v16856_v50  ;;  %19714 = vst [vmem:[#allocation40_spill] sm:$0xff] %v16858_v31  ;;  %v5911_v31 = vadd.f32 %v16564_v5, %v5718_v32 }
 0x79a   : > { %v16863_v44 = vpop.f32.mrf.mxu1  ;;  %v16865_v25 = vpop.f32.mrf.mxu0 }
 0x79b   : > { %19715 = vst [vmem:[#allocation51_spill] sm:$0xff] %v16863_v44  ;;  %19716 = vst [vmem:[#allocation45_spill] sm:$0xff] %v16865_v25 }
 0x79c   : > { %v16870_v36 = vpop.f32.mrf.mxu1  ;;  %v6101_v40 = vpop.f32.mrf.mxu0 }
 0x79d   : > { %19717 = vst [vmem:[#allocation34_spill] sm:$0xff] %v16870_v36  ;;  %v16872_v54 = vadd.f32 %v6101_v40, %v5909_v33 }
 0x79e   : > { %v16875_v50 = vpop.f32.mrf.mxu1  ;;  %v6103_v30 = vpop.f32.mrf.mxu0 }
 0x79f   : > { %19718 = vst [vmem:[#allocation50_spill] sm:$0xff] %v16872_v54  ;;  %19719 = vst [vmem:[#allocation31_spill] sm:$0xff] %v16875_v50  ;;  %v16877_v21 = vadd.f32 %v6103_v30, %v5911_v31 }
 0x7a0   : > { %v16880_v25 = vpop.f32.mrf.mxu1  ;;  %v6105_v44 = vpop.f32.mrf.mxu0 }
 0x7a1   : > { %19720 = vst [vmem:[#allocation38_spill] sm:$0xff] %v16877_v21  ;;  %19721 = vst [vmem:[#allocation6_spill] sm:$0xff] %v16880_v25  ;;  %v16882_v14 = vadd.f32 %v6105_v44, %v5913_v8 }
 0x7a2   : > { %v16884_v24 = vpop.f32.mrf.mxu1  ;;  %v16886_v48 = vpop.f32.mrf.mxu0 }
 0x7a3   : > { %19722 = vst [vmem:[#allocation43_spill] sm:$0xff] %v16882_v14  ;;  %19723 = vst [vmem:[#allocation41_spill] sm:$0xff] %v16884_v24 }
 0x7a4   : > { %19724 = vst [vmem:[#allocation63_spill] sm:$0xff] %v16886_v48  ;;  %v16888_v33 = vpop.f32.mrf.mxu1  ;;  %v6111_v40 = vpop.f32.mrf.mxu0 }
 0x7a5   : > { %19725 = vst [vmem:[#allocation64_spill] sm:$0xff] %v16888_v33 }
 0x7a6   : > { %v16890_v5 = vpop.f32.mrf.mxu1  ;;  %v6113_v32 = vpop.f32.mrf.mxu0 }
 0x7a7   : > { %19726 = vst [vmem:[#allocation65_spill] sm:$0xff] %v16890_v5 }
 0x7a8   : > { %v16892_v50 = vpop.f32.mrf.mxu1  ;;  %v6115_v31 = vpop.f32.mrf.mxu0 }
 0x7a9   : > { %19727 = vst [vmem:[#allocation66_spill] sm:$0xff] %v16892_v50 }
 0x7aa   : > { %v16894_v30 = vpop.f32.mrf.mxu1  ;;  %v6117_v6 = vpop.f32.mrf.mxu0 }
 0x7ab   : > { %19728 = vst [vmem:[#allocation67_spill] sm:$0xff] %v16894_v30  ;;  %v5726_v30 = vadd.f32 %v16717_v12, %v16793_v46  ;;  %v5732_v12 = vadd.f32 %v16729_v15, %v16805_v61 }
 0x7ac   : > { %v16896_v20 = vpop.f32.mrf.mxu1  ;;  %v6121_v44 = vpop.f32.mrf.mxu0 }
 0x7ad   : > { %19729 = vst [vmem:[#allocation68_spill] sm:$0xff] %v16896_v20 }
 0x7ae   : > { %v16898_v8 = vpop.f32.mrf.mxu1  ;;  %v6123_v24 = vpop.f32.mrf.mxu0 }
 0x7af   : > { %19730 = vst [vmem:[#allocation69_spill] sm:$0xff] %v16898_v8  ;;  %v5728_v8 = vadd.f32 %v16721_v63, %v16793_v46 }
 0x7b0   : > { %v16900_v25 = vpop.f32.mrf.mxu1  ;;  %v16902_v36 = vpop.f32.mrf.mxu0 }
 0x7b1   : > { %19731 = vst [vmem:[#allocation70_spill] sm:$0xff] %v16900_v25 }
 0x7b2   : > { %v16904_v33 = vpop.f32.mrf.mxu1  ;;  %v6127_v5 = vpop.f32.mrf.mxu0 }
 0x7b3   : > { %19732 = vst [vmem:[#allocation71_spill] sm:$0xff] %v16904_v33  ;;  %v5730_v33 = vadd.f32 %v16725_v26, %v16805_v61  ;;  %v5925_v61 = vadd.f32 %v16596_v23, %v5732_v12  ;;  %v5742_v23 = vadd.f32 %v16745_v17, %v16829_v9 }
 0x7b4   : > { %v16906_v14 = vpop.f32.mrf.mxu1  ;;  %v16908_v50 = vpop.f32.mrf.mxu0 }
 0x7b5   : > { %19733 = vst [vmem:[#allocation72_spill] sm:$0xff] %v16906_v14  ;;  %19734 = vst [vmem:[#allocation73_spill] sm:$0xff] %v16908_v50  ;;  %v5919_v14 = vadd.f32 %v16579_v38, %v5726_v30  ;;  %v5738_v30 = vadd.f32 %v16737_v55, %v16817_v7 }
 0x7b6   : > { %v16912_v54 = vpop.f32.mrf.mxu1  ;;  %v16914_v20 = vpop.f32.mrf.mxu0 }
 0x7b7   : > { %19735 = vst [vmem:[#allocation74_spill] sm:$0xff] %v16912_v54  ;;  %19736 = vst [vmem:[#allocation75_spill] sm:$0xff] %v16914_v20  ;;  %v6112_v54 = vadd.f32 %v6111_v40, %v5919_v14  ;;  %v5921_v20 = vadd.f32 %v16583_v52, %v5728_v8  ;;  %v5736_v52 = vadd.f32 %v16733_v18, %v16817_v7 }
 0x7b8   : > { %v16918_v25 = vpop.f32.mrf.mxu1  ;;  %v16920_v48 = vpop.f32.mrf.mxu0 }
 0x7b9   : > { %19737 = vst [vmem:[#allocation76_spill] sm:$0xff] %v16918_v25  ;;  %19738 = vst [vmem:[#allocation77_spill] sm:$0xff] %v16920_v48  ;;  %v6114_v25 = vadd.f32 %v6113_v32, %v5921_v20  ;;  %v5923_v48 = vadd.f32 %v16585_v49, %v5730_v33  ;;  %v6118_v49 = vadd.f32 %v6117_v6, %v5925_v61 }
 0x7ba   : > { %v16925_v50 = vpop.f32.mrf.mxu1  ;;  %v16927_v21 = vpop.f32.mrf.mxu0  ;;  %v5740_v6 = vadd.f32 %v16741_v28, %v16829_v9 }
 0x7bb   : > { %19739 = vst [vmem:[#allocation78_spill] sm:$0xff] %v16925_v50  ;;  %v6116_v50 = vadd.f32 %v6115_v31, %v5923_v48  ;;  %v5929_v48 = vadd.f32 %v16598_v3, %v5736_v52  ;;  %v4894_v3 = vld [vmem:[%s18940_s5 + $0x70] sm:$0xff] }
 0x7bc   : > { %v16932_v63 = vpop.f32.mrf.mxu1  ;;  %v6304_v46 = vpop.f32.mrf.mxu0  ;;  %v5933_v52 = vadd.f32 %v16604_v56, %v5740_v6 }
 0x7bd   : > { %19740 = vst [vmem:[#allocation79_spill] sm:$0xff] %v16932_v63  ;;  %v16935_v45 = vadd.f32 %v6304_v46, %v6112_v54 }
 0x7be   : > { %v16937_v26 = vpop.f32.mrf.mxu1  ;;  %v6306_v38 = vpop.f32.mrf.mxu0 }
 0x7bf   : > { %19741 = vst [vmem:[#allocation80_spill] sm:$0xff] %v16937_v26  ;;  %v16942_v15 = vadd.f32 %v6306_v38, %v6114_v25  ;;  %v19161_v54 = vmax.f32 %v16935_v45, 0.0  ;;  %v5931_v25 = vadd.f32 %v16602_v59, %v5738_v30  ;;  %v6122_v38 = vadd.f32 %v6121_v44, %v5929_v48 }
 0x7c0   : > { %v16946_v14 = vpop.f32.mrf.mxu1  ;;  %v6308_v40 = vpop.f32.mrf.mxu0  ;;  %v5935_v30 = vadd.f32 %v16615_v57, %v5742_v23  ;;  %v4895_v23 = vld [vmem:[%s18940_s5 + $0x78] sm:$0xff] }
 0x7c1   : > { %19742 = vst [vmem:[#allocation81_spill] sm:$0xff] %v16946_v14  ;;  %v19162_v33 = vmax.f32 %v16942_v15, 0.0  ;;  %v16950_v32 = vadd.f32 %v6308_v40, %v6116_v50  ;;  %v6124_v8 = vadd.f32 %v6123_v24, %v5931_v25  ;;  %v6126_v25 = vadd.f32 %v16902_v36, %v5933_v52 }
 0x7c2   : > { %v16952_v20 = vpop.f32.mrf.mxu1  ;;  %v6310_v55 = vpop.f32.mrf.mxu0  ;;  %v6128_v40 = vadd.f32 %v6127_v5, %v5935_v30  ;;  %v11721_v30 = vld [vmem:[%s18939_s4 + $0x320] ss:$28 sps:$4 sm:$0xff]  }
 0x7c3   : > { %19743 = vst [vmem:[#allocation82_spill] sm:$0xff] %v16952_v20  ;;  %v11061_v7 = vpack.i.bf16 %v19162_v33, %v19161_v54  ;;  %v16961_v18 = vadd.f32 %v6310_v55, %v6118_v49  ;;  %v19157_v17 = vmax.f32 %v16950_v32, 0.0  ;;  %v4896_v55 = vld [vmem:[%s18940_s5 + $0x80] sm:$0xff]  ;;  %v19794_v20 = vld [vmem:[#allocation54_spill] sm:$0xff] }
 0x7c4   : > { %v16964_v31 = vpop.f32.mrf.mxu1  ;;  %v6314_v50 = vpop.f32.mrf.mxu0 }
 0x7c5   : > { %19744 = vst [vmem:[#allocation83_spill] sm:$0xff] %v16964_v31  ;;  %v19160_v59 = vmax.f32 %v16961_v18, 0.0  ;;  %11062 = vrot.lane.b32.xlu0 %v11061_v7, %s11977_s27  ;;  %v16986_v49 = vadd.f32 %v6314_v50, %v6122_v38  ;;  %v19839_v31 = vld [vmem:[#allocation78_spill] sm:$0xff] }
 0x7c6   : > { %v16971_v12 = vpop.f32.mrf.mxu1  ;;  %v6316_v46 = vpop.f32.mrf.mxu0 }
 0x7c7   : > { %19745 = vst [vmem:[#allocation84_spill] sm:$0xff] %v16971_v12  ;;  %v11066_v28 = vpack.i.bf16 %v19160_v59, %v19157_v17  ;;  %v16981_v9 = vadd.f32 %v6316_v46, %v6124_v8  ;;  %v19155_v50 = vmax.f32 %v16986_v49, 0.0  ;;  %v4897_v46 = vld [vmem:[%s18940_s5 + $0x88] sm:$0xff]  ;;  %v17039_v17 = vpop.permute.xlu1 %4969 }
 0x7c8   : > { %v16983_v24 = vpop.f32.mrf.mxu1  ;;  %v6318_v61 = vpop.f32.mrf.mxu0 }
 0x7c9   : > { %19746 = vst [vmem:[#allocation85_spill] sm:$0xff] %v16983_v24  ;;  %4984 = vperm.xlu0 %10640, %v4894_v3   ;;  %11067 = vrot.lane.b32.xlu1 %v11066_v28, %s11977_s27  ;;  %v19156_v56 = vmax.f32 %v16981_v9, 0.0  ;;  %v17004_v6 = vadd.f32 %v6318_v61, %v6126_v25  ;;  %v11723_v28 = vld [vmem:[%s18939_s4 + $0x324] ss:$28 sps:$4 sm:$0xff]  }
 0x7ca   : > { %v16989_v44 = vpop.f32.mrf.mxu1  ;;  %v6320_v57 = vpop.f32.mrf.mxu0  ;;  %6239 = vmatprep.mubr.bf16.mxu1 %v11723_v28 }
 0x7cb   : > { %19747 = vst [vmem:[#allocation86_spill] sm:$0xff] %v16989_v44  ;;  %v16999_v5 = vadd.f32 %v6320_v57, %v6128_v40  ;;  %v11071_v3 = vpack.i.bf16 %v19156_v56, %v19155_v50  ;;  %v17024_v40 = vpop.permute.xlu0 %4964  ;;  %v19158_v57 = vmax.f32 %v17004_v6, 0.0  ;;  %6240 = vmatmul.mubr.bf16.gmra.mxu1 %v11721_v30  ;;  %v11724_v56 = vld [vmem:[%s18939_s4 + $0x328] ss:$28 sps:$4 sm:$0xff]   ;;  %v5746_v30 = vadd.f32 %v16749_v37, %v16835_v19  ;;  %v17056_v54 = vpop.permute.xlu1 %4979 }
 0x7cc   : > { %v17001_v7 = vpop.f32.mrf.mxu1  ;;  %v6324_v48 = vpop.f32.mrf.mxu0  ;;  %10023 = vmatmul.mubr.msk.bf16.gmra.mxu0 %vm850_vm6, %v11724_v56  ;;  %v5750_v56 = vadd.f32 %v16757_v58, %v16845_v4  ;;  %v5752_v37 = vadd.f32 %v16761_v29, %v16845_v4 }
 0x7cd   : > { %19748 = vst [vmem:[#allocation87_spill] sm:$0xff] %v17001_v7  ;;  %4994 = vperm.xlu0 %10640, %v4896_v55   ;;  %4989 = vperm.xlu1 %10639, %v4895_v23   ;;  %v19159_v38 = vmax.f32 %v16999_v5, 0.0  ;;  %v5939_v33 = vadd.f32 %v16617_v34, %v5746_v30 }
 0x7ce   : > { %v17006_v8 = vpop.f32.mrf.mxu1  ;;  %v6326_v36 = vpop.f32.mrf.mxu0  ;;  %6442 = vmatprep.mubr.bf16.mxu0 %v19663_v42  ;;  %v5945_v4 = vadd.f32 %v16634_v53, %v5752_v37 }
 0x7cf   : > { %19749 = vst [vmem:[#allocation88_spill] sm:$0xff] %v17006_v8  ;;  %v11076_v25 = vpack.i.bf16 %v19159_v38, %v19158_v57  ;;  %v17045_v28 = vpop.permute.xlu0 %4974  ;;  %v5748_v38 = vadd.f32 %v16753_v35, %v16835_v19 }
 0x7d0   : > { %v17022_v61 = vpop.f32.mrf.mxu1  ;;  %v6328_v52 = vpop.f32.mrf.mxu0 }
 0x7d1   : > { %19750 = vst [vmem:[#allocation89_spill] sm:$0xff] %v17022_v61  ;;  %11072 = vrot.lane.b32.xlu0 %v11071_v3, %s11977_s27  ;;  %4999 = vperm.xlu1 %10639, %v4897_v46   ;;  %v5941_v8 = vadd.f32 %v16621_v13, %v5748_v38  ;;  %v4960_v61 = vpop.permute.xlu1 %4959 }
 0x7d2   : > { %v17028_v55 = vpop.f32.mrf.mxu1  ;;  %v6330_v23 = vpop.f32.mrf.mxu0  ;;  %v5760_v13 = vadd.f32 %v16773_v1, %v4960_v61 }
 0x7d3   : > { %19751 = vst [vmem:[#allocation90_spill] sm:$0xff] %v17028_v55  ;;  %v5943_v55 = vadd.f32 %v16623_v0, %v5750_v56  ;;  %v5722_v56 = vadd.f32 %v16713_v39, %v16860_v10 }
 0x7d4   : > { %v17034_v50 = vpop.f32.mrf.mxu1  ;;  %v6334_v3 = vpop.f32.mrf.mxu0  ;;  %v5953_v38 = vadd.f32 %v16642_v16, %v5760_v13  ;;  %v4900_v16 = vld [vmem:[%s18940_s5 + $0xa0] sm:$0xff] }
 0x7d5   : > { %19752 = vst [vmem:[#allocation91_spill] sm:$0xff] %v17034_v50  ;;  %11077 = vrot.lane.b32.xlu1 %v11076_v25, %s11977_s27  ;;  %v4955_v50 = vpop.permute.xlu0 %4954  ;;  %v19759_v13 = vld [vmem:[#allocation35_spill] sm:$0xff] }
 0x7d6   : > { %v17042_v46 = vpop.f32.mrf.mxu1  ;;  %v6336_v25 = vpop.f32.mrf.mxu0  ;;  %v5756_v19 = vadd.f32 %v16765_v43, %v4955_v50  ;;  %v5758_v34 = vadd.f32 %v16769_v27, %v4955_v50  ;;  %v5762_v27 = vadd.f32 %v16786_v62, %v4960_v61 }
 0x7d7   : > { %19753 = vst [vmem:[#allocation92_spill] sm:$0xff] %v17042_v46 }
 0x7d8   : > { %v17050_v57 = vpop.f32.mrf.mxu1  ;;  %v6338_v7 = vpop.f32.mrf.mxu0  ;;  %v5949_v43 = vadd.f32 %v16636_v2, %v5756_v19  ;;  %v5951_v2 = vadd.f32 %v16640_v51, %v5758_v34  ;;  %v5955_v37 = vadd.f32 %v16653_v47, %v5762_v27  ;;  %v5768_v19 = vadd.f32 %v16801_v60, %v17024_v40 }
 0x7d9   : > { %19754 = vst [vmem:[#allocation93_spill] sm:$0xff] %v17050_v57  ;;  %v5770_v47 = vadd.f32 %v16810_v22, %v17039_v17  ;;  %v5915_v60 = vadd.f32 %v16577_v11, %v5722_v56  ;;  %v19762_v11 = vld [vmem:[#allocation36_spill] sm:$0xff] }
 0x7da   : > { %v17054_v59 = vpop.f32.mrf.mxu1 }
 0x7db   : > { %19755 = vst [vmem:[#allocation94_spill] sm:$0xff] %v17054_v59 }
 0x7dc   : > { %v6131_v46 = vpop.f32.mrf.mxu1 }
 0x7dd   : > { %v6132_v42 = vadd.f32 %v6131_v46, %v5939_v33  ;;  %v6340_v33 = vpop.f32.mrf.mxu0 }
 0x7de   : > { %v6133_v35 = vpop.f32.mrf.mxu1 }
 0x7df   : > { %v6134_v59 = vadd.f32 %v6133_v35, %v5941_v8  ;;  %v17065_v57 = vadd.f32 %v6324_v48, %v6132_v42 }
 0x7e0   : > { %v6135_v58 = vpop.f32.mrf.mxu1 }
 0x7e1   : > { %v6136_v30 = vadd.f32 %v6135_v58, %v5943_v55  ;;  %v17069_v44 = vadd.f32 %v6326_v36, %v6134_v59  ;;  %v19174_v42 = vmax.f32 %v17065_v57, 0.0  ;;  %v6344_v55 = vpop.f32.mrf.mxu0 }
 0x7e2   : > { %v6137_v29 = vpop.f32.mrf.mxu1 }
 0x7e3   : > { %v19177_v48 = vmax.f32 %v17069_v44, 0.0  ;;  %v6138_v0 = vadd.f32 %v6137_v29, %v5945_v4  ;;  %v17076_v8 = vadd.f32 %v6328_v52, %v6136_v30  ;;  %v5772_v29 = vadd.f32 %v19759_v13, %v17039_v17  ;;  %v19766_v17 = vld [vmem:[#allocation46_spill] sm:$0xff] }
 0x7e4   : > { %v6141_v50 = vpop.f32.mrf.mxu1 }
 0x7e5   : > { %v11081_v53 = vpack.i.bf16 %v19177_v48, %v19174_v42  ;;  %v6142_v1 = vadd.f32 %v6141_v50, %v5949_v43  ;;  %v17083_v59 = vadd.f32 %v6330_v23, %v6138_v0  ;;  %v19172_v52 = vmax.f32 %v17076_v8, 0.0  ;;  %v19760_v43 = vld [vmem:[#allocation38_spill] sm:$0xff]  ;;  %v19761_v0 = vld [vmem:[#allocation75_spill] sm:$0xff] }
 0x7e6   : > { %v6143_v36 = vpop.f32.mrf.mxu1  ;;  %v5766_v23 = vadd.f32 %v16796_v41, %v17024_v40  ;;  %v6346_v41 = vpop.f32.mrf.mxu0  ;;  %v19758_v40 = vld [vmem:[#allocation39_spill] sm:$0xff]  ;;  %v17125_v27 = vadd.f32 %v19761_v0, %v19760_v43  ;;  %v5961_v50 = vadd.f32 %v19762_v11, %v5768_v19  ;;  %v4903_v19 = vld [vmem:[%s18940_s5 + $0xb8] sm:$0xff] }
 0x7e7   : > { %v19173_v46 = vmax.f32 %v17083_v59, 0.0  ;;  %v6144_v62 = vadd.f32 %v6143_v36, %v5951_v2  ;;  %v17089_v61 = vadd.f32 %v6334_v3, %v6142_v1  ;;  %11082 = vrot.lane.b32.xlu0 %v11081_v53, %s11977_s27  ;;  %v19763_v53 = vld [vmem:[#allocation63_spill] sm:$0xff] }
 0x7e8   : > { %v6145_v51 = vpop.f32.mrf.mxu1  ;;  %v5959_v30 = vadd.f32 %v19758_v40, %v5766_v23  ;;  %v6108_v1 = vadd.f32 %v19763_v53, %v5915_v60  ;;  %v6348_v36 = vpop.f32.mrf.mxu0  ;;  %v19768_v40 = vld [vmem:[#allocation43_spill] sm:$0xff] }
 0x7e9   : > { %19756 = vst [vmem:[#allocation95_spill] sm:$0xff] %v17089_v61  ;;  %v11086_v3 = vpack.i.bf16 %v19173_v46, %v19172_v52  ;;  %v6146_v35 = vadd.f32 %v6145_v51, %v5953_v38  ;;  %v17106_v39 = vadd.f32 %v6336_v25, %v6144_v62  ;;  %v4902_v25 = vld [vmem:[%s18940_s5 + $0xb0] sm:$0xff]  ;;  %v19764_v38 = vld [vmem:[#allocation50_spill] sm:$0xff] }
 0x7ea   : > { %v6147_v10 = vpop.f32.mrf.mxu1  ;;  %v19765_v62 = vld [vmem:[#allocation73_spill] sm:$0xff] }
 0x7eb   : > { %v6148_v58 = vadd.f32 %v6147_v10, %v5955_v37  ;;  %v17108_v34 = vadd.f32 %v6338_v7, %v6146_v35  ;;  %5014 = vperm.xlu0 %10640, %v4900_v16   ;;  %11087 = vrot.lane.b32.xlu1 %v11086_v3, %s11977_s27  ;;  %v4901_v7 = vld [vmem:[%s18940_s5 + $0xa8] sm:$0xff]  ;;  %v17133_v56 = vadd.f32 %v19765_v62, %v19764_v38  ;;  %v19171_v3 = vmax.f32 %v17125_v27, 0.0  ;;  %v19777_v46 = vld [vmem:[#allocation49_spill] sm:$0xff] }
 0x7ec   : > { %v6151_v4 = vpop.f32.mrf.mxu1  ;;  %v5963_v37 = vadd.f32 %v19766_v17, %v5770_v47  ;;  %v17144_v35 = vadd.f32 %v16927_v21, %v6108_v1  ;;  %v19769_v47 = vld [vmem:[#allocation77_spill] sm:$0xff]  ;;  %v4899_v21 = vld [vmem:[%s18940_s5 + $0x98] sm:$0xff] }
 0x7ed   : > { %19757 = vst [vmem:[#allocation96_spill] sm:$0xff] %v17108_v34  ;;  %v17127_v22 = vadd.f32 %v6340_v33, %v6148_v58  ;;  %v6152_v23 = vadd.f32 %v6151_v4, %v5959_v30  ;;  %v4898_v33 = vld [vmem:[%s18940_s5 + $0x90] sm:$0xff]  ;;  %v19767_v58 = vld [vmem:[#allocation42_spill] sm:$0xff]  ;;  %v17151_v30 = vadd.f32 %v19769_v47, %v19768_v40 }
 0x7ee   : > { %v6153_v2 = vpop.f32.mrf.mxu1  ;;  %v5965_v60 = vadd.f32 %v19767_v58, %v5772_v29  ;;  %v19170_v29 = vmax.f32 %v17144_v35, 0.0  ;;  %v11727_v17 = vld [vmem:[%s18939_s4 + $0x35c] ss:$28 sps:$4 sm:$0xff]  }
 0x7ef   : > { %v6154_v51 = vadd.f32 %v6153_v2, %v5961_v50  ;;  %5024 = vperm.xlu0 %10640, %v4902_v25   ;;  %5019 = vperm.xlu1 %10639, %v4901_v7   ;;  %v6350_v25 = vpop.f32.mrf.mxu0  ;;  %v19169_v7 = vmax.f32 %v17133_v56, 0.0  ;;  %v17154_v13 = vadd.f32 %v6344_v55, %v6152_v23  ;;  %v19168_v55 = vmax.f32 %v17151_v30, 0.0 }
 0x7f0   : > { %v6155_v16 = vpop.f32.mrf.mxu1  ;;  %6249 = vmatprep.mubr.bf16.mxu1 %v11727_v17 }
 0x7f1   : > { %v17146_v10 = vadd.f32 %v6346_v41, %v6154_v51  ;;  %v6156_v43 = vadd.f32 %v6155_v16, %v5963_v37  ;;  %v11091_v41 = vpack.i.bf16 %v19171_v3, %v19169_v7  ;;  %v19166_v53 = vmax.f32 %v17154_v13, 0.0  ;;  %v11725_v51 = vld [vmem:[%s18939_s4 + $0x358] ss:$28 sps:$4 sm:$0xff]   ;;  %v11728_v37 = vld [vmem:[%s18939_s4 + $0x360] ss:$28 sps:$4 sm:$0xff]  }
 0x7f2   : > { %v6157_v4 = vpop.f32.mrf.mxu1  ;;  %v11096_v2 = vpack.i.bf16 %v19170_v29, %v19168_v55  ;;  %6250 = vmatmul.mubr.bf16.gmra.mxu1 %v11725_v51  ;;  %10024 = vmatmul.mubr.msk.bf16.gmra.mxu0 %vm850_vm6, %v11728_v37  ;;  %v19773_v51 = vld [vmem:[#allocation55_spill] sm:$0xff]  ;;  %vm7286_vm6 = vcmask 424960  }
 0x7f3   : > { %v6158_v0 = vadd.f32 %v6157_v4, %v5965_v60  ;;  %5004 = vperm.xlu0 %10640, %v4898_v33   ;;  %5029 = vperm.xlu1 %10639, %v4903_v19   ;;  %v19167_v11 = vmax.f32 %v17146_v10, 0.0  ;;  %v17169_v1 = vadd.f32 %v6348_v36, %v6156_v43  ;;  %v6354_v33 = vpop.f32.mrf.mxu0  ;;  %v19770_v4 = vld [vmem:[#allocation23_spill] sm:$0xff] }
 0x7f4   : > { %v6161_v16 = vpop.f32.mrf.mxu1  ;;  %v19776_v29 = vld [vmem:[#allocation47_spill] sm:$0xff] }
 0x7f5   : > { %v17165_v50 = vadd.f32 %v6350_v25, %v6158_v0  ;;  %v11101_v38 = vpack.i.bf16 %v19167_v11, %v19166_v53  ;;  %v19164_v23 = vmax.f32 %v17169_v1, 0.0  ;;  %v6356_v58 = vpop.f32.mrf.mxu0  ;;  %v5778_v25 = vadd.f32 %v19770_v4, %v17045_v28  ;;  %v19775_v53 = vld [vmem:[#allocation9_spill] sm:$0xff] }
 0x7f6   : > { %v6163_v19 = vpop.f32.mrf.mxu1 }
 0x7f7   : > { %11092 = vrot.lane.b32.xlu0 %v11091_v41, %s11977_s27  ;;  %5009 = vperm.xlu1 %10639, %v4899_v21   ;;  %v19165_v62 = vmax.f32 %v17165_v50, 0.0  ;;  %v6358_v40 = vpop.f32.mrf.mxu0  ;;  %v19771_v21 = vld [vmem:[#allocation44_spill] sm:$0xff]  ;;  %v5971_v17 = vadd.f32 %v19773_v51, %v5778_v25 }
 0x7f8   : > { %v6165_v60 = vpop.f32.mrf.mxu1  ;;  %v5776_v41 = vadd.f32 %v19771_v21, %v17045_v28 }
 0x7f9   : > { %v11106_v36 = vpack.i.bf16 %v19165_v62, %v19164_v23  ;;  %v6360_v0 = vpop.f32.mrf.mxu0  ;;  %v19774_v23 = vld [vmem:[#allocation53_spill] sm:$0xff]  ;;  %v6164_v11 = vadd.f32 %v6163_v19, %v5971_v17 }
 0x7fa   : > { %v6167_v47 = vpop.f32.mrf.mxu1  ;;  %v5780_v62 = vadd.f32 %v19774_v23, %v17056_v54  ;;  %v5969_v4 = vadd.f32 %v19775_v53, %v5776_v41  ;;  %v19780_v41 = vmax.f32 %v16935_v45, 0.0 }
 0x7fb   : > { %11102 = vrot.lane.b32.xlu0 %v11101_v38, %s11977_s27  ;;  %11097 = vrot.lane.b32.xlu1 %v11096_v2, %s11977_s27  ;;  %v17205_v2 = vpop.f32.mrf.mxu0  ;;  %v19772_v38 = vld [vmem:[#allocation21_spill] sm:$0xff]  ;;  %v17221_v51 = vadd.f32 %v6356_v58, %v6164_v11 }
 0x7fc   : > { %v17201_v43 = vpop.f32.mrf.mxu1  ;;  %v6162_v7 = vadd.f32 %v6161_v16, %v5969_v4  ;;  %v5973_v25 = vadd.f32 %v19777_v46, %v5780_v62 }
 0x7fd   : > { %v17215_v55 = vpop.f32.mrf.mxu0 }
 0x7fe   : > { %v17210_v37 = vpop.f32.mrf.mxu1  ;;  %v17230_v16 = vadd.f32 %v6354_v33, %v6162_v7  ;;  %v19781_v7 = vmax.f32 %v16961_v18, 0.0 }
 0x7ff   : > { %11107 = vrot.lane.b32.xlu1 %v11106_v36, %s11977_s27  ;;  %v5782_v36 = vadd.f32 %v19772_v38, %v17056_v54  ;;  %v19778_v54 = vmax.f32 %v16942_v15, 0.0  ;;  %v17228_v19 = vpop.f32.mrf.mxu0  ;;  %v19176_v15 = vmax.f32 %v17221_v51, 0.0 }
 0x800   : > { %v17218_v3 = vpop.f32.mrf.mxu1 }
 0x801   : > { %v5975_v28 = vadd.f32 %v19776_v29, %v5782_v36  ;;  %v6166_v29 = vadd.f32 %v6165_v60, %v5973_v25  ;;  %v17248_v60 = vpop.f32.mrf.mxu0 }
 0x802   : > { %v17236_v46 = vpop.f32.mrf.mxu1 }
 0x803   : > { %v6168_v42 = vadd.f32 %v6167_v47, %v5975_v28  ;;  %v19175_v47 = vmax.f32 %v17230_v16, 0.0  ;;  %v17251_v4 = vadd.f32 %v6358_v40, %v6166_v29  ;;  %v19783_v28 = vmax.f32 %v16950_v32, 0.0  ;;  %v6374_v25 = vpop.f32.mrf.mxu0 }
 0x804   : > { %v19178_v32 = vmax.f32 %v17106_v39, 0.0  ;;  %v19185_v29 = vmax.f32 %v17108_v34, 0.0 }
 0x805   : > { %v17239_v58 = vadd.f32 %v6360_v0, %v6168_v42  ;;  %v6181_v42 = vpop.f32.mrf.mxu1  ;;  %v19181_v0 = vmax.f32 %v17127_v22, 0.0  ;;  %v11116_v18 = vpack.i.bf16 %v19176_v15, %v19175_v47  ;;  %v19787_v15 = vld [vmem:[#allocation10_spill] sm:$0xff] }
 0x837   : > { %v11063_v21 = vpop.permute.xlu0 %11062 }
 0x838   : > { %v11065_v52 = vunpack.i.h.bf16 %v11063_v21  ;;  %v11064_v38 = vunpack.i.l.bf16 %v11063_v21 }
 0x83a   : > { %v17225_v23 = vmax.f32 %v19778_v54, %v11065_v52  ;;  %v6711_v53 = vsel %vm522_vm4, %v11064_v38, %v11065_v52  ;;  %v19180_v38 = vmax.f32 %v17239_v58, 0.0  ;;  %v19179_v54 = vmax.f32 %v17251_v4, 0.0 }
 0x83b   : > { %v17234_v36 = vmax.f32 %v19780_v41, %v6711_v53  ;;  %v11068_v17 = vpop.permute.xlu1 %11067  ;;  %v6183_v53 = vpop.f32.mrf.mxu1 }
 0x83c   : > { %19779 = vst [vmem:[#allocation39_spill] sm:$0xff] %v17225_v23  ;;  %v11070_v11 = vunpack.i.h.bf16 %v11068_v17  ;;  %v11069_v62 = vunpack.i.l.bf16 %v11068_v17  ;;  %v11131_v17 = vpack.i.bf16 %v19181_v0, %v19178_v32 }
 0x83d   : > { %v11111_v52 = vpack.i.bf16 %v17225_v23, %v17234_v36  ;;  %v17286_v32 = vpop.f32.mrf.mxu1  ;;  %v19791_v23 = vld [vmem:[#allocation51_spill] sm:$0xff] }
 0x83e   : > { %v17245_v33 = vmax.f32 %v19781_v7, %v11070_v11  ;;  %v6712_v45 = vsel %vm522_vm4, %v11069_v62, %v11070_v11  ;;  %v11126_v11 = vpack.i.bf16 %v19180_v38, %v19179_v54  ;;  %v19784_v62 = vld [vmem:[#allocation18_spill] sm:$0xff]  ;;  %v19785_v7 = vld [vmem:[#allocation24_spill] sm:$0xff]  ;;  %v19790_v38 = vld [vmem:[#allocation33_spill] sm:$0xff] }
 0x83f   : > { %v17255_v21 = vmax.f32 %v19783_v28, %v6712_v45  ;;  %11112 = vrot.lane.b32.xlu0 %v11111_v52, %s11982_s25  ;;  %v19184_v28 = vmax.f32 %v17089_v61, 0.0 }
 0x840   : > { %19782 = vst [vmem:[#allocation35_spill] sm:$0xff] %v17245_v33 }
 0x841   : > { %v11121_v40 = vpack.i.bf16 %v17245_v33, %v17255_v21 }
 0x843   : > { %11117 = vrot.lane.b32.xlu0 %v11116_v18, %s11977_s27  ;;  %11122 = vrot.lane.b32.xlu1 %v11121_v40, %s11982_s25  ;;  %v6376_v18 = vpop.f32.mrf.mxu0  ;;  %v19786_v40 = vld [vmem:[#allocation7_spill] sm:$0xff] }
 0x844   : > { %v4985_v41 = vpop.permute.xlu0 %4984 }
 0x845   : > { %v5786_v52 = vadd.f32 %v19784_v62, %v4985_v41  ;;  %v5788_v45 = vadd.f32 %v19785_v7, %v4985_v41  ;;  %v11136_v62 = vpack.i.bf16 %v19185_v29, %v19184_v28  ;;  %v4904_v7 = vld [vmem:[%s18940_s5 + $0xc0] sm:$0xff]  ;;  %v17301_v24 = vpop.f32.mrf.mxu0 }
 0x847   : > { %v5979_v47 = vadd.f32 %v19786_v40, %v5786_v52  ;;  %v5981_v48 = vadd.f32 %v19787_v15, %v5788_v45  ;;  %11132 = vrot.lane.b32.xlu0 %v11131_v17, %s11977_s27  ;;  %11127 = vrot.lane.b32.xlu1 %v11126_v11, %s11977_s27  ;;  %v19788_v17 = vld [vmem:[#allocation34_spill] sm:$0xff]  ;;  %v19789_v11 = vld [vmem:[#allocation31_spill] sm:$0xff] }
 0x848   : > { %v4995_v54 = vpop.permute.xlu0 %4994  ;;  %v4990_v41 = vpop.permute.xlu1 %4989 }
 0x849   : > { %v6172_v52 = vadd.f32 %v17201_v43, %v5979_v47  ;;  %v6174_v15 = vadd.f32 %v17210_v37, %v5981_v48  ;;  %v5796_v45 = vadd.f32 %v19788_v17, %v4995_v54  ;;  %v5798_v40 = vadd.f32 %v19789_v11, %v4995_v54  ;;  %v6187_v48 = vpop.f32.mrf.mxu1  ;;  %v19795_v37 = vld [vmem:[#allocation61_spill] sm:$0xff]  ;;  %v19797_v17 = vld [vmem:[#allocation52_spill] sm:$0xff] }
 0x84a   : > { %v5790_v0 = vadd.f32 %v19790_v38, %v4990_v41  ;;  %v5792_v33 = vadd.f32 %v19791_v23, %v4990_v41  ;;  %v19796_v54 = vld [vmem:[#allocation17_spill] sm:$0xff] }
 0x84b   : > { %v17304_v28 = vadd.f32 %v17205_v2, %v6172_v52  ;;  %v17307_v29 = vadd.f32 %v17215_v55, %v6174_v15  ;;  %v5989_v43 = vadd.f32 %v19794_v20, %v5796_v45  ;;  %5034 = vperm.xlu0 %10640, %v4904_v7   ;;  %11137 = vrot.lane.b32.xlu1 %v11136_v62, %s11977_s27  ;;  %v4906_v2 = vld [vmem:[%s18940_s5 + $0xd0] sm:$0xff]  ;;  %v17322_v62 = vpop.f32.mrf.mxu1 }
 0x84c   : > { %v5983_v47 = vadd.f32 %v19795_v37, %v5790_v0  ;;  %v5985_v38 = vadd.f32 %v19796_v54, %v5792_v33  ;;  %v5991_v23 = vadd.f32 %v19797_v17, %v5798_v40  ;;  %v11073_v41 = vpop.permute.xlu0 %11072  ;;  %v5000_v11 = vpop.permute.xlu1 %4999  ;;  %v4905_v0 = vld [vmem:[%s18940_s5 + $0xc8] sm:$0xff] }
 0x84d   : > { %19792 = vst [vmem:[#allocation38_spill] sm:$0xff] %v17304_v28  ;;  %19793 = vst [vmem:[#allocation75_spill] sm:$0xff] %v17307_v29  ;;  %v19186_v55 = vmax.f32 %v17304_v28, 0.0  ;;  %v6182_v7 = vadd.f32 %v6181_v42, %v5989_v43  ;;  %v11075_v52 = vunpack.i.h.bf16 %v11073_v41  ;;  %v11074_v40 = vunpack.i.l.bf16 %v11073_v41  ;;  %v6380_v37 = vpop.f32.mrf.mxu0  ;;  %v19836_v28 = vld [vmem:[#allocation5_spill] sm:$0xff] }
 0x84e   : > { %v6176_v33 = vadd.f32 %v17218_v3, %v5983_v47  ;;  %v6178_v15 = vadd.f32 %v17236_v46, %v5985_v38  ;;  %v6184_v45 = vadd.f32 %v6183_v53, %v5991_v23  ;;  %v19802_v3 = vmax.f32 %v17307_v29, 0.0  ;;  %v17346_v47 = vpop.f32.mrf.mxu1  ;;  %v19838_v29 = vld [vmem:[#allocation76_spill] sm:$0xff] }
 0x84f   : > { %v17326_v54 = vadd.f32 %v6374_v25, %v6182_v7  ;;  %5044 = vperm.xlu0 %10640, %v4906_v2   ;;  %5039 = vperm.xlu1 %10639, %v4905_v0   ;;  %v17334_v20 = vpop.f32.mrf.mxu0  ;;  %v6713_v23 = vsel %vm522_vm4, %v11074_v40, %v11075_v52  ;;  %v19804_v2 = vld [vmem:[#allocation6_spill] sm:$0xff]  ;;  %v19805_v0 = vld [vmem:[#allocation41_spill] sm:$0xff]  ;;  %v19808_v38 = vmax.f32 %v16986_v49, 0.0  ;;  %v19813_v49 = vmax.f32 %v17004_v6, 0.0 }
 0x850   : > { %v17329_v17 = vadd.f32 %v17228_v19, %v6176_v33  ;;  %v17332_v42 = vadd.f32 %v17248_v60, %v6178_v15  ;;  %v11078_v43 = vpop.permute.xlu1 %11077  ;;  %19801 = vst [vmem:[#allocation73_spill] sm:$0xff] %v17334_v20  ;;  %v11141_v46 = vpack.i.bf16 %v19802_v3, %v19186_v55  ;;  %v17341_v25 = vadd.f32 %v6376_v18, %v6184_v45  ;;  %v4907_v19 = vld [vmem:[%s18940_s5 + $0xd8] sm:$0xff]  ;;  %v19843_v20 = vld [vmem:[#allocation3_spill] sm:$0xff] }
 0x851   : > { %19798 = vst [vmem:[#allocation36_spill] sm:$0xff] %v17326_v54  ;;  %v19187_v53 = vmax.f32 %v17326_v54, 0.0  ;;  %v11080_v41 = vunpack.i.h.bf16 %v11078_v43  ;;  %v5800_v7 = vadd.f32 %v19804_v2, %v5000_v11  ;;  %v5802_v33 = vadd.f32 %v19805_v0, %v5000_v11  ;;  %v17355_v45 = vpop.f32.mrf.mxu0  ;;  %v17370_v2 = vpop.f32.mrf.mxu1 }
 0x852   : > { %19799 = vst [vmem:[#allocation63_spill] sm:$0xff] %v17329_v17  ;;  %19800 = vst [vmem:[#allocation50_spill] sm:$0xff] %v17332_v42  ;;  %v19189_v60 = vmax.f32 %v17329_v17, 0.0  ;;  %v19188_v18 = vmax.f32 %v17341_v25, 0.0  ;;  %v11079_v15 = vunpack.i.l.bf16 %v11078_v43  ;;  %v19806_v3 = vmax.f32 %v16981_v9, 0.0 }
 0x853   : > { %19803 = vst [vmem:[#allocation46_spill] sm:$0xff] %v17341_v25  ;;  %11142 = vrot.lane.b32.xlu0 %v11141_v46, %s11977_s27  ;;  %5049 = vperm.xlu1 %10639, %v4907_v19   ;;  %v17363_v40 = vmax.f32 %v19808_v38, %v6713_v23  ;;  %v19810_v46 = vmax.f32 %v17332_v42, 0.0  ;;  %v19815_v23 = vld [vmem:[#allocation57_spill] sm:$0xff]  ;;  %v19834_v42 = vld [vmem:[#allocation26_spill] sm:$0xff] }
 0x854   : > { %v17359_v55 = vmax.f32 %v19806_v3, %v11075_v52  ;;  %v11151_v11 = vpack.i.bf16 %v19188_v18, %v19187_v53  ;;  %v6714_v43 = vsel %vm522_vm4, %v11079_v15, %v11080_v41  ;;  %v19811_v52 = vmax.f32 %v16999_v5, 0.0  ;;  %v19816_v3 = vld [vmem:[#allocation4_spill] sm:$0xff]  ;;  %v17388_v15 = vpop.f32.mrf.mxu0 }
 0x855   : > { %19809 = vst [vmem:[#allocation43_spill] sm:$0xff] %v17363_v40  ;;  %v11146_v9 = vpack.i.bf16 %v19810_v46, %v19189_v60  ;;  %v17382_v38 = vmax.f32 %v19813_v49, %v6714_v43  ;;  %v5993_v0 = vadd.f32 %v19815_v23, %v5800_v7  ;;  %v5995_v53 = vadd.f32 %v19816_v3, %v5802_v33 }
 0x856   : > { %19807 = vst [vmem:[#allocation42_spill] sm:$0xff] %v17359_v55  ;;  %v17378_v19 = vmax.f32 %v19811_v52, %v11080_v41  ;;  %v11156_v5 = vpack.i.bf16 %v17359_v55, %v17363_v40  ;;  %v17392_v41 = vpop.f32.mrf.mxu1  ;;  %v17404_v49 = vpop.f32.mrf.mxu0  ;;  %v19833_v40 = vld [vmem:[#allocation14_spill] sm:$0xff] }
 0x857   : > { %19814 = vst [vmem:[#allocation23_spill] sm:$0xff] %v17382_v38  ;;  %11152 = vrot.lane.b32.xlu0 %v11151_v11, %s11977_s27  ;;  %11147 = vrot.lane.b32.xlu1 %v11146_v9, %s11977_s27  ;;  %v6186_v7 = vadd.f32 %v17286_v32, %v5993_v0  ;;  %v6188_v33 = vadd.f32 %v6187_v48, %v5995_v53  ;;  %v19817_v11 = vmax.f32 %v17069_v44, 0.0 }
 0x858   : > { %19812 = vst [vmem:[#allocation77_spill] sm:$0xff] %v17378_v19  ;;  %v11161_v43 = vpack.i.bf16 %v17378_v19, %v17382_v38  ;;  %v6201_v60 = vpop.f32.mrf.mxu1  ;;  %v19829_v19 = vld [vmem:[#allocation68_spill] sm:$0xff] }
 0x859   : > { %v11083_v18 = vpop.permute.xlu0 %11082  ;;  %v17411_v53 = vadd.f32 %v17301_v24, %v6186_v7  ;;  %v17413_v44 = vadd.f32 %v6380_v37, %v6188_v33  ;;  %v6394_v24 = vpop.f32.mrf.mxu0 }
 0x85a   : > { %v11085_v46 = vunpack.i.h.bf16 %v11083_v18  ;;  %v11084_v6 = vunpack.i.l.bf16 %v11083_v18  ;;  %v19819_v18 = vmax.f32 %v17065_v57, 0.0 }
 0x85b   : > { %11157 = vrot.lane.b32.xlu0 %v11156_v5, %s11982_s25  ;;  %11162 = vrot.lane.b32.xlu1 %v11161_v43, %s11982_s25  ;;  %19821 = vst [vmem:[#allocation55_spill] sm:$0xff] %v17411_v53  ;;  %19822 = vst [vmem:[#allocation53_spill] sm:$0xff] %v17413_v44  ;;  %v19823_v5 = vmax.f32 %v17083_v59, 0.0  ;;  %v19198_v37 = vmax.f32 %v17411_v53, 0.0  ;;  %v19199_v7 = vmax.f32 %v17413_v44, 0.0 }
 0x85c   : > { %v17400_v9 = vmax.f32 %v19817_v11, %v11085_v46  ;;  %v6715_v52 = vsel %vm522_vm4, %v11084_v6, %v11085_v46  ;;  %v19825_v6 = vmax.f32 %v17076_v8, 0.0  ;;  %v6203_v11 = vpop.f32.mrf.mxu1 }
 0x85d   : > { %v17408_v23 = vmax.f32 %v19819_v18, %v6715_v52  ;;  %v11088_v3 = vpop.permute.xlu1 %11087  ;;  %v6396_v52 = vpop.f32.mrf.mxu0  ;;  %v11176_v8 = vpack.i.bf16 %v19199_v7, %v19198_v37  ;;  %v19831_v37 = vld [vmem:[#allocation72_spill] sm:$0xff] }
 0x85e   : > { %19818 = vst [vmem:[#allocation44_spill] sm:$0xff] %v17400_v9  ;;  %v11090_v32 = vunpack.i.h.bf16 %v11088_v3  ;;  %v11089_v48 = vunpack.i.l.bf16 %v11088_v3  ;;  %v6205_v59 = vpop.f32.mrf.mxu1 }
 0x85f   : > { %19820 = vst [vmem:[#allocation21_spill] sm:$0xff] %v17408_v23  ;;  %v11166_v0 = vpack.i.bf16 %v17400_v9, %v17408_v23 }
 0x860   : > { %v17419_v46 = vmax.f32 %v19823_v5, %v11090_v32  ;;  %v6716_v57 = vsel %vm522_vm4, %v11089_v48, %v11090_v32  ;;  %v6207_v3 = vpop.f32.mrf.mxu1  ;;  %v6398_v32 = vpop.f32.mrf.mxu0  ;;  %v19827_v5 = vld [vmem:[#allocation70_spill] sm:$0xff] }
 0x861   : > { %v17424_v43 = vmax.f32 %v19825_v6, %v6716_v57  ;;  %11167 = vrot.lane.b32.xlu0 %v11166_v0, %s11982_s25  ;;  %v19828_v6 = vld [vmem:[#allocation71_spill] sm:$0xff] }
 0x862   : > { %19824 = vst [vmem:[#allocation9_spill] sm:$0xff] %v17419_v46  ;;  %v6211_v9 = vpop.f32.mrf.mxu1 }
 0x863   : > { %19826 = vst [vmem:[#allocation47_spill] sm:$0xff] %v17424_v43  ;;  %v11171_v33 = vpack.i.bf16 %v17419_v46, %v17424_v43  ;;  %v19830_v43 = vld [vmem:[#allocation69_spill] sm:$0xff] }
 0x865   : > { %11172 = vrot.lane.b32.xlu1 %v11171_v33, %s11982_s25  ;;  %v6400_v33 = vpop.f32.mrf.mxu0 }
 0x866   : > { %v5015_v18 = vpop.permute.xlu0 %5014 }
 0x867   : > { %v5816_v55 = vadd.f32 %v19829_v19, %v5015_v18  ;;  %v5818_v23 = vadd.f32 %v19830_v43, %v5015_v18  ;;  %v6404_v25 = vpop.f32.mrf.mxu0  ;;  %v19837_v43 = vld [vmem:[#allocation60_spill] sm:$0xff] }
 0x869   : > { %11177 = vrot.lane.b32.xlu1 %v11176_v8, %s11977_s27  ;;  %v19832_v8 = vld [vmem:[#allocation74_spill] sm:$0xff]  ;;  %v6011_v14 = vadd.f32 %v19836_v28, %v5818_v23  ;;  %v19841_v28 = vld [vmem:[#allocation65_spill] sm:$0xff] }
 0x86a   : > { %v5025_v48 = vpop.permute.xlu0 %5024  ;;  %v5020_v0 = vpop.permute.xlu1 %5019 }
 0x86b   : > { %v5820_v57 = vadd.f32 %v19827_v5, %v5020_v0  ;;  %v5822_v46 = vadd.f32 %v19828_v6, %v5020_v0  ;;  %v5826_v7 = vadd.f32 %v19831_v37, %v5025_v48  ;;  %v5828_v38 = vadd.f32 %v19832_v8, %v5025_v48  ;;  %v6213_v5 = vpop.f32.mrf.mxu1  ;;  %v19835_v0 = vld [vmem:[#allocation13_spill] sm:$0xff] }
 0x86c   : > { %v6009_v6 = vadd.f32 %v19835_v0, %v5816_v55  ;;  %v6204_v26 = vadd.f32 %v6203_v11, %v6011_v14 }
 0x86d   : > { %v6013_v17 = vadd.f32 %v19833_v40, %v5820_v57  ;;  %v6015_v54 = vadd.f32 %v19834_v42, %v5822_v46  ;;  %v6019_v18 = vadd.f32 %v19837_v43, %v5826_v7  ;;  %v19840_v40 = vld [vmem:[#allocation15_spill] sm:$0xff]  ;;  %v6215_v42 = vpop.f32.mrf.mxu1  ;;  %v6406_v46 = vpop.f32.mrf.mxu0 }
 0x86e   : > { %v17441_v53 = vpop.permute.xlu0 %5004  ;;  %v5030_v44 = vpop.permute.xlu1 %5029  ;;  %v6021_v57 = vadd.f32 %v19840_v40, %v5828_v38  ;;  %v6202_v34 = vadd.f32 %v6201_v60, %v6009_v6  ;;  %v19842_v43 = vld [vmem:[#allocation27_spill] sm:$0xff] }
 0x86f   : > { %v5830_v12 = vadd.f32 %v19838_v29, %v5030_v44  ;;  %v5832_v37 = vadd.f32 %v19839_v31, %v5030_v44  ;;  %v6206_v48 = vadd.f32 %v6205_v59, %v6013_v17  ;;  %v6208_v8 = vadd.f32 %v6207_v3, %v6015_v54  ;;  %v19844_v17 = vld [vmem:[#allocation67_spill] sm:$0xff]  ;;  %v6217_v14 = vpop.f32.mrf.mxu1 }
 0x870   : > { %v6212_v55 = vadd.f32 %v6211_v9, %v6019_v18  ;;  %v5808_v23 = vadd.f32 %v19841_v28, %v17441_v53  ;;  %v6214_v60 = vadd.f32 %v6213_v5, %v6021_v57  ;;  %v6408_v9 = vpop.f32.mrf.mxu0  ;;  %v17465_v11 = vadd.f32 %v6394_v24, %v6202_v34 }
 0x871   : > { %v6023_v29 = vadd.f32 %v19842_v43, %v5830_v12  ;;  %v6025_v31 = vadd.f32 %v19843_v20, %v5832_v37  ;;  %v17461_v44 = vadd.f32 %v6398_v32, %v6206_v48  ;;  %v17463_v38 = vadd.f32 %v6400_v33, %v6208_v8  ;;  %v19846_v20 = vld [vmem:[#allocation58_spill] sm:$0xff] }
 0x872   : > { %v17449_v19 = vpop.permute.xlu1 %5009  ;;  %v11093_v61 = vpop.permute.xlu0 %11092  ;;  %v17467_v59 = vadd.f32 %v6396_v52, %v6204_v26  ;;  %v17470_v12 = vadd.f32 %v6404_v25, %v6212_v55  ;;  %v6001_v18 = vadd.f32 %v19846_v20, %v5808_v23  ;;  %v19847_v5 = vmax.f32 %v17125_v27, 0.0 }
 0x873   : > { %v11095_v0 = vunpack.i.h.bf16 %v11093_v61  ;;  %v11094_v63 = vunpack.i.l.bf16 %v11093_v61  ;;  %v5812_v54 = vadd.f32 %v19844_v17, %v17449_v19  ;;  %v19845_v61 = vld [vmem:[#allocation12_spill] sm:$0xff]  ;;  %v6216_v48 = vadd.f32 %v6215_v42, %v6023_v29  ;;  %v6410_v40 = vpop.f32.mrf.mxu0 }
 0x874   : > { %v6218_v33 = vadd.f32 %v6217_v14, %v6025_v31  ;;  %v19848_v34 = vmax.f32 %v17144_v35, 0.0  ;;  %v19220_v24 = vmax.f32 %v17461_v44, 0.0  ;;  %v19221_v25 = vmax.f32 %v17463_v38, 0.0 }
 0x875   : > { %v6005_v3 = vadd.f32 %v19845_v61, %v5812_v54  ;;  %v6709_v37 = vsel %vm522_vm4, %v11094_v63, %v11095_v0  ;;  %v17476_v8 = vmax.f32 %v19847_v5, %v11095_v0  ;;  %v17484_v52 = vadd.f32 %v6406_v46, %v6214_v60 }
 0x876   : > { %v11098_v7 = vpop.permute.xlu1 %11097  ;;  %v19849_v57 = vmax.f32 %v17133_v56, 0.0  ;;  %v19850_v55 = vmax.f32 %v17151_v30, 0.0  ;;  %v19218_v23 = vmax.f32 %v17465_v11, 0.0  ;;  %v19219_v46 = vmax.f32 %v17467_v59, 0.0  ;;  %v11103_v43 = vpop.permute.xlu0 %11102 }
 0x877   : > { %v11100_v6 = vunpack.i.h.bf16 %v11098_v7  ;;  %v11099_v32 = vunpack.i.l.bf16 %v11098_v7  ;;  %v6198_v27 = vadd.f32 %v17392_v41, %v6005_v3  ;;  %v6194_v0 = vadd.f32 %v17346_v47, %v6001_v18 }
 0x878   : > { %v17489_v42 = vmax.f32 %v19849_v57, %v6709_v37  ;;  %v17501_v7 = vadd.f32 %v6408_v9, %v6216_v48  ;;  %v17503_v56 = vadd.f32 %v6410_v40, %v6218_v33  ;;  %v11196_v30 = vpack.i.bf16 %v19221_v25, %v19220_v24  ;;  %v11731_v40 = vld [vmem:[%s18941_s6 + $0x70] sm:$0xff]   ;;  %v11733_v57 = vld [vmem:[%s18941_s6 + $0x68] sm:$0xff]  }
 0x879   : > { %v17480_v26 = vmax.f32 %v19848_v34, %v11100_v6  ;;  %v6710_v63 = vsel %vm522_vm4, %v11099_v32, %v11100_v6  ;;  %v19216_v29 = vmax.f32 %v17470_v12, 0.0  ;;  %v19217_v31 = vmax.f32 %v17484_v52, 0.0  ;;  %v11730_v34 = vld [vmem:[%s18941_s6 + $0x38] sm:$0xff]  }
 0x87a   : > { %v17496_v28 = vmax.f32 %v19850_v55, %v6710_v63  ;;  %v17515_v47 = vadd.f32 %v17404_v49, %v6198_v27  ;;  %v11105_v17 = vunpack.i.h.bf16 %v11103_v43  ;;  %v11104_v54 = vunpack.i.l.bf16 %v11103_v43  ;;  %v11732_v63 = vld [vmem:[%s18941_s6 + $0x30] sm:$0xff]   ;;  %v11734_v27 = vld [vmem:[%s18941_s6 + $0x28] sm:$0xff]   ;;  %v11736_v55 = vld [vmem:[%s18941_s6 + $0x20] sm:$0xff]  }
 0x87b   : > { %v11181_v35 = vpack.i.bf16 %v17480_v26, %v17476_v8  ;;  %v11191_v60 = vpack.i.bf16 %v19219_v46, %v19218_v23  ;;  %v17523_v14 = vadd.f32 %v17355_v45, %v6194_v0  ;;  %v19212_v9 = vmax.f32 %v17501_v7, 0.0  ;;  %v11737_v0 = vld [vmem:[%s18941_s6 + $0x58] sm:$0xff]  }
 0x87c   : > { %v11186_v41 = vpack.i.bf16 %v17496_v28, %v17489_v42  ;;  %v19215_v61 = vmax.f32 %v17503_v56, 0.0  ;;  %v11201_v49 = vpack.i.bf16 %v19217_v31, %v19216_v29  ;;  %v19211_v3 = vmax.f32 %v17515_v47, 0.0  ;;  %v11738_v43 = vld [vmem:[%s18941_s6 + $0x18] sm:$0xff]  }
 0x87d   : > { %11182 = vrot.lane.b32.xlu0 %v11181_v35, %s11982_s25  ;;  %v6719_v6 = vsel %vm522_vm4, %v11104_v54, %v11105_v17  ;;  %v19210_v45 = vmax.f32 %v17523_v14, 0.0  ;;  %v19851_v18 = vmax.f32 %v17146_v10, 0.0  ;;  %v19852_v32 = vmax.f32 %v17154_v13, 0.0  ;;  %v4909_v10 = vld [vmem:[%s18940_s5 + $0xe8] sm:$0xff]  ;;  %v11729_v13 = vld [vmem:[%s18941_s6 + $0x78] sm:$0xff]   ;;  %v11735_v35 = vld [vmem:[%s18941_s6 + $0x60] sm:$0xff]   ;;  %v11108_v54 = vpop.permute.xlu1 %11107 }
 0x87e   : > { %11187 = vrot.lane.b32.xlu1 %v11186_v41, %s11982_s25  ;;  %v11206_v20 = vpack.i.bf16 %v19215_v61, %v19212_v9  ;;  %10288 = vmatprep.subr.bf16.mxu1 %v11729_v13  ;;  %v11739_v41 = vld [vmem:[%s18941_s6 + $0x50] sm:$0xff]   ;;  %v19854_v13 = vld [vmem:[#allocation64_spill] sm:$0xff] }
 0x87f   : > { %v17543_v37 = vmax.f32 %v19851_v18, %v11105_v17  ;;  %v17547_v48 = vmax.f32 %v19852_v32, %v6719_v6  ;;  %v11211_v33 = vpack.i.bf16 %v19211_v3, %v19210_v45  ;;  %10289 = vmatpush3.bf16.msra.mxu1 %v11730_v34  ;;  %v11741_v17 = vld [vmem:[%s18941_s6 + $0x48] sm:$0xff]   ;;  %v11109_v6 = vunpack.i.l.bf16 %v11108_v54 }
 0x880   : > { %10290 = vmatprep.subr.bf16.mxu1 %v11731_v40  ;;  %v11742_v32 = vld [vmem:[%s18941_s6 + $0x8] sm:$0xff]   ;;  %v5806_v34 = vadd.f32 %v19854_v13, %v17441_v53  ;;  %v19857_v45 = vmax.f32 %v17106_v39, 0.0  ;;  %v19862_v39 = vmax.f32 %v17169_v1, 0.0 }
 0x881   : > { %11197 = vrot.lane.b32.xlu0 %v11196_v30, %s11977_s27  ;;  %v11221_v5 = vpack.i.bf16 %v17543_v37, %v17547_v48  ;;  %v11740_v30 = vld [vmem:[%s18941_s6 + $0x10] sm:$0xff]  }
 0x882   : > { %11192 = vrot.lane.b32.xlu1 %v11191_v60, %s11977_s27 }
 0x883   : > { %10291 = vmatpush3.bf16.msra.mxu1 %v11732_v63 }
 0x884   : > { %10292 = vmatprep.subr.bf16.mxu1 %v11733_v57 }
 0x885   : > { %11202 = vrot.lane.b32.xlu0 %v11201_v49, %s11977_s27  ;;  %v11110_v49 = vunpack.i.h.bf16 %v11108_v54  ;;  %v11744_v54 = vld [vmem:[%s18941_s6] sm:$0xff]  }
 0x886   : > { %11207 = vrot.lane.b32.xlu1 %v11206_v20, %s11977_s27 }
 0x887   : > { %10293 = vmatpush3.bf16.msra.mxu1 %v11734_v27  ;;  %v6720_v40 = vsel %vm522_vm4, %v11109_v6, %v11110_v49  ;;  %v19855_v6 = vld [vmem:[#allocation56_spill] sm:$0xff] }
 0x888   : > { %10294 = vmatprep.subr.bf16.mxu1 %v11735_v35 }
 0x889   : > { %11212 = vrot.lane.b32.xlu0 %v11211_v33, %s11977_s27  ;;  %v19853_v33 = vld [vmem:[#allocation66_spill] sm:$0xff] }
 0x88b   : > { %10295 = vmatpush3.bf16.msra.mxu1 %v11736_v55 }
 0x88c   : > { %10296 = vmatprep.subr.bf16.mxu1 %v11737_v0 }
 0x88d   : > { %11222 = vrot.lane.b32.xlu0 %v11221_v5, %s11982_s25  ;;  %v5810_v5 = vadd.f32 %v19853_v33, %v17449_v19 }
 0x88f   : > { %10297 = vmatpush3.bf16.msra.mxu1 %v11738_v43  ;;  %v6003_v33 = vadd.f32 %v19855_v6, %v5810_v5 }
 0x890   : > { %10298 = vmatprep.subr.bf16.mxu1 %v11739_v41 }
 0x891   : > { %5059 = vperm.xlu0 %10640, %v4909_v10   ;;  %v11743_v10 = vld [vmem:[%s18941_s6 + $0x40] sm:$0xff]  }
 0x893   : > { %10299 = vmatpush3.bf16.msra.mxu1 %v11740_v30 }
 0x894   : > { %10300 = vmatprep.subr.bf16.mxu1 %v11741_v17 }
 0x897   : > { %10301 = vmatpush3.bf16.msra.mxu1 %v11742_v32  ;;  %v19856_v32 = vmax.f32 %v17127_v22, 0.0  ;;  %v19861_v22 = vmax.f32 %v17165_v50, 0.0  ;;  %v6196_v50 = vadd.f32 %v17370_v2, %v6003_v33  ;;  %v19866_v2 = vmax.f32 %v17230_v16, 0.0  ;;  %v6221_v33 = vpop.f32.mrf.mxu1 }
 0x898   : > { %10302 = vmatprep.subr.bf16.mxu1 %v11743_v10  ;;  %v19858_v10 = vmax.f32 %v17239_v58, 0.0 }
 0x899   : > { %v17646_v6 = vmax.f32 %v19861_v22, %v11110_v49 }
 0x89b   : > { %10303 = vmatpush3.bf16.msra.mxu1 %v11744_v54 }
 0x8b1   : > { %v17600_v60 = vpop.permute.xlu0 %11112 }
 0x8b2   : > { %v19222_v55 = vunpack.i.h.bf16 %v17600_v60  ;;  %v11114_v53 = vunpack.i.l.bf16 %v17600_v60 }
 0x8b5   : > { %v11118_v20 = vpop.permute.xlu0 %11117  ;;  %v17602_v18 = vpop.permute.xlu1 %11122 }
 0x8b6   : > { %v19223_v63 = vunpack.i.h.bf16 %v17602_v18  ;;  %v11124_v57 = vunpack.i.l.bf16 %v17602_v18  ;;  %v11120_v41 = vunpack.i.h.bf16 %v11118_v20  ;;  %v11119_v30 = vunpack.i.l.bf16 %v11118_v20  ;;  %v19860_v20 = vld [vmem:[#allocation59_spill] sm:$0xff] }
 0x8b8   : > { %v7065_v9 = vsel %vm4519_vm11, %v11124_v57, %v19223_v63  ;;  %v7064_v57 = vsel %vm4519_vm11, %v11114_v53, %v19222_v55  ;;  %v19864_v53 = vmax.f32 %v17221_v51, 0.0  ;;  %v19894_v55 = vld [vmem:[#allocation36_spill] sm:$0xff] }
 0x8b9   : > { %v17617_v27 = vpop.permute.xlu0 %11132  ;;  %v11128_v35 = vpop.permute.xlu1 %11127  ;;  %v7164_v49 = vmax.f32 %v17255_v21, %v7065_v9  ;;  %v17681_v21 = vadd.f32 %v17388_v15, %v6196_v50  ;;  %v4911_v15 = vld [vmem:[%s18940_s5 + $0xf8] sm:$0xff]  ;;  %v19895_v63 = vmax.f32 %v19894_v55, 0.0 }
 0x8ba   : > { %v11135_v19 = vunpack.i.h.bf16 %v17617_v27  ;;  %v11134_v0 = vunpack.i.l.bf16 %v17617_v27  ;;  %v11130_v43 = vunpack.i.h.bf16 %v11128_v35  ;;  %v11129_v17 = vunpack.i.l.bf16 %v11128_v35  ;;  %v6414_v50 = vpop.f32.mrf.mxu0 }
 0x8bb   : > { %v5999_v35 = vadd.f32 %v19860_v20, %v5806_v34  ;;  %v19863_v34 = vmax.f32 %v17251_v4, 0.0  ;;  %v17673_v54 = vmax.f32 %v19864_v53, %v11120_v41  ;;  %v19870_v53 = vld [vmem:[#allocation22_spill] sm:$0xff] }
 0x8bc   : > { %v17629_v13 = vmax.f32 %v19856_v32, %v11135_v19  ;;  %v17633_v27 = vmax.f32 %v19857_v45, %v11134_v0  ;;  %v17637_v3 = vmax.f32 %v19858_v10, %v11130_v43  ;;  %v6722_v5 = vsel %vm522_vm4, %v11129_v17, %v11130_v43  ;;  %v19867_v10 = vld [vmem:[#allocation73_spill] sm:$0xff] }
 0x8bd   : > { %v17650_v45 = vmax.f32 %v19862_v39, %v6720_v40  ;;  %v17656_v32 = vmax.f32 %v19863_v34, %v6722_v5  ;;  %v6721_v43 = vsel %vm522_vm4, %v11119_v30, %v11120_v41  ;;  %v6192_v40 = vadd.f32 %v17322_v62, %v5999_v35  ;;  %19865 = vst [vmem:[#allocation18_spill] sm:$0xff] %v17673_v54  ;;  %v11138_v9 = vpop.permute.xlu1 %11137  ;;  %v19868_v5 = vld [vmem:[#allocation79_spill] sm:$0xff]  ;;  %v6223_v39 = vpop.f32.mrf.mxu1 }
 0x8be   : > { %19859 = vst [vmem:[#allocation49_spill] sm:$0xff] %v17637_v3  ;;  %v11216_v58 = vpack.i.bf16 %v17629_v13, %v17633_v27  ;;  %v7162_v17 = vmax.f32 %v17234_v36, %v7064_v57  ;;  %v17677_v30 = vmax.f32 %v19866_v2, %v6721_v43  ;;  %v11140_v41 = vunpack.i.h.bf16 %v11138_v9  ;;  %v4908_v57 = vld [vmem:[%s18940_s5 + $0xe0] sm:$0xff] }
 0x8bf   : > { %v11236_v1 = vpack.i.bf16 %v17637_v3, %v17656_v32  ;;  %v11226_v4 = vpack.i.bf16 %v17646_v6, %v17650_v45  ;;  %v17685_v36 = vadd.f32 %v19867_v10, %v6192_v40  ;;  %v11139_v20 = vunpack.i.l.bf16 %v11138_v9 }
 0x8c0   : > { %11217 = vrot.lane.b32.xlu1 %v11216_v58, %s11982_s25  ;;  %v7224_v62 = vpack.c.bf16 %v7164_v49, %v7162_v17  ;;  %v11231_v51 = vpack.i.bf16 %v17673_v54, %v17677_v30  ;;  %v19214_v35 = vmax.f32 %v17681_v21, 0.0  ;;  %v19869_v58 = vld [vmem:[#allocation80_spill] sm:$0xff]  ;;  %v6718_v40 = vsel %vm522_vm4, %v11140_v41, %v11135_v19  ;;  %v4910_v19 = vld [vmem:[%s18940_s5 + $0xf0] sm:$0xff]  ;;  %v19897_v54 = vld [vmem:[#allocation50_spill] sm:$0xff] }
 0x8c1   : > { %11237 = vrot.lane.b32.xlu0 %v11236_v1, %s11982_s25  ;;  %v19213_v43 = vmax.f32 %v17685_v36, 0.0  ;;  %v11745_v1 = vld [vmem:[%s18941_s6 + $0x178] sm:$0xff]  }
 0x8c2   : > { %10332 = vmatprep.subr.bf16.mxu1 %v11745_v1 }
 0x8c3   : > { %v11246_v9 = vpack.i.bf16 %v19214_v35, %v19213_v43 }
 0x8c4   : > { %11227 = vrot.lane.b32.xlu1 %v11226_v4, %s11982_s25  ;;  %v6717_v4 = vsel %vm522_vm4, %v11139_v20, %v11134_v0  ;;  %v19874_v20 = vld [vmem:[#allocation95_spill] sm:$0xff] }
 0x8c5   : > { %7256 = vrot.lane.b32.xlu0 %v7224_v62, %s11987_s24  ;;  %v19871_v62 = vld [vmem:[#allocation11_spill] sm:$0xff] }
 0x8c6   : > { %v5035_v16 = vpop.permute.xlu0 %5034 }
 0x8c7   : > { %v5836_v22 = vadd.f32 %v19868_v5, %v5035_v16  ;;  %v5838_v34 = vadd.f32 %v19869_v58, %v5035_v16  ;;  %v19872_v16 = vld [vmem:[#allocation96_spill] sm:$0xff] }
 0x8c8   : > { %11232 = vrot.lane.b32.xlu1 %v11231_v51, %s11982_s25  ;;  %v17712_v51 = vpop.f32.mrf.mxu1  ;;  %v19873_v0 = vmax.f32 %v19872_v16, 0.0  ;;  %v19876_v16 = vld [vmem:[#allocation83_spill] sm:$0xff] }
 0x8c9   : > { %5069 = vperm.xlu0 %10640, %v4911_v15   ;;  %v6029_v2 = vadd.f32 %v19870_v53, %v5836_v22  ;;  %v6031_v10 = vadd.f32 %v19871_v62, %v5838_v34  ;;  %v19875_v15 = vmax.f32 %v19874_v20, 0.0  ;;  %v6416_v22 = vpop.f32.mrf.mxu0  ;;  %v19877_v20 = vld [vmem:[#allocation84_spill] sm:$0xff] }
 0x8ca   : > { %v5045_v49 = vpop.permute.xlu0 %5044  ;;  %v5040_v17 = vpop.permute.xlu1 %5039  ;;  %v17719_v41 = vmax.f32 %v19873_v0, %v6718_v40 }
 0x8cb   : > { %v17723_v5 = vmax.f32 %v19875_v15, %v6717_v4  ;;  %v6222_v34 = vadd.f32 %v6221_v33, %v6029_v2  ;;  %v6224_v62 = vadd.f32 %v6223_v39, %v6031_v10  ;;  %v17728_v43 = vpop.f32.mrf.mxu1  ;;  %v5846_v40 = vadd.f32 %v19876_v16, %v5045_v49  ;;  %v17731_v0 = vpop.f32.mrf.mxu0  ;;  %v19878_v15 = vld [vmem:[#allocation75_spill] sm:$0xff]  ;;  %v19881_v2 = vld [vmem:[#allocation81_spill] sm:$0xff]  ;;  %v19882_v10 = vld [vmem:[#allocation82_spill] sm:$0xff] }
 0x8cc   : > { %5054 = vperm.xlu1 %10639, %v4908_v57   ;;  %v5848_v4 = vadd.f32 %v19877_v20, %v5045_v49  ;;  %v19879_v35 = vmax.f32 %v19878_v15, 0.0  ;;  %v5840_v39 = vadd.f32 %v19881_v2, %v5040_v17 }
 0x8cd   : > { %11247 = vrot.lane.b32.xlu0 %v11246_v9, %s11977_s27  ;;  %v11241_v33 = vpack.i.bf16 %v17719_v41, %v17723_v5  ;;  %v17747_v49 = vadd.f32 %v6414_v50, %v6222_v34  ;;  %v6231_v15 = vpop.f32.mrf.mxu1  ;;  %v17756_v2 = vpop.f32.mrf.mxu0  ;;  %v19889_v34 = vld [vmem:[#allocation46_spill] sm:$0xff] }
 0x8ce   : > { %v11143_v58 = vpop.permute.xlu0 %11142  ;;  %v17726_v57 = vpop.permute.xlu1 %5049 }
 0x8cf   : > { %v11145_v1 = vunpack.i.h.bf16 %v11143_v58  ;;  %v11144_v53 = vunpack.i.l.bf16 %v11143_v58  ;;  %v19883_v58 = vld [vmem:[#allocation38_spill] sm:$0xff]  ;;  %19886 = vst [vmem:[#allocation10_spill] sm:$0xff] %v17747_v49 }
 0x8d0   : > { %5064 = vperm.xlu1 %10639, %v4910_v19   ;;  %v5842_v19 = vadd.f32 %v19882_v10, %v5040_v17  ;;  %v19884_v16 = vmax.f32 %v19883_v58, 0.0  ;;  %v11749_v17 = vld [vmem:[%s18941_s6 + $0xf8] sm:$0xff]   ;;  %v19890_v58 = vmax.f32 %v19889_v34, 0.0  ;;  %v11753_v34 = vld [vmem:[%s18941_s6 + $0xf0] sm:$0xff]  }
 0x8d1   : > { %v17736_v61 = vmax.f32 %v19879_v35, %v11145_v1  ;;  %v6723_v9 = vsel %vm522_vm4, %v11144_v53, %v11145_v1  ;;  %v17750_v35 = vadd.f32 %v6416_v22, %v6224_v62  ;;  %v19887_v1 = vld [vmem:[#allocation16_spill] sm:$0xff]  ;;  %10310 = vmatprep.subr.bf16.mxu0 %v11749_v17 }
 0x8d2   : > { %v11153_v29 = vpop.permute.xlu0 %11152  ;;  %v17745_v31 = vmax.f32 %v19884_v16, %v6723_v9  ;;  %v11148_v23 = vpop.permute.xlu1 %11147  ;;  %v6039_v53 = vadd.f32 %v19887_v1, %v5846_v40  ;;  %v19888_v9 = vld [vmem:[#allocation48_spill] sm:$0xff]  ;;  %v19893_v1 = vld [vmem:[#allocation25_spill] sm:$0xff] }
 0x8d3   : > { %19880 = vst [vmem:[#allocation24_spill] sm:$0xff] %v17736_v61  ;;  %v11155_v20 = vunpack.i.h.bf16 %v11153_v29  ;;  %v11154_v46 = vunpack.i.l.bf16 %v11153_v29  ;;  %v6041_v10 = vadd.f32 %v19888_v9, %v5848_v4  ;;  %v11150_v22 = vunpack.i.h.bf16 %v11148_v23  ;;  %v11750_v29 = vld [vmem:[%s18941_s6 + $0xb8] sm:$0xff]   ;;  %v19892_v40 = vld [vmem:[#allocation20_spill] sm:$0xff] }
 0x8d4   : > { %19885 = vst [vmem:[#allocation7_spill] sm:$0xff] %v17745_v31  ;;  %11242 = vrot.lane.b32.xlu1 %v11241_v33, %s11982_s25  ;;  %v11251_v50 = vpack.i.bf16 %v17736_v61, %v17745_v31  ;;  %v6033_v16 = vadd.f32 %v19892_v40, %v5840_v39  ;;  %v6035_v24 = vadd.f32 %v19893_v1, %v5842_v19  ;;  %v11149_v9 = vunpack.i.l.bf16 %v11148_v23  ;;  %v11754_v23 = vld [vmem:[%s18941_s6 + $0xb0] sm:$0xff]   ;;  %v11757_v17 = vld [vmem:[%s18941_s6 + $0xe8] sm:$0xff]   ;;  %v19900_v1 = vld [vmem:[#allocation63_spill] sm:$0xff] }
 0x8d5   : > { %v17763_v33 = vmax.f32 %v19890_v58, %v11155_v20  ;;  %v6725_v4 = vsel %vm522_vm4, %v11154_v46, %v11155_v20  ;;  %v19898_v39 = vmax.f32 %v19897_v54, 0.0  ;;  %10311 = vmatpush3.bf16.msra.mxu0 %v11750_v29  ;;  %v6233_v20 = vpop.f32.mrf.mxu1  ;;  %v19907_v54 = vld [vmem:[#allocation23_spill] sm:$0xff] }
 0x8d6   : > { %v17765_v62 = vpop.permute.xlu0 %11157  ;;  %v17773_v25 = vpop.permute.xlu1 %11162  ;;  %v17781_v3 = vmax.f32 %v19895_v63, %v6725_v4  ;;  %v6724_v55 = vsel %vm522_vm4, %v11149_v9, %v11150_v22  ;;  %10312 = vmatprep.subr.bf16.mxu0 %v11753_v34  ;;  %v19901_v4 = vmax.f32 %v19900_v1, 0.0  ;;  %v6226_v61 = vadd.f32 %v17712_v51, %v6033_v16 }
 0x8d7   : > { %19891 = vst [vmem:[#allocation34_spill] sm:$0xff] %v17763_v33  ;;  %v17785_v40 = vmax.f32 %v19898_v39, %v11150_v22  ;;  %v19228_v46 = vunpack.i.h.bf16 %v17765_v62  ;;  %v11159_v63 = vunpack.i.l.bf16 %v17765_v62  ;;  %v6232_v22 = vadd.f32 %v6231_v15, %v6039_v53  ;;  %v11758_v53 = vld [vmem:[%s18941_s6 + $0xa8] sm:$0xff]  }
 0x8d8   : > { %19896 = vst [vmem:[#allocation31_spill] sm:$0xff] %v17781_v3  ;;  %11252 = vrot.lane.b32.xlu1 %v11251_v50, %s11982_s25  ;;  %v6424_v50 = vpop.f32.mrf.mxu0  ;;  %v11261_v29 = vpack.i.bf16 %v17763_v33, %v17781_v3  ;;  %v17803_v39 = vmax.f32 %v19901_v4, %v6724_v55  ;;  %v11164_v34 = vunpack.i.l.bf16 %v17773_v25  ;;  %v6234_v33 = vadd.f32 %v6233_v20, %v6041_v10 }
 0x8d9   : > { %19899 = vst [vmem:[#allocation33_spill] sm:$0xff] %v17785_v40  ;;  %v7066_v9 = vsel %vm4519_vm11, %v11159_v63, %v19228_v46  ;;  %10313 = vmatpush3.bf16.msra.mxu0 %v11754_v23  ;;  %v19903_v15 = vmax.f32 %v17747_v49, 0.0  ;;  %v19904_v63 = vmax.f32 %v17750_v35, 0.0  ;;  %v6228_v51 = vadd.f32 %v17728_v43, %v6035_v24  ;;  %v19906_v23 = vld [vmem:[#allocation43_spill] sm:$0xff] }
 0x8da   : > { %19902 = vst [vmem:[#allocation51_spill] sm:$0xff] %v17803_v39  ;;  %v17805_v19 = vpop.permute.xlu0 %11167  ;;  %v17812_v58 = vpop.permute.xlu1 %11172  ;;  %v11256_v55 = vpack.i.bf16 %v17785_v40, %v17803_v39  ;;  %v19905_v10 = vunpack.i.h.bf16 %v17773_v25  ;;  %10314 = vmatprep.subr.bf16.mxu0 %v11757_v17  ;;  %v7166_v46 = vmax.f32 %v19906_v23, %v7066_v9  ;;  %v11761_v24 = vld [vmem:[%s18941_s6 + $0xe0] sm:$0xff]   ;;  %v17841_v43 = vadd.f32 %v6424_v50, %v6232_v22  ;;  %v19909_v17 = vld [vmem:[#allocation85_spill] sm:$0xff] }
 0x8db   : > { %v11169_v1 = vunpack.i.l.bf16 %v17805_v19  ;;  %v11271_v4 = vpack.i.bf16 %v19904_v63, %v19903_v15  ;;  %v19232_v20 = vunpack.i.h.bf16 %v17812_v58  ;;  %v19908_v3 = vunpack.i.h.bf16 %v17805_v19  ;;  %v11762_v50 = vld [vmem:[%s18941_s6 + $0xa0] sm:$0xff]  }
 0x8dc   : > { %11262 = vrot.lane.b32.xlu1 %v11261_v29, %s11982_s25  ;;  %v7067_v16 = vsel %vm4519_vm11, %v11164_v34, %v19905_v10  ;;  %v6426_v29 = vpop.f32.mrf.mxu0  ;;  %v11174_v15 = vunpack.i.l.bf16 %v17812_v58  ;;  %11257 = vrot.lane.b32.xlu0 %v11256_v55, %s11982_s25  ;;  %v5850_v34 = vadd.f32 %v19909_v17, %v17726_v57  ;;  %v17855_v22 = vadd.f32 %v17731_v0, %v6226_v61  ;;  %v19912_v17 = vld [vmem:[#allocation47_spill] sm:$0xff] }
 0x8dd   : > { %v7168_v40 = vmax.f32 %v19907_v54, %v7067_v16  ;;  %v7068_v39 = vsel %vm4519_vm11, %v11169_v1, %v19908_v3  ;;  %v19910_v54 = vld [vmem:[#allocation86_spill] sm:$0xff]  ;;  %10315 = vmatpush3.bf16.msra.mxu0 %v11758_v53  ;;  %v17858_v55 = vadd.f32 %v17756_v2, %v6228_v51  ;;  %v19911_v16 = vld [vmem:[#allocation21_spill] sm:$0xff]  ;;  %v19915_v61 = vld [vmem:[#allocation55_spill] sm:$0xff] }
 0x8de   : > { %v11178_v9 = vpop.permute.xlu1 %11177  ;;  %v5852_v63 = vadd.f32 %v19910_v54, %v17726_v57  ;;  %v7069_v3 = vsel %vm4519_vm11, %v11174_v15, %v19232_v20  ;;  %v17860_v57 = vadd.f32 %v6426_v29, %v6234_v33  ;;  %v7170_v23 = vmax.f32 %v19911_v16, %v7068_v39  ;;  %10316 = vmatprep.subr.bf16.mxu0 %v11761_v24  ;;  %v6235_v15 = vpop.f32.mrf.mxu1  ;;  %v19917_v2 = vld [vmem:[#allocation37_spill] sm:$0xff]  ;;  %v11765_v39 = vld [vmem:[%s18941_s6 + $0xd8] sm:$0xff]  }
 0x8df   : > { %v11180_v1 = vunpack.i.h.bf16 %v11178_v9  ;;  %v11179_v10 = vunpack.i.l.bf16 %v11178_v9  ;;  %v7172_v9 = vmax.f32 %v19912_v17, %v7069_v3  ;;  %v7226_v31 = vpack.c.bf16 %v7168_v40, %v7166_v46  ;;  %v11766_v51 = vld [vmem:[%s18941_s6 + $0x98] sm:$0xff]  }
 0x8e0   : > { %11272 = vrot.lane.b32.xlu1 %v11271_v4, %s11977_s27  ;;  %v19913_v4 = vld [vmem:[#allocation53_spill] sm:$0xff]  ;;  %v19916_v0 = vmax.f32 %v19915_v61, 0.0  ;;  %v6043_v33 = vadd.f32 %v19917_v2, %v5850_v34  ;;  %v19240_v40 = vmax.f32 %v17855_v22, 0.0  ;;  %v19242_v46 = vmax.f32 %v17858_v55, 0.0  ;;  %v11773_v2 = vld [vmem:[%s18941_s6 + $0xc8] sm:$0xff]  }
 0x8e1   : > { %v19914_v53 = vmax.f32 %v19913_v4, 0.0  ;;  %v6726_v20 = vsel %vm522_vm4, %v11179_v10, %v11180_v1  ;;  %10317 = vmatpush3.bf16.msra.mxu0 %v11762_v50  ;;  %v19237_v34 = vmax.f32 %v17841_v43, 0.0  ;;  %v19239_v3 = vmax.f32 %v17860_v57, 0.0  ;;  %v6428_v10 = vpop.f32.mrf.mxu0  ;;  %v19922_v61 = vld [vmem:[#allocation77_spill] sm:$0xff] }
 0x8e2   : > { %v17871_v49 = vmax.f32 %v19916_v0, %v6726_v20  ;;  %v19918_v20 = vld [vmem:[#allocation28_spill] sm:$0xff]  ;;  %v7228_v50 = vpack.c.bf16 %v7172_v9, %v7170_v23  ;;  %10318 = vmatprep.subr.bf16.mxu0 %v11765_v39  ;;  %v6236_v16 = vadd.f32 %v6235_v15, %v6043_v33  ;;  %v11276_v17 = vpack.i.bf16 %v19242_v46, %v19240_v40  ;;  %v19920_v9 = vld [vmem:[#allocation42_spill] sm:$0xff]  ;;  %v19924_v39 = vld [vmem:[#allocation35_spill] sm:$0xff] }
 0x8e3   : > { %v17866_v54 = vmax.f32 %v19914_v53, %v11180_v1  ;;  %v6045_v29 = vadd.f32 %v19918_v20, %v5852_v63  ;;  %v6237_v1 = vpop.f32.mrf.mxu1  ;;  %v11770_v63 = vld [vmem:[%s18941_s6 + $0x90] sm:$0xff]   ;;  %v19919_v23 = vunpack.i.h.bf16 %v17765_v62  ;;  %v19921_v15 = vunpack.i.h.bf16 %v17773_v25  ;;  %v6430_v20 = vpop.f32.mrf.mxu0 }
 0x8e4   : > { %7265 = vrot.lane.b32.xlu1 %v7226_v31, %s11988_s20  ;;  %v11769_v31 = vld [vmem:[%s18941_s6 + $0xd0] sm:$0xff]   ;;  %v19923_v33 = vunpack.i.h.bf16 %v17602_v18  ;;  %v11281_v62 = vpack.i.bf16 %v19239_v3, %v19237_v34  ;;  %v19925_v25 = vunpack.i.h.bf16 %v17600_v60  ;;  %v11774_v18 = vld [vmem:[%s18941_s6 + $0x88] sm:$0xff]   ;;  %v19929_v60 = vunpack.i.h.bf16 %v17812_v58 }
 0x8e5   : > { %v11266_v24 = vpack.i.bf16 %v17866_v54, %v17871_v49  ;;  %10319 = vmatpush3.bf16.msra.mxu0 %v11766_v51  ;;  %v6238_v4 = vadd.f32 %v6237_v1, %v6045_v29  ;;  %v7167_v53 = vmax.f32 %v19920_v9, %v19919_v23  ;;  %v7169_v0 = vmax.f32 %v19922_v61, %v19921_v15  ;;  %v19926_v29 = vld [vmem:[#allocation39_spill] sm:$0xff]  ;;  %v19928_v9 = vld [vmem:[#allocation44_spill] sm:$0xff]  ;;  %v19930_v15 = vld [vmem:[#allocation9_spill] sm:$0xff] }
 0x8e6   : > { %10320 = vmatprep.subr.bf16.mxu0 %v11769_v31  ;;  %v7165_v51 = vmax.f32 %v19924_v39, %v19923_v33  ;;  %v17920_v31 = vadd.f32 %v6428_v10, %v6236_v16  ;;  %v19927_v23 = vunpack.i.h.bf16 %v17805_v19  ;;  %v7173_v61 = vmax.f32 %v19930_v15, %v19929_v60  ;;  %v11775_v16 = vld [vmem:[%s18941_s6 + $0xc0] sm:$0xff]  }
 0x8e7   : > { %11267 = vrot.lane.b32.xlu0 %v11266_v24, %s11982_s25  ;;  %v7163_v24 = vmax.f32 %v19926_v29, %v19925_v25  ;;  %v17926_v1 = vadd.f32 %v6430_v20, %v6238_v4  ;;  %v11776_v19 = vld [vmem:[%s18941_s6 + $0x80] sm:$0xff]   ;;  %v19931_v20 = vmax.f32 %v17463_v38, 0.0  ;;  %v19934_v38 = vmax.f32 %v17465_v11, 0.0 }
 0x8e8   : > { %7273 = vrot.lane.b32.xlu1 %v7228_v50, %s11989_s10  ;;  %v7227_v50 = vpack.c.bf16 %v7169_v0, %v7167_v53  ;;  %v19936_v11 = vmax.f32 %v17470_v12, 0.0  ;;  %v11787_v12 = vld [vmem:[%s18941_s6 + $0x1f8] sm:$0xff]  }
 0x8e9   : > { %10321 = vmatpush3.bf16.msra.mxu0 %v11770_v63  ;;  %v7225_v10 = vpack.c.bf16 %v7165_v51, %v7163_v24  ;;  %v19235_v63 = vmax.f32 %v17920_v31, 0.0  ;;  %v19236_v58 = vmax.f32 %v17926_v1, 0.0 }
 0x8ea   : > { %10322 = vmatprep.subr.bf16.mxu0 %v11773_v2 }
 0x8eb   : > { %11277 = vrot.lane.b32.xlu0 %v11276_v17, %s11977_s27  ;;  %v7171_v17 = vmax.f32 %v19928_v9, %v19927_v23  ;;  %v11286_v2 = vpack.i.bf16 %v19236_v58, %v19235_v63  ;;  %v19932_v23 = vmax.f32 %v17461_v44, 0.0  ;;  %v19935_v44 = vmax.f32 %v17484_v52, 0.0 }
 0x8ec   : > { %11282 = vrot.lane.b32.xlu1 %v11281_v62, %s11977_s27  ;;  %v19938_v52 = vmax.f32 %v17501_v7, 0.0 }
 0x8ed   : > { %10323 = vmatpush3.bf16.msra.mxu0 %v11774_v18  ;;  %v7229_v4 = vpack.c.bf16 %v7173_v61, %v7171_v17  ;;  %v19933_v17 = vmax.f32 %v17467_v59, 0.0 }
 0x8ee   : > { %10324 = vmatprep.subr.bf16.mxu0 %v11775_v16 }
 0x8ef   : > { %7267 = vrot.lane.b32.xlu0 %v7227_v50, %s11988_s20  ;;  %v11183_v53 = vpop.permute.xlu0 %11182  ;;  %s11992_s20 = smov 78  }
 0x8f0   : > { %7258 = vrot.lane.b32.xlu1 %v7225_v10, %s11987_s24  ;;  %v11188_v0 = vpop.permute.xlu1 %11187  ;;  %s11995_s24 = smov 2  }
 0x8f1   : > { %10325 = vmatpush3.bf16.msra.mxu0 %v11776_v19 }
 0x8f2   : > { %10354 = vmatprep.subr.bf16.mxu0 %v11787_v12 }
 0x8f3   : > { %7275 = vrot.lane.b32.xlu0 %v7229_v4, %s11989_s10  ;;  %v11198_v33 = vpop.permute.xlu0 %11197 }
 0x8f4   : > { %v11200_v39 = vunpack.i.h.bf16 %v11198_v33  ;;  %v11199_v51 = vunpack.i.l.bf16 %v11198_v33  ;;  %v11193_v62 = vpop.permute.xlu1 %11192 }
 0x8f5   : > { %v11195_v29 = vunpack.i.h.bf16 %v11193_v62  ;;  %v11194_v24 = vunpack.i.l.bf16 %v11193_v62 }
 0x8f6   : > { %v17952_v25 = vmax.f32 %v19931_v20, %v11200_v39  ;;  %v6730_v18 = vsel %vm522_vm4, %v11199_v51, %v11200_v39  ;;  %v19937_v20 = vmax.f32 %v17503_v56, 0.0 }
 0x8f7   : > { %11287 = vrot.lane.b32.xlu0 %v11286_v2, %s11977_s27  ;;  %v11203_v50 = vpop.permute.xlu0 %11202  ;;  %v17957_v9 = vmax.f32 %v19932_v23, %v6730_v18  ;;  %v17961_v60 = vmax.f32 %v19933_v17, %v11195_v29  ;;  %v6729_v15 = vsel %vm522_vm4, %v11194_v24, %v11195_v29  ;;  %v11185_v17 = vunpack.i.h.bf16 %v11183_v53 }
 0x8f8   : > { %v11205_v61 = vunpack.i.h.bf16 %v11203_v50  ;;  %v17966_v10 = vmax.f32 %v19934_v38, %v6729_v15  ;;  %v11204_v16 = vunpack.i.l.bf16 %v11203_v50  ;;  %v11208_v19 = vpop.permute.xlu1 %11207  ;;  %v11184_v15 = vunpack.i.l.bf16 %v11183_v53 }
 0x8f9   : > { %v11296_v4 = vpack.i.bf16 %v17952_v25, %v17957_v9  ;;  %v11210_v33 = vunpack.i.h.bf16 %v11208_v19  ;;  %v11209_v59 = vunpack.i.l.bf16 %v11208_v19  ;;  %v11189_v38 = vunpack.i.l.bf16 %v11188_v0 }
 0x8fa   : > { %v17972_v2 = vmax.f32 %v19935_v44, %v11205_v61  ;;  %v11291_v39 = vpack.i.bf16 %v17961_v60, %v17966_v10  ;;  %v6731_v51 = vsel %vm522_vm4, %v11204_v16, %v11205_v61  ;;  %v11190_v61 = vunpack.i.h.bf16 %v11188_v0  ;;  %v18003_v16 = vpop.f32.mrf.mxu1 }
 0x8fb   : > { %v17979_v62 = vmax.f32 %v19936_v11, %v6731_v51  ;;  %v17983_v29 = vmax.f32 %v19937_v20, %v11210_v33  ;;  %v6732_v24 = vsel %vm522_vm4, %v11209_v59, %v11210_v33  ;;  %11297 = vrot.lane.b32.xlu1 %v11296_v4, %s11982_s25  ;;  %v18001_v7 = vpop.permute.xlu0 %11212  ;;  %v7062_v44 = vsel %vm4519_vm11, %v11189_v38, %v11184_v15 }
 0x8fc   : > { %v17989_v18 = vmax.f32 %v19938_v52, %v6732_v24  ;;  %11292 = vrot.lane.b32.xlu0 %v11291_v39, %s11982_s25  ;;  %v7063_v4 = vsel %vm4519_vm11, %v11190_v61, %v11185_v17  ;;  %v7161_v51 = vmax.f32 %v17480_v26, %v11185_v17  ;;  %v7159_v11 = vmax.f32 %v17476_v8, %v11184_v15  ;;  %v18011_v20 = vpop.f32.mrf.mxu1  ;;  %v18015_v24 = vpop.f32.mrf.mxu0 }
 0x8fd   : > { %v11301_v50 = vpack.i.bf16 %v17972_v2, %v17979_v62  ;;  %v7160_v53 = vmax.f32 %v17496_v28, %v7063_v4  ;;  %v7158_v0 = vmax.f32 %v17489_v42, %v7062_v44  ;;  %v11746_v44 = vld [vmem:[%s18941_s6 + $0x138] sm:$0xff]  }
 0x8fe   : > { %v11306_v56 = vpack.i.bf16 %v17983_v29, %v17989_v18  ;;  %v7223_v17 = vpack.c.bf16 %v7161_v51, %v7159_v11  ;;  %v18024_v28 = vpop.f32.mrf.mxu1  ;;  %v18026_v61 = vpop.f32.mrf.mxu0  ;;  %v11747_v11 = vld [vmem:[%s18941_s6 + $0x170] sm:$0xff]  }
 0x8ff   : > { %11302 = vrot.lane.b32.xlu1 %v11301_v50, %s11982_s25  ;;  %v11223_v23 = vpop.permute.xlu0 %11222  ;;  %v7222_v15 = vpack.c.bf16 %v7160_v53, %v7158_v0 }
 0x900   : > { %11307 = vrot.lane.b32.xlu0 %v11306_v56, %s11982_s25  ;;  %v11225_v33 = vunpack.i.h.bf16 %v11223_v23  ;;  %v11224_v59 = vunpack.i.l.bf16 %v11223_v23  ;;  %v6438_v34 = vpop.f32.mrf.mxu0 }
 0x902   : > { %v7072_v50 = vsel %vm4519_vm11, %v11224_v59, %v11225_v33  ;;  %v7179_v59 = vmax.f32 %v17543_v37, %v11225_v33  ;;  %v6247_v33 = vpop.f32.mrf.mxu1 }
 0x903   : > { %v7178_v63 = vmax.f32 %v17547_v48, %v7072_v50 }
 0x90c   : > { %v5060_v19 = vpop.permute.xlu0 %5059 }
 0x932   : > { %v18007_v39 = vpop.permute.xlu1 %11217 }
 0x933   : > { %v18017_v52 = vpop.permute.xlu0 %11237  ;;  %v19244_v12 = vunpack.i.h.bf16 %v18007_v39  ;;  %v19243_v56 = vunpack.i.l.bf16 %v18007_v39 }
 0x934   : > { %v19238_v26 = vunpack.i.h.bf16 %v18017_v52  ;;  %v11239_v8 = vunpack.i.l.bf16 %v18017_v52 }
 0x935   : > { %v7177_v53 = vmax.f32 %v17629_v13, %v19244_v12  ;;  %v7175_v0 = vmax.f32 %v17633_v27, %v19243_v56  ;;  %v11748_v27 = vld [vmem:[%s18941_s6 + $0x130] sm:$0xff]  }
 0x936   : > { %v11228_v23 = vpop.permute.xlu1 %11227  ;;  %v7075_v37 = vsel %vm4519_vm11, %v11239_v8, %v19238_v26  ;;  %v11215_v8 = vunpack.i.h.bf16 %v18001_v7  ;;  %v19940_v26 = vld [vmem:[#allocation90_spill] sm:$0xff]  ;;  %v19950_v56 = vld [vmem:[#allocation45_spill] sm:$0xff] }
 0x937   : > { %v11230_v42 = vunpack.i.h.bf16 %v11228_v23  ;;  %v11229_v38 = vunpack.i.l.bf16 %v11228_v23  ;;  %v18028_v4 = vpop.permute.xlu0 %7256  ;;  %v5862_v3 = vadd.f32 %v19940_v26, %v5060_v19  ;;  %v7231_v40 = vpack.c.bf16 %v7177_v53, %v7175_v0  ;;  %v11755_v53 = vld [vmem:[%s18941_s6 + $0x160] sm:$0xff]  }
 0x938   : > { %v7386_v51 = vsel %vm7260_vm0, %v7223_v17, %v18028_v4 }
 0x939   : > { %v7181_v58 = vmax.f32 %v17646_v6, %v11230_v42  ;;  %v7073_v48 = vsel %vm4519_vm11, %v11229_v38, %v11230_v42  ;;  %9141 = vmatprep.mubr.bf16.mxu1 %v7386_v51  ;;  %v19245_v42 = vunpack.i.l.bf16 %v18001_v7  ;;  %v18064_v38 = vpop.f32.mrf.mxu1  ;;  %v19939_v51 = vld [vmem:[#allocation89_spill] sm:$0xff] }
 0x93a   : > { %v18051_v6 = vpop.permute.xlu1 %11232  ;;  %v7180_v23 = vmax.f32 %v17650_v45, %v7073_v48  ;;  %9142 = vmatmul.mubr.bf16.vlgmr.msra.gmra.mxu1 %v7222_v15  ;;  %v11751_v15 = vld [vmem:[%s18941_s6 + $0x168] sm:$0xff]   ;;  %v5860_v48 = vadd.f32 %v19939_v51, %v5060_v19 }
 0x93b   : > { %v7233_v50 = vpack.c.bf16 %v7181_v58, %v7179_v59  ;;  %v19241_v17 = vunpack.i.h.bf16 %v18051_v6  ;;  %v11234_v13 = vunpack.i.l.bf16 %v18051_v6  ;;  %10333 = vmatpush3.bf16.msra.mxu1 %v11746_v44  ;;  %v7184_v44 = vmax.f32 %v17656_v32, %v7075_v37  ;;  %v18089_v26 = vpop.f32.mrf.mxu1 }
 0x93c   : > { %v7232_v45 = vpack.c.bf16 %v7180_v23, %v7178_v63  ;;  %10334 = vmatprep.subr.bf16.mxu1 %v11747_v11  ;;  %v11752_v63 = vld [vmem:[%s18941_s6 + $0x128] sm:$0xff]   ;;  %v19941_v11 = vmax.f32 %v17515_v47, 0.0  ;;  %v19943_v47 = vld [vmem:[#allocation19_spill] sm:$0xff] }
 0x93d   : > { %v7074_v58 = vsel %vm4519_vm11, %v11234_v13, %v19241_v17  ;;  %7293 = vrot.lane.b32.xlu1 %v7233_v50, %s11990_s17  ;;  %v6440_v13 = vpop.f32.mrf.mxu0  ;;  %v6053_v37 = vadd.f32 %v19943_v47, %v5860_v48  ;;  %v19944_v23 = vld [vmem:[#allocation8_spill] sm:$0xff] }
 0x93e   : > { %v7182_v59 = vmax.f32 %v17677_v30, %v7074_v58  ;;  %7291 = vrot.lane.b32.xlu0 %v7232_v45, %s11990_s17  ;;  %v18080_v32 = vmax.f32 %v19941_v11, %v11215_v8  ;;  %v19942_v30 = vmax.f32 %v17523_v14, 0.0  ;;  %v11756_v14 = vld [vmem:[%s18941_s6 + $0x120] sm:$0xff]   ;;  %v6255_v45 = vpop.f32.mrf.mxu1  ;;  %v19949_v17 = vld [vmem:[#allocation88_spill] sm:$0xff]  ;;  %s9715_s17 = sshll.u32 %s9707_s30, 1 }
 0x93f   : > { %10335 = vmatpush3.bf16.msra.mxu1 %v11748_v27  ;;  %v18094_v0 = vpop.f32.mrf.mxu0  ;;  %v6055_v27 = vadd.f32 %v19944_v23, %v5862_v3  ;;  %v19948_v23 = vld [vmem:[#allocation87_spill] sm:$0xff]  ;;  %p370_p8 = scmp.lt.s32.totalorder %s9715_s17, 3 }
 0x940   : > { %v7234_v50 = vpack.c.bf16 %v7184_v44, %v7182_v59  ;;  %v18086_v19 = vmax.f32 %v19942_v30, %v19245_v42  ;;  %10336 = vmatprep.subr.bf16.mxu1 %v11751_v15  ;;  %v11759_v15 = vld [vmem:[%s18941_s6 + $0x158] sm:$0xff]   ;;  %v19945_v44 = vld [vmem:[#allocation93_spill] sm:$0xff]  ;;  %v19947_v30 = vld [vmem:[#allocation40_spill] sm:$0xff] }
 0x941   : > { %7284 = vrot.lane.b32.xlu1 %v7231_v40, %s11991_s23  ;;  %v19946_v59 = vld [vmem:[#allocation94_spill] sm:$0xff]  ;;  %v18109_v48 = vpop.f32.mrf.mxu0  ;;  %v11764_v42 = vld [vmem:[%s18941_s6 + $0x110] sm:$0xff]   ;;  %s19988_s17 = smov (!%p370_p8, %s9715_s17), 3 }
 0x942   : > { %7299 = vrot.lane.b32.xlu0 %v7234_v50, %s11992_s20  ;;  %v11311_v40 = vpack.i.bf16 %v18080_v32, %v18086_v19  ;;  %v6246_v50 = vadd.f32 %v18024_v28, %v6053_v37  ;;  %v11763_v28 = vld [vmem:[%s18941_s6 + $0x150] sm:$0xff]   ;;  %s9716_s29 = sshll.u32 %s19988_s17, 3 }
 0x943   : > { %10337 = vmatpush3.bf16.msra.mxu1 %v11752_v63  ;;  %v6248_v63 = vadd.f32 %v6247_v33, %v6055_v27  ;;  %v19951_v33 = vld [vmem:[#allocation29_spill] sm:$0xff]  ;;  %v19952_v27 = vld [vmem:[#allocation30_spill] sm:$0xff] }
 0x944   : > { %v5070_v58 = vpop.permute.xlu0 %5069  ;;  %10338 = vmatprep.subr.bf16.mxu1 %v11755_v53 }
 0x945   : > { %v5870_v3 = vadd.f32 %v19945_v44, %v5070_v58  ;;  %v5872_v51 = vadd.f32 %v19946_v59, %v5070_v58  ;;  %v11760_v58 = vld [vmem:[%s18941_s6 + $0x118] sm:$0xff]   ;;  %v6257_v44 = vpop.f32.mrf.mxu1 }
 0x946   : > { %11312 = vrot.lane.b32.xlu0 %v11311_v40, %s11982_s25 }
 0x947   : > { %v5055_v11 = vpop.permute.xlu1 %5054  ;;  %v6063_v47 = vadd.f32 %v19947_v30, %v5870_v3  ;;  %v6065_v12 = vadd.f32 %v19950_v56, %v5872_v51  ;;  %10339 = vmatpush3.bf16.msra.mxu1 %v11756_v14  ;;  %v6448_v3 = vpop.f32.mrf.mxu0 }
 0x948   : > { %v5856_v53 = vadd.f32 %v19948_v23, %v5055_v11  ;;  %v5858_v46 = vadd.f32 %v19949_v17, %v5055_v11  ;;  %v11248_v59 = vpop.permute.xlu0 %11247  ;;  %10340 = vmatprep.subr.bf16.mxu1 %v11759_v15  ;;  %v18125_v17 = vadd.f32 %v6438_v34, %v6246_v50  ;;  %v18127_v11 = vadd.f32 %v6440_v13, %v6248_v63  ;;  %v19955_v63 = vld [vmem:[#allocation92_spill] sm:$0xff] }
 0x949   : > { %v11250_v56 = vunpack.i.h.bf16 %v11248_v59  ;;  %v11249_v14 = vunpack.i.l.bf16 %v11248_v59  ;;  %v6256_v30 = vadd.f32 %v6255_v45, %v6063_v47  ;;  %v6258_v15 = vadd.f32 %v6257_v44, %v6065_v12 }
 0x94a   : > { %v6049_v37 = vadd.f32 %v19951_v33, %v5856_v53  ;;  %v6051_v40 = vadd.f32 %v19952_v27, %v5858_v46  ;;  %v19953_v34 = vunpack.i.l.bf16 %v18001_v7  ;;  %v19954_v53 = vld [vmem:[#allocation91_spill] sm:$0xff]  ;;  %v19956_v47 = vmax.f32 %v17681_v21, 0.0  ;;  %v19958_v33 = vld [vmem:[#allocation62_spill] sm:$0xff] }
 0x94b   : > { %v5065_v51 = vpop.permute.xlu1 %5064  ;;  %10341 = vmatpush3.bf16.msra.mxu1 %v11760_v58  ;;  %v6728_v46 = vsel %vm522_vm4, %v11250_v56, %v11215_v8  ;;  %v6450_v8 = vpop.f32.mrf.mxu0  ;;  %v6511_v7 = vmax.f32 %v18125_v17, 0.0  ;;  %v19957_v44 = vmax.f32 %v17685_v36, 0.0  ;;  %v11833_v17 = vld [vmem:[%s18941_s6 + $0x340] sm:$0xff]  }
 0x94c   : > { %v6242_v23 = vadd.f32 %v18003_v16, %v6049_v37  ;;  %v6727_v50 = vsel %vm522_vm4, %v11249_v14, %v19953_v34  ;;  %v5866_v13 = vadd.f32 %v19954_v53, %v5065_v51  ;;  %v5868_v45 = vadd.f32 %v19955_v63, %v5065_v51  ;;  %10342 = vmatprep.subr.bf16.mxu1 %v11763_v28  ;;  %v11767_v16 = vld [vmem:[%s18941_s6 + $0x148] sm:$0xff]  }
 0x94d   : > { %v6244_v12 = vadd.f32 %v18011_v20, %v6051_v40  ;;  %v18147_v58 = vmax.f32 %v19956_v47, %v6728_v46  ;;  %v18152_v59 = vmax.f32 %v19957_v44, %v6727_v50  ;;  %v19959_v28 = vld [vmem:[#allocation32_spill] sm:$0xff]  ;;  %v6512_v14 = vmax.f32 %v18127_v11, 0.0  ;;  %v11820_v11 = vld [vmem:[%s18941_s6 + $0x2b0] sm:$0xff]  }
 0x94e   : > { %v6059_v37 = vadd.f32 %v19958_v33, %v5866_v13  ;;  %v6061_v27 = vadd.f32 %v19959_v28, %v5868_v45  ;;  %v18157_v51 = vadd.f32 %v6448_v3, %v6256_v30  ;;  %v11768_v40 = vld [vmem:[%s18941_s6 + $0x108] sm:$0xff]   ;;  %v18163_v36 = vadd.f32 %v18015_v24, %v6242_v23  ;;  %v11771_v3 = vld [vmem:[%s18941_s6 + $0x140] sm:$0xff]  }
 0x94f   : > { %v11243_v56 = vpop.permute.xlu1 %11242  ;;  %10343 = vmatpush3.bf16.msra.mxu1 %v11764_v42  ;;  %v18165_v46 = vadd.f32 %v6450_v8, %v6258_v15  ;;  %v18173_v42 = vadd.f32 %v18026_v61, %v6244_v12  ;;  %v19960_v30 = vunpack.i.h.bf16 %v18007_v39  ;;  %v19961_v24 = vunpack.i.l.bf16 %v18007_v39 }
 0x950   : > { %v11245_v20 = vunpack.i.h.bf16 %v11243_v56  ;;  %v11244_v21 = vunpack.i.l.bf16 %v11243_v56  ;;  %v6252_v34 = vadd.f32 %v18064_v38, %v6059_v37  ;;  %v6254_v50 = vadd.f32 %v18089_v26, %v6061_v27  ;;  %10344 = vmatprep.subr.bf16.mxu1 %v11767_v16 }
 0x951   : > { %v11316_v38 = vpack.i.bf16 %v18147_v58, %v18152_v59  ;;  %v11326_v61 = vpack.i.bf16 %v6512_v14, %v6511_v7  ;;  %v19246_v39 = vmax.f32 %v18157_v51, 0.0  ;;  %v6509_v16 = vmax.f32 %v18163_v36, 0.0  ;;  %v11841_v36 = vld [vmem:[%s18941_s6 + $0x478] sm:$0xff]  }
 0x952   : > { %v7071_v53 = vsel %vm4519_vm11, %v11245_v20, %v19960_v30  ;;  %v7070_v23 = vsel %vm4519_vm11, %v11244_v21, %v19961_v24  ;;  %v18194_v63 = vadd.f32 %v18094_v0, %v6252_v34  ;;  %v18197_v45 = vadd.f32 %v18109_v48, %v6254_v50  ;;  %v11777_v0 = vld [vmem:[%s18941_s6 + $0x278] sm:$0xff]  }
 0x953   : > { %v7176_v26 = vmax.f32 %v17719_v41, %v7071_v53  ;;  %v18184_v15 = vpop.permute.xlu1 %11252  ;;  %v7174_v13 = vmax.f32 %v17723_v5, %v7070_v23  ;;  %11317 = vrot.lane.b32.xlu0 %v11316_v38, %s11982_s25  ;;  %10345 = vmatpush3.bf16.msra.mxu1 %v11768_v40  ;;  %v11258_v41 = vpop.permute.xlu0 %11257  ;;  %v11772_v5 = vld [vmem:[%s18941_s6 + $0x100] sm:$0xff]   ;;  %v6510_v12 = vmax.f32 %v18173_v42, 0.0  ;;  %v19247_v47 = vmax.f32 %v18165_v46, 0.0  ;;  %v11824_v42 = vld [vmem:[%s18941_s6 + $0x2a8] sm:$0xff]  }
 0x954   : > { %10346 = vmatprep.subr.bf16.mxu1 %v11771_v3  ;;  %v6513_v48 = vmax.f32 %v18194_v63, 0.0  ;;  %v6514_v33 = vmax.f32 %v18197_v45, 0.0  ;;  %v11255_v56 = vunpack.i.h.bf16 %v18184_v15  ;;  %v11254_v20 = vunpack.i.l.bf16 %v18184_v15 }
 0x955   : > { %v7230_v8 = vpack.c.bf16 %v7176_v26, %v7174_v13  ;;  %v11336_v28 = vpack.i.bf16 %v19247_v47, %v19246_v39  ;;  %v11321_v27 = vpack.i.bf16 %v6510_v12, %v6509_v16  ;;  %v11260_v40 = vunpack.i.h.bf16 %v11258_v41 }
 0x956   : > { %v11259_v34 = vunpack.i.l.bf16 %v11258_v41  ;;  %v11331_v38 = vpack.i.bf16 %v6514_v33, %v6513_v48  ;;  %v19962_v15 = vmax.f32 %v17750_v35, 0.0  ;;  %v19981_v63 = vmax.f32 %v18165_v46, 0.0  ;;  %v11832_v46 = vld [vmem:[%s18941_s6 + $0x298] sm:$0xff]  }
 0x957   : > { %v11263_v44 = vpop.permute.xlu1 %11262  ;;  %11327 = vrot.lane.b32.xlu0 %v11326_v61, %s11977_s27  ;;  %7282 = vrot.lane.b32.xlu1 %v7230_v8, %s11991_s23  ;;  %v19963_v8 = vld [vmem:[#allocation10_spill] sm:$0xff] }
 0x958   : > { %10347 = vmatpush3.bf16.msra.mxu1 %v11772_v5  ;;  %v11265_v30 = vunpack.i.h.bf16 %v11263_v44  ;;  %v11264_v53 = vunpack.i.l.bf16 %v11263_v44  ;;  %v7076_v5 = vsel %vm4519_vm11, %v11254_v20, %v11255_v56  ;;  %v7077_v35 = vsel %vm4519_vm11, %v11259_v34, %v11260_v40  ;;  %v19968_v34 = vld [vmem:[#allocation51_spill] sm:$0xff] }
 0x959   : > { %v11268_v37 = vpop.permute.xlu0 %11267  ;;  %10376 = vmatprep.subr.bf16.mxu1 %v11777_v0  ;;  %v19964_v0 = vmax.f32 %v19963_v8, 0.0 }
 0x95a   : > { %v11270_v24 = vunpack.i.h.bf16 %v11268_v37  ;;  %v11269_v26 = vunpack.i.l.bf16 %v11268_v37 }
 0x95b   : > { %v11273_v21 = vpop.permute.xlu1 %11272  ;;  %11337 = vrot.lane.b32.xlu0 %v11336_v28, %s11977_s27  ;;  %11322 = vrot.lane.b32.xlu1 %v11321_v27, %s11977_s27 }
 0x95c   : > { %v11275_v50 = vunpack.i.h.bf16 %v11273_v21  ;;  %v11274_v3 = vunpack.i.l.bf16 %v11273_v21  ;;  %v19965_v21 = vmax.f32 %v17858_v55, 0.0  ;;  %v19967_v55 = vmax.f32 %v17855_v22, 0.0  ;;  %v11778_v22 = vld [vmem:[%s18941_s6 + $0x238] sm:$0xff]  }
 0x95d   : > { %v11278_v23 = vpop.permute.xlu0 %11277 }
 0x95e   : > { %v18230_v13 = vmax.f32 %v19962_v15, %v11275_v50  ;;  %v6733_v61 = vsel %vm522_vm4, %v11274_v3, %v11275_v50  ;;  %v11280_v41 = vunpack.i.h.bf16 %v11278_v23  ;;  %v11279_v28 = vunpack.i.l.bf16 %v11278_v23  ;;  %v19966_v3 = vld [vmem:[#allocation7_spill] sm:$0xff] }
 0x95f   : > { %v18236_v44 = vmax.f32 %v19964_v0, %v6733_v61  ;;  %v7266_v27 = vpop.permute.xlu1 %7265  ;;  %11332 = vrot.lane.b32.xlu1 %v11331_v38, %s11977_s27  ;;  %v7186_v15 = vmax.f32 %v19966_v3, %v7076_v5  ;;  %v7078_v61 = vsel %vm4519_vm11, %v11264_v53, %v11265_v30  ;;  %v7079_v23 = vsel %vm4519_vm11, %v11269_v26, %v11270_v24  ;;  %v19970_v5 = vld [vmem:[#allocation31_spill] sm:$0xff] }
 0x960   : > { %v18240_v39 = vmax.f32 %v19965_v21, %v11280_v41  ;;  %v6734_v50 = vsel %vm522_vm4, %v11279_v28, %v11280_v41  ;;  %v7188_v0 = vmax.f32 %v19968_v34, %v7077_v35  ;;  %v19969_v21 = vld [vmem:[#allocation24_spill] sm:$0xff]  ;;  %v7190_v53 = vmax.f32 %v19970_v5, %v7078_v61  ;;  %v19972_v61 = vld [vmem:[#allocation34_spill] sm:$0xff] }
 0x961   : > { %v11341_v37 = vpack.i.bf16 %v18230_v13, %v18236_v44  ;;  %v7268_v20 = vpop.permute.xlu0 %7267  ;;  %v18252_v8 = vmax.f32 %v19967_v55, %v6734_v50  ;;  %v7187_v47 = vmax.f32 %v19969_v21, %v11255_v56  ;;  %v7192_v26 = vmax.f32 %v17871_v49, %v7079_v23  ;;  %v19971_v50 = vld [vmem:[#allocation33_spill] sm:$0xff] }
 0x962   : > { %v7189_v3 = vmax.f32 %v19971_v50, %v11260_v40  ;;  %v7270_v35 = vsel %vm7269_vm1, %v7266_v27, %v7268_v20  ;;  %v11779_v49 = vld [vmem:[%s18941_s6 + $0x270] sm:$0xff]   ;;  %v7191_v23 = vmax.f32 %v19972_v61, %v11265_v30  ;;  %v7193_v55 = vmax.f32 %v17866_v54, %v11270_v24 }
 0x963   : > { %v7274_v38 = vpop.permute.xlu1 %7273  ;;  %v11346_v41 = vpack.i.bf16 %v18240_v39, %v18252_v8  ;;  %11342 = vrot.lane.b32.xlu1 %v11341_v37, %s11982_s25  ;;  %v7236_v37 = vpack.c.bf16 %v7188_v0, %v7186_v15  ;;  %v7238_v15 = vpack.c.bf16 %v7192_v26, %v7190_v53  ;;  %v11780_v0 = vld [vmem:[%s18941_s6 + $0x230] sm:$0xff]   ;;  %v19973_v30 = vmax.f32 %v17860_v57, 0.0  ;;  %v11781_v26 = vld [vmem:[%s18941_s6 + $0x268] sm:$0xff]   ;;  %v11789_v57 = vld [vmem:[%s18941_s6 + $0x1b8] sm:$0xff]  }
 0x964   : > { %v7396_v34 = vsel %vm7277_vm2, %v7270_v35, %v7274_v38  ;;  %v7237_v21 = vpack.c.bf16 %v7189_v3, %v7187_v47  ;;  %v7239_v50 = vpack.c.bf16 %v7193_v55, %v7191_v23  ;;  %v19974_v3 = vmax.f32 %v17841_v43, 0.0  ;;  %v11791_v61 = vld [vmem:[%s18941_s6 + $0x1f0] sm:$0xff]  }
 0x965   : > { %v18261_v28 = vpop.permute.xlu0 %7275  ;;  %11347 = vrot.lane.b32.xlu0 %v11346_v41, %s11982_s25 }
 0x966   : > { %v7278_v56 = vsel %vm7277_vm2, %v7274_v38, %v18261_v28 }
 0x967   : > { %9223 = vmatprep.mubr.bf16.mxu1 %v7278_v56  ;;  %v11283_v40 = vpop.permute.xlu1 %11282  ;;  %7308 = vrot.lane.b32.xlu1 %v7236_v37, %s11993_s21 }
 0x968   : > { %v11285_v20 = vunpack.i.h.bf16 %v11283_v40  ;;  %v11284_v5 = vunpack.i.l.bf16 %v11283_v40  ;;  %9224 = vmatmul.mubr.bf16.vlgmr.msra.gmra.mxu1 %v7396_v34  ;;  %v19977_v34 = vunpack.i.h.bf16 %v18051_v6  ;;  %v19980_v6 = vld [vmem:[#allocation49_spill] sm:$0xff] }
 0x969   : > { %v11288_v41 = vpop.permute.xlu0 %11287  ;;  %10377 = vmatpush3.bf16.msra.mxu1 %v11778_v22  ;;  %7310 = vrot.lane.b32.xlu0 %v7237_v21, %s11993_s21  ;;  %v19975_v22 = vmax.f32 %v17926_v1, 0.0  ;;  %v19976_v1 = vmax.f32 %v17920_v31, 0.0  ;;  %v11783_v21 = vld [vmem:[%s18941_s6 + $0x260] sm:$0xff]  }
 0x96a   : > { %v18282_v54 = vmax.f32 %v19973_v30, %v11285_v20  ;;  %v6735_v24 = vsel %vm522_vm4, %v11284_v5, %v11285_v20  ;;  %v11290_v38 = vunpack.i.h.bf16 %v11288_v41  ;;  %v11289_v47 = vunpack.i.l.bf16 %v11288_v41  ;;  %10378 = vmatprep.subr.bf16.mxu1 %v11779_v49  ;;  %v11793_v20 = vld [vmem:[%s18941_s6 + $0x1b0] sm:$0xff]   ;;  %v11784_v30 = vld [vmem:[%s18941_s6 + $0x220] sm:$0xff]  }
 0x96b   : > { %v18287_v35 = vmax.f32 %v19974_v3, %v6735_v24  ;;  %v7259_v53 = vpop.permute.xlu1 %7258  ;;  %7316 = vrot.lane.b32.xlu1 %v7238_v15, %s11994_s15  ;;  %v19979_v5 = vunpack.i.h.bf16 %v18017_v52  ;;  %v11795_v15 = vld [vmem:[%s18941_s6 + $0x1e8] sm:$0xff]   ;;  %v11785_v52 = vld [vmem:[%s18941_s6 + $0x258] sm:$0xff]  }
 0x96c   : > { %v18297_v56 = vmax.f32 %v19975_v22, %v11290_v38  ;;  %v6736_v37 = vsel %vm522_vm4, %v11289_v47, %v11290_v38  ;;  %v7261_v43 = vsel %vm7260_vm0, %v18028_v4, %v7259_v53  ;;  %v7391_v49 = vsel %vm7269_vm1, %v7259_v53, %v7266_v27  ;;  %v11782_v4 = vld [vmem:[%s18941_s6 + $0x228] sm:$0xff]   ;;  %v19978_v27 = vld [vmem:[#allocation18_spill] sm:$0xff] }
 0x96d   : > { %v11351_v23 = vpack.i.bf16 %v18282_v54, %v18287_v35  ;;  %v18310_v55 = vmax.f32 %v19976_v1, %v6736_v37  ;;  %9182 = vmatprep.mubr.bf16.mxu0 %v7391_v49  ;;  %10379 = vmatpush3.bf16.msra.mxu1 %v11780_v0  ;;  %v7183_v40 = vmax.f32 %v19978_v27, %v19977_v34  ;;  %v11799_v37 = vld [vmem:[%s18941_s6 + $0x1e0] sm:$0xff]   ;;  %vm9642_vm0 = vcmask 80896  }
 0x96e   : > { %7318 = vrot.lane.b32.xlu0 %v7239_v50, %s11994_s15  ;;  %9183 = vmatmul.mubr.bf16.vlgmr.msra.gmra.mxu0 %v7261_v43  ;;  %v7185_v41 = vmax.f32 %v19980_v6, %v19979_v5  ;;  %v11293_v38 = vpop.permute.xlu0 %11292  ;;  %v11801_v6 = vld [vmem:[%s18941_s6 + $0x1d8] sm:$0xff]   ;;  %s11999_s15 = smov 105  }
 0x96f   : > { %v11356_v31 = vpack.i.bf16 %v18297_v56, %v18310_v55  ;;  %10380 = vmatprep.subr.bf16.mxu1 %v11781_v26  ;;  %10355 = vmatpush3.bf16.msra.mxu0 %v11789_v57  ;;  %v11298_v0 = vpop.permute.xlu1 %11297  ;;  %v11295_v3 = vunpack.i.h.bf16 %v11293_v38  ;;  %v11294_v53 = vunpack.i.l.bf16 %v11293_v38  ;;  %v11797_v26 = vld [vmem:[%s18941_s6 + $0x1a8] sm:$0xff]  }
 0x970   : > { %11352 = vrot.lane.b32.xlu1 %v11351_v23, %s11982_s25  ;;  %10356 = vmatprep.subr.bf16.mxu0 %v11791_v61  ;;  %v7235_v24 = vpack.c.bf16 %v7185_v41, %v7183_v40  ;;  %v11300_v47 = vunpack.i.h.bf16 %v11298_v0  ;;  %v11299_v50 = vunpack.i.l.bf16 %v11298_v0 }
 0x971   : > { %10381 = vmatpush3.bf16.msra.mxu1 %v11782_v4  ;;  %v7199_v43 = vmax.f32 %v17961_v60, %v11295_v3  ;;  %v7082_v49 = vsel %vm4519_vm11, %v11294_v53, %v11295_v3  ;;  %v11788_v60 = vld [vmem:[%s18941_s6 + $0x250] sm:$0xff]   ;;  %v11807_v3 = vld [vmem:[%s18941_s6 + $0x1c8] sm:$0xff]   ;;  %v11798_v53 = vld [vmem:[%s18941_s6 + $0x200] sm:$0xff]  }
 0x972   : > { %11357 = vrot.lane.b32.xlu0 %v11356_v31, %s11982_s25  ;;  %10382 = vmatprep.subr.bf16.mxu1 %v11783_v21  ;;  %v7201_v57 = vmax.f32 %v17952_v25, %v11300_v47  ;;  %v7083_v22 = vsel %vm4519_vm11, %v11299_v50, %v11300_v47  ;;  %v11786_v25 = vld [vmem:[%s18941_s6 + $0x218] sm:$0xff]   ;;  %v7198_v1 = vmax.f32 %v17966_v10, %v7082_v49  ;;  %v11308_v4 = vpop.permute.xlu0 %11307  ;;  %v11794_v47 = vld [vmem:[%s18941_s6 + $0x208] sm:$0xff]   ;;  %v11796_v50 = vld [vmem:[%s18941_s6 + $0x240] sm:$0xff]  }
 0x973   : > { %10357 = vmatpush3.bf16.msra.mxu0 %v11793_v20  ;;  %v7200_v61 = vmax.f32 %v17957_v9, %v7083_v22  ;;  %v11303_v23 = vpop.permute.xlu1 %11302  ;;  %v11310_v21 = vunpack.i.h.bf16 %v11308_v4  ;;  %v11309_v31 = vunpack.i.l.bf16 %v11308_v4  ;;  %v11800_v9 = vld [vmem:[%s18941_s6 + $0x1a0] sm:$0xff]   ;;  %v11806_v4 = vld [vmem:[%s18941_s6 + $0x338] sm:$0xff]  }
 0x974   : > { %7301 = vrot.lane.b32.xlu1 %v7235_v24, %s11992_s20  ;;  %10358 = vmatprep.subr.bf16.mxu0 %v11795_v15  ;;  %v11305_v34 = vunpack.i.h.bf16 %v11303_v23  ;;  %v11304_v27 = vunpack.i.l.bf16 %v11303_v23  ;;  %v7243_v40 = vpack.c.bf16 %v7201_v57, %v7199_v43  ;;  %v11808_v57 = vld [vmem:[%s18941_s6 + $0x188] sm:$0xff]   ;;  %v11811_v22 = vld [vmem:[%s18941_s6 + $0x1c0] sm:$0xff]   ;;  %v11815_v43 = vld [vmem:[%s18941_s6 + $0x2f8] sm:$0xff]   ;;  %s11998_s20 = smov 28  }
 0x975   : > { %10383 = vmatpush3.bf16.msra.mxu1 %v11784_v30  ;;  %v7242_v5 = vpack.c.bf16 %v7200_v61, %v7198_v1  ;;  %v18370_v41 = vmax.f32 %v17983_v29, %v11310_v21  ;;  %v7085_v15 = vsel %vm4519_vm11, %v11309_v31, %v11310_v21  ;;  %v11792_v29 = vld [vmem:[%s18941_s6 + $0x248] sm:$0xff]   ;;  %v11810_v21 = vld [vmem:[%s18941_s6 + $0x330] sm:$0xff]  }
 0x976   : > { %10384 = vmatprep.subr.bf16.mxu1 %v11785_v52  ;;  %v18363_v20 = vmax.f32 %v17972_v2, %v11305_v34  ;;  %v7084_v10 = vsel %vm4519_vm11, %v11304_v27, %v11305_v34  ;;  %v11790_v2 = vld [vmem:[%s18941_s6 + $0x210] sm:$0xff]   ;;  %v7204_v30 = vmax.f32 %v17989_v18, %v7085_v15  ;;  %v11814_v15 = vld [vmem:[%s18941_s6 + $0x328] sm:$0xff]  }
 0x977   : > { %10359 = vmatpush3.bf16.msra.mxu0 %v11797_v26  ;;  %v7202_v0 = vmax.f32 %v17979_v62, %v7084_v10  ;;  %7334 = vrot.lane.b32.xlu0 %v7242_v5, %s11995_s24  ;;  %v11802_v62 = vld [vmem:[%s18941_s6 + $0x198] sm:$0xff]   ;;  %v11803_v18 = vld [vmem:[%s18941_s6 + $0x1d0] sm:$0xff]   ;;  %v11813_v10 = vld [vmem:[%s18941_s6 + $0x368] sm:$0xff]  }
 0x978   : > { %10360 = vmatprep.subr.bf16.mxu0 %v11799_v37  ;;  %7336 = vrot.lane.b32.xlu1 %v7243_v40, %s11995_s24  ;;  %v7245_v24 = vpack.c.bf16 %v18370_v41, %v18363_v20  ;;  %v11804_v52 = vld [vmem:[%s18941_s6 + $0x190] sm:$0xff]   ;;  %v11805_v26 = vld [vmem:[%s18941_s6 + $0x378] sm:$0xff]   ;;  %v11812_v37 = vld [vmem:[%s18941_s6 + $0x180] sm:$0xff]  }
 0x979   : > { %10385 = vmatpush3.bf16.msra.mxu1 %v11786_v25  ;;  %v7244_v38 = vpack.c.bf16 %v7204_v30, %v7202_v0  ;;  %v11809_v27 = vld [vmem:[%s18941_s6 + $0x370] sm:$0xff]   ;;  %v11822_v30 = vld [vmem:[%s18941_s6 + $0x318] sm:$0xff]   ;;  %v11862_v20 = vld [vmem:[%s18941_s6 + $0x3a8] sm:$0xff]  }
 0x97a   : > { %10386 = vmatprep.subr.bf16.mxu1 %v11788_v60  ;;  %v11863_v41 = vld [vmem:[%s18941_s6 + $0x3e0] sm:$0xff]  }
 0x97b   : > { %10361 = vmatpush3.bf16.msra.mxu0 %v11800_v9  ;;  %7342 = vrot.lane.b32.xlu0 %v7244_v38, %s11996_s18  ;;  %v11826_v38 = vld [vmem:[%s18941_s6 + $0x310] sm:$0xff]  }
 0x97c   : > { %10362 = vmatprep.subr.bf16.mxu0 %v11801_v6 }
 0x97d   : > { %10387 = vmatpush3.bf16.msra.mxu1 %v11790_v2  ;;  %v11817_v2 = vld [vmem:[%s18941_s6 + $0x360] sm:$0xff]  }
 0x97e   : > { %10388 = vmatprep.subr.bf16.mxu1 %v11792_v29 }
 0x97f   : > { %10363 = vmatpush3.bf16.msra.mxu0 %v11802_v62  ;;  %v11825_v62 = vld [vmem:[%s18941_s6 + $0x350] sm:$0xff]  }
 0x980   : > { %10364 = vmatprep.subr.bf16.mxu0 %v11803_v18 }
 0x981   : > { %10389 = vmatpush3.bf16.msra.mxu1 %v11794_v47 }
 0x982   : > { %10390 = vmatprep.subr.bf16.mxu1 %v11796_v50  ;;  %v11816_v50 = vld [vmem:[%s18941_s6 + $0x2b8] sm:$0xff]  }
 0x983   : > { %10365 = vmatpush3.bf16.msra.mxu0 %v11804_v52  ;;  %v11829_v52 = vld [vmem:[%s18941_s6 + $0x348] sm:$0xff]  }
 0x984   : > { %10366 = vmatprep.subr.bf16.mxu0 %v11807_v3 }
 0x985   : > { %10391 = vmatpush3.bf16.msra.mxu1 %v11798_v53 }
 0x986   : > { %10420 = vmatprep.subr.bf16.mxu1 %v11805_v26 }
 0x987   : > { %10367 = vmatpush3.bf16.msra.mxu0 %v11808_v57 }
 0x988   : > { %10368 = vmatprep.subr.bf16.mxu0 %v11811_v22  ;;  %v11819_v22 = vld [vmem:[%s18941_s6 + $0x2f0] sm:$0xff]  }
 0x98b   : > { %10369 = vmatpush3.bf16.msra.mxu0 %v11812_v37 }
 0x98c   : > { %10398 = vmatprep.subr.bf16.mxu0 %v11815_v43 }
 0x9af   : > { %v7294_v49 = vpop.permute.xlu1 %7293 }
 0x9b0   : > { %v7292_v61 = vpop.permute.xlu0 %7291 }
 0x9b1   : > { %v7296_v25 = vsel %vm7295_vm3, %v7292_v61, %v7294_v49 }
 0x9b3   : > { %v7285_v23 = vpop.permute.xlu1 %7284 }
 0x9b4   : > { %v18420_v1 = vpop.permute.xlu0 %7299  ;;  %v7406_v60 = vsel %vm7295_vm3, %v7285_v23, %v7292_v61 }
 0x9b5   : > { %v7411_v34 = vsel %vm7303_vm5, %v7296_v25, %v18420_v1 }
 0x9b6   : > { %9305 = vmatprep.mubr.bf16.mxu1 %v7411_v34 }
 0x9b7   : > { %9306 = vmatmul.mubr.bf16.vlgmr.msra.gmra.mxu1 %v7406_v60 }
 0x9b8   : > { %v11313_v40 = vpop.permute.xlu0 %11312  ;;  %10421 = vmatpush3.bf16.msra.mxu1 %v11806_v4 }
 0x9b9   : > { %v11315_v31 = vunpack.i.h.bf16 %v11313_v40  ;;  %v11314_v9 = vunpack.i.l.bf16 %v11313_v40  ;;  %10422 = vmatprep.subr.bf16.mxu1 %v11809_v27  ;;  %v11823_v27 = vld [vmem:[%s18941_s6 + $0x2e8] sm:$0xff]  }
 0x9bb   : > { %v7197_v5 = vmax.f32 %v18080_v32, %v11315_v31  ;;  %v7195_v6 = vmax.f32 %v18086_v19, %v11314_v9  ;;  %v11818_v32 = vld [vmem:[%s18941_s6 + $0x320] sm:$0xff]   ;;  %v11821_v19 = vld [vmem:[%s18941_s6 + $0x358] sm:$0xff]  }
 0x9bc   : > { %10423 = vmatpush3.bf16.msra.mxu1 %v11810_v21 }
 0x9bd   : > { %v7241_v0 = vpack.c.bf16 %v7197_v5, %v7195_v6  ;;  %10424 = vmatprep.subr.bf16.mxu1 %v11813_v10  ;;  %v11834_v5 = vld [vmem:[%s18941_s6 + $0x300] sm:$0xff]  }
 0x9bf   : > { %7327 = vrot.lane.b32.xlu1 %v7241_v0, %s11997_s19 }
 0x9c0   : > { %10425 = vmatpush3.bf16.msra.mxu1 %v11814_v15 }
 0x9c1   : > { %10426 = vmatprep.subr.bf16.mxu1 %v11817_v2  ;;  %v11827_v2 = vld [vmem:[%s18941_s6 + $0x2e0] sm:$0xff]  }
 0x9c4   : > { %10427 = vmatpush3.bf16.msra.mxu1 %v11818_v32 }
 0x9c5   : > { %v11318_v29 = vpop.permute.xlu0 %11317  ;;  %10428 = vmatprep.subr.bf16.mxu1 %v11821_v19 }
 0x9c6   : > { %v11320_v37 = vunpack.i.h.bf16 %v11318_v29  ;;  %v11319_v43 = vunpack.i.l.bf16 %v11318_v29 }
 0x9c8   : > { %10429 = vmatpush3.bf16.msra.mxu1 %v11822_v30  ;;  %v7081_v60 = vsel %vm4519_vm11, %v11320_v37, %v11315_v31  ;;  %v7080_v40 = vsel %vm4519_vm11, %v11319_v43, %v11314_v9 }
 0x9c9   : > { %v11328_v18 = vpop.permute.xlu0 %11327  ;;  %v7283_v47 = vpop.permute.xlu1 %7282  ;;  %10430 = vmatprep.subr.bf16.mxu1 %v11825_v62  ;;  %v7194_v32 = vmax.f32 %v18152_v59, %v7080_v40  ;;  %v11828_v59 = vld [vmem:[%s18941_s6 + $0x2a0] sm:$0xff]   ;;  %v11843_v40 = vld [vmem:[%s18941_s6 + $0x470] sm:$0xff]  }
 0x9ca   : > { %v11330_v3 = vunpack.i.h.bf16 %v11328_v18  ;;  %v11329_v53 = vunpack.i.l.bf16 %v11328_v18  ;;  %v7401_v26 = vsel %vm7286_vm6, %v18261_v28, %v7283_v47  ;;  %v7287_v57 = vsel %vm7286_vm6, %v7283_v47, %v7285_v23  ;;  %v11830_v28 = vld [vmem:[%s18941_s6 + $0x308] sm:$0xff]   ;;  %v11831_v18 = vld [vmem:[%s18941_s6 + $0x2d8] sm:$0xff]  }
 0x9cb   : > { %9264 = vmatprep.mubr.bf16.mxu0 %v7287_v57 }
 0x9cc   : > { %v18472_v49 = vmax.f32 %v6512_v14, %v11330_v3  ;;  %v6738_v61 = vsel %vm522_vm4, %v11329_v53, %v11330_v3  ;;  %9265 = vmatmul.mubr.bf16.vlgmr.msra.gmra.mxu0 %v7401_v26  ;;  %10431 = vmatpush3.bf16.msra.mxu1 %v11826_v38  ;;  %v19982_v3 = vmax.f32 %v18157_v51, 0.0  ;;  %v11835_v51 = vld [vmem:[%s18941_s6 + $0x2d0] sm:$0xff]  }
 0x9cd   : > { %v18480_v23 = vmax.f32 %v6511_v7, %v6738_v61  ;;  %10399 = vmatpush3.bf16.msra.mxu0 %v11816_v50  ;;  %v11323_v25 = vpop.permute.xlu1 %11322  ;;  %10432 = vmatprep.subr.bf16.mxu1 %v11829_v52  ;;  %v11338_v14 = vpop.permute.xlu0 %11337 }
 0x9ce   : > { %v11325_v4 = vunpack.i.h.bf16 %v11323_v25  ;;  %v11324_v34 = vunpack.i.l.bf16 %v11323_v25  ;;  %10400 = vmatprep.subr.bf16.mxu0 %v11819_v22  ;;  %v11340_v6 = vunpack.i.h.bf16 %v11338_v14  ;;  %v11339_v15 = vunpack.i.l.bf16 %v11338_v14 }
 0x9cf   : > { %v11366_v7 = vpack.i.bf16 %v18472_v49, %v18480_v23 }
 0x9d0   : > { %v18497_v21 = vmax.f32 %v6510_v12, %v11325_v4  ;;  %v6737_v10 = vsel %vm522_vm4, %v11324_v34, %v11325_v4  ;;  %10433 = vmatpush3.bf16.msra.mxu1 %v11830_v28  ;;  %v6740_v62 = vsel %vm522_vm4, %v11339_v15, %v11340_v6 }
 0x9d1   : > { %v18505_v0 = vmax.f32 %v6509_v16, %v6737_v10  ;;  %11367 = vrot.lane.b32.xlu1 %v11366_v7, %s11982_s25  ;;  %10401 = vmatpush3.bf16.msra.mxu0 %v11820_v11  ;;  %v11333_v31 = vpop.permute.xlu1 %11332  ;;  %v7196_v16 = vmax.f32 %v18147_v58, %v7081_v60  ;;  %v18546_v53 = vmax.f32 %v19982_v3, %v6740_v62 }
 0x9d2   : > { %v11335_v12 = vunpack.i.h.bf16 %v11333_v31  ;;  %v11334_v9 = vunpack.i.l.bf16 %v11333_v31  ;;  %10402 = vmatprep.subr.bf16.mxu0 %v11823_v27  ;;  %10434 = vmatprep.subr.bf16.mxu1 %v11833_v17  ;;  %v11836_v27 = vld [vmem:[%s18941_s6 + $0x290] sm:$0xff]  }
 0x9d3   : > { %v11361_v19 = vpack.i.bf16 %v18497_v21, %v18505_v0  ;;  %v7240_v52 = vpack.c.bf16 %v7196_v16, %v7194_v32 }
 0x9d4   : > { %v18523_v30 = vmax.f32 %v6514_v33, %v11335_v12  ;;  %v6739_v29 = vsel %vm522_vm4, %v11334_v9, %v11335_v12  ;;  %10435 = vmatpush3.bf16.msra.mxu1 %v11834_v5  ;;  %vm7312_vm4 = vcmask 220160   ;;  %v11844_v9 = vld [vmem:[%s18941_s6 + $0x430] sm:$0xff]  }
 0x9d5   : > { %v18529_v38 = vmax.f32 %v6513_v48, %v6739_v29  ;;  %10403 = vmatpush3.bf16.msra.mxu0 %v11824_v42  ;;  %v11343_v58 = vpop.permute.xlu1 %11342  ;;  %11362 = vrot.lane.b32.xlu0 %v11361_v19, %s11982_s25  ;;  %v18540_v48 = vmax.f32 %v19981_v63, %v11340_v6  ;;  %v11838_v6 = vld [vmem:[%s18941_s6 + $0x288] sm:$0xff]   ;;  %v11839_v42 = vld [vmem:[%s18941_s6 + $0x2c0] sm:$0xff]  }
 0x9d6   : > { %v11345_v45 = vunpack.i.h.bf16 %v11343_v58  ;;  %v11344_v33 = vunpack.i.l.bf16 %v11343_v58  ;;  %10404 = vmatprep.subr.bf16.mxu0 %v11827_v2  ;;  %10464 = vmatprep.subr.bf16.mxu1 %v11841_v36  ;;  %v11845_v19 = vld [vmem:[%s18941_s6 + $0x468] sm:$0xff]   ;;  %v11840_v58 = vld [vmem:[%s18941_s6 + $0x280] sm:$0xff]  }
 0x9d7   : > { %v11371_v47 = vpack.i.bf16 %v18523_v30, %v18529_v38  ;;  %v11348_v50 = vpop.permute.xlu0 %11347  ;;  %v11376_v25 = vpack.i.bf16 %v18540_v48, %v18546_v53 }
 0x9d8   : > { %v7086_v26 = vsel %vm4519_vm11, %v11344_v33, %v11345_v45  ;;  %v11350_v57 = vunpack.i.h.bf16 %v11348_v50  ;;  %v11349_v22 = vunpack.i.l.bf16 %v11348_v50  ;;  %v7207_v11 = vmax.f32 %v18230_v13, %v11345_v45  ;;  %v11842_v13 = vld [vmem:[%s18941_s6 + $0x438] sm:$0xff]  }
 0x9d9   : > { %v7206_v37 = vmax.f32 %v18236_v44, %v7086_v26  ;;  %10405 = vmatpush3.bf16.msra.mxu0 %v11828_v59  ;;  %v7309_v43 = vpop.permute.xlu1 %7308  ;;  %11372 = vrot.lane.b32.xlu1 %v11371_v47, %s11982_s25  ;;  %v11855_v33 = vld [vmem:[%s18941_s6 + $0x3f8] sm:$0xff]   ;;  %v11848_v26 = vld [vmem:[%s18941_s6 + $0x420] sm:$0xff]  }
 0x9da   : > { %v7087_v61 = vsel %vm4519_vm11, %v11349_v22, %v11350_v57  ;;  %7325 = vrot.lane.b32.xlu0 %v7240_v52, %s11997_s19  ;;  %10406 = vmatprep.subr.bf16.mxu0 %v11831_v18  ;;  %v7209_v14 = vmax.f32 %v18240_v39, %v11350_v57  ;;  %v11837_v39 = vld [vmem:[%s18941_s6 + $0x2c8] sm:$0xff]   ;;  %v11856_v50 = vld [vmem:[%s18941_s6 + $0x3b8] sm:$0xff]   ;;  %s373_s19 = scalar_lea.vmem %s18943_s8, %s9716_s29 }
 0x9db   : > { %v7208_v28 = vmax.f32 %v18252_v8, %v7087_v61  ;;  %v7311_v44 = vpop.permute.xlu0 %7310  ;;  %v11849_v22 = vld [vmem:[%s18941_s6 + $0x458] sm:$0xff]  }
 0x9dc   : > { %v7247_v17 = vpack.c.bf16 %v7209_v14, %v7207_v11  ;;  %v7313_v7 = vsel %vm7312_vm4, %v7309_v43, %v7311_v44  ;;  %v11850_v61 = vld [vmem:[%s18941_s6 + $0x418] sm:$0xff]   ;;  %v11853_v44 = vld [vmem:[%s18941_s6 + $0x448] sm:$0xff]  }
 0x9dd   : > { %10407 = vmatpush3.bf16.msra.mxu0 %v11832_v46  ;;  %v7317_v4 = vpop.permute.xlu1 %7316  ;;  %v7246_v34 = vpack.c.bf16 %v7208_v28, %v7206_v37  ;;  %v11861_v37 = vld [vmem:[%s18941_s6 + $0x3e8] sm:$0xff]   ;;  %v11851_v28 = vld [vmem:[%s18941_s6 + $0x450] sm:$0xff]   ;;  %v11865_v11 = vld [vmem:[%s18941_s6 + $0x3d8] sm:$0xff]  }
 0x9de   : > { %11377 = vrot.lane.b32.xlu0 %v11376_v25, %s11982_s25  ;;  %10408 = vmatprep.subr.bf16.mxu0 %v11835_v51  ;;  %v7421_v10 = vsel %vm7320_vm7, %v7313_v7, %v7317_v4  ;;  %v11864_v25 = vld [vmem:[%s18941_s6 + $0x3a0] sm:$0xff]   ;;  %v11854_v14 = vld [vmem:[%s18941_s6 + $0x408] sm:$0xff]  }
 0x9df   : > { %7351 = vrot.lane.b32.xlu1 %v7246_v34, %s11998_s20  ;;  %v11866_v34 = vld [vmem:[%s18941_s6 + $0x398] sm:$0xff]   ;;  %v11873_v7 = vld [vmem:[%s18941_s6 + $0x3c8] sm:$0xff]  }
 0x9e0   : > { %v18568_v8 = vpop.permute.xlu0 %7318 }
 0x9e1   : > { %v7321_v60 = vsel %vm7320_vm7, %v7317_v4, %v18568_v8  ;;  %10409 = vmatpush3.bf16.msra.mxu0 %v11836_v27  ;;  %v11857_v4 = vld [vmem:[%s18941_s6 + $0x440] sm:$0xff]   ;;  %v11869_v27 = vld [vmem:[%s18941_s6 + $0x3d0] sm:$0xff]  }
 0x9e2   : > { %9387 = vmatprep.mubr.bf16.mxu1 %v7321_v60  ;;  %v11353_v5 = vpop.permute.xlu1 %11352  ;;  %7353 = vrot.lane.b32.xlu0 %v7247_v17, %s11998_s20  ;;  %v11870_v17 = vld [vmem:[%s18941_s6 + $0x390] sm:$0xff]   ;;  %v11874_v60 = vld [vmem:[%s18941_s6 + $0x388] sm:$0xff]  }
 0x9e3   : > { %v11355_v15 = vunpack.i.h.bf16 %v11353_v5  ;;  %v11354_v31 = vunpack.i.l.bf16 %v11353_v5  ;;  %9388 = vmatmul.mubr.bf16.vlgmr.msra.gmra.mxu1 %v7421_v10  ;;  %10410 = vmatprep.subr.bf16.mxu0 %v11837_v39  ;;  %v11858_v39 = vld [vmem:[%s18941_s6 + $0x400] sm:$0xff]   ;;  %v11881_v5 = vld [vmem:[%s18941_s6 + $0x4f8] sm:$0xff]  }
 0x9e4   : > { %v11358_v12 = vpop.permute.xlu0 %11357  ;;  %10465 = vmatpush3.bf16.msra.mxu1 %v11842_v13  ;;  %v11867_v13 = vld [vmem:[%s18941_s6 + $0x578] sm:$0xff]   ;;  %v11878_v10 = vld [vmem:[%s18941_s6 + $0x380] sm:$0xff]  }
 0x9e5   : > { %v7211_v2 = vmax.f32 %v18282_v54, %v11355_v15  ;;  %v7088_v36 = vsel %vm4519_vm11, %v11354_v31, %v11355_v15  ;;  %v11360_v16 = vunpack.i.h.bf16 %v11358_v12  ;;  %v11359_v32 = vunpack.i.l.bf16 %v11358_v12  ;;  %10466 = vmatprep.subr.bf16.mxu1 %v11843_v40  ;;  %10411 = vmatpush3.bf16.msra.mxu0 %v11838_v6  ;;  %v11877_v40 = vld [vmem:[%s18941_s6 + $0x3c0] sm:$0xff]   ;;  %v11868_v6 = vld [vmem:[%s18941_s6 + $0x538] sm:$0xff]   ;;  %v11871_v31 = vld [vmem:[%s18941_s6 + $0x570] sm:$0xff]  }
 0x9e6   : > { %v7210_v29 = vmax.f32 %v18287_v35, %v7088_v36  ;;  %v7302_v62 = vpop.permute.xlu1 %7301  ;;  %10412 = vmatprep.subr.bf16.mxu0 %v11839_v42  ;;  %v11846_v35 = vld [vmem:[%s18941_s6 + $0x428] sm:$0xff]   ;;  %v11872_v12 = vld [vmem:[%s18941_s6 + $0x530] sm:$0xff]   ;;  %v11879_v36 = vld [vmem:[%s18941_s6 + $0x560] sm:$0xff]  }
 0x9e7   : > { %v7213_v59 = vmax.f32 %v18297_v56, %v11360_v16  ;;  %v7089_v54 = vsel %vm4519_vm11, %v11359_v32, %v11360_v16  ;;  %v7416_v45 = vsel %vm7312_vm4, %v7302_v62, %v7309_v43  ;;  %v11847_v56 = vld [vmem:[%s18941_s6 + $0x460] sm:$0xff]   ;;  %v7304_v52 = vsel %vm7303_vm5, %v18420_v1, %v7302_v62  ;;  %v11860_v1 = vld [vmem:[%s18941_s6 + $0x3b0] sm:$0xff]   ;;  %v11883_v32 = vld [vmem:[%s18941_s6 + $0x558] sm:$0xff]  }
 0x9e8   : > { %v7212_v18 = vmax.f32 %v18310_v55, %v7089_v54  ;;  %9346 = vmatprep.mubr.bf16.mxu0 %v7416_v45  ;;  %10467 = vmatpush3.bf16.msra.mxu1 %v11844_v9  ;;  %v11859_v55 = vld [vmem:[%s18941_s6 + $0x3f0] sm:$0xff]   ;;  %v11875_v9 = vld [vmem:[%s18941_s6 + $0x568] sm:$0xff]   ;;  %v11880_v16 = vld [vmem:[%s18941_s6 + $0x520] sm:$0xff]  }
 0x9e9   : > { %v7249_v63 = vpack.c.bf16 %v7213_v59, %v7211_v2  ;;  %10468 = vmatprep.subr.bf16.mxu1 %v11845_v19  ;;  %10413 = vmatpush3.bf16.msra.mxu0 %v11840_v58  ;;  %v18620_v3 = vpop.permute.xlu0 %7334  ;;  %v11876_v2 = vld [vmem:[%s18941_s6 + $0x528] sm:$0xff]   ;;  %v11884_v19 = vld [vmem:[%s18941_s6 + $0x518] sm:$0xff]   ;;  %v11888_v54 = vld [vmem:[%s18941_s6 + $0x510] sm:$0xff]  }
 0x9ea   : > { %v7248_v47 = vpack.c.bf16 %v7212_v18, %v7210_v29  ;;  %10442 = vmatprep.subr.bf16.mxu0 %v11855_v33  ;;  %v7337_v57 = vpop.permute.xlu1 %7336  ;;  %v11887_v29 = vld [vmem:[%s18941_s6 + $0x550] sm:$0xff]   ;;  %v11891_v45 = vld [vmem:[%s18941_s6 + $0x548] sm:$0xff]  }
 0x9eb   : > { %7361 = vrot.lane.b32.xlu0 %v7249_v63, %s11999_s15  ;;  %v7339_v43 = vsel %vm7338_vm8, %v18620_v3, %v7337_v57 }
 0x9ec   : > { %7359 = vrot.lane.b32.xlu1 %v7248_v47, %s11999_s15  ;;  %10469 = vmatpush3.bf16.msra.mxu1 %v11846_v35  ;;  %v11895_v47 = vld [vmem:[%s18941_s6 + $0x540] sm:$0xff]  }
 0x9ed   : > { %9347 = vmatmul.mubr.bf16.vlgmr.msra.gmra.mxu0 %v7304_v52  ;;  %10470 = vmatprep.subr.bf16.mxu1 %v11847_v56  ;;  %v18636_v46 = vpop.permute.xlu0 %7342  ;;  %v11892_v56 = vld [vmem:[%s18941_s6 + $0x508] sm:$0xff]  }
 0x9ee   : > { %10443 = vmatpush3.bf16.msra.mxu0 %v11856_v50  ;;  %v7436_v51 = vsel %vm7346_vm9, %v7339_v43, %v18636_v46  ;;  %v11882_v43 = vld [vmem:[%s18941_s6 + $0x4b8] sm:$0xff]  }
 0x9ef   : > { %10444 = vmatprep.subr.bf16.mxu0 %v11859_v55  ;;  %9469 = vmatprep.mubr.bf16.mxu1 %v7436_v51 }
 0x9f0   : > { %7344 = vrot.lane.b32.xlu1 %v7245_v24, %s11996_s18  ;;  %10471 = vmatpush3.bf16.msra.mxu1 %v11848_v26  ;;  %v11852_v24 = vld [vmem:[%s18941_s6 + $0x410] sm:$0xff]   ;;  %s12000_s18 = smov 54  }
 0x9f1   : > { %10472 = vmatprep.subr.bf16.mxu1 %v11849_v22 }
 0x9f2   : > { %10445 = vmatpush3.bf16.msra.mxu0 %v11860_v1 }
 0x9f3   : > { %10446 = vmatprep.subr.bf16.mxu0 %v11861_v37 }
 0x9f4   : > { %10473 = vmatpush3.bf16.msra.mxu1 %v11850_v61 }
 0x9f5   : > { %10474 = vmatprep.subr.bf16.mxu1 %v11851_v28 }
 0x9f6   : > { %10447 = vmatpush3.bf16.msra.mxu0 %v11862_v20  ;;  %v11886_v20 = vld [vmem:[%s18941_s6 + $0x4b0] sm:$0xff]  }
 0x9f7   : > { %10448 = vmatprep.subr.bf16.mxu0 %v11863_v41 }
 0x9f8   : > { %10475 = vmatpush3.bf16.msra.mxu1 %v11852_v24 }
 0x9f9   : > { %10476 = vmatprep.subr.bf16.mxu1 %v11853_v44  ;;  %v11889_v44 = vld [vmem:[%s18941_s6 + $0x4e8] sm:$0xff]  }
 0x9fa   : > { %10449 = vmatpush3.bf16.msra.mxu0 %v11864_v25  ;;  %v19983_v25 = vmov 0  }
 0x9fb   : > { %10450 = vmatprep.subr.bf16.mxu0 %v11865_v11 }
 0x9fc   : > { %10477 = vmatpush3.bf16.msra.mxu1 %v11854_v14 }
 0x9fd   : > { %10478 = vmatprep.subr.bf16.mxu1 %v11857_v4 }
 0x9fe   : > { %10451 = vmatpush3.bf16.msra.mxu0 %v11866_v34 }
 0x9ff   : > { %10452 = vmatprep.subr.bf16.mxu0 %v11869_v27 }
 0xa00   : > { %10479 = vmatpush3.bf16.msra.mxu1 %v11858_v39  ;;  %v11890_v39 = vld [vmem:[%s18941_s6 + $0x4a8] sm:$0xff]  }
 0xa01   : > { %10508 = vmatprep.subr.bf16.mxu1 %v11867_v13 }
 0xa02   : > { %10453 = vmatpush3.bf16.msra.mxu0 %v11870_v17  ;;  %v11893_v17 = vld [vmem:[%s18941_s6 + $0x4e0] sm:$0xff]  }
 0xa03   : > { %10454 = vmatprep.subr.bf16.mxu0 %v11873_v7  ;;  %v11897_v7 = vld [vmem:[%s18941_s6 + $0x4d8] sm:$0xff]  }
 0xa06   : > { %10455 = vmatpush3.bf16.msra.mxu0 %v11874_v60 }
 0xa07   : > { %10456 = vmatprep.subr.bf16.mxu0 %v11877_v40  ;;  %v11898_v40 = vld [vmem:[%s18941_s6 + $0x498] sm:$0xff]  }
 0xa0a   : > { %10457 = vmatpush3.bf16.msra.mxu0 %v11878_v10 }
 0xa0b   : > { %10486 = vmatprep.subr.bf16.mxu0 %v11881_v5 }
 0xa31   : > { %v7328_v15 = vpop.permute.xlu1 %7327 }
 0xa32   : > { %v7431_v42 = vsel %vm7338_vm8, %v7328_v15, %v18620_v3 }
 0xa33   : > { %9470 = vmatmul.mubr.bf16.vlgmr.msra.gmra.mxu1 %v7431_v42 }
 0xa34   : > { %10509 = vmatpush3.bf16.msra.mxu1 %v11868_v6  ;;  %v11899_v6 = vld [vmem:[%s18941_s6 + $0x4d0] sm:$0xff]  }
 0xa35   : > { %10510 = vmatprep.subr.bf16.mxu1 %v11871_v31 }
 0xa38   : > { %10511 = vmatpush3.bf16.msra.mxu1 %v11872_v12  ;;  %v11900_v12 = vld [vmem:[%s18941_s6 + $0x490] sm:$0xff]  }
 0xa39   : > { %10512 = vmatprep.subr.bf16.mxu1 %v11875_v9 }
 0xa3c   : > { %10513 = vmatpush3.bf16.msra.mxu1 %v11876_v2  ;;  %v11901_v2 = vld [vmem:[%s18941_s6 + $0x4c8] sm:$0xff]  }
 0xa3d   : > { %10514 = vmatprep.subr.bf16.mxu1 %v11879_v36  ;;  %v11906_v36 = vld [vmem:[%s18941_s6 + $0x630] sm:$0xff]  }
 0xa40   : > { %10515 = vmatpush3.bf16.msra.mxu1 %v11880_v16 }
 0xa41   : > { %10516 = vmatprep.subr.bf16.mxu1 %v11883_v32  ;;  %v11902_v32 = vld [vmem:[%s18941_s6 + $0x488] sm:$0xff]  }
 0xa43   : > { %v11368_v62 = vpop.permute.xlu1 %11367 }
 0xa44   : > { %v11370_v58 = vunpack.i.h.bf16 %v11368_v62  ;;  %v11369_v59 = vunpack.i.l.bf16 %v11368_v62  ;;  %10517 = vmatpush3.bf16.msra.mxu1 %v11884_v19  ;;  %v11903_v19 = vld [vmem:[%s18941_s6 + $0x4c0] sm:$0xff]  }
 0xa45   : > { %10518 = vmatprep.subr.bf16.mxu1 %v11887_v29  ;;  %v11907_v29 = vld [vmem:[%s18941_s6 + $0x628] sm:$0xff]   ;;  %v11904_v62 = vld [vmem:[%s18941_s6 + $0x480] sm:$0xff]  }
 0xa46   : > { %v7091_v18 = vsel %vm4519_vm11, %v11369_v59, %v11370_v58  ;;  %v7217_v50 = vmax.f32 %v18472_v49, %v11370_v58  ;;  %v11896_v49 = vld [vmem:[%s18941_s6 + $0x500] sm:$0xff]   ;;  %v11908_v58 = vld [vmem:[%s18941_s6 + $0x5f8] sm:$0xff]  }
 0xa47   : > { %v11363_v33 = vpop.permute.xlu0 %11362  ;;  %v7216_v3 = vmax.f32 %v18480_v23, %v7091_v18  ;;  %v11910_v59 = vld [vmem:[%s18941_s6 + $0x620] sm:$0xff]  }
 0xa48   : > { %v11365_v35 = vunpack.i.h.bf16 %v11363_v33  ;;  %v11364_v63 = vunpack.i.l.bf16 %v11363_v33  ;;  %10519 = vmatpush3.bf16.msra.mxu1 %v11888_v54  ;;  %v11909_v54 = vld [vmem:[%s18941_s6 + $0x5b8] sm:$0xff]  }
 0xa49   : > { %10520 = vmatprep.subr.bf16.mxu1 %v11891_v45  ;;  %v11911_v45 = vld [vmem:[%s18941_s6 + $0x5f0] sm:$0xff]   ;;  %v11913_v33 = vld [vmem:[%s18941_s6 + $0x618] sm:$0xff]  }
 0xa4a   : > { %v7215_v55 = vmax.f32 %v18497_v21, %v11365_v35  ;;  %v7090_v52 = vsel %vm4519_vm11, %v11364_v63, %v11365_v35  ;;  %v11912_v35 = vld [vmem:[%s18941_s6 + $0x5b0] sm:$0xff]   ;;  %v11914_v63 = vld [vmem:[%s18941_s6 + $0x5e8] sm:$0xff]  }
 0xa4b   : > { %v7214_v26 = vmax.f32 %v18505_v0, %v7090_v52  ;;  %v11373_v57 = vpop.permute.xlu1 %11372  ;;  %v11885_v0 = vld [vmem:[%s18941_s6 + $0x4f0] sm:$0xff]   ;;  %v11920_v52 = vld [vmem:[%s18941_s6 + $0x5d8] sm:$0xff]  }
 0xa4c   : > { %v7251_v22 = vpack.c.bf16 %v7217_v50, %v7215_v55  ;;  %v11375_v1 = vunpack.i.h.bf16 %v11373_v57  ;;  %v7326_v37 = vpop.permute.xlu0 %7325  ;;  %10521 = vmatpush3.bf16.msra.mxu1 %v11892_v56  ;;  %v11374_v21 = vunpack.i.l.bf16 %v11373_v57  ;;  %v11916_v56 = vld [vmem:[%s18941_s6 + $0x610] sm:$0xff]   ;;  %v11919_v50 = vld [vmem:[%s18941_s6 + $0x608] sm:$0xff]   ;;  %v11918_v55 = vld [vmem:[%s18941_s6 + $0x5a0] sm:$0xff]  }
 0xa4d   : > { %v7426_v61 = vsel %vm7329_vm10, %v18568_v8, %v7326_v37  ;;  %v7330_v51 = vsel %vm7329_vm10, %v7326_v37, %v7328_v15  ;;  %v7250_v23 = vpack.c.bf16 %v7216_v3, %v7214_v26  ;;  %10522 = vmatprep.subr.bf16.mxu1 %v11895_v47  ;;  %v11905_v15 = vld [vmem:[%s18941_s6 + $0x638] sm:$0xff]   ;;  %v11917_v47 = vld [vmem:[%s18941_s6 + $0x5e0] sm:$0xff]   ;;  %v11923_v57 = vld [vmem:[%s18941_s6 + $0x5d0] sm:$0xff]  }
 0xa4e   : > { %9428 = vmatprep.mubr.bf16.mxu0 %v7330_v51  ;;  %7370 = vrot.lane.b32.xlu1 %v7251_v22, %s12000_s18  ;;  %v7092_v8 = vsel %vm4519_vm11, %v11374_v21, %v11375_v1  ;;  %v7219_v11 = vmax.f32 %v18523_v30, %v11375_v1  ;;  %v11922_v3 = vld [vmem:[%s18941_s6 + $0x600] sm:$0xff]   ;;  %v11921_v26 = vld [vmem:[%s18941_s6 + $0x598] sm:$0xff]   ;;  %v11924_v1 = vld [vmem:[%s18941_s6 + $0x590] sm:$0xff]  }
 0xa4f   : > { %9429 = vmatmul.mubr.bf16.vlgmr.msra.gmra.mxu0 %v7426_v61  ;;  %7368 = vrot.lane.b32.xlu0 %v7250_v23, %s12000_s18  ;;  %v7218_v34 = vmax.f32 %v18529_v38, %v7092_v8  ;;  %v11894_v38 = vld [vmem:[%s18941_s6 + $0x4a0] sm:$0xff]   ;;  %v11926_v37 = vld [vmem:[%s18941_s6 + $0x5c8] sm:$0xff]   ;;  %v11931_v61 = vld [vmem:[%s18941_s6 + $0x650] sm:$0xff]  }
 0xa50   : > { %10487 = vmatpush3.bf16.msra.mxu0 %v11882_v43  ;;  %v11378_v28 = vpop.permute.xlu0 %11377  ;;  %10523 = vmatpush3.bf16.msra.mxu1 %v11896_v49  ;;  %v11925_v22 = vld [vmem:[%s18941_s6 + $0x660] sm:$0xff]   ;;  %v11928_v43 = vld [vmem:[%s18941_s6 + $0x658] sm:$0xff]   ;;  %v11927_v49 = vld [vmem:[%s18941_s6 + $0x588] sm:$0xff]  }
 0xa51   : > { %v11380_v41 = vunpack.i.h.bf16 %v11378_v28  ;;  %v11379_v24 = vunpack.i.l.bf16 %v11378_v28  ;;  %10488 = vmatprep.subr.bf16.mxu0 %v11885_v0  ;;  %9601 = vmatprep.subr.bf16.mxu1 %v19983_v25  ;;  %v11929_v21 = vld [vmem:[%s18941_s6 + $0x5c0] sm:$0xff]   ;;  %v11932_v23 = vld [vmem:[%s18941_s6 + $0x648] sm:$0xff]  }
 0xa52   : > { %v11930_v51 = vld [vmem:[%s18941_s6 + $0x580] sm:$0xff]  }
 0xa53   : > { %v7221_v14 = vmax.f32 %v18540_v48, %v11380_v41  ;;  %v7093_v4 = vsel %vm4519_vm11, %v11379_v24, %v11380_v41  ;;  %vm7355_vm11 = vcmask 228352   ;;  %v11933_v0 = vld [vmem:[%s18941_s6 + $0x640] sm:$0xff]  }
 0xa54   : > { %v7220_v27 = vmax.f32 %v18546_v53, %v7093_v4  ;;  %10489 = vmatpush3.bf16.msra.mxu0 %v11886_v20  ;;  %v7354_v48 = vpop.permute.xlu0 %7353  ;;  %v7352_v53 = vpop.permute.xlu1 %7351 }
 0xa55   : > { %v7253_v13 = vpack.c.bf16 %v7221_v14, %v7219_v11  ;;  %10490 = vmatprep.subr.bf16.mxu0 %v11889_v44  ;;  %v7356_v10 = vsel %vm7355_vm11, %v7352_v53, %v7354_v48  ;;  %v10304_v4 = vpop.f32.mrf.mxu1 }
 0xa56   : > { %v7252_v30 = vpack.c.bf16 %v7220_v27, %v7218_v34 }
 0xa57   : > { %7379 = vrot.lane.b32.xlu1 %v7253_v13, %s12001_s22  ;;  %v10305_v34 = vpop.f32.mrf.mxu1 }
 0xa58   : > { %10491 = vmatpush3.bf16.msra.mxu0 %v11890_v39  ;;  %7377 = vrot.lane.b32.xlu0 %v7252_v30, %s12001_s22 }
 0xa59   : > { %10492 = vmatprep.subr.bf16.mxu0 %v11893_v17  ;;  %v10307_v27 = vpop.f32.mrf.mxu1 }
 0xa5b   : > { %v10308_v13 = vpop.f32.mrf.mxu1 }
 0xa5c   : > { %10493 = vmatpush3.bf16.msra.mxu0 %v11894_v38 }
 0xa5d   : > { %v18789_v60 = vpop.permute.xlu0 %7361  ;;  %10494 = vmatprep.subr.bf16.mxu0 %v11897_v7  ;;  %v10348_v17 = vpop.f32.mrf.mxu1 }
 0xa5e   : > { %v7360_v5 = vpop.permute.xlu1 %7359 }
 0xa5f   : > { %v7446_v31 = vsel %vm7363_vm12, %v7356_v10, %v7360_v5  ;;  %v7364_v42 = vsel %vm7363_vm12, %v7360_v5, %v18789_v60  ;;  %v10349_v48 = vpop.f32.mrf.mxu1 }
 0xa60   : > { %9551 = vmatprep.mubr.bf16.mxu1 %v7364_v42  ;;  %10495 = vmatpush3.bf16.msra.mxu0 %v11898_v40 }
 0xa61   : > { %9552 = vmatmul.mubr.bf16.vlgmr.msra.gmra.mxu1 %v7446_v31  ;;  %10496 = vmatprep.subr.bf16.mxu0 %v11899_v6  ;;  %v10351_v7 = vpop.f32.mrf.mxu1 }
 0xa62   : > { %v7345_v9 = vpop.permute.xlu1 %7344  ;;  %9602 = vmatpush1.bf16.msra.mxu1 %v11905_v15 }
 0xa63   : > { %v7441_v16 = vsel %vm7355_vm11, %v7345_v9, %v7352_v53  ;;  %9603 = vmatprep.subr.bf16.mxu1 %v19983_v25  ;;  %v7347_v18 = vsel %vm7346_vm9, %v18636_v46, %v7345_v9  ;;  %v11915_v46 = vld [vmem:[%s18941_s6 + $0x5a8] sm:$0xff]   ;;  %v10352_v40 = vpop.f32.mrf.mxu1 }
 0xa64   : > { %9510 = vmatprep.mubr.bf16.mxu0 %v7441_v16  ;;  %10497 = vmatpush3.bf16.msra.mxu0 %v11900_v12 }
 0xa65   : > { %10498 = vmatprep.subr.bf16.mxu0 %v11901_v2 }
 0xa66   : > { %9604 = vmatpush1.bf16.msra.mxu1 %v11906_v36 }
 0xa67   : > { %9605 = vmatprep.subr.bf16.mxu1 %v19983_v25 }
 0xa68   : > { %10499 = vmatpush3.bf16.msra.mxu0 %v11902_v32 }
 0xa69   : > { %10500 = vmatprep.subr.bf16.mxu0 %v11903_v19  ;;  %v10306_v19 = vadd.f32 %v10305_v34, %v10304_v4 }
 0xa6a   : > { %9606 = vmatpush1.bf16.msra.mxu1 %v11907_v29 }
 0xa6b   : > { %9607 = vmatprep.subr.bf16.mxu1 %v19983_v25 }
 0xa6c   : > { %10501 = vmatpush3.bf16.msra.mxu0 %v11904_v62  ;;  %v10025_v62 = vld [vmem:[%s18942_s7] ss:$0 sm:$0xff] }
 0xa6d   : > { %10530 = vmatprep.subr.bf16.mxu0 %v11908_v58 }
 0xa6e   : > { %9608 = vmatpush1.bf16.msra.mxu1 %v11910_v59 }
 0xa6f   : > { %9609 = vmatprep.subr.bf16.mxu1 %v19983_v25  ;;  %9511 = vmatmul.mubr.bf16.vlgmr.msra.gmra.mxu0 %v7347_v18 }
 0xa70   : > { %10531 = vmatpush3.bf16.msra.mxu0 %v11909_v54  ;;  %v9144_v54 = vadd.f32 %v10306_v19, %v10025_v62 }
 0xa71   : > { %10532 = vmatprep.subr.bf16.mxu0 %v11911_v45  ;;  %v10309_v45 = vadd.f32 %v10308_v13, %v10307_v27 }
 0xa72   : > { %9610 = vmatpush1.bf16.msra.mxu1 %v11913_v33 }
 0xa73   : > { %9611 = vmatprep.subr.bf16.mxu1 %v19983_v25 }
 0xa74   : > { %10533 = vmatpush3.bf16.msra.mxu0 %v11912_v35 }
 0xa75   : > { %10534 = vmatprep.subr.bf16.mxu0 %v11914_v63 }
 0xa76   : > { %9612 = vmatpush1.bf16.msra.mxu1 %v11916_v56 }
 0xa77   : > { %9613 = vmatprep.subr.bf16.mxu1 %v19983_v25  ;;  %v10392_v10 = vpop.f32.mrf.mxu1 }
 0xa78   : > { %10535 = vmatpush3.bf16.msra.mxu0 %v11915_v46  ;;  %v9147_v46 = vadd.f32 %v10309_v45, %v10025_v62 }
 0xa79   : > { %10536 = vmatprep.subr.bf16.mxu0 %v11917_v47  ;;  %v10393_v6 = vpop.f32.mrf.mxu1  ;;  %v10350_v47 = vadd.f32 %v10349_v48, %v10348_v17 }
 0xa7a   : > { %9614 = vmatpush1.bf16.msra.mxu1 %v11919_v50 }
 0xa7b   : > { %9615 = vmatprep.subr.bf16.mxu1 %v19983_v25  ;;  %v10395_v42 = vpop.f32.mrf.mxu1 }
 0xa7c   : > { %10537 = vmatpush3.bf16.msra.mxu0 %v11918_v55 }
 0xa7d   : > { %10538 = vmatprep.subr.bf16.mxu0 %v11920_v52  ;;  %v10396_v9 = vpop.f32.mrf.mxu1 }
 0xa7e   : > { %9616 = vmatpush1.bf16.msra.mxu1 %v11922_v3 }
 0xa7f   : > { %9623 = vmatprep.subr.bf16.mxu1 %v19983_v25 }
 0xa80   : > { %10539 = vmatpush3.bf16.msra.mxu0 %v11921_v26 }
 0xa81   : > { %10540 = vmatprep.subr.bf16.mxu0 %v11923_v57  ;;  %v10353_v57 = vadd.f32 %v10352_v40, %v10351_v7 }
 0xa82   : > { %9624 = vmatpush2.bf16.msra.mxu1 %v11925_v22 }
 0xa83   : > { %9625 = vmatprep.subr.bf16.mxu1 %v19983_v25 }
 0xa84   : > { %10541 = vmatpush3.bf16.msra.mxu0 %v11924_v1 }
 0xa85   : > { %10542 = vmatprep.subr.bf16.mxu0 %v11926_v37 }
 0xa86   : > { %9626 = vmatpush2.bf16.msra.mxu1 %v11928_v43  ;;  %v10394_v43 = vadd.f32 %v10393_v6, %v10392_v10 }
 0xa87   : > { %9627 = vmatprep.subr.bf16.mxu1 %v19983_v25 }
 0xa88   : > { %10543 = vmatpush3.bf16.msra.mxu0 %v11927_v49 }
 0xa89   : > { %10544 = vmatprep.subr.bf16.mxu0 %v11929_v21 }
 0xa8a   : > { %9628 = vmatpush2.bf16.msra.mxu1 %v11931_v61 }
 0xa8b   : > { %9629 = vmatprep.subr.bf16.mxu1 %v19983_v25 }
 0xa8c   : > { %10545 = vmatpush3.bf16.msra.mxu0 %v11930_v51 }
 0xa8e   : > { %9630 = vmatpush2.bf16.msra.mxu1 %v11932_v23 }
 0xa8f   : > { %9631 = vmatprep.subr.bf16.mxu1 %v19983_v25  ;;  %v10326_v25 = vpop.f32.mrf.mxu0 }
 0xa91   : > { %v10327_v39 = vpop.f32.mrf.mxu0 }
 0xa92   : > { %9632 = vmatpush2.bf16.msra.mxu1 %v11933_v0  ;;  %v10328_v59 = vadd.f32 %v10327_v39, %v10326_v25 }
 0xa93   : > { %v10329_v30 = vpop.f32.mrf.mxu0 }
 0xa94   : > { %v9185_v35 = vadd.f32 %v10328_v59, %v9144_v54 }
 0xa95   : > { %v10330_v38 = vpop.f32.mrf.mxu0 }
 0xa96   : > { %v10331_v63 = vadd.f32 %v10330_v38, %v10329_v30  ;;  %v9226_v3 = vadd.f32 %v10350_v47, %v9185_v35 }
 0xa97   : > { %v10370_v53 = vpop.f32.mrf.mxu0 }
 0xa98   : > { %v9188_v52 = vadd.f32 %v10331_v63, %v9147_v46 }
 0xa9a   : > { %v9229_v49 = vadd.f32 %v10353_v57, %v9188_v52 }
 0xaa3   : > { %v10436_v2 = vpop.f32.mrf.mxu1 }
 0xaa5   : > { %v10437_v16 = vpop.f32.mrf.mxu1 }
 0xaa7   : > { %v10439_v58 = vpop.f32.mrf.mxu1 }
 0xaa9   : > { %v10440_v18 = vpop.f32.mrf.mxu1 }
 0xaaa   : > { %v10441_v39 = vadd.f32 %v10440_v18, %v10439_v58 }
 0xac0   : > { %v7371_v28 = vpop.permute.xlu1 %7370 }
 0xac1   : > { %v7369_v20 = vpop.permute.xlu0 %7368 }
 0xac2   : > { %v7451_v8 = vsel %vm7372_vm13, %v18789_v60, %v7369_v20  ;;  %v7373_v41 = vsel %vm7372_vm13, %v7369_v20, %v7371_v28  ;;  %v10371_v60 = vpop.f32.mrf.mxu0 }
 0xac3   : > { %9592 = vmatprep.mubr.bf16.mxu0 %v7373_v41  ;;  %v10372_v50 = vadd.f32 %v10371_v60, %v10370_v53 }
 0xac4   : > { %9593 = vmatmul.mubr.bf16.vlgmr.msra.gmra.mxu0 %v7451_v8  ;;  %v10373_v5 = vpop.f32.mrf.mxu0 }
 0xac5   : > { %v9267_v22 = vadd.f32 %v10372_v50, %v9226_v3 }
 0xac6   : > { %v10374_v15 = vpop.f32.mrf.mxu0 }
 0xac7   : > { %v10375_v1 = vadd.f32 %v10374_v15, %v10373_v5  ;;  %v9308_v0 = vadd.f32 %v10394_v43, %v9267_v22 }
 0xac8   : > { %v10414_v31 = vpop.f32.mrf.mxu0 }
 0xac9   : > { %v7380_v24 = vpop.permute.xlu1 %7379  ;;  %v9270_v23 = vadd.f32 %v10375_v1, %v9229_v49 }
 0xaca   : > { %v7378_v44 = vpop.permute.xlu0 %7377  ;;  %v10415_v12 = vpop.f32.mrf.mxu0 }
 0xacb   : > { %v7382_v11 = vsel %vm7381_vm14, %v7378_v44, %v7380_v24  ;;  %v7456_v14 = vsel %vm7381_vm14, %v7371_v28, %v7378_v44  ;;  %v10416_v21 = vadd.f32 %v10415_v12, %v10414_v31  ;;  %v10397_v28 = vadd.f32 %v10396_v9, %v10395_v42 }
 0xacc   : > { %10231 = vmatprep.mubr.msk.bf16.mxu1 %vm9105_vm15, %v7382_v11  ;;  %v10417_v36 = vpop.f32.mrf.mxu0  ;;  %v10438_v44 = vadd.f32 %v10437_v16, %v10436_v2 }
 0xacd   : > { %9634 = vmatmul.mubr.bf16.vlgmr.msra.gmra.mxu1 %v7456_v14  ;;  %v9349_v20 = vadd.f32 %v10416_v21, %v9308_v0  ;;  %v9311_v11 = vadd.f32 %v10397_v28, %v9270_v23 }
 0xace   : > { %v10418_v32 = vpop.f32.mrf.mxu0 }
 0xacf   : > { %v10419_v8 = vadd.f32 %v10418_v32, %v10417_v36  ;;  %v9390_v25 = vadd.f32 %v10438_v44, %v9349_v20 }
 0xad1   : > { %v9352_v34 = vadd.f32 %v10419_v8, %v9311_v11 }
 0xad3   : > { %v9393_v38 = vadd.f32 %v10441_v39, %v9352_v34 }
 0xaf3   : > { %v10480_v56 = vpop.f32.mrf.mxu1 }
 0xaf5   : > { %v10481_v26 = vpop.f32.mrf.mxu1 }
 0xaf6   : > { %v10482_v48 = vadd.f32 %v10481_v26, %v10480_v56 }
 0xaf7   : > { %v10483_v51 = vpop.f32.mrf.mxu1 }
 0xaf9   : > { %v10484_v24 = vpop.f32.mrf.mxu1 }
 0xafa   : > { %v10485_v6 = vadd.f32 %v10484_v24, %v10483_v51 }
 0xb0f   : > { %v10458_v29 = vpop.f32.mrf.mxu0 }
 0xb11   : > { %v10459_v33 = vpop.f32.mrf.mxu0 }
 0xb12   : > { %v10460_v14 = vadd.f32 %v10459_v33, %v10458_v29 }
 0xb13   : > { %v10461_v55 = vpop.f32.mrf.mxu0 }
 0xb14   : > { %v9431_v13 = vadd.f32 %v10460_v14, %v9390_v25 }
 0xb15   : > { %v10462_v37 = vpop.f32.mrf.mxu0 }
 0xb16   : > { %v10463_v17 = vadd.f32 %v10462_v37, %v10461_v55  ;;  %v9472_v40 = vadd.f32 %v10482_v48, %v9431_v13 }
 0xb18   : > { %v9434_v60 = vadd.f32 %v10463_v17, %v9393_v38 }
 0xb1a   : > { %v9475_v9 = vadd.f32 %v10485_v6, %v9434_v60 }
 0xb21   : > { %v10524_v4 = vpop.f32.mrf.mxu1 }
 0xb23   : > { %v10525_v30 = vpop.f32.mrf.mxu1 }
 0xb24   : > { %v10526_v12 = vadd.f32 %v10525_v30, %v10524_v4 }
 0xb25   : > { %v10527_v5 = vpop.f32.mrf.mxu1 }
 0xb27   : > { %v10528_v16 = vpop.f32.mrf.mxu1 }
 0xb28   : > { %v10529_v62 = vadd.f32 %v10528_v16, %v10527_v5 }
 0xb2f   : > { %v10502_v61 = vpop.f32.mrf.mxu0 }
 0xb31   : > { %v10503_v41 = vpop.f32.mrf.mxu0 }
 0xb32   : > { %v10504_v53 = vadd.f32 %v10503_v41, %v10502_v61 }
 0xb33   : > { %v10505_v27 = vpop.f32.mrf.mxu0 }
 0xb34   : > { %v9513_v15 = vadd.f32 %v10504_v53, %v9472_v40 }
 0xb35   : > { %v10506_v7 = vpop.f32.mrf.mxu0 }
 0xb36   : > { %v10507_v31 = vadd.f32 %v10506_v7, %v10505_v27  ;;  %v9554_v29 = vadd.f32 %v10526_v12, %v9513_v15 }
 0xb38   : > { %v9516_v32 = vadd.f32 %v10507_v31, %v9475_v9 }
 0xb3a   : > { %v9557_v33 = vadd.f32 %v10529_v62, %v9516_v32 }
 0xb84   : > { %v10546_v10 = vpop.f32.mrf.mxu0 }
 0xb86   : > { %v10547_v42 = vpop.f32.mrf.mxu0 }
 0xb87   : > { %v10548_v2 = vadd.f32 %v10547_v42, %v10546_v10 }
 0xb88   : > { %v10549_v36 = vpop.f32.mrf.mxu0 }
 0xb89   : > { %v9595_v59 = vadd.f32 %v10548_v2, %v9554_v29 }
 0xb8a   : > { %v10550_v19 = vpop.f32.mrf.mxu0 }
 0xb8b   : > { %v10551_v58 = vadd.f32 %v10550_v19, %v10549_v36 }
 0xb8d   : > { %v9635_v54 = vpop.f32.mrf.mxu1  ;;  %v9598_v35 = vadd.f32 %v10551_v58, %v9557_v33 }
 0xb8e   : > { %v9636_v45 = vadd.f32 %v9635_v54, %v9595_v59 }
 0xb8f   : > { %v9637_v18 = vpop.f32.mrf.mxu1 }
 0xb90   : > { %9643 = vst.msk [vmem:[%s373_s19] sm:$0xff] %vm9642_vm0, %v9636_v45 }
 0xb91   : > { %v9638_v63 = vpop.f32.mrf.mxu1 }
 0xb92   : > { %v9639_v56 = vadd.f32 %v9638_v63, %v9598_v35 }
 0xb93   : > { %v9640_v46 = vpop.f32.mrf.mxu1 }
 0xb94   : > { %9644 = vst.msk [vmem:[%s373_s19 + $0x8] sm:$0xff] %vm9642_vm0, %v9639_v56 }
 0xb95 PF: > { %p15_p9 = scmp.ge.s32.totalorder %s12064_s9, 4   ;;  %s19984_s27 = smov %s11967_s28 }
 0xb96   : > { %s19985_s28 = smov %s12073_s12  ;;  %s19986_s29 = smov %s12064_s9 }
 0xb97   :  { %17 = sbr.rel (!%p15_p9) target bundleno = 2 (0x2), region = 110 }

</bundles_post_ra>
